<compile_context>
chip_gen: v7x
topology: tpu7x:2x2x1
jax: 0.10.0
libtpu: 0.0.40
codegen_flags: <defaults>
</compile_context>

<pallas_src>
import functools

import jax
import jax.numpy as jnp
from jax import lax
from jax.experimental import pallas as pl
from jax.experimental.pallas import tpu as pltpu

EPS = 1e-5
NEG_SLOPE = 0.2


# ---------------------------------------------------------------------------
# Shared conv core: 9 shifted matmuls + masked BN partial statistics.
# ---------------------------------------------------------------------------
def _conv9_stats(z, w_ref, mask_p, y_ref, sum_ref, ssq_ref, *, P, Wp, halo):
    """z: (PE, Cin) bf16 flat-padded activation.  Writes raw conv output
    (same flat layout, bf16) plus per-image f32 sum / sum-of-squares."""
    cout = w_ref.shape[-1]
    acc = jnp.zeros((P, cout), jnp.float32)
    for kh in range(3):
        for kw in range(3):
            off = kh * Wp + kw                       # static tap offset (rows)
            a = z[off:off + P, :]                    # (P, Cin) bf16
            acc = acc + jnp.dot(a, w_ref[kh * 3 + kw],
                                preferred_element_type=jnp.float32)
    # zero non-interior rows (spatial padding + wrap/halo garbage)
    acc = jnp.where(mask_p > 0.0, acc, 0.0)
    # per-image BN partial statistics (f32, reduced later in the wrapper)
    sum_ref[...] = jnp.sum(acc, axis=0, keepdims=True)
    ssq_ref[...] = jnp.sum(acc * acc, axis=0, keepdims=True)
    # store the raw conv output back in the same flat-padded layout
    zeros = jnp.zeros((halo, cout), y_ref.dtype)
    y_ref[0:halo, :] = zeros
    y_ref[halo:halo + P, :] = acc.astype(y_ref.dtype)
    y_ref[halo + P:halo + P + halo, :] = zeros


# ---------------------------------------------------------------------------
# Pass A: conv1 + BN1 partial stats (input already zero-padded bf16).
# ---------------------------------------------------------------------------
def conv_stats_kernel(x_ref, w_ref, mask_ref, y_ref, sum_ref, ssq_ref,
                      *, P, Wp, halo):
    z = x_ref[...]                                   # (PE, Cin) bf16
    mask_p = mask_ref[halo:halo + P, :]              # (P, 1)
    _conv9_stats(z, w_ref, mask_p, y_ref, sum_ref, ssq_ref,
                 P=P, Wp=Wp, halo=halo)


# ---------------------------------------------------------------------------
# Pass B: (BN1 affine + LeakyReLU + re-zeroed padding) fused into conv2's
#         input path, then conv2 + BN2 partial stats.
# ---------------------------------------------------------------------------
def bn_act_conv_stats_kernel(y_in_ref, w_ref, scale_ref, shift_ref, mask_ref,
                             y_out_ref, sum_ref, ssq_ref, *, P, Wp, halo):
    v = y_in_ref[...].astype(jnp.float32) * scale_ref[...] + shift_ref[...]
    v = jnp.where(v >= 0.0, v, NEG_SLOPE * v)
    z = jnp.where(mask_ref[...] > 0.0, v, 0.0).astype(jnp.bfloat16)  # (PE, Cmid)
    mask_p = mask_ref[halo:halo + P, :]
    _conv9_stats(z, w_ref, mask_p, y_out_ref, sum_ref, ssq_ref,
                 P=P, Wp=Wp, halo=halo)


# ---------------------------------------------------------------------------
# Pass C: final BN2 affine + LeakyReLU (elementwise).
# ---------------------------------------------------------------------------
def bn_act_kernel(y_ref, scale_ref, shift_ref, o_ref):
    v = y_ref[...].astype(jnp.float32) * scale_ref[...] + shift_ref[...]
    o_ref[...] = jnp.where(v >= 0.0, v, NEG_SLOPE * v)


# ---------------------------------------------------------------------------
# Wrapper helpers.
# ---------------------------------------------------------------------------
def _fold_bn(psum, pssq, gamma_1c, beta_1c, count):
    """Reduce per-image partials and fold BN into a per-channel affine."""
    s = jnp.sum(psum, axis=0)                    # (1, C)
    q = jnp.sum(pssq, axis=0)                    # (1, C)
    mean = s / count
    var = jnp.maximum(q / count - mean * mean, 0.0)   # clamp one-pass variance
    scale = gamma_1c * lax.rsqrt(var + EPS)
    shift = beta_1c - mean * scale
    return scale, shift


def _conv_pass(z_ext, w9, mask_ext, P, Wp, halo, scale=None, shift=None):
    """One conv block.  If scale/shift are given, BN affine + LeakyReLU of the
    previous block are fused into this kernel's input path."""
    N, PE, cin = z_ext.shape
    cout = w9.shape[-1]
    fused = scale is not None

    if fused:
        kern = functools.partial(bn_act_conv_stats_kernel, P=P, Wp=Wp, halo=halo)
        extra_in = [scale, shift, mask_ext]
        extra_specs = [pl.BlockSpec((1, cin), lambda n: (0, 0)),
                       pl.BlockSpec((1, cin), lambda n: (0, 0)),
                       pl.BlockSpec((PE, 1), lambda n: (0, 0))]
    else:
        kern = functools.partial(conv_stats_kernel, P=P, Wp=Wp, halo=halo)
        extra_in = [mask_ext]
        extra_specs = [pl.BlockSpec((PE, 1), lambda n: (0, 0))]

    flops = 2 * N * P * 9 * cin * cout
    bytes_accessed = (z_ext.size * 2 + w9.size * 2 + N * PE * cout * 2
                      + mask_ext.size * 4 + 2 * N * cout * 4)

    return pl.pallas_call(
        kern,
        out_shape=(jax.ShapeDtypeStruct((N, PE, cout), jnp.bfloat16),
                   jax.ShapeDtypeStruct((N, 1, cout), jnp.float32),
                   jax.ShapeDtypeStruct((N, 1, cout), jnp.float32)),
        grid_spec=pltpu.PrefetchScalarGridSpec(
            num_scalar_prefetch=0,
            grid=(N,),
            in_specs=[pl.BlockSpec((None, PE, cin), lambda n: (n, 0, 0)),
                      pl.BlockSpec((9, cin, cout), lambda n: (0, 0, 0))]
                     + extra_specs,
            out_specs=[pl.BlockSpec((None, PE, cout), lambda n: (n, 0, 0)),
                       pl.BlockSpec((None, 1, cout), lambda n: (n, 0, 0)),
                       pl.BlockSpec((None, 1, cout), lambda n: (n, 0, 0))]),
        compiler_params=pltpu.CompilerParams(
            dimension_semantics=("parallel",)),
        cost_estimate=pl.CostEstimate(flops=flops, transcendentals=0,
                                      bytes_accessed=bytes_accessed),
    )(z_ext, w9, *extra_in)


# ---------------------------------------------------------------------------
# DoubleCv forward: NCHW in, NCHW out.
# ---------------------------------------------------------------------------
@jax.jit
def double_cv(x_nchw, w1, w2, gamma, beta):
    N, Cin, H, W = x_nchw.shape
    Cmid, Cout = w1.shape[0], w2.shape[0]
    assert Cmid == Cout, "DoubleCv reuses one BatchNorm -> mid == out channels"

    Hp, Wp = H + 2, W + 2
    P = Hp * Wp                 # flattened padded frame rows per image
    halo = Wp + 1               # max |tap offset| in the flat layout
    PE = P + 2 * halo           # extended rows per image
    M = N * H * W               # BN element count per channel

    # NCHW -> flat-padded channels-last layout (N, PE, C), bf16 for the MXU.
    x_nhwc = jnp.transpose(x_nchw, (0, 2, 3, 1))
    xp = jnp.pad(x_nhwc, ((0, 0), (1, 1), (1, 1), (0, 0)))
    x_ext = jnp.pad(xp.reshape(N, P, Cin), ((0, 0), (halo, halo), (0, 0)))
    x_ext = x_ext.astype(jnp.bfloat16)

    # interior-position mask (1.0 at real output positions) in the flat layout
    mframe = jnp.zeros((Hp, Wp), jnp.float32).at[1:H + 1, 1:W + 1].set(1.0)
    mask_ext = jnp.pad(mframe.reshape(P, 1), ((halo, halo), (0, 0)))

    # PyTorch OIHW weights -> (tap = kh*3+kw, Cin, Cout), bf16
    w1t = jnp.transpose(w1, (2, 3, 1, 0)).reshape(9, Cin, Cmid).astype(jnp.bfloat16)
    w2t = jnp.transpose(w2, (2, 3, 1, 0)).reshape(9, Cmid, Cout).astype(jnp.bfloat16)

    g = gamma.reshape(1, Cmid).astype(jnp.float32)
    b = beta.reshape(1, Cmid).astype(jnp.float32)

    # Pass A: conv1 + BN1 partial stats.
    y1, s1, q1 = _conv_pass(x_ext, w1t, mask_ext, P, Wp, halo)
    scale1, shift1 = _fold_bn(s1, q1, g, b, M)

    # Pass B: fused (BN1 + LeakyReLU) -> conv2 + BN2 partial stats.
    y2, s2, q2 = _conv_pass(y1, w2t, mask_ext, P, Wp, halo,
                            scale=scale1, shift=shift1)
    scale2, shift2 = _fold_bn(s2, q2, g, b, M)

    # Pass C: final BN2 affine + LeakyReLU.
    out_ext = pl.pallas_call(
        bn_act_kernel,
        out_shape=jax.ShapeDtypeStruct((N, PE, Cout), jnp.float32),
        grid_spec=pltpu.PrefetchScalarGridSpec(
            num_scalar_prefetch=0,
            grid=(N,),
            in_specs=[pl.BlockSpec((None, PE, Cout), lambda n: (n, 0, 0)),
                      pl.BlockSpec((1, Cout), lambda n: (0, 0)),
                      pl.BlockSpec((1, Cout), lambda n: (0, 0))],
            out_specs=pl.BlockSpec((None, PE, Cout), lambda n: (n, 0, 0))),
        compiler_params=pltpu.CompilerParams(
            dimension_semantics=("parallel",)),
        cost_estimate=pl.CostEstimate(flops=3 * N * PE * Cout, transcendentals=0,
                                      bytes_accessed=N * PE * Cout * 6),
    )(y2, scale2, shift2)

    # flat-padded -> NHWC interior -> NCHW
    out = out_ext[:, halo:halo + P, :].reshape(N, Hp, Wp, Cout)
    out = out[:, 1:H + 1, 1:W + 1, :]
    return jnp.transpose(out, (0, 3, 1, 2))


# ---------------------------------------------------------------------------
# Pure-JAX f32 reference (numerical sanity check only).
# ---------------------------------------------------------------------------
def _ref_block(x_nchw, w, gamma, beta):
    y = lax.conv_general_dilated(
        x_nchw, w, window_strides=(1, 1), padding="SAME",
        dimension_numbers=("NCHW", "OIHW", "NCHW"))
    mean = y.mean(axis=(0, 2, 3), keepdims=True)
    var = y.var(axis=(0, 2, 3), keepdims=True)  # biased (training-mode BN)
    gg = gamma.reshape(1, -1, 1, 1)
    bb = beta.reshape(1, -1, 1, 1)
    yh = (y - mean) / jnp.sqrt(var + EPS) * gg + bb
    return jnp.where(yh >= 0, yh, NEG_SLOPE * yh)


def _ref_double_cv(x, w1, w2, gamma, beta):
    return _ref_block(_ref_block(x, w1, gamma, beta), w2, gamma, beta)


if __name__ == "__main__":
    key = jax.random.PRNGKey(0)
    k_x, k_w1, k_w2 = jax.random.split(key, 3)

    # Small shapes consistent with the module.  DoubleCv reuses the same
    # BatchNorm after both convs, so out_channels == mid_channels.
    N, C_in, H, W = 2, 4, 16, 16
    C_mid = C_out = 8

    x = jax.random.normal(k_x, (N, C_in, H, W), dtype=jnp.float32)
    w1 = jax.random.normal(k_w1, (C_mid, C_in, 3, 3), dtype=jnp.float32) * 0.1
    w2 = jax.random.normal(k_w2, (C_out, C_mid, 3, 3), dtype=jnp.float32) * 0.1
    gamma = jnp.ones((C_mid,), dtype=jnp.float32)   # BatchNorm2d default init
    beta = jnp.zeros((C_mid,), dtype=jnp.float32)

    out = jax.block_until_ready(double_cv(x, w1, w2, gamma, beta))

    ref = _ref_double_cv(x, w1, w2, gamma, beta)
    assert out.shape == (N, C_out, H, W)
    max_err = float(jnp.max(jnp.abs(out - ref)))
    # bf16 matmul feeds + bf16 intermediates vs f32 reference -> loose-ish tol.
    assert jnp.allclose(out, ref, rtol=5e-2, atol=5e-2), (
        f"mismatch vs reference (max abs err {max_err})")

    print("KERNEL_OK")
</pallas_src>

<mosaic_0001>
module attributes {stable_mosaic.version = 11 : i64} {
  func.func @bn_act_kernel(%arg0: i32, %arg1: memref<1x362x8xbf16, #tpu.memory_space<vmem>>, %arg2: memref<1x8xf32, #tpu.memory_space<vmem>>, %arg3: memref<1x8xf32, #tpu.memory_space<vmem>>, %arg4: memref<1x362x8xf32, #tpu.memory_space<vmem>>) attributes {dimension_semantics = [#tpu.dimension_semantics<parallel>], iteration_bounds = array<i64: 2>, scalar_prefetch = 0 : i64, scratch_operands = 0 : i64, tpu.core_type = #tpu.core_type<tc>, window_params = [{transform_indices = @transform_0, window_bounds = array<i64: 1, 362, 8>}, {pipeline_mode = #tpu.pipeline_mode<synchronous>, transform_indices = @transform_1, window_bounds = array<i64: 1, 8>}, {pipeline_mode = #tpu.pipeline_mode<synchronous>, transform_indices = @transform_2, window_bounds = array<i64: 1, 8>}, {transform_indices = @transform_3, window_bounds = array<i64: 1, 362, 8>}]} {
    %c0 = arith.constant 0 : index
    %c0_0 = arith.constant 0 : index
    %c0_1 = arith.constant 0 : index
    %0 = vector.load %arg1[%c0, %c0_0, %c0_1] : memref<1x362x8xbf16, #tpu.memory_space<vmem>>, vector<1x362x8xbf16>
    %1 = vector.shape_cast %0 : vector<1x362x8xbf16> to vector<362x8xbf16>
    %2 = arith.extf %1 : vector<362x8xbf16> to vector<362x8xf32>
    %c0_2 = arith.constant 0 : index
    %c0_3 = arith.constant 0 : index
    %3 = vector.load %arg2[%c0_2, %c0_3] : memref<1x8xf32, #tpu.memory_space<vmem>>, vector<1x8xf32>
    %4 = vector.broadcast %3 : vector<1x8xf32> to vector<362x8xf32>
    %5 = arith.mulf %2, %4 : vector<362x8xf32>
    %c0_4 = arith.constant 0 : index
    %c0_5 = arith.constant 0 : index
    %6 = vector.load %arg3[%c0_4, %c0_5] : memref<1x8xf32, #tpu.memory_space<vmem>>, vector<1x8xf32>
    %7 = vector.broadcast %6 : vector<1x8xf32> to vector<362x8xf32>
    %8 = arith.addf %5, %7 : vector<362x8xf32>
    %cst = arith.constant 0.000000e+00 : f32
    %9 = vector.broadcast %cst : f32 to vector<362x8xf32>
    %10 = arith.cmpf oge, %8, %9 : vector<362x8xf32>
    %cst_6 = arith.constant 2.000000e-01 : f32
    %11 = vector.broadcast %cst_6 : f32 to vector<362x8xf32>
    %12 = arith.mulf %11, %8 : vector<362x8xf32>
    %13 = arith.select %10, %8, %12 : vector<362x8xi1>, vector<362x8xf32>
    %c0_7 = arith.constant 0 : index
    %c0_8 = arith.constant 0 : index
    %c0_9 = arith.constant 0 : index
    %14 = vector.load %arg4[%c0_7, %c0_8, %c0_9] : memref<1x362x8xf32, #tpu.memory_space<vmem>>, vector<1x362x8xf32>
    %15 = vector.shape_cast %14 : vector<1x362x8xf32> to vector<362x8xf32>
    %16 = vector.shape_cast %13 : vector<362x8xf32> to vector<1x362x8xf32>
    tpu.vector_store %arg4[%c0_7, %c0_8, %c0_9], %16 {strides = array<i32>} : memref<1x362x8xf32, #tpu.memory_space<vmem>>, vector<1x362x8xf32>,
    return
  }
  func.func @transform_0(%arg0: i32) -> (i32, i32, i32) {
    %c0_i32 = arith.constant 0 : i32
    %c0_i32_0 = arith.constant 0 : i32
    %c0_i32_1 = arith.constant 0 : i32
    return %arg0, %c0_i32, %c0_i32_0 : i32, i32, i32
  }
  func.func @transform_1(%arg0: i32) -> (i32, i32) {
    %c0_i32 = arith.constant 0 : i32
    %c0_i32_0 = arith.constant 0 : i32
    %c0_i32_1 = arith.constant 0 : i32
    return %c0_i32, %c0_i32_0 : i32, i32
  }
  func.func @transform_2(%arg0: i32) -> (i32, i32) {
    %c0_i32 = arith.constant 0 : i32
    %c0_i32_0 = arith.constant 0 : i32
    %c0_i32_1 = arith.constant 0 : i32
    return %c0_i32, %c0_i32_0 : i32, i32
  }
  func.func @transform_3(%arg0: i32) -> (i32, i32, i32) {
    %c0_i32 = arith.constant 0 : i32
    %c0_i32_0 = arith.constant 0 : i32
    %c0_i32_1 = arith.constant 0 : i32
    return %arg0, %c0_i32, %c0_i32_0 : i32, i32, i32
  }
}

module attributes {stable_mosaic.version = 11 : i64} {
  func.func @conv_stats_kernel(%arg0: i32, %arg1: memref<1x362x4xbf16, #tpu.memory_space<vmem>>, %arg2: memref<9x4x8xbf16, #tpu.memory_space<vmem>>, %arg3: memref<362x1xf32, #tpu.memory_space<vmem>>, %arg4: memref<1x362x8xbf16, #tpu.memory_space<vmem>>, %arg5: memref<1x1x8xf32, #tpu.memory_space<vmem>>, %arg6: memref<1x1x8xf32, #tpu.memory_space<vmem>>) attributes {dimension_semantics = [#tpu.dimension_semantics<parallel>], iteration_bounds = array<i64: 2>, scalar_prefetch = 0 : i64, scratch_operands = 0 : i64, tpu.core_type = #tpu.core_type<tc>, window_params = [{transform_indices = @transform_0, window_bounds = array<i64: 1, 362, 4>}, {pipeline_mode = #tpu.pipeline_mode<synchronous>, transform_indices = @transform_1, window_bounds = array<i64: 9, 4, 8>}, {pipeline_mode = #tpu.pipeline_mode<synchronous>, transform_indices = @transform_2, window_bounds = array<i64: 362, 1>}, {transform_indices = @transform_3, window_bounds = array<i64: 1, 362, 8>}, {transform_indices = @transform_4, window_bounds = array<i64: 1, 1, 8>}, {transform_indices = @transform_5, window_bounds = array<i64: 1, 1, 8>}]} {
    %c0 = arith.constant 0 : index
    %c0_0 = arith.constant 0 : index
    %c0_1 = arith.constant 0 : index
    %0 = vector.load %arg1[%c0, %c0_0, %c0_1] : memref<1x362x4xbf16, #tpu.memory_space<vmem>>, vector<1x362x4xbf16>
    %1 = vector.shape_cast %0 : vector<1x362x4xbf16> to vector<362x4xbf16>
    %c19 = arith.constant 19 : index
    %c0_2 = arith.constant 0 : index
    %2 = vector.load %arg3[%c19, %c0_2] : memref<362x1xf32, #tpu.memory_space<vmem>>, vector<324x1xf32>
    %cst = arith.constant 0.000000e+00 : f32
    %3 = vector.broadcast %cst : f32 to vector<324x8xf32>
    %4 = vector.extract_strided_slice %1 {offsets = [0, 0], sizes = [324, 4], strides = [1, 1]} : vector<362x4xbf16> to vector<324x4xbf16>
    %c0_3 = arith.constant 0 : index
    %c0_4 = arith.constant 0 : index
    %c0_5 = arith.constant 0 : index
    %5 = vector.load %arg2[%c0_3, %c0_4, %c0_5] : memref<9x4x8xbf16, #tpu.memory_space<vmem>>, vector<1x4x8xbf16>
    %6 = vector.shape_cast %5 : vector<1x4x8xbf16> to vector<4x8xbf16>
    %cst_6 = arith.constant dense<0.000000e+00> : vector<324x8xf32>
    %7 = tpu.matmul %4, %6, %cst_6 {dimension_numbers = #tpu.dot_dimension_numbers<[1], [0], [0], [1], [0, 0, 1, 1], [], []>} : vector<324x4xbf16>, vector<4x8xbf16>, vector<324x8xf32> -> vector<324x8xf32>
    %8 = arith.addf %3, %7 : vector<324x8xf32>
    %9 = vector.extract_strided_slice %1 {offsets = [1, 0], sizes = [324, 4], strides = [1, 1]} : vector<362x4xbf16> to vector<324x4xbf16>
    %c1 = arith.constant 1 : index
    %c0_7 = arith.constant 0 : index
    %c0_8 = arith.constant 0 : index
    %10 = vector.load %arg2[%c1, %c0_7, %c0_8] : memref<9x4x8xbf16, #tpu.memory_space<vmem>>, vector<1x4x8xbf16>
    %11 = vector.shape_cast %10 : vector<1x4x8xbf16> to vector<4x8xbf16>
    %cst_9 = arith.constant dense<0.000000e+00> : vector<324x8xf32>
    %12 = tpu.matmul %9, %11, %cst_9 {dimension_numbers = #tpu.dot_dimension_numbers<[1], [0], [0], [1], [0, 0, 1, 1], [], []>} : vector<324x4xbf16>, vector<4x8xbf16>, vector<324x8xf32> -> vector<324x8xf32>
    %13 = arith.addf %8, %12 : vector<324x8xf32>
    %14 = vector.extract_strided_slice %1 {offsets = [2, 0], sizes = [324, 4], strides = [1, 1]} : vector<362x4xbf16> to vector<324x4xbf16>
    %c2 = arith.constant 2 : index
    %c0_10 = arith.constant 0 : index
    %c0_11 = arith.constant 0 : index
    %15 = vector.load %arg2[%c2, %c0_10, %c0_11] : memref<9x4x8xbf16, #tpu.memory_space<vmem>>, vector<1x4x8xbf16>
    %16 = vector.shape_cast %15 : vector<1x4x8xbf16> to vector<4x8xbf16>
    %cst_12 = arith.constant dense<0.000000e+00> : vector<324x8xf32>
    %17 = tpu.matmul %14, %16, %cst_12 {dimension_numbers = #tpu.dot_dimension_numbers<[1], [0], [0], [1], [0, 0, 1, 1], [], []>} : vector<324x4xbf16>, vector<4x8xbf16>, vector<324x8xf32> -> vector<324x8xf32>
    %18 = arith.addf %13, %17 : vector<324x8xf32>
    %19 = vector.extract_strided_slice %1 {offsets = [18, 0], sizes = [324, 4], strides = [1, 1]} : vector<362x4xbf16> to vector<324x4xbf16>
    %c3 = arith.constant 3 : index
    %c0_13 = arith.constant 0 : index
    %c0_14 = arith.constant 0 : index
    %20 = vector.load %arg2[%c3, %c0_13, %c0_14] : memref<9x4x8xbf16, #tpu.memory_space<vmem>>, vector<1x4x8xbf16>
    %21 = vector.shape_cast %20 : vector<1x4x8xbf16> to vector<4x8xbf16>
    %cst_15 = arith.constant dense<0.000000e+00> : vector<324x8xf32>
    %22 = tpu.matmul %19, %21, %cst_15 {dimension_numbers = #tpu.dot_dimension_numbers<[1], [0], [0], [1], [0, 0, 1, 1], [], []>} : vector<324x4xbf16>, vector<4x8xbf16>, vector<324x8xf32> -> vector<324x8xf32>
    %23 = arith.addf %18, %22 : vector<324x8xf32>
    %24 = vector.extract_strided_slice %1 {offsets = [19, 0], sizes = [324, 4], strides = [1, 1]} : vector<362x4xbf16> to vector<324x4xbf16>
    %c4 = arith.constant 4 : index
    %c0_16 = arith.constant 0 : index
    %c0_17 = arith.constant 0 : index
    %25 = vector.load %arg2[%c4, %c0_16, %c0_17] : memref<9x4x8xbf16, #tpu.memory_space<vmem>>, vector<1x4x8xbf16>
    %26 = vector.shape_cast %25 : vector<1x4x8xbf16> to vector<4x8xbf16>
    %cst_18 = arith.constant dense<0.000000e+00> : vector<324x8xf32>
    %27 = tpu.matmul %24, %26, %cst_18 {dimension_numbers = #tpu.dot_dimension_numbers<[1], [0], [0], [1], [0, 0, 1, 1], [], []>} : vector<324x4xbf16>, vector<4x8xbf16>, vector<324x8xf32> -> vector<324x8xf32>
    %28 = arith.addf %23, %27 : vector<324x8xf32>
    %29 = vector.extract_strided_slice %1 {offsets = [20, 0], sizes = [324, 4], strides = [1, 1]} : vector<362x4xbf16> to vector<324x4xbf16>
    %c5 = arith.constant 5 : index
    %c0_19 = arith.constant 0 : index
    %c0_20 = arith.constant 0 : index
    %30 = vector.load %arg2[%c5, %c0_19, %c0_20] : memref<9x4x8xbf16, #tpu.memory_space<vmem>>, vector<1x4x8xbf16>
    %31 = vector.shape_cast %30 : vector<1x4x8xbf16> to vector<4x8xbf16>
    %cst_21 = arith.constant dense<0.000000e+00> : vector<324x8xf32>
    %32 = tpu.matmul %29, %31, %cst_21 {dimension_numbers = #tpu.dot_dimension_numbers<[1], [0], [0], [1], [0, 0, 1, 1], [], []>} : vector<324x4xbf16>, vector<4x8xbf16>, vector<324x8xf32> -> vector<324x8xf32>
    %33 = arith.addf %28, %32 : vector<324x8xf32>
    %34 = vector.extract_strided_slice %1 {offsets = [36, 0], sizes = [324, 4], strides = [1, 1]} : vector<362x4xbf16> to vector<324x4xbf16>
    %c6 = arith.constant 6 : index
    %c0_22 = arith.constant 0 : index
    %c0_23 = arith.constant 0 : index
    %35 = vector.load %arg2[%c6, %c0_22, %c0_23] : memref<9x4x8xbf16, #tpu.memory_space<vmem>>, vector<1x4x8xbf16>
    %36 = vector.shape_cast %35 : vector<1x4x8xbf16> to vector<4x8xbf16>
    %cst_24 = arith.constant dense<0.000000e+00> : vector<324x8xf32>
    %37 = tpu.matmul %34, %36, %cst_24 {dimension_numbers = #tpu.dot_dimension_numbers<[1], [0], [0], [1], [0, 0, 1, 1], [], []>} : vector<324x4xbf16>, vector<4x8xbf16>, vector<324x8xf32> -> vector<324x8xf32>
    %38 = arith.addf %33, %37 : vector<324x8xf32>
    %39 = vector.extract_strided_slice %1 {offsets = [37, 0], sizes = [324, 4], strides = [1, 1]} : vector<362x4xbf16> to vector<324x4xbf16>
    %c7 = arith.constant 7 : index
    %c0_25 = arith.constant 0 : index
    %c0_26 = arith.constant 0 : index
    %40 = vector.load %arg2[%c7, %c0_25, %c0_26] : memref<9x4x8xbf16, #tpu.memory_space<vmem>>, vector<1x4x8xbf16>
    %41 = vector.shape_cast %40 : vector<1x4x8xbf16> to vector<4x8xbf16>
    %cst_27 = arith.constant dense<0.000000e+00> : vector<324x8xf32>
    %42 = tpu.matmul %39, %41, %cst_27 {dimension_numbers = #tpu.dot_dimension_numbers<[1], [0], [0], [1], [0, 0, 1, 1], [], []>} : vector<324x4xbf16>, vector<4x8xbf16>, vector<324x8xf32> -> vector<324x8xf32>
    %43 = arith.addf %38, %42 : vector<324x8xf32>
    %44 = vector.extract_strided_slice %1 {offsets = [38, 0], sizes = [324, 4], strides = [1, 1]} : vector<362x4xbf16> to vector<324x4xbf16>
    %c8 = arith.constant 8 : index
    %c0_28 = arith.constant 0 : index
    %c0_29 = arith.constant 0 : index
    %45 = vector.load %arg2[%c8, %c0_28, %c0_29] : memref<9x4x8xbf16, #tpu.memory_space<vmem>>, vector<1x4x8xbf16>
    %46 = vector.shape_cast %45 : vector<1x4x8xbf16> to vector<4x8xbf16>
    %cst_30 = arith.constant dense<0.000000e+00> : vector<324x8xf32>
    %47 = tpu.matmul %44, %46, %cst_30 {dimension_numbers = #tpu.dot_dimension_numbers<[1], [0], [0], [1], [0, 0, 1, 1], [], []>} : vector<324x4xbf16>, vector<4x8xbf16>, vector<324x8xf32> -> vector<324x8xf32>
    %48 = arith.addf %43, %47 : vector<324x8xf32>
    %cst_31 = arith.constant 0.000000e+00 : f32
    %49 = vector.broadcast %cst_31 : f32 to vector<324x1xf32>
    %50 = arith.cmpf ogt, %2, %49 : vector<324x1xf32>
    %cst_32 = arith.constant 0.000000e+00 : f32
    %51 = vector.shape_cast %50 : vector<324x1xi1> to vector<324x1xi1>
    %52 = vector.broadcast %51 : vector<324x1xi1> to vector<324x8xi1>
    %53 = vector.broadcast %cst_32 : f32 to vector<324x8xf32>
    %54 = arith.select %52, %48, %53 : vector<324x8xi1>, vector<324x8xf32>
    %cst_33 = arith.constant dense<0.000000e+00> : vector<8xf32>
    %55 = vector.multi_reduction <add>, %54, %cst_33 [0] : vector<324x8xf32> to vector<8xf32>
    %56 = vector.shape_cast %55 : vector<8xf32> to vector<1x8xf32>
    %c0_34 = arith.constant 0 : index
    %c0_35 = arith.constant 0 : index
    %c0_36 = arith.constant 0 : index
    %57 = vector.load %arg5[%c0_34, %c0_35, %c0_36] : memref<1x1x8xf32, #tpu.memory_space<vmem>>, vector<1x1x8xf32>
    %58 = vector.shape_cast %57 : vector<1x1x8xf32> to vector<1x8xf32>
    %59 = vector.shape_cast %56 : vector<1x8xf32> to vector<1x1x8xf32>
    tpu.vector_store %arg5[%c0_34, %c0_35, %c0_36], %59 {strides = array<i32>} : memref<1x1x8xf32, #tpu.memory_space<vmem>>, vector<1x1x8xf32>,
    %60 = arith.mulf %54, %54 : vector<324x8xf32>
    %cst_37 = arith.constant dense<0.000000e+00> : vector<8xf32>
    %61 = vector.multi_reduction <add>, %60, %cst_37 [0] : vector<324x8xf32> to vector<8xf32>
    %62 = vector.shape_cast %61 : vector<8xf32> to vector<1x8xf32>
    %c0_38 = arith.constant 0 : index
    %c0_39 = arith.constant 0 : index
    %c0_40 = arith.constant 0 : index
    %63 = vector.load %arg6[%c0_38, %c0_39, %c0_40] : memref<1x1x8xf32, #tpu.memory_space<vmem>>, vector<1x1x8xf32>
    %64 = vector.shape_cast %63 : vector<1x1x8xf32> to vector<1x8xf32>
    %65 = vector.shape_cast %62 : vector<1x8xf32> to vector<1x1x8xf32>
    tpu.vector_store %arg6[%c0_38, %c0_39, %c0_40], %65 {strides = array<i32>} : memref<1x1x8xf32, #tpu.memory_space<vmem>>, vector<1x1x8xf32>,
    %cst_41 = arith.constant 0.000000e+00 : bf16
    %66 = vector.broadcast %cst_41 : bf16 to vector<19x8xbf16>
    %c0_42 = arith.constant 0 : index
    %c0_43 = arith.constant 0 : index
    %c0_44 = arith.constant 0 : index
    %67 = vector.load %arg4[%c0_42, %c0_43, %c0_44] : memref<1x362x8xbf16, #tpu.memory_space<vmem>>, vector<1x19x8xbf16>
    %68 = vector.shape_cast %67 : vector<1x19x8xbf16> to vector<19x8xbf16>
    %69 = vector.shape_cast %66 : vector<19x8xbf16> to vector<1x19x8xbf16>
    tpu.vector_store %arg4[%c0_42, %c0_43, %c0_44], %69 {strides = array<i32>} : memref<1x362x8xbf16, #tpu.memory_space<vmem>>, vector<1x19x8xbf16>,
    %70 = arith.truncf %54 : vector<324x8xf32> to vector<324x8xbf16>
    %c0_45 = arith.constant 0 : index
    %c19_46 = arith.constant 19 : index
    %c0_47 = arith.constant 0 : index
    %71 = vector.load %arg4[%c0_45, %c19_46, %c0_47] : memref<1x362x8xbf16, #tpu.memory_space<vmem>>, vector<1x324x8xbf16>
    %72 = vector.shape_cast %71 : vector<1x324x8xbf16> to vector<324x8xbf16>
    %73 = vector.shape_cast %70 : vector<324x8xbf16> to vector<1x324x8xbf16>
    tpu.vector_store %arg4[%c0_45, %c19_46, %c0_47], %73 {strides = array<i32>} : memref<1x362x8xbf16, #tpu.memory_space<vmem>>, vector<1x324x8xbf16>,
    %c0_48 = arith.constant 0 : index
    %c343 = arith.constant 343 : index
    %c0_49 = arith.constant 0 : index
    %74 = vector.load %arg4[%c0_48, %c343, %c0_49] : memref<1x362x8xbf16, #tpu.memory_space<vmem>>, vector<1x19x8xbf16>
    %75 = vector.shape_cast %74 : vector<1x19x8xbf16> to vector<19x8xbf16>
    %76 = vector.shape_cast %66 : vector<19x8xbf16> to vector<1x19x8xbf16>
    tpu.vector_store %arg4[%c0_48, %c343, %c0_49], %76 {strides = array<i32>} : memref<1x362x8xbf16, #tpu.memory_space<vmem>>, vector<1x19x8xbf16>,
    return
  }
  func.func @transform_0(%arg0: i32) -> (i32, i32, i32) {
    %c0_i32 = arith.constant 0 : i32
    %c0_i32_0 = arith.constant 0 : i32
    %c0_i32_1 = arith.constant 0 : i32
    return %arg0, %c0_i32, %c0_i32_0 : i32, i32, i32
  }
  func.func @transform_1(%arg0: i32) -> (i32, i32, i32) {
    %c0_i32 = arith.constant 0 : i32
    %c0_i32_0 = arith.constant 0 : i32
    %c0_i32_1 = arith.constant 0 : i32
    %c0_i32_2 = arith.constant 0 : i32
    return %c0_i32, %c0_i32_0, %c0_i32_1 : i32, i32, i32
  }
  func.func @transform_2(%arg0: i32) -> (i32, i32) {
    %c0_i32 = arith.constant 0 : i32
    %c0_i32_0 = arith.constant 0 : i32
    %c0_i32_1 = arith.constant 0 : i32
    return %c0_i32, %c0_i32_0 : i32, i32
  }
  func.func @transform_3(%arg0: i32) -> (i32, i32, i32) {
    %c0_i32 = arith.constant 0 : i32
    %c0_i32_0 = arith.constant 0 : i32
    %c0_i32_1 = arith.constant 0 : i32
    return %arg0, %c0_i32, %c0_i32_0 : i32, i32, i32
  }
  func.func @transform_4(%arg0: i32) -> (i32, i32, i32) {
    %c0_i32 = arith.constant 0 : i32
    %c0_i32_0 = arith.constant 0 : i32
    %c0_i32_1 = arith.constant 0 : i32
    return %arg0, %c0_i32, %c0_i32_0 : i32, i32, i32
  }
  func.func @transform_5(%arg0: i32) -> (i32, i32, i32) {
    %c0_i32 = arith.constant 0 : i32
    %c0_i32_0 = arith.constant 0 : i32
    %c0_i32_1 = arith.constant 0 : i32
    return %arg0, %c0_i32, %c0_i32_0 : i32, i32, i32
  }
}

module attributes {stable_mosaic.version = 11 : i64} {
  func.func @bn_act_conv_stats_kernel(%arg0: i32, %arg1: memref<1x362x8xbf16, #tpu.memory_space<vmem>>, %arg2: memref<9x8x8xbf16, #tpu.memory_space<vmem>>, %arg3: memref<1x8xf32, #tpu.memory_space<vmem>>, %arg4: memref<1x8xf32, #tpu.memory_space<vmem>>, %arg5: memref<362x1xf32, #tpu.memory_space<vmem>>, %arg6: memref<1x362x8xbf16, #tpu.memory_space<vmem>>, %arg7: memref<1x1x8xf32, #tpu.memory_space<vmem>>, %arg8: memref<1x1x8xf32, #tpu.memory_space<vmem>>) attributes {dimension_semantics = [#tpu.dimension_semantics<parallel>], iteration_bounds = array<i64: 2>, scalar_prefetch = 0 : i64, scratch_operands = 0 : i64, tpu.core_type = #tpu.core_type<tc>, window_params = [{transform_indices = @transform_0, window_bounds = array<i64: 1, 362, 8>}, {pipeline_mode = #tpu.pipeline_mode<synchronous>, transform_indices = @transform_1, window_bounds = array<i64: 9, 8, 8>}, {pipeline_mode = #tpu.pipeline_mode<synchronous>, transform_indices = @transform_2, window_bounds = array<i64: 1, 8>}, {pipeline_mode = #tpu.pipeline_mode<synchronous>, transform_indices = @transform_3, window_bounds = array<i64: 1, 8>}, {pipeline_mode = #tpu.pipeline_mode<synchronous>, transform_indices = @transform_4, window_bounds = array<i64: 362, 1>}, {transform_indices = @transform_5, window_bounds = array<i64: 1, 362, 8>}, {transform_indices = @transform_6, window_bounds = array<i64: 1, 1, 8>}, {transform_indices = @transform_7, window_bounds = array<i64: 1, 1, 8>}]} {
    %c0 = arith.constant 0 : index
    %c0_0 = arith.constant 0 : index
    %c0_1 = arith.constant 0 : index
    %0 = vector.load %arg1[%c0, %c0_0, %c0_1] : memref<1x362x8xbf16, #tpu.memory_space<vmem>>, vector<1x362x8xbf16>
    %1 = vector.shape_cast %0 : vector<1x362x8xbf16> to vector<362x8xbf16>
    %2 = arith.extf %1 : vector<362x8xbf16> to vector<362x8xf32>
    %c0_2 = arith.constant 0 : index
    %c0_3 = arith.constant 0 : index
    %3 = vector.load %arg3[%c0_2, %c0_3] : memref<1x8xf32, #tpu.memory_space<vmem>>, vector<1x8xf32>
    %4 = vector.broadcast %3 : vector<1x8xf32> to vector<362x8xf32>
    %5 = arith.mulf %2, %4 : vector<362x8xf32>
    %c0_4 = arith.constant 0 : index
    %c0_5 = arith.constant 0 : index
    %6 = vector.load %arg4[%c0_4, %c0_5] : memref<1x8xf32, #tpu.memory_space<vmem>>, vector<1x8xf32>
    %7 = vector.broadcast %6 : vector<1x8xf32> to vector<362x8xf32>
    %8 = arith.addf %5, %7 : vector<362x8xf32>
    %cst = arith.constant 0.000000e+00 : f32
    %9 = vector.broadcast %cst : f32 to vector<362x8xf32>
    %10 = arith.cmpf oge, %8, %9 : vector<362x8xf32>
    %cst_6 = arith.constant 2.000000e-01 : f32
    %11 = vector.broadcast %cst_6 : f32 to vector<362x8xf32>
    %12 = arith.mulf %11, %8 : vector<362x8xf32>
    %13 = arith.select %10, %8, %12 : vector<362x8xi1>, vector<362x8xf32>
    %c0_7 = arith.constant 0 : index
    %c0_8 = arith.constant 0 : index
    %14 = vector.load %arg5[%c0_7, %c0_8] : memref<362x1xf32, #tpu.memory_space<vmem>>, vector<362x1xf32>
    %cst_9 = arith.constant 0.000000e+00 : f32
    %15 = vector.broadcast %cst_9 : f32 to vector<362x1xf32>
    %16 = arith.cmpf ogt, %14, %15 : vector<362x1xf32>
    %cst_10 = arith.constant 0.000000e+00 : f32
    %17 = vector.shape_cast %16 : vector<362x1xi1> to vector<362x1xi1>
    %18 = vector.broadcast %17 : vector<362x1xi1> to vector<362x8xi1>
    %19 = vector.broadcast %cst_10 : f32 to vector<362x8xf32>
    %20 = arith.select %18, %13, %19 : vector<362x8xi1>, vector<362x8xf32>
    %21 = arith.truncf %20 : vector<362x8xf32> to vector<362x8xbf16>
    %c19 = arith.constant 19 : index
    %c0_11 = arith.constant 0 : index
    %22 = vector.load %arg5[%c19, %c0_11] : memref<362x1xf32, #tpu.memory_space<vmem>>, vector<324x1xf32>
    %cst_12 = arith.constant 0.000000e+00 : f32
    %23 = vector.broadcast %cst_12 : f32 to vector<324x8xf32>
    %24 = vector.extract_strided_slice %21 {offsets = [0, 0], sizes = [324, 8], strides = [1, 1]} : vector<362x8xbf16> to vector<324x8xbf16>
    %c0_13 = arith.constant 0 : index
    %c0_14 = arith.constant 0 : index
    %c0_15 = arith.constant 0 : index
    %25 = vector.load %arg2[%c0_13, %c0_14, %c0_15] : memref<9x8x8xbf16, #tpu.memory_space<vmem>>, vector<1x8x8xbf16>
    %26 = vector.shape_cast %25 : vector<1x8x8xbf16> to vector<8x8xbf16>
    %cst_16 = arith.constant dense<0.000000e+00> : vector<324x8xf32>
    %27 = tpu.matmul %24, %26, %cst_16 {dimension_numbers = #tpu.dot_dimension_numbers<[1], [0], [0], [1], [0, 0, 1, 1], [], []>} : vector<324x8xbf16>, vector<8x8xbf16>, vector<324x8xf32> -> vector<324x8xf32>
    %28 = arith.addf %23, %27 : vector<324x8xf32>
    %29 = vector.extract_strided_slice %21 {offsets = [1, 0], sizes = [324, 8], strides = [1, 1]} : vector<362x8xbf16> to vector<324x8xbf16>
    %c1 = arith.constant 1 : index
    %c0_17 = arith.constant 0 : index
    %c0_18 = arith.constant 0 : index
    %30 = vector.load %arg2[%c1, %c0_17, %c0_18] : memref<9x8x8xbf16, #tpu.memory_space<vmem>>, vector<1x8x8xbf16>
    %31 = vector.shape_cast %30 : vector<1x8x8xbf16> to vector<8x8xbf16>
    %cst_19 = arith.constant dense<0.000000e+00> : vector<324x8xf32>
    %32 = tpu.matmul %29, %31, %cst_19 {dimension_numbers = #tpu.dot_dimension_numbers<[1], [0], [0], [1], [0, 0, 1, 1], [], []>} : vector<324x8xbf16>, vector<8x8xbf16>, vector<324x8xf32> -> vector<324x8xf32>
    %33 = arith.addf %28, %32 : vector<324x8xf32>
    %34 = vector.extract_strided_slice %21 {offsets = [2, 0], sizes = [324, 8], strides = [1, 1]} : vector<362x8xbf16> to vector<324x8xbf16>
    %c2 = arith.constant 2 : index
    %c0_20 = arith.constant 0 : index
    %c0_21 = arith.constant 0 : index
    %35 = vector.load %arg2[%c2, %c0_20, %c0_21] : memref<9x8x8xbf16, #tpu.memory_space<vmem>>, vector<1x8x8xbf16>
    %36 = vector.shape_cast %35 : vector<1x8x8xbf16> to vector<8x8xbf16>
    %cst_22 = arith.constant dense<0.000000e+00> : vector<324x8xf32>
    %37 = tpu.matmul %34, %36, %cst_22 {dimension_numbers = #tpu.dot_dimension_numbers<[1], [0], [0], [1], [0, 0, 1, 1], [], []>} : vector<324x8xbf16>, vector<8x8xbf16>, vector<324x8xf32> -> vector<324x8xf32>
    %38 = arith.addf %33, %37 : vector<324x8xf32>
    %39 = vector.extract_strided_slice %21 {offsets = [18, 0], sizes = [324, 8], strides = [1, 1]} : vector<362x8xbf16> to vector<324x8xbf16>
    %c3 = arith.constant 3 : index
    %c0_23 = arith.constant 0 : index
    %c0_24 = arith.constant 0 : index
    %40 = vector.load %arg2[%c3, %c0_23, %c0_24] : memref<9x8x8xbf16, #tpu.memory_space<vmem>>, vector<1x8x8xbf16>
    %41 = vector.shape_cast %40 : vector<1x8x8xbf16> to vector<8x8xbf16>
    %cst_25 = arith.constant dense<0.000000e+00> : vector<324x8xf32>
    %42 = tpu.matmul %39, %41, %cst_25 {dimension_numbers = #tpu.dot_dimension_numbers<[1], [0], [0], [1], [0, 0, 1, 1], [], []>} : vector<324x8xbf16>, vector<8x8xbf16>, vector<324x8xf32> -> vector<324x8xf32>
    %43 = arith.addf %38, %42 : vector<324x8xf32>
    %44 = vector.extract_strided_slice %21 {offsets = [19, 0], sizes = [324, 8], strides = [1, 1]} : vector<362x8xbf16> to vector<324x8xbf16>
    %c4 = arith.constant 4 : index
    %c0_26 = arith.constant 0 : index
    %c0_27 = arith.constant 0 : index
    %45 = vector.load %arg2[%c4, %c0_26, %c0_27] : memref<9x8x8xbf16, #tpu.memory_space<vmem>>, vector<1x8x8xbf16>
    %46 = vector.shape_cast %45 : vector<1x8x8xbf16> to vector<8x8xbf16>
    %cst_28 = arith.constant dense<0.000000e+00> : vector<324x8xf32>
    %47 = tpu.matmul %44, %46, %cst_28 {dimension_numbers = #tpu.dot_dimension_numbers<[1], [0], [0], [1], [0, 0, 1, 1], [], []>} : vector<324x8xbf16>, vector<8x8xbf16>, vector<324x8xf32> -> vector<324x8xf32>
    %48 = arith.addf %43, %47 : vector<324x8xf32>
    %49 = vector.extract_strided_slice %21 {offsets = [20, 0], sizes = [324, 8], strides = [1, 1]} : vector<362x8xbf16> to vector<324x8xbf16>
    %c5 = arith.constant 5 : index
    %c0_29 = arith.constant 0 : index
    %c0_30 = arith.constant 0 : index
    %50 = vector.load %arg2[%c5, %c0_29, %c0_30] : memref<9x8x8xbf16, #tpu.memory_space<vmem>>, vector<1x8x8xbf16>
    %51 = vector.shape_cast %50 : vector<1x8x8xbf16> to vector<8x8xbf16>
    %cst_31 = arith.constant dense<0.000000e+00> : vector<324x8xf32>
    %52 = tpu.matmul %49, %51, %cst_31 {dimension_numbers = #tpu.dot_dimension_numbers<[1], [0], [0], [1], [0, 0, 1, 1], [], []>} : vector<324x8xbf16>, vector<8x8xbf16>, vector<324x8xf32> -> vector<324x8xf32>
    %53 = arith.addf %48, %52 : vector<324x8xf32>
    %54 = vector.extract_strided_slice %21 {offsets = [36, 0], sizes = [324, 8], strides = [1, 1]} : vector<362x8xbf16> to vector<324x8xbf16>
    %c6 = arith.constant 6 : index
    %c0_32 = arith.constant 0 : index
    %c0_33 = arith.constant 0 : index
    %55 = vector.load %arg2[%c6, %c0_32, %c0_33] : memref<9x8x8xbf16, #tpu.memory_space<vmem>>, vector<1x8x8xbf16>
    %56 = vector.shape_cast %55 : vector<1x8x8xbf16> to vector<8x8xbf16>
    %cst_34 = arith.constant dense<0.000000e+00> : vector<324x8xf32>
    %57 = tpu.matmul %54, %56, %cst_34 {dimension_numbers = #tpu.dot_dimension_numbers<[1], [0], [0], [1], [0, 0, 1, 1], [], []>} : vector<324x8xbf16>, vector<8x8xbf16>, vector<324x8xf32> -> vector<324x8xf32>
    %58 = arith.addf %53, %57 : vector<324x8xf32>
    %59 = vector.extract_strided_slice %21 {offsets = [37, 0], sizes = [324, 8], strides = [1, 1]} : vector<362x8xbf16> to vector<324x8xbf16>
    %c7 = arith.constant 7 : index
    %c0_35 = arith.constant 0 : index
    %c0_36 = arith.constant 0 : index
    %60 = vector.load %arg2[%c7, %c0_35, %c0_36] : memref<9x8x8xbf16, #tpu.memory_space<vmem>>, vector<1x8x8xbf16>
    %61 = vector.shape_cast %60 : vector<1x8x8xbf16> to vector<8x8xbf16>
    %cst_37 = arith.constant dense<0.000000e+00> : vector<324x8xf32>
    %62 = tpu.matmul %59, %61, %cst_37 {dimension_numbers = #tpu.dot_dimension_numbers<[1], [0], [0], [1], [0, 0, 1, 1], [], []>} : vector<324x8xbf16>, vector<8x8xbf16>, vector<324x8xf32> -> vector<324x8xf32>
    %63 = arith.addf %58, %62 : vector<324x8xf32>
    %64 = vector.extract_strided_slice %21 {offsets = [38, 0], sizes = [324, 8], strides = [1, 1]} : vector<362x8xbf16> to vector<324x8xbf16>
    %c8 = arith.constant 8 : index
    %c0_38 = arith.constant 0 : index
    %c0_39 = arith.constant 0 : index
    %65 = vector.load %arg2[%c8, %c0_38, %c0_39] : memref<9x8x8xbf16, #tpu.memory_space<vmem>>, vector<1x8x8xbf16>
    %66 = vector.shape_cast %65 : vector<1x8x8xbf16> to vector<8x8xbf16>
    %cst_40 = arith.constant dense<0.000000e+00> : vector<324x8xf32>
    %67 = tpu.matmul %64, %66, %cst_40 {dimension_numbers = #tpu.dot_dimension_numbers<[1], [0], [0], [1], [0, 0, 1, 1], [], []>} : vector<324x8xbf16>, vector<8x8xbf16>, vector<324x8xf32> -> vector<324x8xf32>
    %68 = arith.addf %63, %67 : vector<324x8xf32>
    %cst_41 = arith.constant 0.000000e+00 : f32
    %69 = vector.broadcast %cst_41 : f32 to vector<324x1xf32>
    %70 = arith.cmpf ogt, %22, %69 : vector<324x1xf32>
    %cst_42 = arith.constant 0.000000e+00 : f32
    %71 = vector.shape_cast %70 : vector<324x1xi1> to vector<324x1xi1>
    %72 = vector.broadcast %71 : vector<324x1xi1> to vector<324x8xi1>
    %73 = vector.broadcast %cst_42 : f32 to vector<324x8xf32>
    %74 = arith.select %72, %68, %73 : vector<324x8xi1>, vector<324x8xf32>
    %cst_43 = arith.constant dense<0.000000e+00> : vector<8xf32>
    %75 = vector.multi_reduction <add>, %74, %cst_43 [0] : vector<324x8xf32> to vector<8xf32>
    %76 = vector.shape_cast %75 : vector<8xf32> to vector<1x8xf32>
    %c0_44 = arith.constant 0 : index
    %c0_45 = arith.constant 0 : index
    %c0_46 = arith.constant 0 : index
    %77 = vector.load %arg7[%c0_44, %c0_45, %c0_46] : memref<1x1x8xf32, #tpu.memory_space<vmem>>, vector<1x1x8xf32>
    %78 = vector.shape_cast %77 : vector<1x1x8xf32> to vector<1x8xf32>
    %79 = vector.shape_cast %76 : vector<1x8xf32> to vector<1x1x8xf32>
    tpu.vector_store %arg7[%c0_44, %c0_45, %c0_46], %79 {strides = array<i32>} : memref<1x1x8xf32, #tpu.memory_space<vmem>>, vector<1x1x8xf32>,
    %80 = arith.mulf %74, %74 : vector<324x8xf32>
    %cst_47 = arith.constant dense<0.000000e+00> : vector<8xf32>
    %81 = vector.multi_reduction <add>, %80, %cst_47 [0] : vector<324x8xf32> to vector<8xf32>
    %82 = vector.shape_cast %81 : vector<8xf32> to vector<1x8xf32>
    %c0_48 = arith.constant 0 : index
    %c0_49 = arith.constant 0 : index
    %c0_50 = arith.constant 0 : index
    %83 = vector.load %arg8[%c0_48, %c0_49, %c0_50] : memref<1x1x8xf32, #tpu.memory_space<vmem>>, vector<1x1x8xf32>
    %84 = vector.shape_cast %83 : vector<1x1x8xf32> to vector<1x8xf32>
    %85 = vector.shape_cast %82 : vector<1x8xf32> to vector<1x1x8xf32>
    tpu.vector_store %arg8[%c0_48, %c0_49, %c0_50], %85 {strides = array<i32>} : memref<1x1x8xf32, #tpu.memory_space<vmem>>, vector<1x1x8xf32>,
    %cst_51 = arith.constant 0.000000e+00 : bf16
    %86 = vector.broadcast %cst_51 : bf16 to vector<19x8xbf16>
    %c0_52 = arith.constant 0 : index
    %c0_53 = arith.constant 0 : index
    %c0_54 = arith.constant 0 : index
    %87 = vector.load %arg6[%c0_52, %c0_53, %c0_54] : memref<1x362x8xbf16, #tpu.memory_space<vmem>>, vector<1x19x8xbf16>
    %88 = vector.shape_cast %87 : vector<1x19x8xbf16> to vector<19x8xbf16>
    %89 = vector.shape_cast %86 : vector<19x8xbf16> to vector<1x19x8xbf16>
    tpu.vector_store %arg6[%c0_52, %c0_53, %c0_54], %89 {strides = array<i32>} : memref<1x362x8xbf16, #tpu.memory_space<vmem>>, vector<1x19x8xbf16>,
    %90 = arith.truncf %74 : vector<324x8xf32> to vector<324x8xbf16>
    %c0_55 = arith.constant 0 : index
    %c19_56 = arith.constant 19 : index
    %c0_57 = arith.constant 0 : index
    %91 = vector.load %arg6[%c0_55, %c19_56, %c0_57] : memref<1x362x8xbf16, #tpu.memory_space<vmem>>, vector<1x324x8xbf16>
    %92 = vector.shape_cast %91 : vector<1x324x8xbf16> to vector<324x8xbf16>
    %93 = vector.shape_cast %90 : vector<324x8xbf16> to vector<1x324x8xbf16>
    tpu.vector_store %arg6[%c0_55, %c19_56, %c0_57], %93 {strides = array<i32>} : memref<1x362x8xbf16, #tpu.memory_space<vmem>>, vector<1x324x8xbf16>,
    %c0_58 = arith.constant 0 : index
    %c343 = arith.constant 343 : index
    %c0_59 = arith.constant 0 : index
    %94 = vector.load %arg6[%c0_58, %c343, %c0_59] : memref<1x362x8xbf16, #tpu.memory_space<vmem>>, vector<1x19x8xbf16>
    %95 = vector.shape_cast %94 : vector<1x19x8xbf16> to vector<19x8xbf16>
    %96 = vector.shape_cast %86 : vector<19x8xbf16> to vector<1x19x8xbf16>
    tpu.vector_store %arg6[%c0_58, %c343, %c0_59], %96 {strides = array<i32>} : memref<1x362x8xbf16, #tpu.memory_space<vmem>>, vector<1x19x8xbf16>,
    return
  }
  func.func @transform_0(%arg0: i32) -> (i32, i32, i32) {
    %c0_i32 = arith.constant 0 : i32
    %c0_i32_0 = arith.constant 0 : i32
    %c0_i32_1 = arith.constant 0 : i32
    return %arg0, %c0_i32, %c0_i32_0 : i32, i32, i32
  }
  func.func @transform_1(%arg0: i32) -> (i32, i32, i32) {
    %c0_i32 = arith.constant 0 : i32
    %c0_i32_0 = arith.constant 0 : i32
    %c0_i32_1 = arith.constant 0 : i32
    %c0_i32_2 = arith.constant 0 : i32
    return %c0_i32, %c0_i32_0, %c0_i32_1 : i32, i32, i32
  }
  func.func @transform_2(%arg0: i32) -> (i32, i32) {
    %c0_i32 = arith.constant 0 : i32
    %c0_i32_0 = arith.constant 0 : i32
    %c0_i32_1 = arith.constant 0 : i32
    return %c0_i32, %c0_i32_0 : i32, i32
  }
  func.func @transform_3(%arg0: i32) -> (i32, i32) {
    %c0_i32 = arith.constant 0 : i32
    %c0_i32_0 = arith.constant 0 : i32
    %c0_i32_1 = arith.constant 0 : i32
    return %c0_i32, %c0_i32_0 : i32, i32
  }
  func.func @transform_4(%arg0: i32) -> (i32, i32) {
    %c0_i32 = arith.constant 0 : i32
    %c0_i32_0 = arith.constant 0 : i32
    %c0_i32_1 = arith.constant 0 : i32
    return %c0_i32, %c0_i32_0 : i32, i32
  }
  func.func @transform_5(%arg0: i32) -> (i32, i32, i32) {
    %c0_i32 = arith.constant 0 : i32
    %c0_i32_0 = arith.constant 0 : i32
    %c0_i32_1 = arith.constant 0 : i32
    return %arg0, %c0_i32, %c0_i32_0 : i32, i32, i32
  }
  func.func @transform_6(%arg0: i32) -> (i32, i32, i32) {
    %c0_i32 = arith.constant 0 : i32
    %c0_i32_0 = arith.constant 0 : i32
    %c0_i32_1 = arith.constant 0 : i32
    return %arg0, %c0_i32, %c0_i32_0 : i32, i32, i32
  }
  func.func @transform_7(%arg0: i32) -> (i32, i32, i32) {
    %c0_i32 = arith.constant 0 : i32
    %c0_i32_0 = arith.constant 0 : i32
    %c0_i32_1 = arith.constant 0 : i32
    return %arg0, %c0_i32, %c0_i32_0 : i32, i32, i32
  }
}

</mosaic_0001>

<bundles_post_ra>
// kernel: double_cv.5
= control target key start
LH: loop header
LB: loop body
LE: loop exit
PB: predicated region body
PF: predicated region fallthrough
CT: control target
= control target key end

     0   :  { %s768_s12 = smov 0   ;;  %s1010_s0 = inlined_call_operand.vmem [shape: bf16[2,362,8], index: 0, kind: input, shape index: {}]   ;;  %s1011_s1 = inlined_call_operand.vmem [shape: f32[1,8], index: 1, kind: input, shape index: {}]   ;;  %s1012_s2 = inlined_call_operand.vmem [shape: f32[1,8], index: 2, kind: input, shape index: {}]   ;;  %s1013_s3 = inlined_call_operand.vmem [shape: f32[2,362,8], index: 3, kind: output, shape index: {}]  }
   0x1 LB: > { %s610_s13 = sadd.s32 4294967295, %s746_s12   ;;  %p614_p0 = scmp.ge.s32.totalorder %s746_s12, 1  ;;  %s746_s12 = sphi %s768_s12, %s13_s12  }
   0x2   : > { %p137_p1 = scmp.lt.s32.totalorder %s746_s12, 3 }
   0x4   : > { %p138_p2 = pnand %p614_p0, %p137_p1 }
   0x5   : > { %p161_p3 = scmp.lt.s32.totalorder (!%p138_p2), %s610_s13, 1  ;;  %v787_v0 = vld [vmem:[%s1011_s1] ss:$0 sm:$0xff] (!%p138_p2)  ;;  %vm507_vm0 = vcmask (!%p138_p2), 64512  }
   0x6   : > { %141 = sbr.rel (%p138_p2) target bundleno = 92 (0x5c), region = 32  ;;  %v796_v9 = vld [vmem:[%s1012_s2] ss:$0 sm:$0xff] (!%p138_p2) }
   0xd   : > { %s1015_s13 = smov (!%p161_p3, %s610_s13), 1 }
   0xe   : > { %s730_s14 = smul.u32 184, %s1015_s13 }
   0xf   : > { %s731_s22 = smul.u32 368, %s1015_s13 }
  0x10   : > { %s782_s17 = scalar_lea.vmem %s1010_s0, %s730_s14 }
  0x11   : > { %v622_v1 = vld [vmem:[%s782_s17] sm:$0xff]   ;;  %v709_v2 = vld [vmem:[%s782_s17 + $0x8] sm:$0xff]   ;;  %v710_v3 = vld [vmem:[%s782_s17 + $0x10] sm:$0xff]   ;;  %s818_s25 = scalar_lea.vmem %s1013_s3, %s731_s22 }
  0x12   : > { %v623_v4 = vunpack.c.l.bf16 %v622_v1  ;;  %v624_v5 = vunpack.c.h.bf16 %v622_v1  ;;  %v627_v6 = vunpack.c.l.bf16 %v709_v2  ;;  %v628_v7 = vunpack.c.h.bf16 %v709_v2  ;;  %v711_v8 = vld [vmem:[%s782_s17 + $0x18] sm:$0xff]   ;;  %v712_v37 = vld [vmem:[%s782_s17 + $0x20] sm:$0xff]   ;;  %v713_v41 = vld [vmem:[%s782_s17 + $0x28] sm:$0xff]  }
  0x13   : > { %v631_v10 = vunpack.c.l.bf16 %v710_v3  ;;  %v632_v11 = vunpack.c.h.bf16 %v710_v3  ;;  %v635_v12 = vunpack.c.l.bf16 %v711_v8  ;;  %v636_v13 = vunpack.c.h.bf16 %v711_v8  ;;  %v714_v42 = vld [vmem:[%s782_s17 + $0x30] sm:$0xff]   ;;  %v715_v49 = vld [vmem:[%s782_s17 + $0x38] sm:$0xff]  }
  0x14   : > { %v270_v14 = vmul.f32 %v623_v4, %v787_v0  ;;  %v271_v15 = vmul.f32 %v624_v5, %v787_v0  ;;  %v272_v16 = vmul.f32 %v627_v6, %v787_v0  ;;  %v273_v17 = vmul.f32 %v628_v7, %v787_v0  ;;  %v716_v7 = vld [vmem:[%s782_s17 + $0x40] sm:$0xff]  }
  0x15   : > { %v274_v18 = vmul.f32 %v631_v10, %v787_v0  ;;  %v275_v19 = vmul.f32 %v632_v11, %v787_v0  ;;  %v276_v20 = vmul.f32 %v635_v12, %v787_v0  ;;  %v277_v21 = vmul.f32 %v636_v13, %v787_v0 }
  0x16   : > { %v323_v22 = vadd.f32 %v796_v9, %v270_v14  ;;  %v324_v23 = vadd.f32 %v796_v9, %v271_v15  ;;  %v325_v24 = vadd.f32 %v796_v9, %v272_v16  ;;  %v326_v25 = vadd.f32 %v796_v9, %v273_v17 }
  0x17   : > { %v327_v26 = vadd.f32 %v796_v9, %v274_v18  ;;  %v328_v27 = vadd.f32 %v796_v9, %v275_v19  ;;  %v329_v28 = vadd.f32 %v796_v9, %v276_v20  ;;  %v330_v29 = vadd.f32 %v796_v9, %v277_v21  ;;  %v717_v20 = vld [vmem:[%s782_s17 + $0x48] sm:$0xff]  }
  0x18   : > { %vm369_vm1 = vcmp.ge.f32.partialorder %v323_v22, 0.0  ;;  %v415_v30 = vmul.f32 0.2, %v323_v22  ;;  %vm370_vm2 = vcmp.ge.f32.partialorder %v324_v23, 0.0  ;;  %v416_v31 = vmul.f32 0.2, %v324_v23 }
  0x19   : > { %vm371_vm3 = vcmp.ge.f32.partialorder %v325_v24, 0.0  ;;  %v417_v32 = vmul.f32 0.2, %v325_v24  ;;  %vm372_vm4 = vcmp.ge.f32.partialorder %v326_v25, 0.0  ;;  %v418_v33 = vmul.f32 0.2, %v326_v25 }
  0x1a   : > { %v461_v34 = vsel %vm369_vm1, %v323_v22, %v415_v30  ;;  %v462_v35 = vsel %vm370_vm2, %v324_v23, %v416_v31  ;;  %vm373_vm5 = vcmp.ge.f32.partialorder %v327_v26, 0.0  ;;  %v419_v36 = vmul.f32 0.2, %v327_v26 }
  0x1b   : > { %508 = vst.msk [vmem:[%s818_s25] sm:$0xff] %vm507_vm0, %v461_v34  ;;  %509 = vst.msk [vmem:[%s818_s25 + $0x8] sm:$0xff] %vm507_vm0, %v462_v35  ;;  %v463_v38 = vsel %vm371_vm3, %v325_v24, %v417_v32  ;;  %v464_v39 = vsel %vm372_vm4, %v326_v25, %v418_v33  ;;  %vm374_vm6 = vcmp.ge.f32.partialorder %v328_v27, 0.0  ;;  %v420_v40 = vmul.f32 0.2, %v328_v27  ;;  %v718_v25 = vld [vmem:[%s782_s17 + $0x50] sm:$0xff]  }
  0x1c   : > { %510 = vst.msk [vmem:[%s818_s25 + $0x10] sm:$0xff] %vm507_vm0, %v463_v38  ;;  %511 = vst.msk [vmem:[%s818_s25 + $0x18] sm:$0xff] %vm507_vm0, %v464_v39  ;;  %v465_v43 = vsel %vm373_vm5, %v327_v26, %v419_v36  ;;  %vm375_vm7 = vcmp.ge.f32.partialorder %v329_v28, 0.0  ;;  %v421_v44 = vmul.f32 0.2, %v329_v28  ;;  %vm376_vm8 = vcmp.ge.f32.partialorder %v330_v29, 0.0 }
  0x1d   : > { %512 = vst.msk [vmem:[%s818_s25 + $0x20] sm:$0xff] %vm507_vm0, %v465_v43  ;;  %v466_v45 = vsel %vm374_vm6, %v328_v27, %v420_v40  ;;  %v422_v46 = vmul.f32 0.2, %v330_v29  ;;  %v639_v47 = vunpack.c.l.bf16 %v712_v37  ;;  %v640_v48 = vunpack.c.h.bf16 %v712_v37  ;;  %v719_v43 = vld [vmem:[%s782_s17 + $0x58] sm:$0xff]  }
  0x1e   : > { %513 = vst.msk [vmem:[%s818_s25 + $0x28] sm:$0xff] %vm507_vm0, %v466_v45  ;;  %v467_v50 = vsel %vm375_vm7, %v329_v28, %v421_v44  ;;  %v643_v51 = vunpack.c.l.bf16 %v713_v41  ;;  %v644_v52 = vunpack.c.h.bf16 %v713_v41  ;;  %v647_v53 = vunpack.c.l.bf16 %v714_v42 }
  0x1f   : > { %514 = vst.msk [vmem:[%s818_s25 + $0x30] sm:$0xff] %vm507_vm0, %v467_v50  ;;  %v468_v54 = vsel %vm376_vm8, %v330_v29, %v422_v46  ;;  %v278_v55 = vmul.f32 %v639_v47, %v787_v0  ;;  %v279_v56 = vmul.f32 %v640_v48, %v787_v0  ;;  %v648_v57 = vunpack.c.h.bf16 %v714_v42 }
  0x20   : > { %515 = vst.msk [vmem:[%s818_s25 + $0x38] sm:$0xff] %vm507_vm0, %v468_v54  ;;  %v280_v58 = vmul.f32 %v643_v51, %v787_v0  ;;  %v281_v59 = vmul.f32 %v644_v52, %v787_v0  ;;  %v282_v60 = vmul.f32 %v647_v53, %v787_v0  ;;  %v651_v61 = vunpack.c.l.bf16 %v715_v49  ;;  %v720_v54 = vld [vmem:[%s782_s17 + $0x60] sm:$0xff]  }
  0x21   : > { %v331_v62 = vadd.f32 %v796_v9, %v278_v55  ;;  %v332_v63 = vadd.f32 %v796_v9, %v279_v56  ;;  %v283_v1 = vmul.f32 %v648_v57, %v787_v0  ;;  %v652_v2 = vunpack.c.h.bf16 %v715_v49 }
  0x22   : > { %v333_v3 = vadd.f32 %v796_v9, %v280_v58  ;;  %v334_v4 = vadd.f32 %v796_v9, %v281_v59  ;;  %v335_v5 = vadd.f32 %v796_v9, %v282_v60  ;;  %v284_v6 = vmul.f32 %v651_v61, %v787_v0 }
  0x23   : > { %vm377_vm9 = vcmp.ge.f32.partialorder %v331_v62, 0.0  ;;  %v423_v8 = vmul.f32 0.2, %v331_v62  ;;  %vm378_vm10 = vcmp.ge.f32.partialorder %v332_v63, 0.0  ;;  %v424_v10 = vmul.f32 0.2, %v332_v63 }
  0x24   : > { %vm379_vm11 = vcmp.ge.f32.partialorder %v333_v3, 0.0  ;;  %v425_v11 = vmul.f32 0.2, %v333_v3  ;;  %vm380_vm12 = vcmp.ge.f32.partialorder %v334_v4, 0.0  ;;  %v426_v12 = vmul.f32 0.2, %v334_v4 }
  0x25   : > { %v469_v13 = vsel %vm377_vm9, %v331_v62, %v423_v8  ;;  %v470_v14 = vsel %vm378_vm10, %v332_v63, %v424_v10  ;;  %vm381_vm13 = vcmp.ge.f32.partialorder %v335_v5, 0.0  ;;  %v427_v15 = vmul.f32 0.2, %v335_v5 }
  0x26   : > { %516 = vst.msk [vmem:[%s818_s25 + $0x40] sm:$0xff] %vm507_vm0, %v469_v13  ;;  %517 = vst.msk [vmem:[%s818_s25 + $0x48] sm:$0xff] %vm507_vm0, %v470_v14  ;;  %v471_v16 = vsel %vm379_vm11, %v333_v3, %v425_v11  ;;  %v472_v17 = vsel %vm380_vm12, %v334_v4, %v426_v12  ;;  %v336_v18 = vadd.f32 %v796_v9, %v283_v1  ;;  %v655_v23 = vunpack.c.l.bf16 %v716_v7  ;;  %v721_v1 = vld [vmem:[%s782_s17 + $0x68] sm:$0xff]  }
  0x27   : > { %v337_v19 = vadd.f32 %v796_v9, %v284_v6  ;;  %518 = vst.msk [vmem:[%s818_s25 + $0x50] sm:$0xff] %vm507_vm0, %v471_v16  ;;  %519 = vst.msk [vmem:[%s818_s25 + $0x58] sm:$0xff] %vm507_vm0, %v472_v17  ;;  %v473_v21 = vsel %vm381_vm13, %v335_v5, %v427_v15  ;;  %v285_v22 = vmul.f32 %v652_v2, %v787_v0  ;;  %v656_v24 = vunpack.c.h.bf16 %v716_v7  ;;  %v722_v2 = vld [vmem:[%s782_s17 + $0x70] sm:$0xff]  }
  0x28   : > { %520 = vst.msk [vmem:[%s818_s25 + $0x60] sm:$0xff] %vm507_vm0, %v473_v21  ;;  %vm382_vm14 = vcmp.ge.f32.partialorder %v336_v18, 0.0  ;;  %v428_v26 = vmul.f32 0.2, %v336_v18  ;;  %v286_v29 = vmul.f32 %v655_v23, %v787_v0  ;;  %v659_v31 = vunpack.c.l.bf16 %v717_v20  ;;  %v723_v21 = vld [vmem:[%s782_s17 + $0x78] sm:$0xff]  }
  0x29   : > { %vm383_vm15 = vcmp.ge.f32.partialorder %v337_v19, 0.0  ;;  %v429_v27 = vmul.f32 0.2, %v337_v19  ;;  %v338_v28 = vadd.f32 %v796_v9, %v285_v22  ;;  %v287_v30 = vmul.f32 %v656_v24, %v787_v0 }
  0x2a   : > { %v474_v32 = vsel %vm382_vm14, %v336_v18, %v428_v26  ;;  %v660_v34 = vunpack.c.h.bf16 %v717_v20  ;;  %v663_v35 = vunpack.c.l.bf16 %v718_v25  ;;  %v339_v37 = vadd.f32 %v796_v9, %v286_v29 }
  0x2b   : > { %v475_v33 = vsel %vm383_vm15, %v337_v19, %v429_v27  ;;  %521 = vst.msk [vmem:[%s818_s25 + $0x68] sm:$0xff] %vm507_vm0, %v474_v32  ;;  %vm384_vm1 = vcmp.ge.f32.partialorder %v338_v28, 0.0  ;;  %v430_v36 = vmul.f32 0.2, %v338_v28  ;;  %v340_v38 = vadd.f32 %v796_v9, %v287_v30 }
  0x2c   : > { %522 = vst.msk [vmem:[%s818_s25 + $0x70] sm:$0xff] %vm507_vm0, %v475_v33  ;;  %v288_v39 = vmul.f32 %v659_v31, %v787_v0  ;;  %v289_v40 = vmul.f32 %v660_v34, %v787_v0  ;;  %v290_v41 = vmul.f32 %v663_v35, %v787_v0  ;;  %v664_v42 = vunpack.c.h.bf16 %v718_v25  ;;  %v724_v35 = vld [vmem:[%s782_s17 + $0x80] sm:$0xff]  }
  0x2d   : > { %v476_v44 = vsel %vm384_vm1, %v338_v28, %v430_v36  ;;  %vm385_vm2 = vcmp.ge.f32.partialorder %v339_v37, 0.0  ;;  %v431_v45 = vmul.f32 0.2, %v339_v37  ;;  %vm386_vm3 = vcmp.ge.f32.partialorder %v340_v38, 0.0 }
  0x2e   : > { %523 = vst.msk [vmem:[%s818_s25 + $0x78] sm:$0xff] %vm507_vm0, %v476_v44  ;;  %v432_v46 = vmul.f32 0.2, %v340_v38  ;;  %v341_v47 = vadd.f32 %v796_v9, %v288_v39  ;;  %v342_v48 = vadd.f32 %v796_v9, %v289_v40  ;;  %v343_v49 = vadd.f32 %v796_v9, %v290_v41 }
  0x2f   : > { %v477_v50 = vsel %vm385_vm2, %v339_v37, %v431_v45  ;;  %v291_v51 = vmul.f32 %v664_v42, %v787_v0  ;;  %v667_v52 = vunpack.c.l.bf16 %v719_v43  ;;  %v668_v53 = vunpack.c.h.bf16 %v719_v43  ;;  %v725_v42 = vld [vmem:[%s782_s17 + $0x88] sm:$0xff]  }
  0x30   : > { %524 = vst.msk [vmem:[%s818_s25 + $0x80] sm:$0xff] %vm507_vm0, %v477_v50  ;;  %v478_v55 = vsel %vm386_vm3, %v340_v38, %v432_v46  ;;  %vm387_vm4 = vcmp.ge.f32.partialorder %v341_v47, 0.0  ;;  %v433_v56 = vmul.f32 0.2, %v341_v47  ;;  %vm388_vm5 = vcmp.ge.f32.partialorder %v342_v48, 0.0 }
  0x31   : > { %525 = vst.msk [vmem:[%s818_s25 + $0x88] sm:$0xff] %vm507_vm0, %v478_v55  ;;  %v434_v57 = vmul.f32 0.2, %v342_v48  ;;  %vm389_vm6 = vcmp.ge.f32.partialorder %v343_v49, 0.0  ;;  %v435_v58 = vmul.f32 0.2, %v343_v49  ;;  %v344_v59 = vadd.f32 %v796_v9, %v291_v51 }
  0x32   : > { %v479_v60 = vsel %vm387_vm4, %v341_v47, %v433_v56  ;;  %v292_v61 = vmul.f32 %v667_v52, %v787_v0  ;;  %v293_v62 = vmul.f32 %v668_v53, %v787_v0  ;;  %v671_v63 = vunpack.c.l.bf16 %v720_v54 }
  0x33   : > { %526 = vst.msk [vmem:[%s818_s25 + $0x90] sm:$0xff] %vm507_vm0, %v479_v60  ;;  %v480_v3 = vsel %vm388_vm5, %v342_v48, %v434_v57  ;;  %v481_v4 = vsel %vm389_vm6, %v343_v49, %v435_v58  ;;  %vm390_vm7 = vcmp.ge.f32.partialorder %v344_v59, 0.0  ;;  %v436_v5 = vmul.f32 0.2, %v344_v59 }
  0x34   : > { %527 = vst.msk [vmem:[%s818_s25 + $0x98] sm:$0xff] %vm507_vm0, %v480_v3  ;;  %528 = vst.msk [vmem:[%s818_s25 + $0xa0] sm:$0xff] %vm507_vm0, %v481_v4  ;;  %v345_v6 = vadd.f32 %v796_v9, %v292_v61  ;;  %v346_v7 = vadd.f32 %v796_v9, %v293_v62  ;;  %v294_v8 = vmul.f32 %v671_v63, %v787_v0  ;;  %v672_v10 = vunpack.c.h.bf16 %v720_v54  ;;  %v726_v54 = vld [vmem:[%s782_s17 + $0x90] sm:$0xff]   ;;  %v727_v3 = vld [vmem:[%s782_s17 + $0x98] sm:$0xff]  }
  0x35   : > { %v482_v11 = vsel %vm390_vm7, %v344_v59, %v436_v5  ;;  %v675_v12 = vunpack.c.l.bf16 %v721_v1  ;;  %v676_v13 = vunpack.c.h.bf16 %v721_v1  ;;  %v679_v14 = vunpack.c.l.bf16 %v722_v2 }
  0x36   : > { %529 = vst.msk [vmem:[%s818_s25 + $0xa8] sm:$0xff] %vm507_vm0, %v482_v11  ;;  %vm391_vm8 = vcmp.ge.f32.partialorder %v345_v6, 0.0  ;;  %v437_v15 = vmul.f32 0.2, %v345_v6  ;;  %vm392_vm9 = vcmp.ge.f32.partialorder %v346_v7, 0.0  ;;  %v347_v17 = vadd.f32 %v796_v9, %v294_v8 }
  0x37   : > { %v438_v16 = vmul.f32 0.2, %v346_v7  ;;  %v295_v18 = vmul.f32 %v672_v10, %v787_v0  ;;  %v296_v19 = vmul.f32 %v675_v12, %v787_v0  ;;  %v297_v20 = vmul.f32 %v676_v13, %v787_v0 }
  0x38   : > { %v483_v22 = vsel %vm391_vm8, %v345_v6, %v437_v15  ;;  %v298_v24 = vmul.f32 %v679_v14, %v787_v0  ;;  %v680_v25 = vunpack.c.h.bf16 %v722_v2  ;;  %vm393_vm10 = vcmp.ge.f32.partialorder %v347_v17, 0.0 }
  0x39   : > { %v484_v23 = vsel %vm392_vm9, %v346_v7, %v438_v16  ;;  %530 = vst.msk [vmem:[%s818_s25 + $0xb0] sm:$0xff] %vm507_vm0, %v483_v22  ;;  %v439_v26 = vmul.f32 0.2, %v347_v17  ;;  %v348_v27 = vadd.f32 %v796_v9, %v295_v18  ;;  %v349_v28 = vadd.f32 %v796_v9, %v296_v19 }
  0x3a   : > { %531 = vst.msk [vmem:[%s818_s25 + $0xb8] sm:$0xff] %vm507_vm0, %v484_v23  ;;  %v350_v29 = vadd.f32 %v796_v9, %v297_v20  ;;  %v351_v30 = vadd.f32 %v796_v9, %v298_v24  ;;  %v299_v31 = vmul.f32 %v680_v25, %v787_v0  ;;  %v683_v32 = vunpack.c.l.bf16 %v723_v21  ;;  %v728_v20 = vld [vmem:[%s782_s17 + $0xa0] sm:$0xff]   ;;  %v729_v25 = vld [vmem:[%s782_s17 + $0xa8] sm:$0xff]  }
  0x3b   : > { %v485_v33 = vsel %vm393_vm10, %v347_v17, %v439_v26  ;;  %vm394_vm11 = vcmp.ge.f32.partialorder %v348_v27, 0.0  ;;  %v440_v34 = vmul.f32 0.2, %v348_v27  ;;  %vm395_vm12 = vcmp.ge.f32.partialorder %v349_v28, 0.0 }
  0x3c   : > { %532 = vst.msk [vmem:[%s818_s25 + $0xc0] sm:$0xff] %vm507_vm0, %v485_v33  ;;  %v441_v36 = vmul.f32 0.2, %v349_v28  ;;  %vm396_vm13 = vcmp.ge.f32.partialorder %v350_v29, 0.0  ;;  %v442_v37 = vmul.f32 0.2, %v350_v29  ;;  %v352_v40 = vadd.f32 %v796_v9, %v299_v31 }
  0x3d   : > { %vm397_vm14 = vcmp.ge.f32.partialorder %v351_v30, 0.0  ;;  %v486_v38 = vsel %vm394_vm11, %v348_v27, %v440_v34  ;;  %v443_v39 = vmul.f32 0.2, %v351_v30  ;;  %v300_v41 = vmul.f32 %v683_v32, %v787_v0 }
  0x3e   : > { %533 = vst.msk [vmem:[%s818_s25 + $0xc8] sm:$0xff] %vm507_vm0, %v486_v38  ;;  %v487_v43 = vsel %vm395_vm12, %v349_v28, %v441_v36  ;;  %v488_v44 = vsel %vm396_vm13, %v350_v29, %v442_v37  ;;  %v684_v45 = vunpack.c.h.bf16 %v723_v21  ;;  %v687_v46 = vunpack.c.l.bf16 %v724_v35  ;;  %v215_v36 = vld [vmem:[%s782_s17 + $0xb0] sm:$0xf] }
  0x3f   : > { %534 = vst.msk [vmem:[%s818_s25 + $0xd0] sm:$0xff] %vm507_vm0, %v487_v43  ;;  %535 = vst.msk [vmem:[%s818_s25 + $0xd8] sm:$0xff] %vm507_vm0, %v488_v44  ;;  %v489_v47 = vsel %vm397_vm14, %v351_v30, %v443_v39  ;;  %vm398_vm15 = vcmp.ge.f32.partialorder %v352_v40, 0.0  ;;  %v444_v48 = vmul.f32 0.2, %v352_v40  ;;  %v353_v49 = vadd.f32 %v796_v9, %v300_v41 }
  0x40   : > { %536 = vst.msk [vmem:[%s818_s25 + $0xe0] sm:$0xff] %vm507_vm0, %v489_v47  ;;  %v301_v50 = vmul.f32 %v684_v45, %v787_v0  ;;  %v302_v51 = vmul.f32 %v687_v46, %v787_v0  ;;  %v688_v52 = vunpack.c.h.bf16 %v724_v35  ;;  %v691_v53 = vunpack.c.l.bf16 %v725_v42  ;;  %v216_v44 = vld [vmem:[%s782_s17 + $0xb4] sm:$0x1] }
  0x41   : > { %v490_v55 = vsel %vm398_vm15, %v352_v40, %v444_v48  ;;  %vm399_vm1 = vcmp.ge.f32.partialorder %v353_v49, 0.0  ;;  %v445_v56 = vmul.f32 0.2, %v353_v49  ;;  %v692_v57 = vunpack.c.h.bf16 %v725_v42 }
  0x42   : > { %537 = vst.msk [vmem:[%s818_s25 + $0xe8] sm:$0xff] %vm507_vm0, %v490_v55  ;;  %v354_v58 = vadd.f32 %v796_v9, %v301_v50  ;;  %v355_v59 = vadd.f32 %v796_v9, %v302_v51  ;;  %v303_v60 = vmul.f32 %v688_v52, %v787_v0  ;;  %v304_v61 = vmul.f32 %v691_v53, %v787_v0 }
  0x43   : > { %v491_v62 = vsel %vm399_vm1, %v353_v49, %v445_v56  ;;  %v305_v63 = vmul.f32 %v692_v57, %v787_v0  ;;  %v695_v1 = vunpack.c.l.bf16 %v726_v54  ;;  %v696_v2 = vunpack.c.h.bf16 %v726_v54 }
  0x44   : > { %538 = vst.msk [vmem:[%s818_s25 + $0xf0] sm:$0xff] %vm507_vm0, %v491_v62  ;;  %vm400_vm2 = vcmp.ge.f32.partialorder %v354_v58, 0.0  ;;  %v446_v4 = vmul.f32 0.2, %v354_v58  ;;  %vm401_vm3 = vcmp.ge.f32.partialorder %v355_v59, 0.0  ;;  %v356_v6 = vadd.f32 %v796_v9, %v303_v60 }
  0x45   : > { %v447_v5 = vmul.f32 0.2, %v355_v59  ;;  %v357_v7 = vadd.f32 %v796_v9, %v304_v61  ;;  %v358_v8 = vadd.f32 %v796_v9, %v305_v63  ;;  %v306_v10 = vmul.f32 %v695_v1, %v787_v0 }
  0x46   : > { %v492_v11 = vsel %vm400_vm2, %v354_v58, %v446_v4  ;;  %v307_v13 = vmul.f32 %v696_v2, %v787_v0  ;;  %v699_v14 = vunpack.c.l.bf16 %v727_v3  ;;  %vm402_vm4 = vcmp.ge.f32.partialorder %v356_v6, 0.0 }
  0x47   : > { %v493_v12 = vsel %vm401_vm3, %v355_v59, %v447_v5  ;;  %539 = vst.msk [vmem:[%s818_s25 + $0xf8] sm:$0xff] %vm507_vm0, %v492_v11  ;;  %v448_v15 = vmul.f32 0.2, %v356_v6  ;;  %vm403_vm5 = vcmp.ge.f32.partialorder %v357_v7, 0.0  ;;  %v449_v16 = vmul.f32 0.2, %v357_v7 }
  0x48   : > { %540 = vst.msk [vmem:[%s818_s25 + $0x100] sm:$0xff] %vm507_vm0, %v493_v12  ;;  %vm404_vm6 = vcmp.ge.f32.partialorder %v358_v8, 0.0  ;;  %v450_v17 = vmul.f32 0.2, %v358_v8  ;;  %v359_v18 = vadd.f32 %v796_v9, %v306_v10  ;;  %v360_v19 = vadd.f32 %v796_v9, %v307_v13 }
  0x49   : > { %v494_v21 = vsel %vm402_vm4, %v356_v6, %v448_v15  ;;  %v495_v22 = vsel %vm403_vm5, %v357_v7, %v449_v16  ;;  %v308_v23 = vmul.f32 %v699_v14, %v787_v0  ;;  %v700_v24 = vunpack.c.h.bf16 %v727_v3 }
  0x4a   : > { %541 = vst.msk [vmem:[%s818_s25 + $0x108] sm:$0xff] %vm507_vm0, %v494_v21  ;;  %542 = vst.msk [vmem:[%s818_s25 + $0x110] sm:$0xff] %vm507_vm0, %v495_v22  ;;  %v496_v26 = vsel %vm404_vm6, %v358_v8, %v450_v17  ;;  %vm405_vm7 = vcmp.ge.f32.partialorder %v359_v18, 0.0  ;;  %v451_v27 = vmul.f32 0.2, %v359_v18  ;;  %vm406_vm8 = vcmp.ge.f32.partialorder %v360_v19, 0.0 }
  0x4b   : > { %543 = vst.msk [vmem:[%s818_s25 + $0x118] sm:$0xff] %vm507_vm0, %v496_v26  ;;  %v452_v28 = vmul.f32 0.2, %v360_v19  ;;  %v361_v29 = vadd.f32 %v796_v9, %v308_v23  ;;  %v309_v30 = vmul.f32 %v700_v24, %v787_v0  ;;  %v703_v31 = vunpack.c.l.bf16 %v728_v20 }
  0x4c   : > { %v497_v32 = vsel %vm405_vm7, %v359_v18, %v451_v27  ;;  %v704_v33 = vunpack.c.h.bf16 %v728_v20  ;;  %v707_v34 = vunpack.c.l.bf16 %v729_v25  ;;  %v708_v35 = vunpack.c.h.bf16 %v729_v25 }
  0x4d   : > { %544 = vst.msk [vmem:[%s818_s25 + $0x120] sm:$0xff] %vm507_vm0, %v497_v32  ;;  %v498_v37 = vsel %vm406_vm8, %v360_v19, %v452_v28  ;;  %vm407_vm9 = vcmp.ge.f32.partialorder %v361_v29, 0.0  ;;  %v453_v38 = vmul.f32 0.2, %v361_v29  ;;  %v362_v39 = vadd.f32 %v796_v9, %v309_v30 }
  0x4e   : > { %545 = vst.msk [vmem:[%s818_s25 + $0x128] sm:$0xff] %vm507_vm0, %v498_v37  ;;  %v310_v40 = vmul.f32 %v703_v31, %v787_v0  ;;  %v311_v41 = vmul.f32 %v704_v33, %v787_v0  ;;  %v312_v42 = vmul.f32 %v707_v34, %v787_v0  ;;  %v313_v43 = vmul.f32 %v708_v35, %v787_v0 }
  0x4f   : > { %v499_v45 = vsel %vm407_vm9, %v361_v29, %v453_v38  ;;  %vm408_vm10 = vcmp.ge.f32.partialorder %v362_v39, 0.0  ;;  %v454_v46 = vmul.f32 0.2, %v362_v39  ;;  %v261_v47 = vunpack.c.l.bf16 %v215_v36 }
  0x50   : > { %546 = vst.msk [vmem:[%s818_s25 + $0x130] sm:$0xff] %vm507_vm0, %v499_v45  ;;  %v363_v48 = vadd.f32 %v796_v9, %v310_v40  ;;  %v364_v49 = vadd.f32 %v796_v9, %v311_v41  ;;  %v365_v50 = vadd.f32 %v796_v9, %v312_v42  ;;  %v366_v51 = vadd.f32 %v796_v9, %v313_v43 }
  0x51   : > { %v500_v52 = vsel %vm408_vm10, %v362_v39, %v454_v46  ;;  %v314_v53 = vmul.f32 %v787_v0, %v261_v47  ;;  %v262_v54 = vunpack.c.l.bf16 %v216_v44  ;;  %vm553_vm2 = vcmask 58368  }
  0x52   : > { %547 = vst.msk [vmem:[%s818_s25 + $0x138] sm:$0xff] %vm507_vm0, %v500_v52  ;;  %vm409_vm11 = vcmp.ge.f32.partialorder %v363_v48, 0.0  ;;  %v455_v55 = vmul.f32 0.2, %v363_v48  ;;  %vm410_vm12 = vcmp.ge.f32.partialorder %v364_v49, 0.0  ;;  %vm411_vm13 = vcmp.ge.f32.partialorder %v365_v50, 0.0 }
  0x53   : > { %v456_v56 = vmul.f32 0.2, %v364_v49  ;;  %v457_v57 = vmul.f32 0.2, %v365_v50  ;;  %vm412_vm14 = vcmp.ge.f32.partialorder %v366_v51, 0.0  ;;  %v367_v61 = vadd.f32 %v796_v9, %v314_v53 }
  0x54   : > { %v458_v58 = vmul.f32 0.2, %v366_v51  ;;  %v501_v59 = vsel %vm409_vm11, %v363_v48, %v455_v55  ;;  %v315_v62 = vmul.f32 %v787_v0, %v262_v54 }
  0x55   : > { %v502_v60 = vsel %vm410_vm12, %v364_v49, %v456_v56  ;;  %548 = vst.msk [vmem:[%s818_s25 + $0x140] sm:$0xff] %vm507_vm0, %v501_v59  ;;  %v503_v63 = vsel %vm411_vm13, %v365_v50, %v457_v57  ;;  %vm413_vm15 = vcmp.ge.f32.partialorder %v367_v61, 0.0  ;;  %v459_v2 = vmul.f32 0.2, %v367_v61 }
  0x56   : > { %549 = vst.msk [vmem:[%s818_s25 + $0x148] sm:$0xff] %vm507_vm0, %v502_v60  ;;  %v504_v1 = vsel %vm412_vm14, %v366_v51, %v458_v58  ;;  %550 = vst.msk [vmem:[%s818_s25 + $0x150] sm:$0xff] %vm507_vm0, %v503_v63  ;;  %v368_v3 = vadd.f32 %v796_v9, %v315_v62 }
  0x57   : > { %551 = vst.msk [vmem:[%s818_s25 + $0x158] sm:$0xff] %vm507_vm0, %v504_v1  ;;  %v505_v4 = vsel %vm413_vm15, %v367_v61, %v459_v2 }
  0x58   : > { %vm414_vm1 = vcmp.ge.f32.partialorder %v368_v3, 0.0  ;;  %v460_v5 = vmul.f32 0.2, %v368_v3  ;;  %552 = vst.msk [vmem:[%s818_s25 + $0x160] sm:$0xff] %vm507_vm0, %v505_v4 }
  0x5a   : > { %v506_v0 = vsel %vm414_vm1, %v368_v3, %v460_v5 }
  0x5b   : > { %554 = vst.msk [vmem:[%s818_s25 + $0x168] sm:$0x3] %vm553_vm2, %v506_v0 }
  0x5c PF: > { %s13_s12 = sadd.s32 1, %s746_s12  }
  0x5d   : > { %p10_p4 = scmp.ge.s32.totalorder %s13_s12, 4  }
  0x5f   :  { %12 = sbr.rel (!%p10_p4) target bundleno = 1 (0x1), region = 62 }

// kernel: double_cv.3
= control target key start
LH: loop header
LB: loop body
LE: loop exit
PB: predicated region body
PF: predicated region fallthrough
CT: control target
= control target key end

     0   :  { %s6780_s18 = smov 0   ;;  %s8752_s0 = inlined_call_operand.vmem [shape: bf16[2,362,4], index: 0, kind: input, shape index: {}]   ;;  %s8753_s1 = inlined_call_operand.vmem [shape: bf16[9,4,8], index: 1, kind: input, shape index: {}]   ;;  %s8754_s2 = inlined_call_operand.vmem [shape: f32[362,1], index: 2, kind: input, shape index: {}]   ;;  %s8755_s3 = inlined_call_operand.vmem [shape: bf16[2,362,8], index: 3, kind: output, shape index: {0}]   ;;  %s8756_s4 = inlined_call_operand.vmem [shape: f32[2,1,8], index: 4, kind: output, shape index: {1}]   ;;  %s8757_s5 = inlined_call_operand.vmem [shape: f32[2,1,8], index: 5, kind: output, shape index: {2}]  }
   0x1 LB: > { %s4764_s19 = sadd.s32 4294967295, %s6745_s18   ;;  %p4768_p0 = scmp.ge.s32.totalorder %s6745_s18, 1  ;;  %s6745_s18 = sphi %s6780_s18, %s16_s18  }
   0x2   : > { %p192_p1 = scmp.lt.s32.totalorder %s6745_s18, 3 }
   0x4   : > { %p193_p2 = pnand %p4768_p0, %p192_p1 }
   0x6   : > { %196 = sbr.rel (%p193_p2) target bundleno = 1017 (0x3f9), region = 32 }
   0xd   : > { %vm668_vm0 = vcmask 1041408   ;;  %v4881_v0 = vld [vmem:[%s8753_s1 + $0x8] sm:$0x3]  ;;  %v4771_v1 = vld [vmem:[%s8753_s1 + $0x2] sm:$0x3]  ;;  %v6747_v2 = vmov 0.0  }
   0xe   : > { %5620 = vmatprep.subr.bf16.mxu0 %v6747_v2  ;;  %5276 = vmatprep.subr.bf16.mxu1 %v6747_v2  ;;  %v6797_v3 = vsel %vm668_vm0, %v4881_v0, 0  ;;  %v670_v4 = vsel %vm668_vm0, %v4771_v1, 0  ;;  %p226_p3 = scmp.lt.s32.totalorder %s4764_s19, 1  ;;  %vm6748_vm1 = vmmov 0   ;;  %vm436_vm2 = vsmask.f32 7424 }
   0xf   : > { %8795 = vst [vmem:[#allocation2_spill] sm:$0xff] %v6797_v3  ;;  %5621 = vmatpush3.bf16.msra.mxu0 %v6797_v3  ;;  %5277 = vmatpush3.bf16.msra.mxu1 %v670_v4  ;;  %vm1735_vm3 = vsmask.f32 6400  ;;  %v4903_v14 = vld [vmem:[%s8753_s1 + $0xa] sm:$0x3]  ;;  %vm604_vm4 = vcmask 31744  }
  0x10   : > { %5278 = vmatprep.mubr.msk.bf16.mxu1 %vm6748_vm1, %v6747_v2  ;;  %5622 = vmatprep.mubr.msk.bf16.mxu0 %vm6748_vm1, %v6747_v2  ;;  %s8842_s19 = smov (!%p226_p3, %s4764_s19), 1  ;;  %v330_v20 = vld [vmem:[%s8753_s1] sm:$0x3]  ;;  %v2244_v31 = vsel %vm668_vm0, %v4903_v14, 0  ;;  %vm2138_vm5 = vcmask 1045504   ;;  %vm1119_vm6 = vcmask 1046528  }
  0x11   : > { %5706 = vmatprep.subr.bf16.mxu0 %v6747_v2  ;;  %5362 = vmatprep.subr.bf16.mxu1 %v6747_v2  ;;  %s6681_s24 = smul.u32 184, %s8842_s19  ;;  %v915_v34 = vsel %vm668_vm0, %v330_v20, 0  ;;  %vm2757_vm7 = vsmask.f32 5376  ;;  %s238_s20 = scalar_lea.vmem %s8756_s4, %s8842_s19 }
  0x12   : > { %s241_s23 = scalar_lea.vmem %s8757_s5, %s8842_s19 }
  0x13   : > { %s6815_s27 = scalar_lea.vmem %s8752_s0, %s6681_s24  ;;  %s8190_s17 = scalar_lea.vmem %s8755_s3, %s6681_s24 }
  0x14   : > { %v6818_v5 = vld [vmem:[%s6815_s27] sm:$0xff]   ;;  %v6821_v6 = vld [vmem:[%s6815_s27 + $0x8] sm:$0xff]   ;;  %v6824_v7 = vld [vmem:[%s6815_s27 + $0x10] sm:$0xff]  }
  0x15   : > { %v438_v8 = vshrl.u32 %v6818_v5, 16  ;;  %v440_v9 = vshll.u32 %v6818_v5, 16  ;;  %v445_v10 = vshll.u32 %v6821_v6, 16  ;;  %v449_v11 = vshrl.u32 %v6821_v6, 16  ;;  %v6840_v15 = vld [vmem:[%s6815_s27 + $0x18] sm:$0xff]   ;;  %v6854_v27 = vld [vmem:[%s6815_s27 + $0x20] sm:$0xff]  }
  0x16   : > { %v6831_v12 = vshll.u32 %v6824_v7, 16  ;;  %v6834_v13 = vshrl.u32 %v6824_v7, 16  ;;  %v6848_v23 = vshll.u32 %v6840_v15, 16  ;;  %v6851_v26 = vshrl.u32 %v6840_v15, 16  ;;  %v6881_v43 = vld [vmem:[%s6815_s27 + $0x28] sm:$0xff]   ;;  %v6900_v51 = vld [vmem:[%s6815_s27 + $0x30] sm:$0xff]  }
  0x17   : > { %v442_v16 = vrot.slane %v440_v9, 1  ;;  %v447_v17 = vrot.slane %v445_v10, 1  ;;  %v1736_v18 = vrot.slane %v449_v11, 1  ;;  %v1737_v19 = vrot.slane %v445_v10, 2  ;;  %v6924_v0 = vld [vmem:[%s6815_s27 + $0x38] sm:$0xff]  }
  0x18   : > { %v1739_v21 = vrot.slane %v6834_v13, 1  ;;  %v1740_v22 = vrot.slane %v6831_v12, 2  ;;  %v1744_v29 = vrot.slane %v6848_v23, 2  ;;  %v1743_v32 = vrot.slane %v6851_v26, 1 }
  0x19   : > { %v443_v24 = vor.u32 %v442_v16, %v438_v8  ;;  %v1738_v25 = vor.u32 %v1737_v19, %v1736_v18  ;;  %v451_v35 = vor.u32 %v449_v11, %v447_v17  ;;  %v455_v36 = vrot.slane %v6831_v12, 1  ;;  %v6945_v18 = vld [vmem:[%s6815_s27 + $0x40] sm:$0xff]  }
  0x1a   : > { %v1741_v28 = vor.u32 %v1740_v22, %v1739_v21  ;;  %v6868_v37 = vshll.u32 %v6854_v27, 16  ;;  %v6871_v38 = vshrl.u32 %v6854_v27, 16  ;;  %v1745_v39 = vor.u32 %v1744_v29, %v1743_v32 }
  0x1b   : > { %v448_v30 = vsel %vm436_vm2, %v443_v24, %v447_v17  ;;  %v456_v40 = vsel %vm436_vm2, %v451_v35, %v455_v36  ;;  %v459_v45 = vor.u32 %v6834_v13, %v455_v36  ;;  %v463_v46 = vrot.slane %v6848_v23, 1 }
  0x1c   : > { %5279 = vmatmul.mubr.msk.bf16.vlgmr.msra.gmra.mrb[0].mxu1 %vm604_vm4, %v448_v30  ;;  %v1742_v33 = vsel %vm1735_vm3, %v1738_v25, %v1741_v28  ;;  %v1747_v41 = vrot.slane %v6871_v38, 1  ;;  %v1748_v42 = vrot.slane %v6868_v37, 2  ;;  %v1746_v44 = vsel %vm1735_vm3, %v1741_v28, %v1745_v39 }
  0x1d   : > { %5623 = vmatmul.mubr.msk.bf16.vlgmr.msra.gmra.mrb[0].mxu0 %vm604_vm4, %v1742_v33  ;;  %5282 = vmatprep.mubr.msk.bf16.mxu1 %vm6748_vm1, %v6747_v2  ;;  %v6893_v48 = vshll.u32 %v6881_v43, 16  ;;  %v6896_v49 = vshrl.u32 %v6881_v43, 16  ;;  %v464_v50 = vsel %vm436_vm2, %v459_v45, %v463_v46  ;;  %v467_v55 = vor.u32 %v6851_v26, %v463_v46 }
  0x1e   : > { %5707 = vmatpush3.bf16.msra.mxu0 %v2244_v31  ;;  %5626 = vmatprep.mubr.msk.bf16.mxu0 %vm6748_vm1, %v6747_v2  ;;  %v1749_v47 = vor.u32 %v1748_v42, %v1747_v41  ;;  %v471_v56 = vrot.slane %v6868_v37, 1  ;;  %v6914_v58 = vshll.u32 %v6900_v51, 16  ;;  %v6917_v59 = vshrl.u32 %v6900_v51, 16  ;;  %v6966_v31 = vld [vmem:[%s6815_s27 + $0x48] sm:$0xff]  }
  0x1f   : > { %5363 = vmatpush3.bf16.msra.mxu1 %v915_v34  ;;  %5792 = vmatprep.subr.bf16.mxu0 %v6747_v2  ;;  %v1751_v53 = vrot.slane %v6896_v49, 1  ;;  %v1752_v54 = vrot.slane %v6893_v48, 2  ;;  %v479_v4 = vrot.slane %v6893_v48, 1  ;;  %v6935_v9 = vshll.u32 %v6924_v0, 16 }
  0x20   : > { %5448 = vmatprep.subr.bf16.mxu1 %v6747_v2  ;;  %v1750_v52 = vsel %vm1735_vm3, %v1745_v39, %v1749_v47  ;;  %v472_v60 = vsel %vm436_vm2, %v467_v55, %v471_v56  ;;  %v1755_v62 = vrot.slane %v6917_v59, 1  ;;  %v1756_v63 = vrot.slane %v6914_v58, 2 }
  0x21   : > { %v1753_v57 = vor.u32 %v1752_v54, %v1751_v53  ;;  %v475_v1 = vor.u32 %v6871_v38, %v471_v56  ;;  %v6938_v10 = vshrl.u32 %v6924_v0, 16  ;;  %v1760_v17 = vrot.slane %v6935_v9, 2 }
  0x22   : > { %v1757_v8 = vor.u32 %v1756_v63, %v1755_v62  ;;  %v483_v19 = vor.u32 %v6896_v49, %v479_v4  ;;  %v487_v20 = vrot.slane %v6914_v58, 1  ;;  %v6956_v22 = vshll.u32 %v6945_v18, 16 }
  0x23   : > { %v1754_v61 = vsel %vm1735_vm3, %v1749_v47, %v1753_v57  ;;  %v480_v11 = vsel %vm436_vm2, %v475_v1, %v479_v4  ;;  %v1759_v16 = vrot.slane %v6938_v10, 1  ;;  %v6959_v24 = vshrl.u32 %v6945_v18, 16 }
  0x24   : > { %5283 = vmatmul.mubr.msk.bf16.gmra.mrb[4].mxu1 %vm604_vm4, %v456_v40  ;;  %v1758_v14 = vsel %vm1735_vm3, %v1753_v57, %v1757_v8  ;;  %v488_v25 = vsel %vm436_vm2, %v483_v19, %v487_v20  ;;  %v1764_v30 = vrot.slane %v6956_v22, 2  ;;  %v491_v32 = vor.u32 %v6917_v59, %v487_v20  ;;  %v7008_v57 = vld [vmem:[%s6815_s27 + $0x58] sm:$0xff]  }
  0x25   : > { %5627 = vmatmul.mubr.msk.bf16.gmra.mrb[4].mxu0 %vm604_vm4, %v1746_v44  ;;  %5286 = vmatprep.mubr.msk.bf16.mxu1 %vm6748_vm1, %v6747_v2  ;;  %v1761_v21 = vor.u32 %v1760_v17, %v1759_v16  ;;  %v1763_v29 = vrot.slane %v6959_v24, 1  ;;  %v495_v33 = vrot.slane %v6935_v9, 1  ;;  %v6977_v35 = vshll.u32 %v6966_v31, 16  ;;  %v6987_v44 = vld [vmem:[%s6815_s27 + $0x50] sm:$0xff]   ;;  %v7029_v16 = vld [vmem:[%s6815_s27 + $0x60] sm:$0xff]  }
  0x26   : > { %5630 = vmatprep.mubr.msk.bf16.mxu0 %vm6748_vm1, %v6747_v2  ;;  %v6980_v36 = vshrl.u32 %v6966_v31, 16  ;;  %v503_v46 = vrot.slane %v6956_v22, 1  ;;  %v7019_v63 = vshll.u32 %v7008_v57, 16  ;;  %v7022_v1 = vshrl.u32 %v7008_v57, 16 }
  0x27   : > { %v1762_v28 = vsel %vm1735_vm3, %v1757_v8, %v1761_v21  ;;  %v1765_v34 = vor.u32 %v1764_v30, %v1763_v29  ;;  %v496_v39 = vsel %vm436_vm2, %v491_v32, %v495_v33  ;;  %v1768_v42 = vrot.slane %v6977_v35, 2 }
  0x28   : > { %v1767_v41 = vrot.slane %v6980_v36, 1  ;;  %v499_v45 = vor.u32 %v6938_v10, %v495_v33  ;;  %8796 = vst [vmem:[#allocation3_spill] sm:$0xff] %v7019_v63 }
  0x29   : > { %v1766_v40 = vsel %vm1735_vm3, %v1761_v21, %v1765_v34  ;;  %v7040_v21 = vshll.u32 %v7029_v16, 16 }
  0x2a   : > { %v1769_v47 = vor.u32 %v1768_v42, %v1767_v41  ;;  %v504_v53 = vsel %vm436_vm2, %v499_v45, %v503_v46 }
  0x2b   : > { %8797 = vst [vmem:[#allocation4_spill] sm:$0xff] %v7040_v21  ;;  %v1780_v32 = vrot.slane %v7040_v21, 2  ;;  %v535_v45 = vrot.slane %v7040_v21, 1  ;;  %v284_v21 = vld [vmem:[%s6815_s27 + $0xa4] sm:$0xf] }
  0x2c   : > { %5287 = vmatmul.mubr.msk.bf16.gmra.mrb[8].mxu1 %vm604_vm4, %v464_v50  ;;  %v6998_v50 = vshll.u32 %v6987_v44, 16  ;;  %v1770_v54 = vsel %vm1735_vm3, %v1765_v34, %v1769_v47  ;;  %v527_v34 = vrot.slane %v7019_v63, 1 }
  0x2d   : > { %5631 = vmatmul.mubr.msk.bf16.gmra.mrb[8].mxu0 %vm604_vm4, %v1750_v52  ;;  %5290 = vmatprep.mubr.msk.bf16.mxu1 %vm6748_vm1, %v6747_v2  ;;  %v7001_v52 = vshrl.u32 %v6987_v44, 16 }
  0x2e   : > { %5634 = vmatprep.mubr.msk.bf16.mxu0 %vm6748_vm1, %v6747_v2  ;;  %v1772_v56 = vrot.slane %v6998_v50, 2  ;;  %v519_v19 = vrot.slane %v6998_v50, 1  ;;  %v531_v42 = vor.u32 %v7022_v1, %v527_v34 }
  0x2f   : > { %v1771_v55 = vrot.slane %v7001_v52, 1 }
  0x30   : > { %v523_v33 = vor.u32 %v7001_v52, %v519_v19 }
  0x31   : > { %v1773_v62 = vor.u32 %v1772_v56, %v1771_v55  ;;  %v536_v55 = vsel %vm436_vm2, %v531_v42, %v535_v45 }
  0x33   : > { %v1774_v8 = vsel %vm1735_vm3, %v1769_v47, %v1773_v62  ;;  %v2139_v47 = vrot.slane %v6821_v6, 2 }
  0x34   : > { %5291 = vmatmul.mubr.msk.bf16.gmra.mrb[12].mxu1 %vm604_vm4, %v472_v60  ;;  %v507_v60 = vor.u32 %v6959_v24, %v503_v46  ;;  %v7069_v46 = vld [vmem:[%s6815_s27 + $0x68] sm:$0xff]  }
  0x35   : > { %5635 = vmatmul.mubr.msk.bf16.gmra.mrb[12].mxu0 %vm604_vm4, %v1754_v61  ;;  %5294 = vmatprep.mubr.msk.bf16.mxu1 %vm6748_vm1, %v6747_v2  ;;  %v511_v61 = vrot.slane %v6977_v35, 1  ;;  %v7080_v56 = vshll.u32 %v7069_v46, 16 }
  0x36   : > { %5638 = vmatprep.mubr.msk.bf16.mxu0 %vm6748_vm1, %v6747_v2 }
  0x37   : > { %v512_v4 = vsel %vm436_vm2, %v507_v60, %v511_v61  ;;  %v515_v17 = vor.u32 %v6980_v36, %v511_v61  ;;  %8800 = vst [vmem:[#allocation7_spill] sm:$0xff] %v7080_v56 }
  0x3c   : > { %5295 = vmatmul.mubr.msk.bf16.gmra.mrb[16].mxu1 %vm604_vm4, %v480_v11  ;;  %v1775_v11 = vrot.slane %v7022_v1, 1 }
  0x3d   : > { %5639 = vmatmul.mubr.msk.bf16.gmra.mrb[16].mxu0 %vm604_vm4, %v1758_v14  ;;  %5298 = vmatprep.mubr.msk.bf16.mxu1 %vm6748_vm1, %v6747_v2  ;;  %v1776_v14 = vrot.slane %v7019_v63, 2 }
  0x3e   : > { %5642 = vmatprep.mubr.msk.bf16.mxu0 %vm6748_vm1, %v6747_v2 }
  0x3f   : > { %v1777_v20 = vor.u32 %v1776_v14, %v1775_v11  ;;  %v2142_v11 = vrot.slane %v6840_v15, 2 }
  0x41   : > { %v1778_v29 = vsel %vm1735_vm3, %v1773_v62, %v1777_v20 }
  0x44   : > { %5299 = vmatmul.mubr.msk.bf16.gmra.mrb[20].mxu1 %vm604_vm4, %v488_v25  ;;  %v7043_v25 = vshrl.u32 %v7029_v16, 16 }
  0x45   : > { %5643 = vmatmul.mubr.msk.bf16.gmra.mrb[20].mxu0 %vm604_vm4, %v1762_v28  ;;  %5302 = vmatprep.mubr.msk.bf16.mxu1 %vm6748_vm1, %v6747_v2  ;;  %v520_v28 = vsel %vm436_vm2, %v515_v17, %v519_v19  ;;  %v7099_v17 = vshrl.u32 %v7069_v46, 16 }
  0x46   : > { %5646 = vmatprep.mubr.msk.bf16.mxu0 %vm6748_vm1, %v6747_v2  ;;  %8798 = vst [vmem:[#allocation5_spill] sm:$0xff] %v7043_v25  ;;  %v1779_v30 = vrot.slane %v7043_v25, 1  ;;  %v539_v62 = vor.u32 %v7043_v25, %v535_v45 }
  0x47   : > { %8801 = vst [vmem:[#allocation8_spill] sm:$0xff] %v7099_v17 }
  0x4c   : > { %5303 = vmatmul.mubr.msk.bf16.gmra.mrb[24].mxu1 %vm604_vm4, %v496_v39  ;;  %v7057_v39 = vor.u32 %v1780_v32, %v1779_v30  ;;  %v7115_v30 = vld [vmem:[%s6815_s27 + $0x78] sm:$0xff]   ;;  %v2144_v32 = vrot.slane %v6854_v27, 2 }
  0x4d   : > { %5647 = vmatmul.mubr.msk.bf16.gmra.mrb[24].mxu0 %vm604_vm4, %v1766_v40  ;;  %5306 = vmatprep.mubr.msk.bf16.mxu1 %vm6748_vm1, %v6747_v2  ;;  %v528_v40 = vsel %vm436_vm2, %v523_v33, %v527_v34 }
  0x4e   : > { %5650 = vmatprep.mubr.msk.bf16.mxu0 %vm6748_vm1, %v6747_v2  ;;  %8799 = vst [vmem:[#allocation6_spill] sm:$0xff] %v7057_v39  ;;  %v1782_v41 = vsel %vm1735_vm3, %v1777_v20, %v7057_v39 }
  0x54   : > { %5307 = vmatmul.mubr.msk.bf16.gmra.mrb[28].mxu1 %vm604_vm4, %v504_v53  ;;  %v2140_v53 = vrot.slane %v6824_v7, 2 }
  0x55   : > { %5651 = vmatmul.mubr.msk.bf16.gmra.mrb[28].mxu0 %vm604_vm4, %v1770_v54  ;;  %5310 = vmatprep.mubr.msk.bf16.mxu1 %vm6748_vm1, %v6747_v2  ;;  %v4925_v54 = vld [vmem:[%s8753_s1 + $0xc] sm:$0x3] }
  0x56   : > { %5654 = vmatprep.mubr.msk.bf16.mxu0 %vm6748_vm1, %v6747_v2  ;;  %v2141_v60 = vsel %vm2138_vm5, %v2139_v47, %v2140_v53  ;;  %v2509_v61 = vsel %vm668_vm0, %v4925_v54, 0  ;;  %v7105_v20 = vsel %vm2138_vm5, %v2140_v53, %v2142_v11  ;;  %v7138_v47 = vld [vmem:[%s6815_s27 + $0x80] sm:$0xff]   ;;  %v2146_v53 = vrot.slane %v6881_v43, 2 }
  0x5c   : > { %5311 = vmatmul.mubr.msk.bf16.gmra.mrb[32].mxu1 %vm604_vm4, %v512_v4  ;;  %v543_v4 = vrot.slane %v7080_v56, 1 }
  0x5d   : > { %5655 = vmatmul.mubr.msk.bf16.gmra.mrb[32].mxu0 %vm604_vm4, %v1774_v8  ;;  %5314 = vmatprep.mubr.msk.bf16.mxu1 %vm6748_vm1, %v6747_v2  ;;  %v7091_v8 = vld [vmem:[%s6815_s27 + $0x70] sm:$0xff]  }
  0x5e   : > { %5658 = vmatprep.mubr.msk.bf16.mxu0 %vm6748_vm1, %v6747_v2  ;;  %v544_v14 = vsel %vm436_vm2, %v539_v62, %v543_v4  ;;  %v7102_v19 = vshll.u32 %v7091_v8, 16  ;;  %v7122_v34 = vshrl.u32 %v7091_v8, 16 }
  0x60   : > { %8802 = vst [vmem:[#allocation9_spill] sm:$0xff] %v7102_v19  ;;  %8803 = vst [vmem:[#allocation10_spill] sm:$0xff] %v7122_v34 }
  0x64   : > { %5315 = vmatmul.mubr.msk.bf16.gmra.mrb[36].mxu1 %vm604_vm4, %v520_v28  ;;  %v547_v28 = vor.u32 %v7099_v17, %v543_v4 }
  0x65   : > { %5659 = vmatmul.mubr.msk.bf16.gmra.mrb[36].mxu0 %vm604_vm4, %v1778_v29  ;;  %5318 = vmatprep.mubr.msk.bf16.mxu1 %vm6748_vm1, %v6747_v2  ;;  %v551_v29 = vrot.slane %v7102_v19, 1 }
  0x66   : > { %5662 = vmatprep.mubr.msk.bf16.mxu0 %vm6748_vm1, %v6747_v2 }
  0x67   : > { %v552_v33 = vsel %vm436_vm2, %v547_v28, %v551_v29  ;;  %v555_v42 = vor.u32 %v7122_v34, %v551_v29  ;;  %v7168_v29 = vshrl.u32 %v7138_v47, 16 }
  0x69   : > { %8807 = vst [vmem:[#allocation14_spill] sm:$0xff] %v7168_v29 }
  0x6c   : > { %5319 = vmatmul.mubr.msk.bf16.gmra.mrb[40].mxu1 %vm604_vm4, %v528_v40  ;;  %v7125_v40 = vshll.u32 %v7115_v30, 16 }
  0x6d   : > { %5663 = vmatmul.mubr.msk.bf16.gmra.mrb[40].mxu0 %vm604_vm4, %v1782_v41  ;;  %5322 = vmatprep.mubr.msk.bf16.mxu1 %vm6748_vm1, %v6747_v2  ;;  %v7128_v41 = vsel %vm2138_vm5, %v2142_v11, %v2144_v32  ;;  %v7161_v11 = vld [vmem:[%s6815_s27 + $0x88] sm:$0xff]  }
  0x6e   : > { %5708 = vmatprep.mubr.msk.bf16.mxu0 %vm6748_vm1, %v6747_v2  ;;  %8804 = vst [vmem:[#allocation11_spill] sm:$0xff] %v7125_v40  ;;  %v559_v45 = vrot.slane %v7125_v40, 1 }
  0x70   : > { %v560_v54 = vsel %vm436_vm2, %v555_v42, %v559_v45 }
  0x74   : > { %5323 = vmatmul.mubr.msk.bf16.gmra.mrb[44].mxu1 %vm604_vm4, %v536_v55  ;;  %v7145_v55 = vshrl.u32 %v7115_v30, 16 }
  0x75   : > { %5709 = vmatmul.mubr.msk.bf16.vlgmr.msra.gmra.mrb[0].mxu0 %vm604_vm4, %v2141_v60  ;;  %5326 = vmatprep.mubr.msk.bf16.mxu1 %vm6748_vm1, %v6747_v2  ;;  %v7148_v60 = vshll.u32 %v7138_v47, 16 }
  0x76   : > { %5793 = vmatpush3.bf16.msra.mxu0 %v2509_v61  ;;  %5712 = vmatprep.mubr.msk.bf16.mxu0 %vm6748_vm1, %v6747_v2  ;;  %8805 = vst [vmem:[#allocation12_spill] sm:$0xff] %v7145_v55  ;;  %v7151_v61 = vsel %vm2138_vm5, %v2144_v32, %v2146_v53  ;;  %v563_v62 = vor.u32 %v7145_v55, %v559_v45  ;;  %v7171_v32 = vshll.u32 %v7161_v11, 16 }
  0x77   : > { %5878 = vmatprep.subr.bf16.mxu0 %v6747_v2  ;;  %8806 = vst [vmem:[#allocation13_spill] sm:$0xff] %v7148_v60  ;;  %v567_v4 = vrot.slane %v7148_v60, 1  ;;  %v7207_v60 = vld [vmem:[%s6815_s27 + $0x98] sm:$0xff]  }
  0x78   : > { %8808 = vst [vmem:[#allocation15_spill] sm:$0xff] %v7171_v32  ;;  %v575_v45 = vrot.slane %v7171_v32, 1  ;;  %v7217_v40 = vshll.u32 %v7207_v60, 16  ;;  %v7241_v3 = vshrl.u32 %v7207_v60, 16 }
  0x79   : > { %v568_v28 = vsel %vm436_vm2, %v563_v62, %v567_v4  ;;  %v571_v42 = vor.u32 %v7168_v29, %v567_v4 }
  0x7a   : > { %8812 = vst [vmem:[#allocation19_spill] sm:$0xff] %v7217_v40  ;;  %8813 = vst [vmem:[#allocation20_spill] sm:$0xff] %v7241_v3 }
  0x7b   : > { %v576_v62 = vsel %vm436_vm2, %v571_v42, %v575_v45 }
  0x7c   : > { %5327 = vmatmul.mubr.msk.bf16.gmra.mrb[48].mxu1 %vm604_vm4, %v544_v14  ;;  %v2148_v14 = vrot.slane %v6900_v51, 2 }
  0x7d   : > { %5713 = vmatmul.mubr.msk.bf16.gmra.mrb[4].mxu0 %vm604_vm4, %v7105_v20  ;;  %5330 = vmatprep.mubr.msk.bf16.mxu1 %vm6748_vm1, %v6747_v2 }
  0x7e   : > { %5716 = vmatprep.mubr.msk.bf16.mxu0 %vm6748_vm1, %v6747_v2 }
  0x84   : > { %5331 = vmatmul.mubr.msk.bf16.gmra.mrb[52].mxu1 %vm604_vm4, %v552_v33  ;;  %v7174_v33 = vsel %vm2138_vm5, %v2146_v53, %v2148_v14  ;;  %v2150_v53 = vrot.slane %v6924_v0, 2 }
  0x85   : > { %5717 = vmatmul.mubr.msk.bf16.gmra.mrb[8].mxu0 %vm604_vm4, %v7128_v41  ;;  %5334 = vmatprep.mubr.msk.bf16.mxu1 %vm6748_vm1, %v6747_v2 }
  0x86   : > { %5720 = vmatprep.mubr.msk.bf16.mxu0 %vm6748_vm1, %v6747_v2  ;;  %v7197_v4 = vsel %vm2138_vm5, %v2148_v14, %v2150_v53  ;;  %v2152_v14 = vrot.slane %v6945_v18, 2 }
  0x88   : > { %v7220_v55 = vsel %vm2138_vm5, %v2150_v53, %v2152_v14  ;;  %v2154_v53 = vrot.slane %v6966_v31, 2 }
  0x8c   : > { %5335 = vmatmul.mubr.msk.bf16.gmra.mrb[56].mxu1 %vm604_vm4, %v560_v54  ;;  %v7184_v54 = vld [vmem:[%s6815_s27 + $0x90] sm:$0xff]  }
  0x8d   : > { %5721 = vmatmul.mubr.msk.bf16.gmra.mrb[12].mxu0 %vm604_vm4, %v7151_v61  ;;  %5338 = vmatprep.mubr.msk.bf16.mxu1 %vm6748_vm1, %v6747_v2  ;;  %v7194_v39 = vshll.u32 %v7184_v54, 16 }
  0x8e   : > { %5724 = vmatprep.mubr.msk.bf16.mxu0 %vm6748_vm1, %v6747_v2 }
  0x8f   : > { %8810 = vst [vmem:[#allocation17_spill] sm:$0xff] %v7194_v39  ;;  %v583_v32 = vrot.slane %v7194_v39, 1  ;;  %v591_v39 = vrot.slane %v7217_v40, 1 }
  0x91   : > { %v595_v40 = vor.u32 %v7241_v3, %v591_v39 }
  0x94   : > { %5339 = vmatmul.mubr.msk.bf16.gmra.mrb[60].mxu1 %vm604_vm4, %v568_v28  ;;  %v7191_v28 = vshrl.u32 %v7161_v11, 16 }
  0x95   : > { %5725 = vmatmul.mubr.msk.bf16.gmra.mrb[16].mxu0 %vm604_vm4, %v7174_v33  ;;  %5342 = vmatprep.mubr.msk.bf16.mxu1 %vm6748_vm1, %v6747_v2 }
  0x96   : > { %5728 = vmatprep.mubr.msk.bf16.mxu0 %vm6748_vm1, %v6747_v2  ;;  %8809 = vst [vmem:[#allocation16_spill] sm:$0xff] %v7191_v28  ;;  %v579_v42 = vor.u32 %v7191_v28, %v575_v45  ;;  %v7223_v45 = vld [vmem:[%s6815_s27 + $0xa0] sm:$0xf] }
  0x97   : > { %v7234_v28 = vcombine.low %v7223_v45, %v7223_v45  ;;  %v7371_v25 = vcombine.low %v7223_v45, %v284_v21  ;;  %v7388_v21 = vld [vmem:[%s6815_s27 + $0xa8] sm:$0xf] }
  0x98   : > { %v584_v29 = vsel %vm436_vm2, %v579_v42, %v583_v32 }
  0x99   : > { %v597_v19 = vshll.u32 %v7234_v28, 16  ;;  %8814 = vst [vmem:[#allocation21_spill] sm:$0xff] %v7371_v25  ;;  %v7385_v63 = vrot.slane %v7371_v25, 2 }
  0x9c   : > { %5343 = vmatmul.mubr.msk.bf16.gmra.mrb[64].mxu1 %vm604_vm4, %v576_v62  ;;  %v7214_v62 = vshrl.u32 %v7184_v54, 16 }
  0x9d   : > { %5729 = vmatmul.mubr.msk.bf16.gmra.mrb[20].mxu0 %vm604_vm4, %v7197_v4  ;;  %5346 = vmatprep.mubr.msk.bf16.mxu1 %vm6748_vm1, %v6747_v2 }
  0x9e   : > { %5732 = vmatprep.mubr.msk.bf16.mxu0 %vm6748_vm1, %v6747_v2  ;;  %8811 = vst [vmem:[#allocation18_spill] sm:$0xff] %v7214_v62  ;;  %v587_v42 = vor.u32 %v7214_v62, %v583_v32  ;;  %v7245_v32 = vsel %vm2138_vm5, %v2152_v14, %v2154_v53  ;;  %v599_v62 = vrot.slane %v597_v19, 1 }
  0xa0   : > { %v600_v34 = vsel %vm436_vm2, %v595_v40, %v599_v62 }
  0xa4   : > { %5347 = vmatmul.mubr.msk.bf16.gmra.mrb[68].mxu1 %vm604_vm4, %v584_v29  ;;  %v592_v29 = vsel %vm436_vm2, %v587_v42, %v591_v39  ;;  %v2156_v42 = vrot.slane %v6987_v44, 2  ;;  %v2158_v39 = vrot.slane %v7008_v57, 2 }
  0xa5   : > { %5733 = vmatmul.mubr.msk.bf16.gmra.mrb[24].mxu0 %vm604_vm4, %v7220_v55  ;;  %5350 = vmatprep.mubr.msk.bf16.mxu1 %vm6748_vm1, %v6747_v2 }
  0xa6   : > { %5736 = vmatprep.mubr.msk.bf16.mxu0 %vm6748_vm1, %v6747_v2  ;;  %v7258_v14 = vsel %vm2138_vm5, %v2154_v53, %v2156_v42  ;;  %v7270_v40 = vsel %vm2138_vm5, %v2156_v42, %v2158_v39 }
  0xac   : > { %5351 = vmatmul.mubr.msk.bf16.gmra.mrb[72].mxu1 %vm604_vm4, %v592_v29  ;;  %v601_v29 = vshrl.u32 %v7234_v28, 16 }
  0xad   : > { %5737 = vmatmul.mubr.msk.bf16.gmra.mrb[28].mxu0 %vm604_vm4, %v7245_v32  ;;  %5354 = vmatprep.mubr.msk.bf16.mxu1 %vm6748_vm1, %v6747_v2 }
  0xae   : > { %5740 = vmatprep.mubr.msk.bf16.mxu0 %vm6748_vm1, %v6747_v2  ;;  %v603_v19 = vor.u32 %v601_v29, %v599_v62  ;;  %v4835_v62 = vld [vmem:[%s8753_s1 + $0x4] sm:$0x3]  ;;  %v2162_v29 = vrot.slane %v7069_v46, 2 }
  0xaf   : > { %v1225_v42 = vsel %vm668_vm0, %v4835_v62, 0 }
  0xb4   : > { %5355 = vmatmul.mubr.msk.bf16.gmra.mrb[76].mxu1 %vm604_vm4, %v600_v34  ;;  %v2160_v34 = vrot.slane %v7029_v16, 2 }
  0xb5   : > { %5741 = vmatmul.mubr.msk.bf16.gmra.mrb[32].mxu0 %vm604_vm4, %v7258_v14  ;;  %5358 = vmatprep.mubr.msk.bf16.mxu1 %vm6748_vm1, %v6747_v2 }
  0xb6   : > { %5744 = vmatprep.mubr.msk.bf16.mxu0 %vm6748_vm1, %v6747_v2  ;;  %v7284_v53 = vsel %vm2138_vm5, %v2158_v39, %v2160_v34  ;;  %v7298_v39 = vsel %vm2138_vm5, %v2160_v34, %v2162_v29  ;;  %v2166_v34 = vrot.slane %v7115_v30, 2 }
  0xbc   : > { %5359 = vmatmul.mubr.msk.bf16.gmra.mrb[80].mxu1 %vm604_vm4, %v603_v19  ;;  %v2164_v19 = vrot.slane %v7091_v8, 2 }
  0xbd   : > { %5745 = vmatmul.mubr.msk.bf16.gmra.mrb[36].mxu0 %vm604_vm4, %v7270_v40  ;;  %5364 = vmatprep.mubr.msk.bf16.mxu1 %vm6748_vm1, %v6747_v2 }
  0xbe   : > { %5748 = vmatprep.mubr.msk.bf16.mxu0 %vm6748_vm1, %v6747_v2  ;;  %v7310_v62 = vsel %vm2138_vm5, %v2162_v29, %v2164_v19  ;;  %v2168_v29 = vrot.slane %v7138_v47, 2 }
  0xc0   : > { %v7334_v3 = vsel %vm2138_vm5, %v2166_v34, %v2168_v29 }
  0xc4   : > { %5365 = vmatmul.mubr.msk.bf16.vlgmr.msra.gmra.mrb[0].mxu1 %vm604_vm4, %v6818_v5 }
  0xc5   : > { %5749 = vmatmul.mubr.msk.bf16.gmra.mrb[40].mxu0 %vm604_vm4, %v7284_v53  ;;  %5368 = vmatprep.mubr.msk.bf16.mxu1 %vm6748_vm1, %v6747_v2 }
  0xc6   : > { %5752 = vmatprep.mubr.msk.bf16.mxu0 %vm6748_vm1, %v6747_v2  ;;  %5449 = vmatpush3.bf16.msra.mxu1 %v1225_v42  ;;  %v7322_v42 = vsel %vm2138_vm5, %v2164_v19, %v2166_v34  ;;  %v2170_v19 = vrot.slane %v7161_v11, 2  ;;  %v2172_v34 = vrot.slane %v7184_v54, 2 }
  0xc7   : > { %5534 = vmatprep.subr.bf16.mxu1 %v6747_v2 }
  0xc8   : > { %v7346_v56 = vsel %vm2138_vm5, %v2168_v29, %v2170_v19  ;;  %v7358_v17 = vsel %vm2138_vm5, %v2170_v19, %v2172_v34  ;;  %v2174_v29 = vrot.slane %v7207_v60, 2 }
  0xca   : > { %v7374_v19 = vsel %vm2138_vm5, %v2172_v34, %v2174_v29  ;;  %v7392_v45 = vsel %vm2138_vm5, %v2174_v29, %v7385_v63  ;;  %v7396_v34 = vcombine.low %v7388_v21, %v7388_v21 }
  0xcc   : > { %5369 = vmatmul.mubr.msk.bf16.gmra.mrb[4].mxu1 %vm604_vm4, %v6821_v6  ;;  %8815 = vst [vmem:[#allocation22_spill] sm:$0xff] %v7396_v34  ;;  %v2178_v25 = vrot.slane %v7396_v34, 2 }
  0xcd   : > { %5753 = vmatmul.mubr.msk.bf16.gmra.mrb[44].mxu0 %vm604_vm4, %v7298_v39  ;;  %5372 = vmatprep.mubr.msk.bf16.mxu1 %vm6748_vm1, %v6747_v2 }
  0xce   : > { %5756 = vmatprep.mubr.msk.bf16.mxu0 %vm6748_vm1, %v6747_v2  ;;  %v2179_v29 = vsel %vm2138_vm5, %v7385_v63, %v2178_v25 }
  0xd4   : > { %5373 = vmatmul.mubr.msk.bf16.gmra.mrb[8].mxu1 %vm604_vm4, %v6824_v7 }
  0xd5   : > { %5757 = vmatmul.mubr.msk.bf16.gmra.mrb[48].mxu0 %vm604_vm4, %v7310_v62  ;;  %5376 = vmatprep.mubr.msk.bf16.mxu1 %vm6748_vm1, %v6747_v2 }
  0xd6   : > { %5760 = vmatprep.mubr.msk.bf16.mxu0 %vm6748_vm1, %v6747_v2 }
  0xdc   : > { %5377 = vmatmul.mubr.msk.bf16.gmra.mrb[12].mxu1 %vm604_vm4, %v6840_v15 }
  0xdd   : > { %5761 = vmatmul.mubr.msk.bf16.gmra.mrb[52].mxu0 %vm604_vm4, %v7322_v42  ;;  %5380 = vmatprep.mubr.msk.bf16.mxu1 %vm6748_vm1, %v6747_v2 }
  0xde   : > { %5764 = vmatprep.mubr.msk.bf16.mxu0 %vm6748_vm1, %v6747_v2 }
  0xe4   : > { %5381 = vmatmul.mubr.msk.bf16.gmra.mrb[16].mxu1 %vm604_vm4, %v6854_v27 }
  0xe5   : > { %5765 = vmatmul.mubr.msk.bf16.gmra.mrb[56].mxu0 %vm604_vm4, %v7334_v3  ;;  %5384 = vmatprep.mubr.msk.bf16.mxu1 %vm6748_vm1, %v6747_v2 }
  0xe6   : > { %5768 = vmatprep.mubr.msk.bf16.mxu0 %vm6748_vm1, %v6747_v2 }
  0xec   : > { %5385 = vmatmul.mubr.msk.bf16.gmra.mrb[20].mxu1 %vm604_vm4, %v6881_v43 }
  0xed   : > { %5769 = vmatmul.mubr.msk.bf16.gmra.mrb[60].mxu0 %vm604_vm4, %v7346_v56  ;;  %5388 = vmatprep.mubr.msk.bf16.mxu1 %vm6748_vm1, %v6747_v2 }
  0xee   : > { %5772 = vmatprep.mubr.msk.bf16.mxu0 %vm6748_vm1, %v6747_v2 }
  0xf4   : > { %5389 = vmatmul.mubr.msk.bf16.gmra.mrb[24].mxu1 %vm604_vm4, %v6900_v51 }
  0xf5   : > { %5773 = vmatmul.mubr.msk.bf16.gmra.mrb[64].mxu0 %vm604_vm4, %v7358_v17  ;;  %5392 = vmatprep.mubr.msk.bf16.mxu1 %vm6748_vm1, %v6747_v2 }
  0xf6   : > { %5776 = vmatprep.mubr.msk.bf16.mxu0 %vm6748_vm1, %v6747_v2 }
  0xfc   : > { %5393 = vmatmul.mubr.msk.bf16.gmra.mrb[28].mxu1 %vm604_vm4, %v6924_v0 }
  0xfd   : > { %5777 = vmatmul.mubr.msk.bf16.gmra.mrb[68].mxu0 %vm604_vm4, %v7374_v19  ;;  %5396 = vmatprep.mubr.msk.bf16.mxu1 %vm6748_vm1, %v6747_v2 }
  0xfe   : > { %5780 = vmatprep.mubr.msk.bf16.mxu0 %vm6748_vm1, %v6747_v2 }
 0x104   : > { %5397 = vmatmul.mubr.msk.bf16.gmra.mrb[32].mxu1 %vm604_vm4, %v6945_v18 }
 0x105   : > { %5781 = vmatmul.mubr.msk.bf16.gmra.mrb[72].mxu0 %vm604_vm4, %v7392_v45  ;;  %5400 = vmatprep.mubr.msk.bf16.mxu1 %vm6748_vm1, %v6747_v2 }
 0x106   : > { %5784 = vmatprep.mubr.msk.bf16.mxu0 %vm6748_vm1, %v6747_v2 }
 0x10c   : > { %5401 = vmatmul.mubr.msk.bf16.gmra.mrb[36].mxu1 %vm604_vm4, %v6966_v31 }
 0x10d   : > { %5785 = vmatmul.mubr.msk.bf16.gmra.mrb[76].mxu0 %vm604_vm4, %v2179_v29  ;;  %5404 = vmatprep.mubr.msk.bf16.mxu1 %vm6748_vm1, %v6747_v2  ;;  %v4949_v29 = vld [vmem:[%s8753_s1 + $0xe] sm:$0x3] }
 0x10e   : > { %5788 = vmatprep.mubr.msk.bf16.mxu0 %vm6748_vm1, %v6747_v2  ;;  %v2915_v34 = vsel %vm668_vm0, %v4949_v29, 0  ;;  %v2758_v29 = vrot.slane %v6834_v13, 2 }
 0x114   : > { %5405 = vmatmul.mubr.msk.bf16.gmra.mrb[40].mxu1 %vm604_vm4, %v6987_v44 }
 0x115   : > { %5789 = vmatmul.mubr.msk.bf16.gmra.mrb[80].mxu0 %vm604_vm4, %v2178_v25  ;;  %5408 = vmatprep.mubr.msk.bf16.mxu1 %vm6748_vm1, %v6747_v2  ;;  %v1120_v25 = vrot.slane %v6818_v5, 1  ;;  %v1123_v5 = vrot.slane %v6824_v7, 1  ;;  %v1125_v7 = vrot.slane %v6840_v15, 1 }
 0x116   : > { %5794 = vmatprep.mubr.msk.bf16.mxu0 %vm6748_vm1, %v6747_v2 }
 0x11c   : > { %5409 = vmatmul.mubr.msk.bf16.gmra.mrb[44].mxu1 %vm604_vm4, %v7008_v57 }
 0x11d   : > { %5795 = vmatmul.mubr.msk.bf16.vlgmr.msra.gmra.mrb[0].mxu0 %vm604_vm4, %v7105_v20  ;;  %5412 = vmatprep.mubr.msk.bf16.mxu1 %vm6748_vm1, %v6747_v2  ;;  %v1121_v20 = vrot.slane %v6821_v6, 1 }
 0x11e   : > { %5879 = vmatpush3.bf16.msra.mxu0 %v2915_v34  ;;  %5798 = vmatprep.mubr.msk.bf16.mxu0 %vm6748_vm1, %v6747_v2  ;;  %v1141_v34 = vrot.slane %v7008_v57, 1  ;;  %v1143_v57 = vrot.slane %v7029_v16, 1 }
 0x11f   : > { %5964 = vmatprep.subr.bf16.mxu0 %v6747_v2  ;;  %v7525_v6 = vsel %vm1119_vm6, %v1121_v20, %v1123_v5 }
 0x124   : > { %5413 = vmatmul.mubr.msk.bf16.gmra.mrb[48].mxu1 %vm604_vm4, %v7029_v16 }
 0x125   : > { %5799 = vmatmul.mubr.msk.bf16.gmra.mrb[4].mxu0 %vm604_vm4, %v7128_v41  ;;  %5416 = vmatprep.mubr.msk.bf16.mxu1 %vm6748_vm1, %v6747_v2  ;;  %v4857_v41 = vld [vmem:[%s8753_s1 + $0x6] sm:$0x3] }
 0x126   : > { %5802 = vmatprep.mubr.msk.bf16.mxu0 %vm6748_vm1, %v6747_v2 }
 0x12c   : > { %5417 = vmatmul.mubr.msk.bf16.gmra.mrb[52].mxu1 %vm604_vm4, %v7069_v46 }
 0x12d   : > { %5803 = vmatmul.mubr.msk.bf16.gmra.mrb[8].mxu0 %vm604_vm4, %v7151_v61  ;;  %5420 = vmatprep.mubr.msk.bf16.mxu1 %vm6748_vm1, %v6747_v2  ;;  %v1490_v61 = vsel %vm668_vm0, %v4857_v41, 0  ;;  %v2762_v41 = vrot.slane %v6848_v23, 3  ;;  %v7662_v23 = vsel %vm1119_vm6, %v1141_v34, %v1143_v57 }
 0x12e   : > { %5806 = vmatprep.mubr.msk.bf16.mxu0 %vm6748_vm1, %v6747_v2 }
 0x134   : > { %5421 = vmatmul.mubr.msk.bf16.gmra.mrb[56].mxu1 %vm604_vm4, %v7091_v8 }
 0x135   : > { %5807 = vmatmul.mubr.msk.bf16.gmra.mrb[12].mxu0 %vm604_vm4, %v7174_v33  ;;  %5424 = vmatprep.mubr.msk.bf16.mxu1 %vm6748_vm1, %v6747_v2  ;;  %v7537_v33 = vsel %vm1119_vm6, %v1123_v5, %v1125_v7  ;;  %v2766_v5 = vrot.slane %v6868_v37, 3 }
 0x136   : > { %5810 = vmatprep.mubr.msk.bf16.mxu0 %vm6748_vm1, %v6747_v2 }
 0x13c   : > { %5425 = vmatmul.mubr.msk.bf16.gmra.mrb[60].mxu1 %vm604_vm4, %v7115_v30 }
 0x13d   : > { %5811 = vmatmul.mubr.msk.bf16.gmra.mrb[16].mxu0 %vm604_vm4, %v7197_v4  ;;  %5428 = vmatprep.mubr.msk.bf16.mxu1 %vm6748_vm1, %v6747_v2  ;;  %v1127_v4 = vrot.slane %v6854_v27, 1 }
 0x13e   : > { %5814 = vmatprep.mubr.msk.bf16.mxu0 %vm6748_vm1, %v6747_v2 }
 0x13f   : > { %v7549_v15 = vsel %vm1119_vm6, %v1125_v7, %v1127_v4  ;;  %v1145_v7 = vrot.slane %v7069_v46, 1  ;;  %v1147_v46 = vrot.slane %v7091_v8, 1  ;;  %v1149_v8 = vrot.slane %v7115_v30, 1 }
 0x140   : > { %v1151_v30 = vrot.slane %v7138_v47, 1 }
 0x144   : > { %5429 = vmatmul.mubr.msk.bf16.gmra.mrb[64].mxu1 %vm604_vm4, %v7138_v47  ;;  %v1153_v47 = vrot.slane %v7161_v11, 1 }
 0x145   : > { %5815 = vmatmul.mubr.msk.bf16.gmra.mrb[20].mxu0 %vm604_vm4, %v7220_v55  ;;  %5432 = vmatprep.mubr.msk.bf16.mxu1 %vm6748_vm1, %v6747_v2  ;;  %v1122_v55 = vsel %vm1119_vm6, %v1120_v25, %v1121_v20  ;;  %v2759_v25 = vrot.slane %v6831_v12, 3  ;;  %v2761_v20 = vrot.slane %v6851_v26, 2  ;;  %v4972_v12 = vld [vmem:[%s8753_s1 + $0x10] sm:$0x3] }
 0x146   : > { %5818 = vmatprep.mubr.msk.bf16.mxu0 %vm6748_vm1, %v6747_v2  ;;  %v3266_v16 = vsel %vm668_vm0, %v4972_v12, 0 }
 0x147   : > { %v2760_v13 = vor.u32 %v2759_v25, %v2758_v29  ;;  %v2786_v29 = vrot.slane %v6977_v35, 3  ;;  %v2789_v35 = vrot.slane %v7001_v52, 2 }
 0x14c   : > { %5433 = vmatmul.mubr.msk.bf16.gmra.mrb[68].mxu1 %vm604_vm4, %v7161_v11  ;;  %v1155_v11 = vrot.slane %v7184_v54, 1 }
 0x14d   : > { %5819 = vmatmul.mubr.msk.bf16.gmra.mrb[24].mxu0 %vm604_vm4, %v7245_v32  ;;  %5436 = vmatprep.mubr.msk.bf16.mxu1 %vm6748_vm1, %v6747_v2  ;;  %v1129_v32 = vrot.slane %v6881_v43, 1 }
 0x14e   : > { %5822 = vmatprep.mubr.msk.bf16.mxu0 %vm6748_vm1, %v6747_v2 }
 0x14f   : > { %v7561_v27 = vsel %vm1119_vm6, %v1127_v4, %v1129_v32 }
 0x154   : > { %5437 = vmatmul.mubr.msk.bf16.gmra.mrb[72].mxu1 %vm604_vm4, %v7184_v54  ;;  %v7758_v54 = vrot.slane %v7207_v60, 1 }
 0x155   : > { %5823 = vmatmul.mubr.msk.bf16.gmra.mrb[28].mxu0 %vm604_vm4, %v7258_v14  ;;  %5440 = vmatprep.mubr.msk.bf16.mxu1 %vm6748_vm1, %v6747_v2 }
 0x156   : > { %5826 = vmatprep.mubr.msk.bf16.mxu0 %vm6748_vm1, %v6747_v2  ;;  %v7764_v52 = vsel %vm1119_vm6, %v1155_v11, %v7758_v54 }
 0x15c   : > { %5441 = vmatmul.mubr.msk.bf16.gmra.mrb[76].mxu1 %vm604_vm4, %v7207_v60  ;;  %v1159_v60 = vrot.slane %v7234_v28, 1 }
 0x15d   : > { %5827 = vmatmul.mubr.msk.bf16.gmra.mrb[32].mxu0 %vm604_vm4, %v7270_v40  ;;  %5444 = vmatprep.mubr.msk.bf16.mxu1 %vm6748_vm1, %v6747_v2 }
 0x15e   : > { %5830 = vmatprep.mubr.msk.bf16.mxu0 %vm6748_vm1, %v6747_v2 }
 0x164   : > { %5445 = vmatmul.mubr.msk.bf16.gmra.mrb[80].mxu1 %vm604_vm4, %v7234_v28 }
 0x165   : > { %5831 = vmatmul.mubr.msk.bf16.gmra.mrb[36].mxu0 %vm604_vm4, %v7284_v53  ;;  %5450 = vmatprep.mubr.msk.bf16.mxu1 %vm6748_vm1, %v6747_v2 }
 0x166   : > { %5834 = vmatprep.mubr.msk.bf16.mxu0 %vm6748_vm1, %v6747_v2 }
 0x16c   : > { %5451 = vmatmul.mubr.msk.bf16.vlgmr.msra.gmra.mrb[0].mxu1 %vm604_vm4, %v1122_v55  ;;  %v2763_v55 = vor.u32 %v2762_v41, %v2761_v20  ;;  %v7747_v20 = vsel %vm1119_vm6, %v1153_v47, %v1155_v11  ;;  %v2790_v41 = vrot.slane %v6998_v50, 3 }
 0x16d   : > { %5835 = vmatmul.mubr.msk.bf16.gmra.mrb[40].mxu0 %vm604_vm4, %v7298_v39  ;;  %5454 = vmatprep.mubr.msk.bf16.mxu1 %vm6748_vm1, %v6747_v2  ;;  %v7614_v39 = vld [vmem:[%s6815_s27 + $0xb0] sm:$0xf] }
 0x16e   : > { %5838 = vmatprep.mubr.msk.bf16.mxu0 %vm6748_vm1, %v6747_v2  ;;  %5535 = vmatpush3.bf16.msra.mxu1 %v1490_v61  ;;  %v2764_v26 = vsel %vm2757_vm7, %v2760_v13, %v2763_v55  ;;  %v2765_v61 = vrot.slane %v6871_v38, 2  ;;  %v7677_v38 = vsel %vm1119_vm6, %v1143_v57, %v1145_v7  ;;  %v2791_v57 = vor.u32 %v2790_v41, %v2789_v35  ;;  %v8829_v35 = vld [vmem:[#allocation15_spill] sm:$0xff] }
 0x16f   : > { %6050 = vmatprep.subr.bf16.mxu1 %v6747_v2  ;;  %v2793_v13 = vrot.slane %v7022_v1, 2  ;;  %v2818_v41 = vrot.slane %v8829_v35, 3 }
 0x170   : > { %v2767_v4 = vor.u32 %v2766_v5, %v2765_v61  ;;  %v1160_v61 = vsel %vm1119_vm6, %v7758_v54, %v1159_v60  ;;  %v8817_v5 = vld [vmem:[#allocation5_spill] sm:$0xff] }
 0x172   : > { %v2768_v37 = vsel %vm2757_vm7, %v2763_v55, %v2767_v4  ;;  %v8816_v55 = vld [vmem:[#allocation3_spill] sm:$0xff] }
 0x173   : > { %v2794_v12 = vrot.slane %v8816_v55, 3  ;;  %v8831_v55 = vld [vmem:[#allocation17_spill] sm:$0xff] }
 0x174   : > { %5455 = vmatmul.mubr.msk.bf16.gmra.mrb[4].mxu1 %vm604_vm4, %v7525_v6 }
 0x175   : > { %5839 = vmatmul.mubr.msk.bf16.gmra.mrb[44].mxu0 %vm604_vm4, %v7310_v62  ;;  %5458 = vmatprep.mubr.msk.bf16.mxu1 %vm6748_vm1, %v6747_v2 }
 0x176   : > { %5842 = vmatprep.mubr.msk.bf16.mxu0 %vm6748_vm1, %v6747_v2 }
 0x17c   : > { %5459 = vmatmul.mubr.msk.bf16.gmra.mrb[8].mxu1 %vm604_vm4, %v7537_v33 }
 0x17d   : > { %5843 = vmatmul.mubr.msk.bf16.gmra.mrb[48].mxu0 %vm604_vm4, %v7322_v42  ;;  %5462 = vmatprep.mubr.msk.bf16.mxu1 %vm6748_vm1, %v6747_v2 }
 0x17e   : > { %5846 = vmatprep.mubr.msk.bf16.mxu0 %vm6748_vm1, %v6747_v2 }
 0x184   : > { %5463 = vmatmul.mubr.msk.bf16.gmra.mrb[12].mxu1 %vm604_vm4, %v7549_v15 }
 0x185   : > { %5847 = vmatmul.mubr.msk.bf16.gmra.mrb[52].mxu0 %vm604_vm4, %v7334_v3  ;;  %5466 = vmatprep.mubr.msk.bf16.mxu1 %vm6748_vm1, %v6747_v2  ;;  %v1131_v3 = vrot.slane %v6900_v51, 1 }
 0x186   : > { %5850 = vmatprep.mubr.msk.bf16.mxu0 %vm6748_vm1, %v6747_v2 }
 0x187   : > { %v7573_v43 = vsel %vm1119_vm6, %v1129_v32, %v1131_v3  ;;  %v2769_v32 = vrot.slane %v6896_v49, 2 }
 0x18c   : > { %5467 = vmatmul.mubr.msk.bf16.gmra.mrb[16].mxu1 %vm604_vm4, %v7561_v27 }
 0x18d   : > { %5851 = vmatmul.mubr.msk.bf16.gmra.mrb[56].mxu0 %vm604_vm4, %v7346_v56  ;;  %5470 = vmatprep.mubr.msk.bf16.mxu1 %vm6748_vm1, %v6747_v2  ;;  %v1133_v56 = vrot.slane %v6924_v0, 1  ;;  %v286_v0 = vld [vmem:[%s6815_s27 + $0xac] sm:$0xf] }
 0x18e   : > { %5854 = vmatprep.mubr.msk.bf16.mxu0 %vm6748_vm1, %v6747_v2  ;;  %v7601_v40 = vcombine.low %v7388_v21, %v286_v0  ;;  %v2774_v0 = vrot.slane %v6914_v58, 3  ;;  %v2777_v58 = vrot.slane %v6938_v10, 2 }
 0x18f   : > { %v7585_v51 = vsel %vm1119_vm6, %v1131_v3, %v1133_v56  ;;  %v2770_v3 = vrot.slane %v6893_v48, 3  ;;  %v2773_v48 = vrot.slane %v6917_v59, 2 }
 0x190   : > { %v2495_v53 = vrot.slane %v7601_v40, 2 }
 0x192   : > { %v2496_v42 = vsel %vm2138_vm5, %v7385_v63, %v2495_v53 }
 0x194   : > { %5471 = vmatmul.mubr.msk.bf16.gmra.mrb[20].mxu1 %vm604_vm4, %v7573_v43 }
 0x195   : > { %5855 = vmatmul.mubr.msk.bf16.gmra.mrb[60].mxu0 %vm604_vm4, %v7358_v17  ;;  %5474 = vmatprep.mubr.msk.bf16.mxu1 %vm6748_vm1, %v6747_v2  ;;  %v1135_v17 = vrot.slane %v6945_v18, 1  ;;  %v1137_v18 = vrot.slane %v6966_v31, 1  ;;  %v1139_v31 = vrot.slane %v6987_v44, 1 }
 0x196   : > { %5858 = vmatprep.mubr.msk.bf16.mxu0 %vm6748_vm1, %v6747_v2 }
 0x197   : > { %v7598_v14 = vsel %vm1119_vm6, %v1133_v56, %v1135_v17  ;;  %v7617_v62 = vsel %vm1119_vm6, %v1135_v17, %v1137_v18  ;;  %v7644_v44 = vsel %vm1119_vm6, %v1139_v31, %v1141_v34  ;;  %v2771_v56 = vor.u32 %v2770_v3, %v2769_v32  ;;  %v8819_v32 = vld [vmem:[#allocation8_spill] sm:$0xff] }
 0x198   : > { %v7691_v17 = vsel %vm1119_vm6, %v1145_v7, %v1147_v46  ;;  %v7733_v34 = vsel %vm1119_vm6, %v1151_v30, %v1153_v47  ;;  %v8818_v7 = vld [vmem:[#allocation4_spill] sm:$0xff]  ;;  %v2801_v3 = vrot.slane %v8819_v32, 2 }
 0x199   : > { %v2772_v49 = vsel %vm2757_vm7, %v2767_v4, %v2771_v56  ;;  %v2798_v4 = vrot.slane %v8818_v7, 3  ;;  %v290_v7 = vld [vmem:[%s8754_s2 + $0x1b] sm:$0xff] }
 0x19a   : > { %vm3510_vm9 = vcmp.gt.f32.partialorder %v290_v7, 0.0 }
 0x19c   : > { %5475 = vmatmul.mubr.msk.bf16.gmra.mrb[24].mxu1 %vm604_vm4, %v7585_v51 }
 0x19d   : > { %5859 = vmatmul.mubr.msk.bf16.gmra.mrb[64].mxu0 %vm604_vm4, %v7374_v19  ;;  %5478 = vmatprep.mubr.msk.bf16.mxu1 %vm6748_vm1, %v6747_v2  ;;  %v4927_v19 = vcombine.low %v7614_v39, %v7614_v39 }
 0x19e   : > { %5862 = vmatprep.mubr.msk.bf16.mxu0 %vm6748_vm1, %v6747_v2 }
 0x19f   : > { %v2497_v21 = vrot.slane %v4927_v19, 2 }
 0x1a1   : > { %v2498_v63 = vsel %vm2138_vm5, %v2495_v53, %v2497_v21  ;;  %v7705_v53 = vsel %vm1119_vm6, %v1147_v46, %v1149_v8  ;;  %v8820_v46 = vld [vmem:[#allocation7_spill] sm:$0xff] }
 0x1a4   : > { %5479 = vmatmul.mubr.msk.bf16.gmra.mrb[28].mxu1 %vm604_vm4, %v7598_v14 }
 0x1a5   : > { %5863 = vmatmul.mubr.msk.bf16.gmra.mrb[68].mxu0 %vm604_vm4, %v7392_v45  ;;  %5482 = vmatprep.mubr.msk.bf16.mxu1 %vm6748_vm1, %v6747_v2  ;;  %v7632_v45 = vsel %vm1119_vm6, %v1137_v18, %v1139_v31  ;;  %v2775_v18 = vor.u32 %v2774_v0, %v2773_v48  ;;  %v7719_v31 = vsel %vm1119_vm6, %v1149_v8, %v1151_v30  ;;  %v8821_v0 = vld [vmem:[#allocation10_spill] sm:$0xff] }
 0x1a6   : > { %5866 = vmatprep.mubr.msk.bf16.mxu0 %vm6748_vm1, %v6747_v2  ;;  %v2805_v8 = vrot.slane %v8821_v0, 2 }
 0x1a7   : > { %v2776_v59 = vsel %vm2757_vm7, %v2771_v56, %v2775_v18  ;;  %v2802_v56 = vrot.slane %v8820_v46, 3 }
 0x1ac   : > { %5483 = vmatmul.mubr.msk.bf16.gmra.mrb[32].mxu1 %vm604_vm4, %v7617_v62 }
 0x1ad   : > { %5867 = vmatmul.mubr.msk.bf16.gmra.mrb[72].mxu0 %vm604_vm4, %v2496_v42  ;;  %5486 = vmatprep.mubr.msk.bf16.mxu1 %vm6748_vm1, %v6747_v2  ;;  %v2778_v42 = vrot.slane %v6935_v9, 3  ;;  %v2781_v9 = vrot.slane %v6959_v24, 2 }
 0x1ae   : > { %5870 = vmatprep.mubr.msk.bf16.mxu0 %vm6748_vm1, %v6747_v2 }
 0x1af   : > { %v2779_v19 = vor.u32 %v2778_v42, %v2777_v58  ;;  %v8823_v58 = vld [vmem:[#allocation2_spill] sm:$0xff] }
 0x1b1   : > { %v2780_v10 = vsel %vm2757_vm7, %v2775_v18, %v2779_v19  ;;  %v8822_v18 = vld [vmem:[#allocation9_spill] sm:$0xff] }
 0x1b4   : > { %5487 = vmatmul.mubr.msk.bf16.gmra.mrb[36].mxu1 %vm604_vm4, %v7632_v45 }
 0x1b5   : > { %5871 = vmatmul.mubr.msk.bf16.gmra.mrb[76].mxu0 %vm604_vm4, %v2498_v63  ;;  %5490 = vmatprep.mubr.msk.bf16.mxu1 %vm6748_vm1, %v6747_v2 }
 0x1b6   : > { %5874 = vmatprep.mubr.msk.bf16.mxu0 %vm6748_vm1, %v6747_v2 }
 0x1bc   : > { %5491 = vmatmul.mubr.msk.bf16.gmra.mrb[40].mxu1 %vm604_vm4, %v7644_v44 }
 0x1bd   : > { %5875 = vmatmul.mubr.msk.bf16.gmra.mrb[80].mxu0 %vm604_vm4, %v2497_v21  ;;  %5494 = vmatprep.mubr.msk.bf16.mxu1 %vm6748_vm1, %v6747_v2  ;;  %v2782_v21 = vrot.slane %v6956_v22, 3  ;;  %v2785_v22 = vrot.slane %v6980_v36, 2 }
 0x1be   : > { %5880 = vmatprep.mubr.msk.bf16.mxu0 %vm6748_vm1, %v6747_v2 }
 0x1bf   : > { %v2783_v63 = vor.u32 %v2782_v21, %v2781_v9  ;;  %v2787_v25 = vor.u32 %v2786_v29, %v2785_v22  ;;  %v8825_v9 = vld [vmem:[#allocation11_spill] sm:$0xff]  ;;  %v8827_v22 = vld [vmem:[#allocation13_spill] sm:$0xff] }
 0x1c0   : > { %v2810_v21 = vrot.slane %v8825_v9, 3  ;;  %v2814_v29 = vrot.slane %v8827_v22, 3 }
 0x1c1   : > { %v2784_v24 = vsel %vm2757_vm7, %v2779_v19, %v2783_v63  ;;  %v2788_v36 = vsel %vm2757_vm7, %v2783_v63, %v2787_v25  ;;  %v2792_v50 = vsel %vm2757_vm7, %v2787_v25, %v2791_v57  ;;  %v8824_v19 = vld [vmem:[#allocation12_spill] sm:$0xff]  ;;  %v8826_v63 = vld [vmem:[#allocation14_spill] sm:$0xff] }
 0x1c2   : > { %v8828_v25 = vld [vmem:[#allocation16_spill] sm:$0xff] }
 0x1c4   : > { %5495 = vmatmul.mubr.msk.bf16.gmra.mrb[44].mxu1 %vm604_vm4, %v7662_v23 }
 0x1c5   : > { %5881 = vmatmul.mubr.msk.bf16.vlgmr.msra.gmra.mrb[0].mxu0 %vm604_vm4, %v2764_v26  ;;  %5498 = vmatprep.mubr.msk.bf16.mxu1 %vm6748_vm1, %v6747_v2  ;;  %v2795_v26 = vor.u32 %v2794_v12, %v2793_v13  ;;  %v2822_v12 = vrot.slane %v8831_v55, 3 }
 0x1c6   : > { %5965 = vmatpush3.bf16.msra.mxu0 %v3266_v16  ;;  %5884 = vmatprep.mubr.msk.bf16.mxu0 %vm6748_vm1, %v6747_v2  ;;  %v2797_v16 = vrot.slane %v8817_v5, 2 }
 0x1c7   : > { %v2796_v1 = vsel %vm2757_vm7, %v2791_v57, %v2795_v26 }
 0x1c8   : > { %v2799_v28 = vor.u32 %v2798_v4, %v2797_v16  ;;  %v289_v16 = vld [vmem:[%s8754_s2 + $0x13] sm:$0xff] }
 0x1c9   : > { %v8834_v4 = vld [vmem:[#allocation21_spill] sm:$0xff]  ;;  %vm3509_vm8 = vcmp.gt.f32.partialorder %v289_v16, 0.0 }
 0x1cc   : > { %5499 = vmatmul.mubr.msk.bf16.gmra.mrb[48].mxu1 %vm604_vm4, %v7677_v38 }
 0x1cd   : > { %5885 = vmatmul.mubr.msk.bf16.gmra.mrb[4].mxu0 %vm604_vm4, %v2768_v37  ;;  %5502 = vmatprep.mubr.msk.bf16.mxu1 %vm6748_vm1, %v6747_v2  ;;  %v2800_v37 = vsel %vm2757_vm7, %v2795_v26, %v2799_v28 }
 0x1ce   : > { %5888 = vmatprep.mubr.msk.bf16.mxu0 %vm6748_vm1, %v6747_v2 }
 0x1d4   : > { %5503 = vmatmul.mubr.msk.bf16.gmra.mrb[52].mxu1 %vm604_vm4, %v7691_v17 }
 0x1d5   : > { %5889 = vmatmul.mubr.msk.bf16.gmra.mrb[8].mxu0 %vm604_vm4, %v2772_v49  ;;  %5506 = vmatprep.mubr.msk.bf16.mxu1 %vm6748_vm1, %v6747_v2  ;;  %v2803_v49 = vor.u32 %v2802_v56, %v2801_v3 }
 0x1d6   : > { %5892 = vmatprep.mubr.msk.bf16.mxu0 %vm6748_vm1, %v6747_v2 }
 0x1d7   : > { %v2804_v48 = vsel %vm2757_vm7, %v2799_v28, %v2803_v49  ;;  %v1812_v28 = vshrl.u32 %v8834_v4, 16 }
 0x1dc   : > { %5507 = vmatmul.mubr.msk.bf16.gmra.mrb[56].mxu1 %vm604_vm4, %v7705_v53 }
 0x1dd   : > { %5893 = vmatmul.mubr.msk.bf16.gmra.mrb[12].mxu0 %vm604_vm4, %v2776_v59  ;;  %5510 = vmatprep.mubr.msk.bf16.mxu1 %vm6748_vm1, %v6747_v2  ;;  %v2806_v59 = vrot.slane %v8822_v18, 3 }
 0x1de   : > { %5896 = vmatprep.mubr.msk.bf16.mxu0 %vm6748_vm1, %v6747_v2 }
 0x1df   : > { %v2807_v42 = vor.u32 %v2806_v59, %v2805_v8  ;;  %v2834_v59 = vshrl.u32 %v7601_v40, 16 }
 0x1e1   : > { %v2808_v30 = vsel %vm2757_vm7, %v2803_v49, %v2807_v42 }
 0x1e4   : > { %5511 = vmatmul.mubr.msk.bf16.gmra.mrb[60].mxu1 %vm604_vm4, %v7719_v31 }
 0x1e5   : > { %5897 = vmatmul.mubr.msk.bf16.gmra.mrb[16].mxu0 %vm604_vm4, %v2780_v10  ;;  %5514 = vmatprep.mubr.msk.bf16.mxu1 %vm6748_vm1, %v6747_v2  ;;  %v2809_v10 = vrot.slane %v8824_v19, 2 }
 0x1e6   : > { %5900 = vmatprep.mubr.msk.bf16.mxu0 %vm6748_vm1, %v6747_v2 }
 0x1ec   : > { %5515 = vmatmul.mubr.msk.bf16.gmra.mrb[64].mxu1 %vm604_vm4, %v7733_v34 }
 0x1ed   : > { %5901 = vmatmul.mubr.msk.bf16.gmra.mrb[20].mxu0 %vm604_vm4, %v2784_v24  ;;  %5518 = vmatprep.mubr.msk.bf16.mxu1 %vm6748_vm1, %v6747_v2  ;;  %v2813_v24 = vrot.slane %v8826_v63, 2 }
 0x1ee   : > { %5904 = vmatprep.mubr.msk.bf16.mxu0 %vm6748_vm1, %v6747_v2 }
 0x1f4   : > { %5519 = vmatmul.mubr.msk.bf16.gmra.mrb[68].mxu1 %vm604_vm4, %v7747_v20 }
 0x1f5   : > { %5905 = vmatmul.mubr.msk.bf16.gmra.mrb[24].mxu0 %vm604_vm4, %v2788_v36  ;;  %5522 = vmatprep.mubr.msk.bf16.mxu1 %vm6748_vm1, %v6747_v2  ;;  %v2817_v36 = vrot.slane %v8828_v25, 2 }
 0x1f6   : > { %5908 = vmatprep.mubr.msk.bf16.mxu0 %vm6748_vm1, %v6747_v2 }
 0x1fc   : > { %5523 = vmatmul.mubr.msk.bf16.gmra.mrb[72].mxu1 %vm604_vm4, %v7764_v52 }
 0x1fd   : > { %5909 = vmatmul.mubr.msk.bf16.gmra.mrb[28].mxu0 %vm604_vm4, %v2792_v50  ;;  %5526 = vmatprep.mubr.msk.bf16.mxu1 %vm6748_vm1, %v6747_v2  ;;  %v8830_v50 = vld [vmem:[#allocation18_spill] sm:$0xff] }
 0x1fe   : > { %5912 = vmatprep.mubr.msk.bf16.mxu0 %vm6748_vm1, %v6747_v2  ;;  %v2821_v13 = vrot.slane %v8830_v50, 2 }
 0x204   : > { %5527 = vmatmul.mubr.msk.bf16.gmra.mrb[76].mxu1 %vm604_vm4, %v1160_v61  ;;  %v8833_v61 = vld [vmem:[#allocation19_spill] sm:$0xff] }
 0x205   : > { %5913 = vmatmul.mubr.msk.bf16.gmra.mrb[32].mxu0 %vm604_vm4, %v2796_v1  ;;  %5530 = vmatprep.mubr.msk.bf16.mxu1 %vm6748_vm1, %v6747_v2  ;;  %v2826_v1 = vrot.slane %v8833_v61, 3 }
 0x206   : > { %5916 = vmatprep.mubr.msk.bf16.mxu0 %vm6748_vm1, %v6747_v2 }
 0x20c   : > { %5531 = vmatmul.mubr.msk.bf16.gmra.mrb[80].mxu1 %vm604_vm4, %v1159_v60  ;;  %v8832_v60 = vld [vmem:[#allocation20_spill] sm:$0xff] }
 0x20d   : > { %5917 = vmatmul.mubr.msk.bf16.gmra.mrb[36].mxu0 %vm604_vm4, %v2800_v37  ;;  %5536 = vmatprep.mubr.msk.bf16.mxu1 %vm6748_vm1, %v6747_v2  ;;  %v2825_v26 = vrot.slane %v8832_v60, 2  ;;  %v6749_v37 = vmov 0  }
 0x20e   : > { %5920 = vmatprep.mubr.msk.bf16.mxu0 %vm6748_vm1, %v6747_v2  ;;  %6693 = vset.pattern.permute.xlu0 %v6749_v37  ;;  %v3550_v3 = vsel %vm3509_vm8, 1, %v6749_v37  ;;  %v3551_v56 = vsel %vm3510_vm9, 1, %v6749_v37 }
 0x20f   : > { %6694 = vset.pattern.permute.xlu1 %v6749_v37  ;;  %3592 = vperm.xlu0 %6693, %v3550_v3   ;;  %v299_v3 = vld [vmem:[%s8754_s2 + $0x63] sm:$0xff] }
 0x210   : > { %vm3519_vm2 = vcmp.gt.f32.partialorder %v299_v3, 0.0 }
 0x213   : > { %3595 = vperm.xlu0 %6693, %v3551_v56   ;;  %v3560_v56 = vsel %vm3519_vm2, 1, %v6749_v37 }
 0x214   : > { %5537 = vmatmul.mubr.msk.bf16.vlgmr.msra.gmra.mrb[0].mxu1 %vm604_vm4, %v7525_v6  ;;  %v2811_v6 = vor.u32 %v2810_v21, %v2809_v10  ;;  %v288_v10 = vld [vmem:[%s6815_s27 + $0xb4] sm:$0x1] }
 0x215   : > { %5921 = vmatmul.mubr.msk.bf16.gmra.mrb[40].mxu0 %vm604_vm4, %v2804_v48  ;;  %5540 = vmatprep.mubr.msk.bf16.mxu1 %vm6748_vm1, %v6747_v2  ;;  %v2829_v48 = vrot.slane %v1812_v28, 2 }
 0x216   : > { %5924 = vmatprep.mubr.msk.bf16.mxu0 %vm6748_vm1, %v6747_v2  ;;  %6051 = vmatpush3.bf16.msra.mxu1 %v8823_v58  ;;  %v2812_v47 = vsel %vm2757_vm7, %v2807_v42, %v2811_v6  ;;  %v2837_v58 = vshll.u32 %v7601_v40, 16  ;;  %v291_v42 = vld [vmem:[%s8754_s2 + $0x23] sm:$0xff] }
 0x217   : > { %vm3511_vm10 = vcmp.gt.f32.partialorder %v291_v42, 0.0 }
 0x21c   : > { %5541 = vmatmul.mubr.msk.bf16.gmra.mrb[4].mxu1 %vm604_vm4, %v7537_v33  ;;  %v2815_v33 = vor.u32 %v2814_v29, %v2813_v24  ;;  %v7897_v24 = vcombine.low %v7614_v39, %v288_v10  ;;  %v2836_v29 = vrot.slane %v2834_v59, 2 }
 0x21d   : > { %5925 = vmatmul.mubr.msk.bf16.gmra.mrb[44].mxu0 %vm604_vm4, %v2808_v30  ;;  %5544 = vmatprep.mubr.msk.bf16.mxu1 %vm6748_vm1, %v6747_v2  ;;  %v293_v30 = vld [vmem:[%s8754_s2 + $0x33] sm:$0xff] }
 0x21e   : > { %5928 = vmatprep.mubr.msk.bf16.mxu0 %vm6748_vm1, %v6747_v2  ;;  %v2816_v11 = vsel %vm2757_vm7, %v2811_v6, %v2815_v33  ;;  %vm3513_vm11 = vcmp.gt.f32.partialorder %v293_v30, 0.0  ;;  %v3552_v6 = vsel %vm3511_vm10, 1, %v6749_v37 }
 0x21f   : > { %3598 = vperm.xlu1 %6694, %v3552_v6   ;;  %v305_v6 = vld [vmem:[%s8754_s2 + $0x93] sm:$0xff] }
 0x224   : > { %5545 = vmatmul.mubr.msk.bf16.gmra.mrb[8].mxu1 %vm604_vm4, %v7549_v15  ;;  %v2819_v15 = vor.u32 %v2818_v41, %v2817_v36  ;;  %v295_v41 = vld [vmem:[%s8754_s2 + $0x43] sm:$0xff] }
 0x225   : > { %5929 = vmatmul.mubr.msk.bf16.gmra.mrb[48].mxu0 %vm604_vm4, %v2812_v47  ;;  %5548 = vmatprep.mubr.msk.bf16.mxu1 %vm6748_vm1, %v6747_v2  ;;  %v3554_v47 = vsel %vm3513_vm11, 1, %v6749_v37  ;;  %vm3515_vm13 = vcmp.gt.f32.partialorder %v295_v41, 0.0  ;;  %vm3525_vm11 = vcmp.gt.f32.partialorder %v305_v6, 0.0  ;;  %v306_v41 = vld [vmem:[%s8754_s2 + $0x9b] sm:$0xff]  ;;  %v316_v6 = vld [vmem:[%s8754_s2 + $0xeb] sm:$0xff] }
 0x226   : > { %5932 = vmatprep.mubr.msk.bf16.mxu0 %vm6748_vm1, %v6747_v2  ;;  %v2820_v57 = vsel %vm2757_vm7, %v2815_v33, %v2819_v15  ;;  %3604 = vperm.xlu0 %6693, %v3554_v47   ;;  %v2839_v33 = vrot.slane %v2837_v58, 3 }
 0x228   : > { %v2840_v39 = vor.u32 %v2839_v33, %v2836_v29  ;;  %v3566_v29 = vsel %vm3525_vm11, 1, %v6749_v37 }
 0x22c   : > { %5549 = vmatmul.mubr.msk.bf16.gmra.mrb[12].mxu1 %vm604_vm4, %v7561_v27  ;;  %v2823_v27 = vor.u32 %v2822_v12, %v2821_v13  ;;  %v294_v13 = vld [vmem:[%s8754_s2 + $0x3b] sm:$0xff]  ;;  %v296_v12 = vld [vmem:[%s8754_s2 + $0x4b] sm:$0xff] }
 0x22d   : > { %5933 = vmatmul.mubr.msk.bf16.gmra.mrb[52].mxu0 %vm604_vm4, %v2816_v11  ;;  %5552 = vmatprep.mubr.msk.bf16.mxu1 %vm6748_vm1, %v6747_v2  ;;  %vm3514_vm14 = vcmp.gt.f32.partialorder %v294_v13, 0.0  ;;  %vm3516_vm0 = vcmp.gt.f32.partialorder %v296_v12, 0.0 }
 0x22e   : > { %5936 = vmatprep.mubr.msk.bf16.mxu0 %vm6748_vm1, %v6747_v2  ;;  %v2824_v5 = vsel %vm2757_vm7, %v2819_v15, %v2823_v27  ;;  %v2843_v15 = vshrl.u32 %v7897_v24, 16 }
 0x230   : > { %v2845_v16 = vrot.slane %v2843_v15, 2 }
 0x234   : > { %5553 = vmatmul.mubr.msk.bf16.gmra.mrb[16].mxu1 %vm604_vm4, %v7573_v43  ;;  %v2827_v43 = vor.u32 %v2826_v1, %v2825_v26  ;;  %v3555_v26 = vsel %vm3514_vm14, 1, %v6749_v37  ;;  %vm3526_vm14 = vcmp.gt.f32.partialorder %v306_v41, 0.0 }
 0x235   : > { %5937 = vmatmul.mubr.msk.bf16.gmra.mrb[56].mxu0 %vm604_vm4, %v2820_v57  ;;  %5556 = vmatprep.mubr.msk.bf16.mxu1 %vm6748_vm1, %v6747_v2  ;;  %v3556_v57 = vsel %vm3515_vm13, 1, %v6749_v37  ;;  %v3567_v13 = vsel %vm3526_vm14, 1, %v6749_v37 }
 0x236   : > { %5940 = vmatprep.mubr.msk.bf16.mxu0 %vm6748_vm1, %v6747_v2  ;;  %v2828_v49 = vsel %vm2757_vm7, %v2823_v27, %v2827_v43  ;;  %v2846_v27 = vshll.u32 %v7897_v24, 16  ;;  %3610 = vperm.xlu0 %6693, %v3556_v57   ;;  %v6722_v57 = vld [vmem:[%s6815_s27 + $0x18] sm:$0xff]  }
 0x238   : > { %v2848_v7 = vrot.slane %v2846_v27, 3  ;;  %v308_v27 = vld [vmem:[%s8754_s2 + $0xab] sm:$0xff] }
 0x239   : > { %vm3528_vm2 = vcmp.gt.f32.partialorder %v308_v27, 0.0  ;;  %v322_v27 = vld [vmem:[%s8754_s2 + $0x11b] sm:$0xff] }
 0x23c   : > { %5557 = vmatmul.mubr.msk.bf16.gmra.mrb[20].mxu1 %vm604_vm4, %v7585_v51  ;;  %v1815_v51 = vshll.u32 %v8834_v4, 16 }
 0x23d   : > { %5941 = vmatmul.mubr.msk.bf16.gmra.mrb[60].mxu0 %vm604_vm4, %v2824_v5  ;;  %5560 = vmatprep.mubr.msk.bf16.mxu1 %vm6748_vm1, %v6747_v2  ;;  %v3557_v5 = vsel %vm3516_vm0, 1, %v6749_v37 }
 0x23e   : > { %5944 = vmatprep.mubr.msk.bf16.mxu0 %vm6748_vm1, %v6747_v2  ;;  %v2830_v8 = vrot.slane %v1815_v51, 3 }
 0x240   : > { %v2831_v21 = vor.u32 %v2830_v8, %v2829_v48  ;;  %v301_v48 = vld [vmem:[%s8754_s2 + $0x73] sm:$0xff]  ;;  %v2849_v8 = vor.u32 %v2848_v7, %v2845_v16  ;;  %v310_v16 = vld [vmem:[%s8754_s2 + $0xbb] sm:$0xff] }
 0x241   : > { %vm3521_vm8 = vcmp.gt.f32.partialorder %v301_v48, 0.0  ;;  %v6723_v7 = vld [vmem:[%s6815_s27 + $0x20] sm:$0xff]   ;;  %v312_v48 = vld [vmem:[%s8754_s2 + $0xcb] sm:$0xff] }
 0x242   : > { %v2832_v36 = vsel %vm2757_vm7, %v2827_v43, %v2831_v21  ;;  %v2841_v43 = vsel %vm2757_vm7, %v2831_v21, %v2840_v39  ;;  %v3562_v58 = vsel %vm3521_vm8, 1, %v6749_v37  ;;  %v2850_v30 = vsel %vm2757_vm7, %v2840_v39, %v2849_v8  ;;  %v302_v21 = vld [vmem:[%s8754_s2 + $0x7b] sm:$0xff]  ;;  %v6721_v39 = vld [vmem:[%s6815_s27 + $0x10] sm:$0xff]  }
 0x243   : > { %vm3522_vm7 = vcmp.gt.f32.partialorder %v302_v21, 0.0  ;;  %v3161_v15 = vrot.slane %v6721_v39, 3  ;;  %v3164_v3 = vrot.slane %v6723_v7, 3  ;;  %vm3530_vm8 = vcmp.gt.f32.partialorder %v310_v16, 0.0  ;;  %v321_v39 = vld [vmem:[%s8754_s2 + $0x113] sm:$0xff]  ;;  %v324_v16 = vld [vmem:[%s8754_s2 + $0x12b] sm:$0xff] }
 0x244   : > { %5561 = vmatmul.mubr.msk.bf16.gmra.mrb[24].mxu1 %vm604_vm4, %v7598_v14  ;;  %v292_v14 = vld [vmem:[%s8754_s2 + $0x2b] sm:$0xff]  ;;  %v3563_v47 = vsel %vm3522_vm7, 1, %v6749_v37 }
 0x245   : > { %5945 = vmatmul.mubr.msk.bf16.gmra.mrb[64].mxu0 %vm604_vm4, %v2828_v49  ;;  %5564 = vmatprep.mubr.msk.bf16.mxu1 %vm6748_vm1, %v6747_v2  ;;  %vm3512_vm12 = vcmp.gt.f32.partialorder %v292_v14, 0.0  ;;  %v298_v49 = vld [vmem:[%s8754_s2 + $0x5b] sm:$0xff]  ;;  %v303_v14 = vld [vmem:[%s8754_s2 + $0x83] sm:$0xff] }
 0x246   : > { %5948 = vmatprep.mubr.msk.bf16.mxu0 %vm6748_vm1, %v6747_v2  ;;  %v3553_v11 = vsel %vm3512_vm12, 1, %v6749_v37  ;;  %vm3518_vm5 = vcmp.gt.f32.partialorder %v298_v49, 0.0  ;;  %vm3523_vm10 = vcmp.gt.f32.partialorder %v303_v14, 0.0 }
 0x247   : > { %3601 = vperm.xlu1 %6694, %v3553_v11   ;;  %v3559_v59 = vsel %vm3518_vm5, 1, %v6749_v37  ;;  %v3564_v10 = vsel %vm3523_vm10, 1, %v6749_v37  ;;  %v307_v11 = vld [vmem:[%s8754_s2 + $0xa3] sm:$0xff]  ;;  %vm3532_vm10 = vcmp.gt.f32.partialorder %v312_v48, 0.0 }
 0x248   : > { %vm3527_vm13 = vcmp.gt.f32.partialorder %v307_v11, 0.0  ;;  %v318_v11 = vld [vmem:[%s8754_s2 + $0xfb] sm:$0xff] }
 0x249   : > { %v6727_v48 = vld [vmem:[%s6815_s27 + $0x40] sm:$0xff]  }
 0x24b   : > { %3607 = vperm.xlu1 %6694, %v3555_v26  }
 0x24c   : > { %5565 = vmatmul.mubr.msk.bf16.gmra.mrb[28].mxu1 %vm604_vm4, %v7617_v62  ;;  %v297_v62 = vld [vmem:[%s8754_s2 + $0x53] sm:$0xff] }
 0x24d   : > { %5949 = vmatmul.mubr.msk.bf16.gmra.mrb[68].mxu0 %vm604_vm4, %v2832_v36  ;;  %5568 = vmatprep.mubr.msk.bf16.mxu1 %vm6748_vm1, %v6747_v2  ;;  %vm3517_vm15 = vcmp.gt.f32.partialorder %v297_v62, 0.0  ;;  %v3568_v36 = vsel %vm3527_vm13, 1, %v6749_v37  ;;  %v309_v62 = vld [vmem:[%s8754_s2 + $0xb3] sm:$0xff]  ;;  %vm3536_vm13 = vcmp.gt.f32.partialorder %v316_v6, 0.0 }
 0x24e   : > { %5952 = vmatprep.mubr.msk.bf16.mxu0 %vm6748_vm1, %v6747_v2  ;;  %v3558_v1 = vsel %vm3517_vm15, 1, %v6749_v37  ;;  %vm3160_vm15 = vcmask 1044480   ;;  %vm3529_vm0 = vcmp.gt.f32.partialorder %v309_v62, 0.0  ;;  %v323_v62 = vld [vmem:[%s8754_s2 + $0x123] sm:$0xff] }
 0x24f   : > { %3616 = vperm.xlu0 %6693, %v3558_v1   ;;  %3613 = vperm.xlu1 %6694, %v3557_v5   ;;  %v3570_v12 = vsel %vm3529_vm0, 1, %v6749_v37  ;;  %v3569_v1 = vsel %vm3528_vm2, 1, %v6749_v37  ;;  %v311_v5 = vld [vmem:[%s8754_s2 + $0xc3] sm:$0xff]  ;;  %vm3538_vm0 = vcmp.gt.f32.partialorder %v318_v11, 0.0  ;;  %vm3541_vm2 = vcmp.gt.f32.partialorder %v321_v39, 0.0 }
 0x250   : > { %vm3531_vm5 = vcmp.gt.f32.partialorder %v311_v5, 0.0  ;;  %v325_v5 = vld [vmem:[%s8754_s2 + $0x133] sm:$0xff]  ;;  %v1783_v39 = vrot.slane %v8819_v32, 1  ;;  %v1787_v32 = vrot.slane %v8821_v0, 1 }
 0x253   : > { %3622 = vperm.xlu0 %6693, %v3560_v56   ;;  %3619 = vperm.xlu1 %6694, %v3559_v59   ;;  %v313_v56 = vld [vmem:[%s8754_s2 + $0xd3] sm:$0xff]  ;;  %v315_v59 = vld [vmem:[%s8754_s2 + $0xe3] sm:$0xff] }
 0x254   : > { %5569 = vmatmul.mubr.msk.bf16.gmra.mrb[32].mxu1 %vm604_vm4, %v7632_v45  ;;  %v300_v45 = vld [vmem:[%s8754_s2 + $0x6b] sm:$0xff]  ;;  %vm3535_vm7 = vcmp.gt.f32.partialorder %v315_v59, 0.0 }
 0x255   : > { %5953 = vmatmul.mubr.msk.bf16.gmra.mrb[72].mxu0 %vm604_vm4, %v2841_v43  ;;  %5572 = vmatprep.mubr.msk.bf16.mxu1 %vm6748_vm1, %v6747_v2  ;;  %vm3520_vm9 = vcmp.gt.f32.partialorder %v300_v45, 0.0  ;;  %v3572_v43 = vsel %vm3531_vm5, 1, %v6749_v37 }
 0x256   : > { %5956 = vmatprep.mubr.msk.bf16.mxu0 %vm6748_vm1, %v6747_v2  ;;  %v3561_v42 = vsel %vm3520_vm9, 1, %v6749_v37  ;;  %vm3533_vm9 = vcmp.gt.f32.partialorder %v313_v56, 0.0 }
 0x257   : > { %3628 = vperm.xlu0 %6693, %v3562_v58   ;;  %3625 = vperm.xlu1 %6694, %v3561_v42   ;;  %v3574_v49 = vsel %vm3533_vm9, 1, %v6749_v37  ;;  %v3576_v58 = vsel %vm3535_vm7, 1, %v6749_v37  ;;  %v314_v42 = vld [vmem:[%s8754_s2 + $0xdb] sm:$0xff]  ;;  %vm3542_vm9 = vcmp.gt.f32.partialorder %v322_v27, 0.0  ;;  %vm3544_vm7 = vcmp.gt.f32.partialorder %v324_v16, 0.0 }
 0x258   : > { %vm3534_vm11 = vcmp.gt.f32.partialorder %v314_v42, 0.0 }
 0x25b   : > { %3634 = vperm.xlu0 %6693, %v3564_v10   ;;  %3631 = vperm.xlu1 %6694, %v3563_v47   ;;  %v317_v10 = vld [vmem:[%s8754_s2 + $0xf3] sm:$0xff]  ;;  %v3577_v47 = vsel %vm3536_vm13, 1, %v6749_v37 }
 0x25c   : > { %5573 = vmatmul.mubr.msk.bf16.gmra.mrb[36].mxu1 %vm604_vm4, %v7644_v44  ;;  %v304_v44 = vld [vmem:[%s8754_s2 + $0x8b] sm:$0xff] }
 0x25d   : > { %5957 = vmatmul.mubr.msk.bf16.gmra.mrb[76].mxu0 %vm604_vm4, %v2850_v30  ;;  %5576 = vmatprep.mubr.msk.bf16.mxu1 %vm6748_vm1, %v6747_v2  ;;  %vm3524_vm12 = vcmp.gt.f32.partialorder %v304_v44, 0.0  ;;  %v6724_v30 = vld [vmem:[%s6815_s27 + $0x28] sm:$0xff]  }
 0x25e   : > { %5960 = vmatprep.mubr.msk.bf16.mxu0 %vm6748_vm1, %v6747_v2  ;;  %v3565_v33 = vsel %vm3524_vm12, 1, %v6749_v37  ;;  %v3166_v14 = vrot.slane %v6724_v30, 3  ;;  %vm3537_vm12 = vcmp.gt.f32.partialorder %v317_v10, 0.0 }
 0x25f   : > { %3640 = vperm.xlu0 %6693, %v3566_v29   ;;  %3637 = vperm.xlu1 %6694, %v3565_v33   ;;  %v3578_v21 = vsel %vm3537_vm12, 1, %v6749_v37  ;;  %v319_v29 = vld [vmem:[%s8754_s2 + $0x103] sm:$0xff] }
 0x260   : > { %v3167_v44 = vsel %vm3160_vm15, %v3164_v3, %v3166_v14  ;;  %vm3539_vm14 = vcmp.gt.f32.partialorder %v319_v29, 0.0 }
 0x261   : > { %v3580_v33 = vsel %vm3539_vm14, 1, %v6749_v37 }
 0x263   : > { %3646 = vperm.xlu0 %6693, %v3568_v36   ;;  %3643 = vperm.xlu1 %6694, %v3567_v13   ;;  %v6725_v36 = vld [vmem:[%s6815_s27 + $0x30] sm:$0xff]  }
 0x264   : > { %5577 = vmatmul.mubr.msk.bf16.gmra.mrb[40].mxu1 %vm604_vm4, %v7662_v23  ;;  %v3162_v23 = vrot.slane %v6722_v57, 3  ;;  %v3168_v41 = vrot.slane %v6725_v36, 3  ;;  %v320_v57 = vld [vmem:[%s8754_s2 + $0x10b] sm:$0xff] }
 0x265   : > { %5961 = vmatmul.mubr.msk.bf16.gmra.mrb[80].mxu0 %vm604_vm4, %v2849_v8  ;;  %5580 = vmatprep.mubr.msk.bf16.mxu1 %vm6748_vm1, %v6747_v2  ;;  %v3573_v8 = vsel %vm3532_vm10, 1, %v6749_v37  ;;  %vm3540_vm5 = vcmp.gt.f32.partialorder %v320_v57, 0.0  ;;  %vm3545_vm10 = vcmp.gt.f32.partialorder %v325_v5, 0.0  ;;  %v1791_v5 = vrot.slane %v8824_v19, 1 }
 0x266   : > { %5966 = vmatprep.mubr.msk.bf16.mxu0 %vm6748_vm1, %v6747_v2  ;;  %v3163_v26 = vsel %vm3160_vm15, %v3161_v15, %v3162_v23  ;;  %v3165_v45 = vsel %vm3160_vm15, %v3162_v23, %v3164_v3  ;;  %v3582_v15 = vsel %vm3541_vm2, 1, %v6749_v37  ;;  %v3169_v23 = vsel %vm3160_vm15, %v3166_v14, %v3168_v41  ;;  %v6728_v14 = vld [vmem:[%s6815_s27 + $0x48] sm:$0xff]  }
 0x267   : > { %3652 = vperm.xlu0 %6693, %v3570_v12   ;;  %3649 = vperm.xlu1 %6694, %v3569_v1   ;;  %v3581_v13 = vsel %vm3540_vm5, 1, %v6749_v37  ;;  %v3585_v3 = vsel %vm3544_vm7, 1, %v6749_v37  ;;  %vm3876_vm5 = vcmask 60416  }
 0x268   : > { %4016 = vst.msk [vmem:[%s8190_s17] sm:$0xf] %vm3876_vm5, %v6749_v37  ;;  %4017 = vst.msk [vmem:[%s8190_s17 + $0x4] sm:$0xf] %vm3876_vm5, %v6749_v37 }
 0x269   : > { %4656 = vst.msk [vmem:[%s8190_s17 + $0xac] sm:$0xf] %vm3876_vm5, %v6749_v37  ;;  %4657 = vst.msk [vmem:[%s8190_s17 + $0xb0] sm:$0xf] %vm3876_vm5, %v6749_v37 }
 0x26b   : > { %3658 = vperm.xlu0 %6693, %v3572_v43   ;;  %v3586_v43 = vsel %vm3545_vm10, 1, %v6749_v37 }
 0x26c   : > { %5581 = vmatmul.mubr.msk.bf16.gmra.mrb[44].mxu1 %vm604_vm4, %v7677_v38  ;;  %v3571_v38 = vsel %vm3530_vm8, 1, %v6749_v37  ;;  %vm3543_vm8 = vcmp.gt.f32.partialorder %v323_v62, 0.0 }
 0x26d   : > { %5967 = vmatmul.mubr.msk.bf16.vlgmr.msra.gmra.mrb[0].mxu0 %vm604_vm4, %v3163_v26  ;;  %5584 = vmatprep.mubr.msk.bf16.mxu1 %vm6748_vm1, %v6747_v2  ;;  %v3584_v12 = vsel %vm3543_vm8, 1, %v6749_v37  ;;  %v6726_v26 = vld [vmem:[%s6815_s27 + $0x38] sm:$0xff]   ;;  %vm4600_vm8 = vsmask.f32 7942 }
 0x26e   : > { %5970 = vmatprep.mubr.msk.bf16.mxu0 %vm6748_vm1, %v6747_v2  ;;  %3655 = vperm.xlu1 %6694, %v3571_v38   ;;  %v3170_v1 = vrot.slane %v6726_v26, 3  ;;  %v327_v38 = vld [vmem:[%s8754_s2 + $0x143] sm:$0xff] }
 0x26f   : > { %3664 = vperm.xlu0 %6693, %v3574_v49   ;;  %v326_v49 = vld [vmem:[%s8754_s2 + $0x13b] sm:$0xff] }
 0x270   : > { %v3171_v7 = vsel %vm3160_vm15, %v3168_v41, %v3170_v1  ;;  %vm3546_vm12 = vcmp.gt.f32.partialorder %v326_v49, 0.0  ;;  %v6731_v41 = vld [vmem:[%s6815_s27 + $0x60] sm:$0xff]   ;;  %v1795_v49 = vrot.slane %v8826_v63, 1 }
 0x272   : > { %3661 = vperm.xlu1 %6694, %v3573_v8   ;;  %v329_v8 = vld [vmem:[%s8754_s2 + $0x153] sm:$0xf] }
 0x273   : > { %3670 = vperm.xlu0 %6693, %v3576_v58   ;;  %vm3549_vm13 = vcmp.gt.f32.partialorder %v329_v8, 0.0  ;;  %v328_v58 = vld [vmem:[%s8754_s2 + $0x14b] sm:$0xff]  ;;  %v6735_v8 = vld [vmem:[%s6815_s27 + $0x80] sm:$0xff]  }
 0x274   : > { %5585 = vmatmul.mubr.msk.bf16.gmra.mrb[48].mxu1 %vm604_vm4, %v7691_v17  ;;  %v3575_v17 = vsel %vm3534_vm11, 1, %v6749_v37  ;;  %vm3547_vm11 = vcmp.gt.f32.partialorder %v327_v38, 0.0  ;;  %v3590_v59 = vsel %vm3549_vm13, 1, %v6749_v37  ;;  %vm3548_vm14 = vcmp.gt.f32.partialorder %v328_v58, 0.0 }
 0x275   : > { %5971 = vmatmul.mubr.msk.bf16.gmra.mrb[4].mxu0 %vm604_vm4, %v3165_v45  ;;  %5588 = vmatprep.mubr.msk.bf16.mxu1 %vm6748_vm1, %v6747_v2  ;;  %v3588_v56 = vsel %vm3547_vm11, 1, %v6749_v37  ;;  %v3172_v45 = vrot.slane %v6727_v48, 3  ;;  %v3589_v30 = vsel %vm3548_vm14, 1, %v6749_v37  ;;  %v1796_v48 = vrot.slane %v8827_v22, 2 }
 0x276   : > { %5974 = vmatprep.mubr.msk.bf16.mxu0 %vm6748_vm1, %v6747_v2  ;;  %3667 = vperm.xlu1 %6694, %v3575_v17   ;;  %v3174_v17 = vrot.slane %v6728_v14, 3  ;;  %v1799_v22 = vrot.slane %v8828_v25, 1  ;;  %v1800_v58 = vrot.slane %v8829_v35, 2  ;;  %v6736_v14 = vld [vmem:[%s6815_s27 + $0x88] sm:$0xff]   ;;  %v1803_v35 = vrot.slane %v8830_v50, 1 }
 0x277   : > { %3676 = vperm.xlu0 %6693, %v3578_v21   ;;  %v3173_v42 = vsel %vm3160_vm15, %v3170_v1, %v3172_v45  ;;  %v6729_v21 = vld [vmem:[%s6815_s27 + $0x50] sm:$0xff]  }
 0x278   : > { %v3175_v10 = vsel %vm3160_vm15, %v3172_v45, %v3174_v17  ;;  %v3176_v6 = vrot.slane %v6729_v21, 3 }
 0x27a   : > { %3673 = vperm.xlu1 %6694, %v3577_v47   ;;  %v3177_v47 = vsel %vm3160_vm15, %v3174_v17, %v3176_v6  ;;  %v3190_v17 = vrot.slane %v6736_v14, 3 }
 0x27b   : > { %3682 = vperm.xlu0 %6693, %v3580_v33   ;;  %v6730_v33 = vld [vmem:[%s6815_s27 + $0x58] sm:$0xff]  }
 0x27c   : > { %5589 = vmatmul.mubr.msk.bf16.gmra.mrb[52].mxu1 %vm604_vm4, %v7705_v53  ;;  %v3579_v53 = vsel %vm3538_vm0, 1, %v6749_v37  ;;  %v3178_v11 = vrot.slane %v6730_v33, 3  ;;  %vm4019_vm0 = vsmask.f32 1280 }
 0x27d   : > { %5975 = vmatmul.mubr.msk.bf16.gmra.mrb[8].mxu0 %vm604_vm4, %v3167_v44  ;;  %5592 = vmatprep.mubr.msk.bf16.mxu1 %vm6748_vm1, %v6747_v2 }
 0x27e   : > { %5978 = vmatprep.mubr.msk.bf16.mxu0 %vm6748_vm1, %v6747_v2  ;;  %3679 = vperm.xlu1 %6694, %v3579_v53   ;;  %v3180_v53 = vrot.slane %v6731_v41, 3 }
 0x27f   : > { %3688 = vperm.xlu0 %6693, %v3582_v15   ;;  %v1784_v15 = vrot.slane %v8820_v46, 2  ;;  %v1788_v46 = vrot.slane %v8822_v18, 2 }
 0x280   : > { %v3181_v57 = vsel %vm3160_vm15, %v3178_v11, %v3180_v53 }
 0x281   : > { %v1789_v1 = vor.u32 %v1788_v46, %v1787_v32 }
 0x282   : > { %3685 = vperm.xlu1 %6694, %v3581_v13   ;;  %v6732_v13 = vld [vmem:[%s6815_s27 + $0x68] sm:$0xff]  }
 0x283   : > { %3694 = vperm.xlu0 %6693, %v3584_v12   ;;  %v3182_v62 = vrot.slane %v6732_v13, 3  ;;  %v8836_v12 = vld [vmem:[#allocation6_spill] sm:$0xff] }
 0x284   : > { %5593 = vmatmul.mubr.msk.bf16.gmra.mrb[56].mxu1 %vm604_vm4, %v7719_v31  ;;  %v3583_v31 = vsel %vm3542_vm9, 1, %v6749_v37  ;;  %vm4148_vm9 = vsmask.f32 5392 }
 0x285   : > { %5979 = vmatmul.mubr.msk.bf16.gmra.mrb[12].mxu0 %vm604_vm4, %v3169_v23  ;;  %5596 = vmatprep.mubr.msk.bf16.mxu1 %vm6748_vm1, %v6747_v2  ;;  %v1785_v23 = vor.u32 %v1784_v15, %v1783_v39  ;;  %v3183_v26 = vsel %vm3160_vm15, %v3180_v53, %v3182_v62  ;;  %v1814_v53 = vrot.slane %v1812_v28, 1  ;;  %v1817_v39 = vrot.slane %v1815_v51, 2 }
 0x286   : > { %5982 = vmatprep.mubr.msk.bf16.mxu0 %vm6748_vm1, %v6747_v2  ;;  %3691 = vperm.xlu1 %6694, %v3583_v31   ;;  %v6733_v31 = vld [vmem:[%s6815_s27 + $0x70] sm:$0xff]   ;;  %v3196_v28 = vrot.slane %v8834_v4, 3 }
 0x287   : > { %3700 = vperm.xlu0 %6693, %v3586_v43   ;;  %v1786_v27 = vsel %vm1735_vm3, %v8836_v12, %v1785_v23  ;;  %v3184_v0 = vrot.slane %v6733_v31, 3  ;;  %v1790_v18 = vsel %vm1735_vm3, %v1785_v23, %v1789_v1  ;;  %v1792_v43 = vrot.slane %v8825_v9, 2  ;;  %v6734_v9 = vld [vmem:[%s6815_s27 + $0x78] sm:$0xff]  }
 0x288   : > { %v3186_v38 = vrot.slane %v6734_v9, 3  ;;  %v1818_v23 = vor.u32 %v1817_v39, %v1814_v53 }
 0x289   : > { %v3185_v16 = vsel %vm3160_vm15, %v3182_v62, %v3184_v0  ;;  %v1793_v19 = vor.u32 %v1792_v43, %v1791_v5 }
 0x28a   : > { %3697 = vperm.xlu1 %6694, %v3585_v3   ;;  %v3187_v45 = vsel %vm3160_vm15, %v3184_v0, %v3186_v38 }
 0x28b   : > { %3706 = vperm.xlu0 %6693, %v3588_v56   ;;  %v1794_v56 = vsel %vm1735_vm3, %v1789_v1, %v1793_v19 }
 0x28c   : > { %5597 = vmatmul.mubr.msk.bf16.gmra.mrb[60].mxu1 %vm604_vm4, %v7733_v34  ;;  %v3587_v34 = vsel %vm3546_vm12, 1, %v6749_v37  ;;  %vm8362_vm12 = vmor %vm4019_vm0, %vm4148_vm9 }
 0x28d   : > { %5983 = vmatmul.mubr.msk.bf16.gmra.mrb[16].mxu0 %vm604_vm4, %v3171_v7  ;;  %5600 = vmatprep.mubr.msk.bf16.mxu1 %vm6748_vm1, %v6747_v2  ;;  %v4021_v7 = vld [vmem:[%s8190_s17 + $0x8] sm:$0x3] }
 0x28e   : > { %5986 = vmatprep.mubr.msk.bf16.mxu0 %vm6748_vm1, %v6747_v2  ;;  %3703 = vperm.xlu1 %6694, %v3587_v34   ;;  %v1797_v34 = vor.u32 %v1796_v48, %v1795_v49 }
 0x28f   : > { %3712 = vperm.xlu0 %6693, %v3590_v59   ;;  %v3188_v59 = vrot.slane %v6735_v8, 3 }
 0x290   : > { %v1798_v63 = vsel %vm1735_vm3, %v1793_v19, %v1797_v34 }
 0x292   : > { %3709 = vperm.xlu1 %6694, %v3589_v30   ;;  %v1801_v30 = vor.u32 %v1800_v58, %v1799_v22 }
 0x294   : > { %5601 = vmatmul.mubr.msk.bf16.gmra.mrb[64].mxu1 %vm604_vm4, %v7747_v20  ;;  %v1476_v20 = vrot.slane %v8834_v4, 1  ;;  %v1802_v25 = vsel %vm1735_vm3, %v1797_v34, %v1801_v30 }
 0x295   : > { %5987 = vmatmul.mubr.msk.bf16.gmra.mrb[20].mxu0 %vm604_vm4, %v3173_v42  ;;  %5604 = vmatprep.mubr.msk.bf16.mxu1 %vm6748_vm1, %v6747_v2  ;;  %v3189_v42 = vsel %vm3160_vm15, %v3186_v38, %v3188_v59 }
 0x296   : > { %5990 = vmatprep.mubr.msk.bf16.mxu0 %vm6748_vm1, %v6747_v2  ;;  %v1477_v44 = vsel %vm1119_vm6, %v7758_v54, %v1476_v20  ;;  %v3179_v54 = vsel %vm3160_vm15, %v3176_v6, %v3178_v11  ;;  %v6737_v6 = vld [vmem:[%s6815_s27 + $0x90] sm:$0xff]   ;;  %v6738_v11 = vld [vmem:[%s6815_s27 + $0x98] sm:$0xff]  }
 0x29c   : > { %5605 = vmatmul.mubr.msk.bf16.gmra.mrb[68].mxu1 %vm604_vm4, %v7764_v52  ;;  %v8835_v52 = vld [vmem:[#allocation22_spill] sm:$0xff] }
 0x29d   : > { %5991 = vmatmul.mubr.msk.bf16.gmra.mrb[24].mxu0 %vm604_vm4, %v3175_v10  ;;  %5608 = vmatprep.mubr.msk.bf16.mxu1 %vm6748_vm1, %v6747_v2  ;;  %v1478_v29 = vrot.slane %v8835_v52, 1  ;;  %v1804_v10 = vrot.slane %v8831_v55, 2  ;;  %v1807_v55 = vrot.slane %v8832_v60, 1  ;;  %v1821_v13 = vshrl.u32 %v8835_v52, 16 }
 0x29e   : > { %5994 = vmatprep.mubr.msk.bf16.mxu0 %vm6748_vm1, %v6747_v2  ;;  %v1824_v62 = vshll.u32 %v8835_v52, 16  ;;  %v3198_v52 = vrot.slane %v7601_v40, 3  ;;  %v3200_v40 = vrot.slane %v7897_v24, 3 }
 0x29f   : > { %v1479_v36 = vsel %vm1119_vm6, %v1476_v20, %v1478_v29  ;;  %vm4018_vm6 = vcmask 58368   ;;  %v3191_v20 = vsel %vm3160_vm15, %v3188_v59, %v3190_v17  ;;  %v1805_v21 = vor.u32 %v1804_v10, %v1803_v35 }
 0x2a0   : > { %vm4020_vm2 = vmand %vm4018_vm6, %vm4019_vm0 }
 0x2a1   : > { %v4022_v3 = vsel %vm4020_vm2, 0, %v4021_v7  ;;  %v1806_v50 = vsel %vm1735_vm3, %v1801_v30, %v1805_v21  ;;  %v3199_v7 = vsel %vm3160_vm15, %v3196_v28, %v3198_v52 }
 0x2a2   : > { %4023 = vst [vmem:[%s8190_s17 + $0x8] sm:$0x3] %v4022_v3 }
 0x2a4   : > { %5609 = vmatmul.mubr.msk.bf16.gmra.mrb[72].mxu1 %vm604_vm4, %v1477_v44  ;;  %v3192_v44 = vrot.slane %v6737_v6, 3 }
 0x2a5   : > { %5995 = vmatmul.mubr.msk.bf16.gmra.mrb[28].mxu0 %vm604_vm4, %v3177_v47  ;;  %5612 = vmatprep.mubr.msk.bf16.mxu1 %vm6748_vm1, %v6747_v2  ;;  %v1808_v47 = vrot.slane %v8833_v61, 2 }
 0x2a6   : > { %5998 = vmatprep.mubr.msk.bf16.mxu0 %vm6748_vm1, %v6747_v2 }
 0x2a7   : > { %v1809_v33 = vor.u32 %v1808_v47, %v1807_v55 }
 0x2a9   : > { %v1810_v61 = vsel %vm1735_vm3, %v1805_v21, %v1809_v33  ;;  %v1819_v12 = vsel %vm1735_vm3, %v1809_v33, %v1818_v23 }
 0x2ac   : > { %5613 = vmatmul.mubr.msk.bf16.gmra.mrb[76].mxu1 %vm604_vm4, %v1479_v36  ;;  %v3194_v36 = vrot.slane %v6738_v11, 3  ;;  %v3593_v11 = vpop.permute.xlu0 %3592 }
 0x2ad   : > { %5999 = vmatmul.mubr.msk.bf16.gmra.mrb[32].mxu0 %vm604_vm4, %v3179_v54  ;;  %5616 = vmatprep.mubr.msk.bf16.mxu1 %vm6748_vm1, %v6747_v2 }
 0x2ae   : > { %6002 = vmatprep.mubr.msk.bf16.mxu0 %vm6748_vm1, %v6747_v2  ;;  %v3197_v31 = vsel %vm3160_vm15, %v3194_v36, %v3196_v28 }
 0x2b4   : > { %5617 = vmatmul.mubr.msk.bf16.gmra.mrb[80].mxu1 %vm604_vm4, %v1478_v29  ;;  %v3193_v29 = vsel %vm3160_vm15, %v3190_v17, %v3192_v44 }
 0x2b5   : > { %6003 = vmatmul.mubr.msk.bf16.gmra.mrb[36].mxu0 %vm604_vm4, %v3181_v57  ;;  %5666 = vmatprep.mubr.msk.bf16.mxu1 %vm6748_vm1, %v6747_v2  ;;  %v3195_v57 = vsel %vm3160_vm15, %v3192_v44, %v3194_v36 }
 0x2b6   : > { %6006 = vmatprep.mubr.msk.bf16.mxu0 %vm6748_vm1, %v6747_v2 }
 0x2bc   : > { %5667 = vmatmul.mubr.msk.bf16.vlgmr.msra.gmra.mrb[44].mxu1 %vm604_vm4, %v1786_v27  ;;  %v1823_v27 = vrot.slane %v1821_v13, 1 }
 0x2bd   : > { %6007 = vmatmul.mubr.msk.bf16.gmra.mrb[40].mxu0 %vm604_vm4, %v3183_v26  ;;  %5670 = vmatprep.mubr.msk.bf16.mxu1 %vm6748_vm1, %v6747_v2  ;;  %v1826_v26 = vrot.slane %v1824_v62, 2 }
 0x2be   : > { %6010 = vmatprep.mubr.msk.bf16.mxu0 %vm6748_vm1, %v6747_v2 }
 0x2bf   : > { %v1827_v4 = vor.u32 %v1826_v26, %v1823_v27 }
 0x2c1   : > { %v1828_v43 = vsel %vm1735_vm3, %v1818_v23, %v1827_v4 }
 0x2c4   : > { %5671 = vmatmul.mubr.msk.bf16.gmra.mrb[48].mxu1 %vm604_vm4, %v1790_v18 }
 0x2c5   : > { %6011 = vmatmul.mubr.msk.bf16.gmra.mrb[44].mxu0 %vm604_vm4, %v3185_v16  ;;  %5674 = vmatprep.mubr.msk.bf16.mxu1 %vm6748_vm1, %v6747_v2 }
 0x2c6   : > { %6014 = vmatprep.mubr.msk.bf16.mxu0 %vm6748_vm1, %v6747_v2 }
 0x2cc   : > { %5675 = vmatmul.mubr.msk.bf16.gmra.mrb[52].mxu1 %vm604_vm4, %v1794_v56  ;;  %v3201_v56 = vsel %vm3160_vm15, %v3198_v52, %v3200_v40  ;;  %vm4599_vm15 = vcmask 60417  }
 0x2cd   : > { %6015 = vmatmul.mubr.msk.bf16.gmra.mrb[48].mxu0 %vm604_vm4, %v3187_v45  ;;  %5678 = vmatprep.mubr.msk.bf16.mxu1 %vm6748_vm1, %v6747_v2  ;;  %vm8352_vm7 = vmand %vm4599_vm15, %vm4600_vm8 }
 0x2ce   : > { %6018 = vmatprep.mubr.msk.bf16.mxu0 %vm6748_vm1, %v6747_v2 }
 0x2d4   : > { %5679 = vmatmul.mubr.msk.bf16.gmra.mrb[56].mxu1 %vm604_vm4, %v1798_v63 }
 0x2d5   : > { %6019 = vmatmul.mubr.msk.bf16.gmra.mrb[52].mxu0 %vm604_vm4, %v3189_v42  ;;  %5682 = vmatprep.mubr.msk.bf16.mxu1 %vm6748_vm1, %v6747_v2 }
 0x2d6   : > { %6022 = vmatprep.mubr.msk.bf16.mxu0 %vm6748_vm1, %v6747_v2 }
 0x2dc   : > { %5683 = vmatmul.mubr.msk.bf16.gmra.mrb[60].mxu1 %vm604_vm4, %v1802_v25 }
 0x2dd   : > { %6023 = vmatmul.mubr.msk.bf16.gmra.mrb[56].mxu0 %vm604_vm4, %v3191_v20  ;;  %5686 = vmatprep.mubr.msk.bf16.mxu1 %vm6748_vm1, %v6747_v2 }
 0x2de   : > { %6026 = vmatprep.mubr.msk.bf16.mxu0 %vm6748_vm1, %v6747_v2 }
 0x2e4   : > { %5687 = vmatmul.mubr.msk.bf16.gmra.mrb[64].mxu1 %vm604_vm4, %v1806_v50 }
 0x2e5   : > { %6027 = vmatmul.mubr.msk.bf16.gmra.mrb[60].mxu0 %vm604_vm4, %v3193_v29  ;;  %5690 = vmatprep.mubr.msk.bf16.mxu1 %vm6748_vm1, %v6747_v2 }
 0x2e6   : > { %6030 = vmatprep.mubr.msk.bf16.mxu0 %vm6748_vm1, %v6747_v2 }
 0x2e7   : > { %v8262_v54 = vpop.f32.mrb[0].mxu1 }
 0x2e8   : > { %v5538_v60 = vpop.f32.mrb[1].mxu1 }
 0x2e9   : > { %v8264_v41 = vpop.f32.mrb[2].mxu1  ;;  %v3596_v60 = vpop.permute.xlu0 %3595 }
 0x2ea   : > { %v5539_v15 = vpop.f32.mrb[3].mxu1  ;;  %vm3715_vm3 = vcmp.eq.s32.totalorder %v3596_v60, 1 }
 0x2eb   : > { %v3599_v15 = vpop.permute.xlu1 %3598 }
 0x2ec   : > { %5691 = vmatmul.mubr.msk.bf16.gmra.mrb[68].mxu1 %vm604_vm4, %v1810_v61  ;;  %vm3716_vm10 = vcmp.eq.s32.totalorder %v3599_v15, 1 }
 0x2ed   : > { %6031 = vmatmul.mubr.msk.bf16.gmra.mrb[64].mxu0 %vm604_vm4, %v3195_v57  ;;  %5694 = vmatprep.mubr.msk.bf16.mxu1 %vm6748_vm1, %v6747_v2  ;;  %v3605_v15 = vpop.permute.xlu0 %3604 }
 0x2ee   : > { %6034 = vmatprep.mubr.msk.bf16.mxu0 %vm6748_vm1, %v6747_v2  ;;  %vm3718_vm13 = vcmp.eq.s32.totalorder %v3605_v15, 1 }
 0x2ef   : > { %v8281_v51 = vpop.f32.mrb[4].mxu1 }
 0x2f0   : > { %v5542_v32 = vpop.f32.mrb[5].mxu1 }
 0x2f1   : > { %v8283_v46 = vpop.f32.mrb[6].mxu1 }
 0x2f2   : > { %v5543_v1 = vpop.f32.mrb[7].mxu1 }
 0x2f4   : > { %5695 = vmatmul.mubr.msk.bf16.gmra.mrb[72].mxu1 %vm604_vm4, %v1819_v12 }
 0x2f5   : > { %6035 = vmatmul.mubr.msk.bf16.gmra.mrb[68].mxu0 %vm604_vm4, %v3197_v31  ;;  %5698 = vmatprep.mubr.msk.bf16.mxu1 %vm6748_vm1, %v6747_v2 }
 0x2f6   : > { %6038 = vmatprep.mubr.msk.bf16.mxu0 %vm6748_vm1, %v6747_v2 }
 0x2f7   : > { %v8294_v0 = vpop.f32.mrb[8].mxu1 }
 0x2f8   : > { %v5546_v18 = vpop.f32.mrb[9].mxu1 }
 0x2f9   : > { %v8296_v5 = vpop.f32.mrb[10].mxu1  ;;  %v3602_v18 = vpop.permute.xlu1 %3601 }
 0x2fa   : > { %v5547_v16 = vpop.f32.mrb[11].mxu1  ;;  %vm3717_vm11 = vcmp.eq.s32.totalorder %v3602_v18, 1 }
 0x2fc   : > { %5699 = vmatmul.mubr.msk.bf16.gmra.mrb[76].mxu1 %vm604_vm4, %v1828_v43 }
 0x2fd   : > { %6039 = vmatmul.mubr.msk.bf16.gmra.mrb[72].mxu0 %vm604_vm4, %v3199_v7  ;;  %5702 = vmatprep.mubr.msk.bf16.mxu1 %vm6748_vm1, %v6747_v2  ;;  %v3608_v18 = vpop.permute.xlu1 %3607 }
 0x2fe   : > { %6042 = vmatprep.mubr.msk.bf16.mxu0 %vm6748_vm1, %v6747_v2  ;;  %vm3719_vm14 = vcmp.eq.s32.totalorder %v3608_v18, 1 }
 0x2ff   : > { %v8307_v3 = vpop.f32.mrb[12].mxu1 }
 0x300   : > { %v5550_v19 = vpop.f32.mrb[13].mxu1 }
 0x301   : > { %v8309_v9 = vpop.f32.mrb[14].mxu1  ;;  %v4602_v19 = vld [vmem:[%s8190_s17 + $0x8] sm:$0xe] }
 0x302   : > { %v5551_v38 = vpop.f32.mrb[15].mxu1 }
 0x304   : > { %5703 = vmatmul.mubr.msk.bf16.gmra.mrb[80].mxu1 %vm604_vm4, %v1827_v4 }
 0x305   : > { %6043 = vmatmul.mubr.msk.bf16.gmra.mrb[76].mxu0 %vm604_vm4, %v3201_v56 }
 0x306   : > { %6046 = vmatprep.mubr.msk.bf16.mxu0 %vm6748_vm1, %v6747_v2  ;;  %vm3714_vm1 = vcmp.eq.s32.totalorder %v3593_v11, 1 }
 0x307   : > { %v8316_v49 = vpop.f32.mrb[16].mxu1 }
 0x308   : > { %v5554_v48 = vpop.f32.mrb[17].mxu1 }
 0x309   : > { %v8318_v45 = vpop.f32.mrb[18].mxu1 }
 0x30a   : > { %v5555_v24 = vpop.f32.mrb[19].mxu1 }
 0x30d   : > { %6047 = vmatmul.mubr.msk.bf16.gmra.mrb[80].mxu0 %vm604_vm4, %v3200_v40  ;;  %vm3796_vm4 = vcmask 64512  }
 0x30f   : > { %v8321_v34 = vpop.f32.mrb[20].mxu1 }
 0x310   : > { %v5558_v8 = vpop.f32.mrb[21].mxu1 }
 0x311   : > { %v8323_v59 = vpop.f32.mrb[22].mxu1 }
 0x312   : > { %v5559_v63 = vpop.f32.mrb[23].mxu1 }
 0x317   : > { %v8325_v22 = vpop.f32.mrb[24].mxu1 }
 0x318   : > { %v5562_v58 = vpop.f32.mrb[25].mxu1 }
 0x319   : > { %v8327_v42 = vpop.f32.mrb[26].mxu1 }
 0x31a   : > { %v5563_v2 = vpop.f32.mrb[27].mxu1 }
 0x31f   : > { %v8329_v30 = vpop.f32.mrb[28].mxu1 }
 0x320   : > { %v5566_v14 = vpop.f32.mrb[29].mxu1 }
 0x321   : > { %v8331_v17 = vpop.f32.mrb[30].mxu1 }
 0x322   : > { %v5567_v25 = vpop.f32.mrb[31].mxu1 }
 0x327   : > { %v8333_v35 = vpop.f32.mrb[32].mxu1 }
 0x328   : > { %v5570_v10 = vpop.f32.mrb[33].mxu1 }
 0x329   : > { %v8335_v20 = vpop.f32.mrb[34].mxu1 }
 0x32a   : > { %v5571_v21 = vpop.f32.mrb[35].mxu1 }
 0x32f   : > { %v8337_v6 = vpop.f32.mrb[36].mxu1 }
 0x330   : > { %v5574_v44 = vpop.f32.mrb[37].mxu1 }
 0x331   : > { %v8339_v50 = vpop.f32.mrb[38].mxu1 }
 0x332   : > { %v5575_v55 = vpop.f32.mrb[39].mxu1 }
 0x337   : > { %v8341_v47 = vpop.f32.mrb[40].mxu1 }
 0x338   : > { %v5578_v29 = vpop.f32.mrb[41].mxu1 }
 0x339   : > { %v8343_v33 = vpop.f32.mrb[42].mxu1 }
 0x33a   : > { %v5579_v36 = vpop.f32.mrb[43].mxu1 }
 0x340   : > { %v3302_v61 = vpop.f32.mrb[0].mxu0 }
 0x341   : > { %v6052_v53 = vadd.f32 %v3302_v61, %v8262_v54  ;;  %v5968_v39 = vpop.f32.mrb[1].mxu0 }
 0x342   : > { %v3305_v57 = vpop.f32.mrb[2].mxu0 }
 0x343   : > { %v3755_v23 = vsel %vm3714_vm1, %v6052_v53, 0.0  ;;  %v6053_v13 = vadd.f32 %v3305_v57, %v8264_v41  ;;  %v5969_v62 = vpop.f32.mrb[3].mxu0 }
 0x344   : > { %v3887_v28 = vmul.f32 %v3755_v23, %v3755_v23  ;;  %v5037_v32 = vpack.c.bf16 %v3755_v23, %v3755_v23  ;;  %v3797_v27 = vsel %vm3796_vm4, %v3755_v23, 0.0 }
 0x345   : > { %v3756_v12 = vsel %vm3715_vm3, %v6053_v13, 0.0 }
 0x346   : > { %v4151_v26 = vshrl.u32 %v5037_v32, 16  ;;  %v4154_v1 = vshll.u32 %v5037_v32, 16  ;;  %v3798_v54 = vsel %vm3796_vm4, %v3756_v12, 0.0  ;;  %v3888_v4 = vmul.f32 %v3756_v12, %v3756_v12 }
 0x347   : > { %v3799_v31 = vadd.f32 %v3798_v54, %v3797_v27  ;;  %v5038_v52 = vpack.c.bf16 %v3756_v12, %v3756_v12  ;;  %v3928_v41 = vsel %vm3796_vm4, %v3887_v28, 0.0 }
 0x348   : > { %v4153_v43 = vrot.slane %v4151_v26, 6  ;;  %v4156_v16 = vrot.slane %v4154_v1, 7  ;;  %v3310_v7 = vpop.f32.mrb[4].mxu0  ;;  %v3929_v38 = vsel %vm3796_vm4, %v3888_v4, 0.0 }
 0x349   : > { %v4160_v56 = vshrl.u32 %v5038_v52, 16  ;;  %v4163_v48 = vshll.u32 %v5038_v52, 16  ;;  %v6054_v24 = vadd.f32 %v3310_v7, %v8281_v51  ;;  %v5972_v8 = vpop.f32.mrb[5].mxu0  ;;  %v3930_v58 = vadd.f32 %v3929_v38, %v3928_v41 }
 0x34a   : > { %v4157_v63 = vor.u32 %v4156_v16, %v4153_v43  ;;  %v3313_v2 = vpop.f32.mrb[6].mxu0 }
 0x34b   : > { %v4162_v14 = vrot.slane %v4160_v56, 6  ;;  %v4165_v25 = vrot.slane %v4163_v48, 7  ;;  %v3757_v10 = vsel %vm3716_vm10, %v6054_v24, 0.0  ;;  %v6055_v21 = vadd.f32 %v3313_v2, %v8283_v46  ;;  %v5973_v44 = vpop.f32.mrb[7].mxu0 }
 0x34c   : > { %v4158_v29 = vrot.slane %v4157_v63, 4  ;;  %v4603_v51 = vsel %vm8352_vm7, %v4157_v63, %v4602_v19  ;;  %v3800_v11 = vsel %vm3796_vm4, %v3757_v10, 0.0  ;;  %v3889_v36 = vmul.f32 %v3757_v10, %v3757_v10 }
 0x34d   : > { %4604 = vst [vmem:[%s8190_s17 + $0x8] sm:$0xe] %v4603_v51  ;;  %v4166_v60 = vor.u32 %v4165_v25, %v4162_v14  ;;  %v3801_v61 = vadd.f32 %v3800_v11, %v3799_v31  ;;  %v5039_v53 = vpack.c.bf16 %v3757_v10, %v3757_v10  ;;  %v3758_v46 = vsel %vm3717_vm11, %v6055_v21, 0.0 }
 0x34e   : > { %v3931_v39 = vsel %vm3796_vm4, %v3889_v36, 0.0  ;;  %v3802_v57 = vsel %vm3796_vm4, %v3758_v46, 0.0  ;;  %v3890_v23 = vmul.f32 %v3758_v46, %v3758_v46  ;;  %v5040_v13 = vpack.c.bf16 %v3758_v46, %v3758_v46 }
 0x34f   : > { %v4167_v62 = vsel %vm8362_vm12, %v4158_v29, %v4166_v60  ;;  %v3932_v28 = vadd.f32 %v3931_v39, %v3930_v58  ;;  %v4170_v32 = vshrl.u32 %v5039_v53, 16  ;;  %v4173_v12 = vshll.u32 %v5039_v53, 16 }
 0x350   : > { %4605 = vst.msk [vmem:[%s8190_s17 + $0xc] sm:$0xf] %vm3876_vm5, %v4167_v62  ;;  %v3803_v27 = vadd.f32 %v3802_v57, %v3801_v61  ;;  %v3933_v26 = vsel %vm3796_vm4, %v3890_v23, 0.0  ;;  %v4180_v1 = vshrl.u32 %v5040_v13, 16  ;;  %v3318_v54 = vpop.f32.mrb[8].mxu0  ;;  %v4183_v52 = vshll.u32 %v5040_v13, 16  ;;  %v3614_v23 = vpop.permute.xlu1 %3613 }
 0x351   : > { %v4172_v31 = vrot.slane %v4170_v32, 6  ;;  %v3934_v4 = vadd.f32 %v3933_v26, %v3932_v28  ;;  %v6056_v41 = vadd.f32 %v3318_v54, %v8294_v0  ;;  %v5976_v43 = vpop.f32.mrb[9].mxu0  ;;  %v4175_v16 = vrot.slane %v4173_v12, 7  ;;  %v3611_v0 = vpop.permute.xlu0 %3610 }
 0x352   : > { %v4182_v7 = vrot.slane %v4180_v1, 6  ;;  %v3321_v40 = vpop.f32.mrb[10].mxu0  ;;  %v4168_v19 = vrot.slane %v4166_v60, 4  ;;  %v4185_v38 = vrot.slane %v4183_v52, 7  ;;  %vm3720_vm6 = vcmp.eq.s32.totalorder %v3611_v0, 1 }
 0x353   : > { %v3759_v56 = vsel %vm3718_vm13, %v6056_v41, 0.0  ;;  %v6057_v48 = vadd.f32 %v3321_v40, %v8296_v5  ;;  %v5977_v24 = vpop.f32.mrb[11].mxu0  ;;  %v4176_v8 = vor.u32 %v4175_v16, %v4172_v31  ;;  %vm3721_vm0 = vcmp.eq.s32.totalorder %v3614_v23, 1 }
 0x354   : > { %v3804_v63 = vsel %vm3796_vm4, %v3759_v56, 0.0  ;;  %v3891_v58 = vmul.f32 %v3759_v56, %v3759_v56  ;;  %v5041_v2 = vpack.c.bf16 %v3759_v56, %v3759_v56  ;;  %v4186_v14 = vor.u32 %v4185_v38, %v4182_v7 }
 0x355   : > { %v3805_v25 = vadd.f32 %v3804_v63, %v3803_v27  ;;  %v3760_v10 = vsel %vm3719_vm14, %v6057_v48, 0.0  ;;  %v4177_v21 = vsel %vm8362_vm12, %v4168_v19, %v4176_v8  ;;  %v4178_v44 = vrot.slane %v4176_v8, 4  ;;  %v3617_v26 = vpop.permute.xlu0 %3616  ;;  %v3620_v8 = vpop.permute.xlu1 %3619 }
 0x356   : > { %v3935_v29 = vsel %vm3796_vm4, %v3891_v58, 0.0  ;;  %v4190_v51 = vshrl.u32 %v5041_v2, 16  ;;  %4606 = vst.msk [vmem:[%s8190_s17 + $0x10] sm:$0xf] %vm3876_vm5, %v4177_v21  ;;  %v4193_v11 = vshll.u32 %v5041_v2, 16  ;;  %v3806_v36 = vsel %vm3796_vm4, %v3760_v10, 0.0 }
 0x357   : > { %v3936_v5 = vadd.f32 %v3935_v29, %v3934_v4  ;;  %v4187_v60 = vsel %vm8362_vm12, %v4178_v44, %v4186_v14  ;;  %v3807_v53 = vadd.f32 %v3806_v36, %v3805_v25  ;;  %v3892_v46 = vmul.f32 %v3760_v10, %v3760_v10 }
 0x358   : > { %v4192_v61 = vrot.slane %v4190_v51, 6  ;;  %v3326_v39 = vpop.f32.mrb[12].mxu0  ;;  %4607 = vst.msk [vmem:[%s8190_s17 + $0x14] sm:$0xf] %vm3876_vm5, %v4187_v60  ;;  %v4195_v15 = vrot.slane %v4193_v11, 7  ;;  %v5042_v57 = vpack.c.bf16 %v3760_v10, %v3760_v10  ;;  %v4188_v28 = vrot.slane %v4186_v14, 4 }
 0x359   : > { %v6058_v13 = vadd.f32 %v3326_v39, %v8307_v3  ;;  %v5980_v62 = vpop.f32.mrb[13].mxu0  ;;  %v3937_v32 = vsel %vm3796_vm4, %v3892_v46, 0.0  ;;  %vm3722_vm2 = vcmp.eq.s32.totalorder %v3617_v26, 1  ;;  %vm3723_vm1 = vcmp.eq.s32.totalorder %v3620_v8, 1 }
 0x35a   : > { %v3329_v12 = vpop.f32.mrb[14].mxu0  ;;  %v4196_v27 = vor.u32 %v4195_v15, %v4192_v61  ;;  %v3938_v1 = vadd.f32 %v3937_v32, %v3936_v5  ;;  %v4200_v54 = vshrl.u32 %v5042_v57, 16  ;;  %v4203_v31 = vshll.u32 %v5042_v57, 16  ;;  %v3623_v32 = vpop.permute.xlu0 %3622 }
 0x35b   : > { %v5981_v4 = vpop.f32.mrb[15].mxu0  ;;  %v3761_v52 = vsel %vm3720_vm6, %v6058_v13, 0.0  ;;  %v6059_v18 = vadd.f32 %v3329_v12, %v8309_v9  ;;  %vm3724_vm3 = vcmp.eq.s32.totalorder %v3623_v32, 1  ;;  %vm3885_vm10 = vcmask 57344  }
 0x35c   : > { %v4197_v3 = vsel %vm8362_vm12, %v4188_v28, %v4196_v27  ;;  %v4198_v41 = vrot.slane %v4196_v27, 4  ;;  %v4202_v43 = vrot.slane %v4200_v54, 6  ;;  %v4205_v16 = vrot.slane %v4203_v31, 7  ;;  %4658 = vst.msk [vmem:[%s8190_s17 + $0xb4] sm:$0x1] %vm3885_vm10, %v6749_v37 }
 0x35d   : > { %4608 = vst.msk [vmem:[%s8190_s17 + $0x18] sm:$0xf] %vm3876_vm5, %v4197_v3  ;;  %v3808_v7 = vsel %vm3796_vm4, %v3761_v52, 0.0  ;;  %v3893_v40 = vmul.f32 %v3761_v52, %v3761_v52  ;;  %v5043_v19 = vpack.c.bf16 %v3761_v52, %v3761_v52  ;;  %v3762_v38 = vsel %vm3721_vm0, %v6059_v18, 0.0 }
 0x35e   : > { %v4206_v56 = vor.u32 %v4205_v16, %v4202_v43  ;;  %v3809_v48 = vadd.f32 %v3808_v7, %v3807_v53  ;;  %v3810_v24 = vsel %vm3796_vm4, %v3762_v38, 0.0  ;;  %v3894_v9 = vmul.f32 %v3762_v38, %v3762_v38  ;;  %v3626_v43 = vpop.permute.xlu1 %3625 }
 0x35f   : > { %v3939_v63 = vsel %vm3796_vm4, %v3893_v40, 0.0  ;;  %v4210_v58 = vshrl.u32 %v5043_v19, 16  ;;  %v4213_v2 = vshll.u32 %v5043_v19, 16  ;;  %v5044_v14 = vpack.c.bf16 %v3762_v38, %v3762_v38 }
 0x360   : > { %v3334_v0 = vpop.f32.mrb[16].mxu0  ;;  %v4207_v25 = vsel %vm8362_vm12, %v4198_v41, %v4206_v56  ;;  %v3940_v10 = vadd.f32 %v3939_v63, %v3938_v1  ;;  %v3811_v21 = vadd.f32 %v3810_v24, %v3809_v48  ;;  %v3941_v5 = vsel %vm3796_vm4, %v3894_v9, 0.0 }
 0x361   : > { %v5984_v44 = vpop.f32.mrb[17].mxu0  ;;  %4609 = vst.msk [vmem:[%s8190_s17 + $0x1c] sm:$0xf] %vm3876_vm5, %v4207_v25  ;;  %v4212_v29 = vrot.slane %v4210_v58, 6  ;;  %v4215_v51 = vrot.slane %v4213_v2, 7  ;;  %v4220_v11 = vshrl.u32 %v5044_v14, 16  ;;  %v6060_v53 = vadd.f32 %v3334_v0, %v8316_v49 }
 0x362   : > { %v3337_v36 = vpop.f32.mrb[18].mxu0  ;;  %v3942_v60 = vadd.f32 %v3941_v5, %v3940_v10  ;;  %v4223_v61 = vshll.u32 %v5044_v14, 16  ;;  %v4208_v15 = vrot.slane %v4206_v56, 4  ;;  %v3629_v14 = vpop.permute.xlu0 %3628  ;;  %vm3725_vm15 = vcmp.eq.s32.totalorder %v3626_v43, 1 }
 0x363   : > { %v6061_v46 = vadd.f32 %v3337_v36, %v8318_v45  ;;  %v5985_v39 = vpop.f32.mrb[19].mxu0  ;;  %v4216_v57 = vor.u32 %v4215_v51, %v4212_v29  ;;  %v4222_v23 = vrot.slane %v4220_v11, 6  ;;  %v3763_v62 = vsel %vm3722_vm2, %v6060_v53, 0.0 }
 0x364   : > { %v4225_v13 = vrot.slane %v4223_v61, 7  ;;  %v3812_v1 = vsel %vm3796_vm4, %v3763_v62, 0.0  ;;  %v3895_v54 = vmul.f32 %v3763_v62, %v3763_v62  ;;  %v5045_v31 = vpack.c.bf16 %v3763_v62, %v3763_v62 }
 0x365   : > { %v3764_v28 = vsel %vm3723_vm1, %v6061_v46, 0.0  ;;  %v4217_v12 = vsel %vm8362_vm12, %v4208_v15, %v4216_v57  ;;  %v4218_v27 = vrot.slane %v4216_v57, 4  ;;  %v3813_v45 = vadd.f32 %v3812_v1, %v3811_v21 }
 0x366   : > { %4610 = vst.msk [vmem:[%s8190_s17 + $0x20] sm:$0xf] %vm3876_vm5, %v4217_v12  ;;  %v4226_v49 = vor.u32 %v4225_v13, %v4222_v23  ;;  %v3814_v4 = vsel %vm3796_vm4, %v3764_v28, 0.0  ;;  %v3943_v26 = vsel %vm3796_vm4, %v3895_v54, 0.0  ;;  %v3896_v52 = vmul.f32 %v3764_v28, %v3764_v28  ;;  %v3635_v32 = vpop.permute.xlu0 %3634 }
 0x367   : > { %v5046_v18 = vpack.c.bf16 %v3764_v28, %v3764_v28  ;;  %v3944_v16 = vadd.f32 %v3943_v26, %v3942_v60  ;;  %v4230_v7 = vshrl.u32 %v5045_v31, 16  ;;  %v4233_v19 = vshll.u32 %v5045_v31, 16  ;;  %v3632_v60 = vpop.permute.xlu1 %3631 }
 0x368   : > { %v3342_v3 = vpop.f32.mrb[20].mxu0  ;;  %v4227_v41 = vsel %vm8362_vm12, %v4218_v27, %v4226_v49  ;;  %v3815_v38 = vadd.f32 %v3814_v4, %v3813_v45  ;;  %v3945_v56 = vsel %vm3796_vm4, %v3896_v52, 0.0  ;;  %v4228_v21 = vrot.slane %v4226_v49, 4 }
 0x369   : > { %v5988_v40 = vpop.f32.mrb[21].mxu0  ;;  %4611 = vst.msk [vmem:[%s8190_s17 + $0x24] sm:$0xf] %vm3876_vm5, %v4227_v41  ;;  %v4240_v48 = vshrl.u32 %v5046_v18, 16  ;;  %v4232_v9 = vrot.slane %v4230_v7, 6  ;;  %v3946_v8 = vadd.f32 %v3945_v56, %v3944_v16  ;;  %v4243_v63 = vshll.u32 %v5046_v18, 16 }
 0x36a   : > { %v3345_v24 = vpop.f32.mrb[22].mxu0  ;;  %v6062_v58 = vadd.f32 %v3342_v3, %v8321_v34  ;;  %v4235_v0 = vrot.slane %v4233_v19, 7  ;;  %vm3726_vm8 = vcmp.eq.s32.totalorder %v3629_v14, 1  ;;  %vm3727_vm9 = vcmp.eq.s32.totalorder %v3632_v60, 1 }
 0x36b   : > { %v5989_v2 = vpop.f32.mrb[23].mxu0  ;;  %v4242_v25 = vrot.slane %v4240_v48, 6  ;;  %v6063_v10 = vadd.f32 %v3345_v24, %v8323_v59  ;;  %v4245_v44 = vrot.slane %v4243_v63, 7  ;;  %v3638_v41 = vpop.permute.xlu1 %3637  ;;  %vm3728_vm7 = vcmp.eq.s32.totalorder %v3635_v32, 1 }
 0x36c   : > { %v3765_v29 = vsel %vm3724_vm3, %v6062_v58, 0.0  ;;  %v4236_v51 = vor.u32 %v4235_v0, %v4232_v9  ;;  %vm3729_vm11 = vcmp.eq.s32.totalorder %v3638_v41, 1  ;;  %v8448_v24 = vpop.permute.xlu0 %3640 }
 0x36d   : > { %v3816_v5 = vsel %vm3796_vm4, %v3765_v29, 0.0  ;;  %v3897_v11 = vmul.f32 %v3765_v29, %v3765_v29  ;;  %v5047_v36 = vpack.c.bf16 %v3765_v29, %v3765_v29  ;;  %v4246_v34 = vor.u32 %v4245_v44, %v4242_v25 }
 0x36e   : > { %v3817_v61 = vadd.f32 %v3816_v5, %v3815_v38  ;;  %v3766_v53 = vsel %vm3725_vm15, %v6063_v10, 0.0  ;;  %v4237_v46 = vsel %vm8362_vm12, %v4228_v21, %v4236_v51  ;;  %v4238_v39 = vrot.slane %v4236_v51, 4 }
 0x36f   : > { %v3947_v59 = vsel %vm3796_vm4, %v3897_v11, 0.0  ;;  %v4250_v15 = vshrl.u32 %v5047_v36, 16  ;;  %4612 = vst.msk [vmem:[%s8190_s17 + $0x28] sm:$0xf] %vm3876_vm5, %v4237_v46  ;;  %v4253_v13 = vshll.u32 %v5047_v36, 16  ;;  %v3818_v62 = vsel %vm3796_vm4, %v3766_v53, 0.0 }
 0x370   : > { %v3350_v57 = vpop.f32.mrb[24].mxu0  ;;  %v3948_v23 = vadd.f32 %v3947_v59, %v3946_v8  ;;  %v4247_v12 = vsel %vm8362_vm12, %v4238_v39, %v4246_v34  ;;  %v3819_v1 = vadd.f32 %v3818_v62, %v3817_v61  ;;  %v3898_v54 = vmul.f32 %v3766_v53, %v3766_v53 }
 0x371   : > { %v5992_v28 = vpop.f32.mrb[25].mxu0  ;;  %v4252_v27 = vrot.slane %v4250_v15, 6  ;;  %4613 = vst.msk [vmem:[%s8190_s17 + $0x2c] sm:$0xf] %vm3876_vm5, %v4247_v12  ;;  %v4255_v45 = vrot.slane %v4253_v13, 7  ;;  %v5048_v31 = vpack.c.bf16 %v3766_v53, %v3766_v53  ;;  %v6064_v4 = vadd.f32 %v3350_v57, %v8325_v22  ;;  %v8462_v15 = vpop.permute.xlu1 %3643 }
 0x372   : > { %v3353_v49 = vpop.f32.mrb[26].mxu0  ;;  %v4248_v18 = vrot.slane %v4246_v34, 4  ;;  %v3949_v3 = vsel %vm3796_vm4, %v3898_v54, 0.0  ;;  %vm3730_vm13 = vcmp.eq.s32.totalorder %v8448_v24, 1  ;;  %vm3731_vm14 = vcmp.eq.s32.totalorder %v8462_v15, 1 }
 0x373   : > { %v6065_v26 = vadd.f32 %v3353_v49, %v8327_v42  ;;  %v5993_v52 = vpop.f32.mrb[27].mxu0  ;;  %v4256_v43 = vor.u32 %v4255_v45, %v4252_v27  ;;  %v3950_v16 = vadd.f32 %v3949_v3, %v3948_v23  ;;  %v4260_v7 = vshrl.u32 %v5048_v31, 16 }
 0x374   : > { %v4263_v40 = vshll.u32 %v5048_v31, 16  ;;  %v3767_v22 = vsel %vm3726_vm8, %v6064_v4, 0.0 }
 0x375   : > { %v3768_v42 = vsel %vm3727_vm9, %v6065_v26, 0.0  ;;  %v4257_v19 = vsel %vm8362_vm12, %v4248_v18, %v4256_v43  ;;  %v4258_v38 = vrot.slane %v4256_v43, 4  ;;  %v4262_v56 = vrot.slane %v4260_v7, 6 }
 0x376   : > { %v4265_v48 = vrot.slane %v4263_v40, 7  ;;  %4614 = vst.msk [vmem:[%s8190_s17 + $0x30] sm:$0xf] %vm3876_vm5, %v4257_v19  ;;  %v3820_v9 = vsel %vm3796_vm4, %v3767_v22, 0.0  ;;  %v3899_v8 = vmul.f32 %v3767_v22, %v3767_v22  ;;  %v5049_v37 = vpack.c.bf16 %v3767_v22, %v3767_v22 }
 0x377   : > { %v3822_v63 = vsel %vm3796_vm4, %v3768_v42, 0.0  ;;  %v3821_v14 = vadd.f32 %v3820_v9, %v3819_v1  ;;  %v3900_v0 = vmul.f32 %v3768_v42, %v3768_v42  ;;  %v5050_v25 = vpack.c.bf16 %v3768_v42, %v3768_v42  ;;  %v8468_v1 = vpop.permute.xlu0 %3646 }
 0x378   : > { %v3358_v58 = vpop.f32.mrb[28].mxu0  ;;  %v4266_v2 = vor.u32 %v4265_v48, %v4262_v56  ;;  %v3951_v21 = vsel %vm3796_vm4, %v3899_v8, 0.0  ;;  %v4270_v44 = vshrl.u32 %v5049_v37, 16  ;;  %v4273_v29 = vshll.u32 %v5049_v37, 16 }
 0x379   : > { %v5996_v10 = vpop.f32.mrb[29].mxu0  ;;  %v6066_v51 = vadd.f32 %v3358_v58, %v8329_v30  ;;  %v3952_v60 = vadd.f32 %v3951_v21, %v3950_v16  ;;  %v3823_v34 = vadd.f32 %v3822_v63, %v3821_v14  ;;  %v3953_v39 = vsel %vm3796_vm4, %v3900_v0, 0.0 }
 0x37a   : > { %v3361_v5 = vpop.f32.mrb[30].mxu0  ;;  %v4267_v11 = vsel %vm8362_vm12, %v4258_v38, %v4266_v2  ;;  %v4268_v36 = vrot.slane %v4266_v2, 4  ;;  %v4272_v53 = vrot.slane %v4270_v44, 6  ;;  %v4275_v46 = vrot.slane %v4273_v29, 7 }
 0x37b   : > { %v5997_v61 = vpop.f32.mrb[31].mxu0  ;;  %4615 = vst.msk [vmem:[%s8190_s17 + $0x34] sm:$0xf] %vm3876_vm5, %v4267_v11  ;;  %v4280_v59 = vshrl.u32 %v5050_v25, 16  ;;  %v3954_v57 = vadd.f32 %v3953_v39, %v3952_v60  ;;  %v4283_v23 = vshll.u32 %v5050_v25, 16  ;;  %v3769_v30 = vsel %vm3728_vm7, %v6066_v51, 0.0  ;;  %v8487_v51 = vpop.permute.xlu0 %3652 }
 0x37c   : > { %v6067_v13 = vadd.f32 %v3361_v5, %v8331_v17  ;;  %v4276_v62 = vor.u32 %v4275_v46, %v4272_v53  ;;  %v3824_v12 = vsel %vm3796_vm4, %v3769_v30, 0.0  ;;  %v3901_v27 = vmul.f32 %v3769_v30, %v3769_v30  ;;  %v3650_v60 = vpop.permute.xlu1 %3649 }
 0x37d   : > { %v4282_v28 = vrot.slane %v4280_v59, 6  ;;  %v4285_v54 = vrot.slane %v4283_v23, 7  ;;  %v3825_v49 = vadd.f32 %v3824_v12, %v3823_v34  ;;  %v5051_v45 = vpack.c.bf16 %v3769_v30, %v3769_v30 }
 0x37e   : > { %v3770_v31 = vsel %vm3729_vm11, %v6067_v13, 0.0  ;;  %vm3732_vm6 = vcmp.eq.s32.totalorder %v8468_v1, 1  ;;  %v4277_v17 = vsel %vm8362_vm12, %v4268_v36, %v4276_v62  ;;  %v4278_v32 = vrot.slane %v4276_v62, 4 }
 0x37f   : > { %v3955_v4 = vsel %vm3796_vm4, %v3901_v27, 0.0  ;;  %v3826_v26 = vsel %vm3796_vm4, %v3770_v31, 0.0  ;;  %4616 = vst.msk [vmem:[%s8190_s17 + $0x38] sm:$0xf] %vm3876_vm5, %v4277_v17  ;;  %v4286_v18 = vor.u32 %v4285_v54, %v4282_v28  ;;  %v4290_v43 = vshrl.u32 %v5051_v45, 16 }
 0x380   : > { %v3366_v52 = vpop.f32.mrb[32].mxu0  ;;  %v3956_v3 = vadd.f32 %v3955_v4, %v3954_v57  ;;  %v4293_v16 = vshll.u32 %v5051_v45, 16  ;;  %v3827_v7 = vadd.f32 %v3826_v26, %v3825_v49  ;;  %v3902_v40 = vmul.f32 %v3770_v31, %v3770_v31 }
 0x381   : > { %v6000_v41 = vpop.f32.mrb[33].mxu0  ;;  %v5052_v22 = vpack.c.bf16 %v3770_v31, %v3770_v31  ;;  %v6068_v42 = vadd.f32 %v3366_v52, %v8333_v35  ;;  %v4287_v38 = vsel %vm8362_vm12, %v4278_v32, %v4286_v18  ;;  %v4288_v56 = vrot.slane %v4286_v18, 4  ;;  %v8507_v18 = vpop.permute.xlu0 %3658 }
 0x382   : > { %v3369_v19 = vpop.f32.mrb[34].mxu0  ;;  %v4292_v48 = vrot.slane %v4290_v43, 6  ;;  %v4295_v9 = vrot.slane %v4293_v16, 7  ;;  %4617 = vst.msk [vmem:[%s8190_s17 + $0x3c] sm:$0xf] %vm3876_vm5, %v4287_v38  ;;  %v3957_v37 = vsel %vm3796_vm4, %v3902_v40, 0.0  ;;  %v8511_v41 = vpop.permute.xlu1 %3655 }
 0x383   : > { %v6001_v8 = vpop.f32.mrb[35].mxu0  ;;  %v4300_v63 = vshrl.u32 %v5052_v22, 16  ;;  %v4303_v58 = vshll.u32 %v5052_v22, 16  ;;  %v3771_v2 = vsel %vm3730_vm13, %v6068_v42, 0.0  ;;  %v3958_v35 = vadd.f32 %v3957_v37, %v3956_v3 }
 0x384   : > { %v4296_v14 = vor.u32 %v4295_v9, %v4292_v48  ;;  %v3828_v0 = vsel %vm3796_vm4, %v3771_v2, 0.0  ;;  %v3903_v25 = vmul.f32 %v3771_v2, %v3771_v2  ;;  %v5053_v29 = vpack.c.bf16 %v3771_v2, %v3771_v2 }
 0x385   : > { %v4302_v10 = vrot.slane %v4300_v63, 6  ;;  %v4305_v21 = vrot.slane %v4303_v58, 7  ;;  %v3829_v44 = vadd.f32 %v3828_v0, %v3827_v7  ;;  %v6069_v24 = vadd.f32 %v3369_v19, %v8335_v20 }
 0x386   : > { %v4297_v5 = vsel %vm8362_vm12, %v4288_v56, %v4296_v14  ;;  %v4298_v11 = vrot.slane %v4296_v14, 4  ;;  %v3959_v36 = vsel %vm3796_vm4, %v3903_v25, 0.0  ;;  %v4310_v53 = vshrl.u32 %v5053_v29, 16 }
 0x387   : > { %4618 = vst.msk [vmem:[%s8190_s17 + $0x40] sm:$0xf] %vm3876_vm5, %v4297_v5  ;;  %v4306_v34 = vor.u32 %v4305_v21, %v4302_v10  ;;  %v3960_v61 = vadd.f32 %v3959_v36, %v3958_v35  ;;  %v4313_v46 = vshll.u32 %v5053_v29, 16  ;;  %vm3733_vm0 = vcmp.eq.s32.totalorder %v3650_v60, 1 }
 0x388   : > { %v3374_v39 = vpop.f32.mrb[36].mxu0  ;;  %v3772_v59 = vsel %vm3731_vm14, %v6069_v24, 0.0  ;;  %v4312_v13 = vrot.slane %v4310_v53, 6  ;;  %vm3734_vm2 = vcmp.eq.s32.totalorder %v8487_v51, 1  ;;  %vm3735_vm1 = vcmp.eq.s32.totalorder %v8511_v41, 1 }
 0x389   : > { %v6070_v57 = vadd.f32 %v3374_v39, %v8337_v6  ;;  %v6004_v23 = vpop.f32.mrb[37].mxu0  ;;  %v4307_v30 = vsel %vm8362_vm12, %v4298_v11, %v4306_v34  ;;  %v4308_v20 = vrot.slane %v4306_v34, 4  ;;  %v4315_v62 = vrot.slane %v4313_v46, 7  ;;  %v8530_v46 = vpop.permute.xlu0 %3664 }
 0x38a   : > { %v3377_v28 = vpop.f32.mrb[38].mxu0  ;;  %4619 = vst.msk [vmem:[%s8190_s17 + $0x44] sm:$0xf] %vm3876_vm5, %v4307_v30  ;;  %v3830_v12 = vsel %vm3796_vm4, %v3772_v59, 0.0  ;;  %v3904_v27 = vmul.f32 %v3772_v59, %v3772_v59  ;;  %v5054_v54 = vpack.c.bf16 %v3772_v59, %v3772_v59  ;;  %v3662_v23 = vpop.permute.xlu1 %3661  ;;  %vm3736_vm3 = vcmp.eq.s32.totalorder %v8507_v18, 1 }
 0x38b   : > { %v3773_v15 = vsel %vm3732_vm6, %v6070_v57, 0.0  ;;  %v6005_v49 = vpop.f32.mrb[39].mxu0  ;;  %v4316_v6 = vor.u32 %v4315_v62, %v4312_v13  ;;  %v3831_v45 = vadd.f32 %v3830_v12, %v3829_v44  ;;  %v6071_v48 = vadd.f32 %v3377_v28, %v8339_v50 }
 0x38c   : > { %v3832_v31 = vsel %vm3796_vm4, %v3773_v15, 0.0  ;;  %v3905_v17 = vmul.f32 %v3773_v15, %v3773_v15  ;;  %v3961_v32 = vsel %vm3796_vm4, %v3904_v27, 0.0  ;;  %v4320_v4 = vshrl.u32 %v5054_v54, 16 }
 0x38d   : > { %v4323_v26 = vshll.u32 %v5054_v54, 16  ;;  %v5055_v52 = vpack.c.bf16 %v3773_v15, %v3773_v15  ;;  %v4317_v3 = vsel %vm8362_vm12, %v4308_v20, %v4316_v6  ;;  %v4318_v43 = vrot.slane %v4316_v6, 4 }
 0x38e   : > { %v3962_v1 = vadd.f32 %v3961_v32, %v3960_v61  ;;  %v3833_v16 = vadd.f32 %v3832_v31, %v3831_v45  ;;  %4620 = vst.msk [vmem:[%s8190_s17 + $0x48] sm:$0xf] %vm3876_vm5, %v4317_v3  ;;  %v4322_v7 = vrot.slane %v4320_v4, 6  ;;  %v3963_v22 = vsel %vm3796_vm4, %v3905_v17, 0.0 }
 0x38f   : > { %v4325_v40 = vrot.slane %v4323_v26, 7  ;;  %v4330_v42 = vshrl.u32 %v5055_v52, 16  ;;  %v2017_v19 = vpop.f32.mrb[44].mxu1  ;;  %v4333_v56 = vshll.u32 %v5055_v52, 16  ;;  %v3774_v0 = vsel %vm3733_vm0, %v6071_v48, 0.0 }
 0x390   : > { %v3964_v38 = vadd.f32 %v3963_v22, %v3962_v1  ;;  %v3382_v9 = vpop.f32.mrb[40].mxu0  ;;  %v5668_v8 = vpop.f32.mrb[45].mxu1  ;;  %v3834_v44 = vsel %vm3796_vm4, %v3774_v0, 0.0  ;;  %v3906_v29 = vmul.f32 %v3774_v0, %v3774_v0  ;;  %v5056_v36 = vpack.c.bf16 %v3774_v0, %v3774_v0 }
 0x391   : > { %v4326_v37 = vor.u32 %v4325_v40, %v4322_v7  ;;  %v4332_v63 = vrot.slane %v4330_v42, 6  ;;  %v6072_v58 = vadd.f32 %v3382_v9, %v8341_v47  ;;  %v6008_v2 = vpop.f32.mrb[41].mxu0  ;;  %v2020_v14 = vpop.f32.mrb[46].mxu1  ;;  %v4335_v35 = vrot.slane %v4333_v56, 7 }
 0x392   : > { %v3385_v25 = vpop.f32.mrb[42].mxu0  ;;  %v5669_v10 = vpop.f32.mrb[47].mxu1  ;;  %v3835_v47 = vadd.f32 %v3834_v44, %v3833_v16  ;;  %v3965_v60 = vsel %vm3796_vm4, %v3906_v29, 0.0  ;;  %v4340_v57 = vshrl.u32 %v5056_v36, 16  ;;  %v4343_v51 = vshll.u32 %v5056_v36, 16 }
 0x393   : > { %v4327_v21 = vsel %vm8362_vm12, %v4318_v43, %v4326_v37  ;;  %v4328_v50 = vrot.slane %v4326_v37, 4  ;;  %v6009_v5 = vpop.f32.mrb[43].mxu0  ;;  %v4336_v11 = vor.u32 %v4335_v35, %v4332_v63  ;;  %v3775_v24 = vsel %vm3734_vm2, %v6072_v58, 0.0  ;;  %v8549_v9 = vpop.permute.xlu0 %3670 }
 0x394   : > { %4621 = vst.msk [vmem:[%s8190_s17 + $0x4c] sm:$0xf] %vm3876_vm5, %v4327_v21  ;;  %v3836_v34 = vsel %vm3796_vm4, %v3775_v24, 0.0  ;;  %v3907_v61 = vmul.f32 %v3775_v24, %v3775_v24  ;;  %v5057_v53 = vpack.c.bf16 %v3775_v24, %v3775_v24  ;;  %v3966_v59 = vadd.f32 %v3965_v60, %v3964_v38  ;;  %v3668_v58 = vpop.permute.xlu1 %3667 }
 0x395   : > { %v4337_v39 = vsel %vm8362_vm12, %v4328_v50, %v4336_v11  ;;  %v3837_v30 = vadd.f32 %v3836_v34, %v3835_v47  ;;  %v4342_v28 = vrot.slane %v4340_v57, 6  ;;  %v6073_v54 = vadd.f32 %v3385_v25, %v8343_v33 }
 0x396   : > { %4622 = vst.msk [vmem:[%s8190_s17 + $0x50] sm:$0xf] %vm3876_vm5, %v4337_v39  ;;  %v3967_v20 = vsel %vm3796_vm4, %v3907_v61, 0.0  ;;  %v4350_v13 = vshrl.u32 %v5057_v53, 16  ;;  %v4353_v27 = vshll.u32 %v5057_v53, 16  ;;  %v4338_v6 = vrot.slane %v4336_v11, 4 }
 0x397   : > { %v8537_v62 = vpop.f32.mrb[48].mxu1  ;;  %v3968_v12 = vadd.f32 %v3967_v20, %v3966_v59  ;;  %v4345_v45 = vrot.slane %v4343_v51, 7  ;;  %v3776_v52 = vsel %vm3735_vm1, %v6073_v54, 0.0  ;;  %vm3737_vm15 = vcmp.eq.s32.totalorder %v3662_v23, 1 }
 0x398   : > { %v3390_v15 = vpop.f32.mrb[44].mxu0  ;;  %v5672_v49 = vpop.f32.mrb[49].mxu1  ;;  %v4352_v31 = vrot.slane %v4350_v13, 6  ;;  %v4355_v26 = vrot.slane %v4353_v27, 7  ;;  %v3838_v33 = vsel %vm3796_vm4, %v3776_v52, 0.0  ;;  %v3908_v16 = vmul.f32 %v3776_v52, %v3776_v52 }
 0x399   : > { %v6074_v17 = vadd.f32 %v3390_v15, %v2017_v19  ;;  %v6012_v32 = vpop.f32.mrb[45].mxu0  ;;  %v8540_v4 = vpop.f32.mrb[50].mxu1  ;;  %v4346_v1 = vor.u32 %v4345_v45, %v4342_v28  ;;  %v5058_v7 = vpack.c.bf16 %v3776_v52, %v3776_v52  ;;  %v3839_v42 = vadd.f32 %v3838_v33, %v3837_v30 }
 0x39a   : > { %v3393_v3 = vpop.f32.mrb[46].mxu0  ;;  %v5673_v43 = vpop.f32.mrb[51].mxu1  ;;  %v4356_v22 = vor.u32 %v4355_v26, %v4352_v31  ;;  %v3969_v41 = vsel %vm3796_vm4, %v3908_v16, 0.0  ;;  %vm3738_vm8 = vcmp.eq.s32.totalorder %v8530_v46, 1  ;;  %vm3740_vm9 = vcmp.eq.s32.totalorder %v8549_v9, 1 }
 0x39b   : > { %v6013_v40 = vpop.f32.mrb[47].mxu0  ;;  %v3777_v19 = vsel %vm3736_vm3, %v6074_v17, 0.0  ;;  %v6075_v38 = vadd.f32 %v3393_v3, %v2020_v14  ;;  %v4347_v18 = vsel %vm8362_vm12, %v4338_v6, %v4346_v1  ;;  %v4348_v56 = vrot.slane %v4346_v1, 4  ;;  %v8570_v31 = vpop.permute.xlu0 %3676 }
 0x39c   : > { %v4360_v48 = vshrl.u32 %v5058_v7, 16  ;;  %4623 = vst.msk [vmem:[%s8190_s17 + $0x54] sm:$0xf] %vm3876_vm5, %v4347_v18  ;;  %v3970_v8 = vadd.f32 %v3969_v41, %v3968_v12  ;;  %v4363_v37 = vshll.u32 %v5058_v7, 16  ;;  %v3840_v63 = vsel %vm3796_vm4, %v3777_v19, 0.0  ;;  %v3674_v52 = vpop.permute.xlu1 %3673 }
 0x39d   : > { %v4357_v2 = vsel %vm8362_vm12, %v4348_v56, %v4356_v22  ;;  %v3841_v35 = vadd.f32 %v3840_v63, %v3839_v42  ;;  %v3909_v0 = vmul.f32 %v3777_v19, %v3777_v19  ;;  %v4358_v10 = vrot.slane %v4356_v22, 4 }
 0x39e   : > { %v4362_v14 = vrot.slane %v4360_v48, 6  ;;  %4624 = vst.msk [vmem:[%s8190_s17 + $0x58] sm:$0xf] %vm3876_vm5, %v4357_v2  ;;  %v4365_v21 = vrot.slane %v4363_v37, 7  ;;  %v5059_v50 = vpack.c.bf16 %v3777_v19, %v3777_v19  ;;  %v3778_v44 = vsel %vm3737_vm15, %v6075_v38, 0.0 }
 0x39f   : > { %v8556_v25 = vpop.f32.mrb[52].mxu1  ;;  %v3971_v11 = vsel %vm3796_vm4, %v3909_v0, 0.0  ;;  %v3842_v47 = vsel %vm3796_vm4, %v3778_v44, 0.0  ;;  %v3910_v36 = vmul.f32 %v3778_v44, %v3778_v44  ;;  %v5060_v24 = vpack.c.bf16 %v3778_v44, %v3778_v44 }
 0x3a0   : > { %v3398_v29 = vpop.f32.mrb[48].mxu0  ;;  %v5676_v5 = vpop.f32.mrb[53].mxu1  ;;  %v4366_v61 = vor.u32 %v4365_v21, %v4362_v14  ;;  %v3972_v53 = vadd.f32 %v3971_v11, %v3970_v8  ;;  %v4370_v39 = vshrl.u32 %v5059_v50, 16  ;;  %v4373_v59 = vshll.u32 %v5059_v50, 16 }
 0x3a1   : > { %v6016_v60 = vpop.f32.mrb[49].mxu0  ;;  %v2036_v34 = vpop.f32.mrb[54].mxu1  ;;  %v3843_v30 = vadd.f32 %v3842_v47, %v3841_v35  ;;  %v3973_v23 = vsel %vm3796_vm4, %v3910_v36, 0.0  ;;  %v4380_v20 = vshrl.u32 %v5060_v24, 16  ;;  %v4383_v13 = vshll.u32 %v5060_v24, 16 }
 0x3a2   : > { %v3401_v57 = vpop.f32.mrb[50].mxu0  ;;  %v5677_v51 = vpop.f32.mrb[55].mxu1  ;;  %v4367_v12 = vsel %vm8362_vm12, %v4358_v10, %v4366_v61  ;;  %v4372_v27 = vrot.slane %v4370_v39, 6  ;;  %v4375_v54 = vrot.slane %v4373_v59, 7  ;;  %v3974_v15 = vadd.f32 %v3973_v23, %v3972_v53 }
 0x3a3   : > { %v6017_v28 = vpop.f32.mrb[51].mxu0  ;;  %4625 = vst.msk [vmem:[%s8190_s17 + $0x5c] sm:$0xf] %vm3876_vm5, %v4367_v12  ;;  %v4382_v49 = vrot.slane %v4380_v20, 6  ;;  %v4385_v6 = vrot.slane %v4383_v13, 7  ;;  %v6076_v45 = vadd.f32 %v3398_v29, %v8537_v62  ;;  %v4368_v17 = vrot.slane %v4366_v61, 4  ;;  %v3680_v47 = vpop.permute.xlu1 %3679 }
 0x3a4   : > { %v4376_v32 = vor.u32 %v4375_v54, %v4372_v27  ;;  %v6077_v26 = vadd.f32 %v3401_v57, %v8540_v4  ;;  %vm3739_vm7 = vcmp.eq.s32.totalorder %v3668_v58, 1  ;;  %vm3741_vm11 = vcmp.eq.s32.totalorder %v3674_v52, 1  ;;  %v8593_v53 = vpop.permute.xlu0 %3682 }
 0x3a5   : > { %v4386_v3 = vor.u32 %v4385_v6, %v4382_v49  ;;  %v3779_v43 = vsel %vm3738_vm8, %v6076_v45, 0.0  ;;  %vm3742_vm13 = vcmp.eq.s32.totalorder %v8570_v31, 1  ;;  %vm3743_vm14 = vcmp.eq.s32.totalorder %v3680_v47, 1 }
 0x3a6   : > { %v4377_v62 = vsel %vm8362_vm12, %v4368_v17, %v4376_v32  ;;  %v4378_v33 = vrot.slane %v4376_v32, 4  ;;  %v3844_v46 = vsel %vm3796_vm4, %v3779_v43, 0.0  ;;  %v3911_v16 = vmul.f32 %v3779_v43, %v3779_v43 }
 0x3a7   : > { %v8574_v1 = vpop.f32.mrb[56].mxu1  ;;  %4626 = vst.msk [vmem:[%s8190_s17 + $0x60] sm:$0xf] %vm3876_vm5, %v4377_v62  ;;  %v3845_v4 = vadd.f32 %v3844_v46, %v3843_v30  ;;  %v5061_v22 = vpack.c.bf16 %v3779_v43, %v3779_v43  ;;  %v3780_v42 = vsel %vm3739_vm7, %v6077_v26, 0.0  ;;  %v4388_v44 = vrot.slane %v4386_v3, 4 }
 0x3a8   : > { %v3406_v7 = vpop.f32.mrb[52].mxu0  ;;  %v5680_v40 = vpop.f32.mrb[57].mxu1  ;;  %v4387_v18 = vsel %vm8362_vm12, %v4378_v33, %v4386_v3  ;;  %v3975_v56 = vsel %vm3796_vm4, %v3911_v16, 0.0  ;;  %v3846_v41 = vsel %vm3796_vm4, %v3780_v42, 0.0  ;;  %v3912_v48 = vmul.f32 %v3780_v42, %v3780_v42 }
 0x3a9   : > { %v6020_v19 = vpop.f32.mrb[53].mxu0  ;;  %v2044_v38 = vpop.f32.mrb[58].mxu1  ;;  %4627 = vst.msk [vmem:[%s8190_s17 + $0x64] sm:$0xf] %vm3876_vm5, %v4387_v18  ;;  %v3976_v63 = vadd.f32 %v3975_v56, %v3974_v15  ;;  %v4390_v58 = vshrl.u32 %v5061_v22, 16  ;;  %v4393_v2 = vshll.u32 %v5061_v22, 16  ;;  %v3847_v14 = vadd.f32 %v3846_v41, %v3845_v4 }
 0x3aa   : > { %v3409_v8 = vpop.f32.mrb[54].mxu0  ;;  %v5681_v37 = vpop.f32.mrb[59].mxu1  ;;  %v3977_v0 = vsel %vm3796_vm4, %v3912_v48, 0.0  ;;  %v5062_v10 = vpack.c.bf16 %v3780_v42, %v3780_v42  ;;  %v6078_v21 = vadd.f32 %v3406_v7, %v8556_v25  ;;  %vm3744_vm6 = vcmp.eq.s32.totalorder %v8593_v53, 1 }
 0x3ab   : > { %v6021_v35 = vpop.f32.mrb[55].mxu0  ;;  %v6079_v50 = vadd.f32 %v3409_v8, %v2036_v34  ;;  %v4392_v29 = vrot.slane %v4390_v58, 6  ;;  %v4395_v5 = vrot.slane %v4393_v2, 7  ;;  %v3978_v11 = vadd.f32 %v3977_v0, %v3976_v63  ;;  %v3686_v56 = vpop.permute.xlu1 %3685 }
 0x3ac   : > { %v4400_v36 = vshrl.u32 %v5062_v10, 16  ;;  %v4403_v24 = vshll.u32 %v5062_v10, 16  ;;  %v3781_v60 = vsel %vm3740_vm9, %v6078_v21, 0.0  ;;  %v8616_v37 = vpop.permute.xlu0 %3688  ;;  %vm3745_vm0 = vcmp.eq.s32.totalorder %v3686_v56, 1 }
 0x3ad   : > { %v3782_v61 = vsel %vm3741_vm11, %v6079_v50, 0.0  ;;  %v4396_v39 = vor.u32 %v4395_v5, %v4392_v29  ;;  %v3848_v59 = vsel %vm3796_vm4, %v3781_v60, 0.0  ;;  %v3913_v25 = vmul.f32 %v3781_v60, %v3781_v60 }
 0x3ae   : > { %v5063_v34 = vpack.c.bf16 %v3781_v60, %v3781_v60  ;;  %v4402_v51 = vrot.slane %v4400_v36, 6  ;;  %v4405_v30 = vrot.slane %v4403_v24, 7  ;;  %v3849_v23 = vadd.f32 %v3848_v59, %v3847_v14 }
 0x3af   : > { %v8596_v57 = vpop.f32.mrb[60].mxu1  ;;  %v3850_v20 = vsel %vm3796_vm4, %v3782_v61, 0.0  ;;  %v4397_v28 = vsel %vm8362_vm12, %v4388_v44, %v4396_v39  ;;  %v4398_v12 = vrot.slane %v4396_v39, 4  ;;  %v3979_v27 = vsel %vm3796_vm4, %v3913_v25, 0.0 }
 0x3b0   : > { %v3414_v9 = vpop.f32.mrb[56].mxu0  ;;  %v5684_v13 = vpop.f32.mrb[61].mxu1  ;;  %v4410_v54 = vshrl.u32 %v5063_v34, 16  ;;  %4628 = vst.msk [vmem:[%s8190_s17 + $0x68] sm:$0xf] %vm3876_vm5, %v4397_v28  ;;  %v4406_v6 = vor.u32 %v4405_v30, %v4402_v51  ;;  %v3980_v45 = vadd.f32 %v3979_v27, %v3978_v11  ;;  %v4413_v17 = vshll.u32 %v5063_v34, 16 }
 0x3b1   : > { %v6024_v15 = vpop.f32.mrb[57].mxu0  ;;  %v8602_v49 = vpop.f32.mrb[62].mxu1  ;;  %v3851_v32 = vadd.f32 %v3850_v20, %v3849_v23  ;;  %v3914_v43 = vmul.f32 %v3782_v61, %v3782_v61  ;;  %v5064_v62 = vpack.c.bf16 %v3782_v61, %v3782_v61  ;;  %v6080_v33 = vadd.f32 %v3414_v9, %v8574_v1 }
 0x3b2   : > { %v3417_v26 = vpop.f32.mrb[58].mxu0  ;;  %v5685_v52 = vpop.f32.mrb[63].mxu1  ;;  %v4412_v3 = vrot.slane %v4410_v54, 6  ;;  %v4407_v16 = vsel %vm8362_vm12, %v4398_v12, %v4406_v6  ;;  %v4408_v7 = vrot.slane %v4406_v6, 4  ;;  %v4415_v40 = vrot.slane %v4413_v17, 7 }
 0x3b3   : > { %v6025_v46 = vpop.f32.mrb[59].mxu0  ;;  %v6081_v4 = vadd.f32 %v3417_v26, %v2044_v38  ;;  %4629 = vst.msk [vmem:[%s8190_s17 + $0x6c] sm:$0xf] %vm3876_vm5, %v4407_v16  ;;  %v3981_v22 = vsel %vm3796_vm4, %v3914_v43, 0.0  ;;  %v4420_v42 = vshrl.u32 %v5064_v62, 16  ;;  %v4423_v19 = vshll.u32 %v5064_v62, 16  ;;  %v8636_v6 = vpop.permute.xlu0 %3694 }
 0x3b4   : > { %v3783_v18 = vsel %vm3742_vm13, %v6080_v33, 0.0  ;;  %v4416_v1 = vor.u32 %v4415_v40, %v4412_v3  ;;  %v3982_v41 = vadd.f32 %v3981_v22, %v3980_v45  ;;  %v3692_v52 = vpop.permute.xlu1 %3691  ;;  %vm3746_vm2 = vcmp.eq.s32.totalorder %v8616_v37, 1 }
 0x3b5   : > { %v3852_v48 = vsel %vm3796_vm4, %v3783_v18, 0.0  ;;  %v3915_v8 = vmul.f32 %v3783_v18, %v3783_v18  ;;  %v4422_v38 = vrot.slane %v4420_v42, 6  ;;  %v4425_v63 = vrot.slane %v4423_v19, 7 }
 0x3b6   : > { %v3853_v58 = vadd.f32 %v3852_v48, %v3851_v32  ;;  %v5065_v2 = vpack.c.bf16 %v3783_v18, %v3783_v18  ;;  %v4417_v31 = vsel %vm8362_vm12, %v4408_v7, %v4416_v1  ;;  %v4418_v35 = vrot.slane %v4416_v1, 4 }
 0x3b7   : > { %v8618_v14 = vpop.f32.mrb[64].mxu1  ;;  %v3983_v0 = vsel %vm3796_vm4, %v3915_v8, 0.0  ;;  %v3784_v10 = vsel %vm3743_vm14, %v6081_v4, 0.0  ;;  %4630 = vst.msk [vmem:[%s8190_s17 + $0x70] sm:$0xf] %vm3876_vm5, %v4417_v31  ;;  %v4426_v44 = vor.u32 %v4425_v63, %v4422_v38  ;;  %vm3747_vm1 = vcmp.eq.s32.totalorder %v3692_v52, 1 }
 0x3b8   : > { %v3422_v21 = vpop.f32.mrb[60].mxu0  ;;  %v5688_v50 = vpop.f32.mrb[65].mxu1  ;;  %v3984_v29 = vadd.f32 %v3983_v0, %v3982_v41  ;;  %v4430_v5 = vshrl.u32 %v5065_v2, 16  ;;  %v4433_v11 = vshll.u32 %v5065_v2, 16  ;;  %v3854_v60 = vsel %vm3796_vm4, %v3784_v10, 0.0 }
 0x3b9   : > { %v6028_v36 = vpop.f32.mrb[61].mxu0  ;;  %v2060_v24 = vpop.f32.mrb[66].mxu1  ;;  %v3916_v61 = vmul.f32 %v3784_v10, %v3784_v10  ;;  %v5066_v39 = vpack.c.bf16 %v3784_v10, %v3784_v10  ;;  %v6082_v59 = vadd.f32 %v3422_v21, %v8596_v57  ;;  %v4427_v34 = vsel %vm8362_vm12, %v4418_v35, %v4426_v44 }
 0x3ba   : > { %v3425_v25 = vpop.f32.mrb[62].mxu0  ;;  %v5689_v47 = vpop.f32.mrb[67].mxu1  ;;  %v4428_v51 = vrot.slane %v4426_v44, 4  ;;  %v4432_v30 = vrot.slane %v4430_v5, 6  ;;  %v4435_v23 = vrot.slane %v4433_v11, 7  ;;  %v3855_v9 = vadd.f32 %v3854_v60, %v3853_v58 }
 0x3bb   : > { %v6029_v20 = vpop.f32.mrb[63].mxu0  ;;  %4631 = vst.msk [vmem:[%s8190_s17 + $0x74] sm:$0xf] %vm3876_vm5, %v4427_v34  ;;  %v3985_v13 = vsel %vm3796_vm4, %v3916_v61, 0.0  ;;  %v4440_v28 = vshrl.u32 %v5066_v39, 16  ;;  %v4443_v12 = vshll.u32 %v5066_v39, 16  ;;  %v6083_v15 = vadd.f32 %v3425_v25, %v8602_v49  ;;  %v3698_v50 = vpop.permute.xlu1 %3697 }
 0x3bc   : > { %v4436_v27 = vor.u32 %v4435_v23, %v4432_v30  ;;  %v3986_v54 = vadd.f32 %v3985_v13, %v3984_v29  ;;  %v3785_v57 = vsel %vm3744_vm6, %v6082_v59, 0.0  ;;  %vm3748_vm3 = vcmp.eq.s32.totalorder %v8636_v6, 1 }
 0x3bd   : > { %v4442_v45 = vrot.slane %v4440_v28, 6  ;;  %v4445_v17 = vrot.slane %v4443_v12, 7  ;;  %v3856_v32 = vsel %vm3796_vm4, %v3785_v57, 0.0  ;;  %v3917_v26 = vmul.f32 %v3785_v57, %v3785_v57 }
 0x3be   : > { %v4437_v3 = vsel %vm8362_vm12, %v4428_v51, %v4436_v27  ;;  %v4438_v43 = vrot.slane %v4436_v27, 4  ;;  %v3857_v62 = vadd.f32 %v3856_v32, %v3855_v9  ;;  %v5067_v33 = vpack.c.bf16 %v3785_v57, %v3785_v57 }
 0x3bf   : > { %v2065_v46 = vpop.f32.mrb[68].mxu1  ;;  %4632 = vst.msk [vmem:[%s8190_s17 + $0x78] sm:$0xf] %vm3876_vm5, %v4437_v3  ;;  %v4446_v53 = vor.u32 %v4445_v17, %v4442_v45  ;;  %v3987_v49 = vsel %vm3796_vm4, %v3917_v26, 0.0  ;;  %v3786_v16 = vsel %vm3745_vm0, %v6083_v15, 0.0  ;;  %vm3749_vm15 = vcmp.eq.s32.totalorder %v3698_v50, 1 }
 0x3c0   : > { %v3430_v7 = vpop.f32.mrb[64].mxu0  ;;  %v5692_v40 = vpop.f32.mrb[69].mxu1  ;;  %v3988_v4 = vadd.f32 %v3987_v49, %v3986_v54  ;;  %v4450_v22 = vshrl.u32 %v5067_v33, 16  ;;  %v4453_v42 = vshll.u32 %v5067_v33, 16  ;;  %v3858_v19 = vsel %vm3796_vm4, %v3786_v16, 0.0 }
 0x3c1   : > { %v6032_v18 = vpop.f32.mrb[65].mxu0  ;;  %v8646_v1 = vpop.f32.mrb[70].mxu1  ;;  %v4447_v41 = vsel %vm8362_vm12, %v4438_v43, %v4446_v53  ;;  %v3859_v48 = vadd.f32 %v3858_v19, %v3857_v62  ;;  %v3918_v8 = vmul.f32 %v3786_v16, %v3786_v16  ;;  %v5068_v2 = vpack.c.bf16 %v3786_v16, %v3786_v16 }
 0x3c2   : > { %v3433_v56 = vpop.f32.mrb[66].mxu0  ;;  %v5693_v38 = vpop.f32.mrb[71].mxu1  ;;  %4633 = vst.msk [vmem:[%s8190_s17 + $0x7c] sm:$0xf] %vm3876_vm5, %v4447_v41  ;;  %v4452_v63 = vrot.slane %v4450_v22, 6  ;;  %v4455_v58 = vrot.slane %v4453_v42, 7  ;;  %v6084_v31 = vadd.f32 %v3430_v7, %v8618_v14 }
 0x3c3   : > { %v6033_v35 = vpop.f32.mrb[67].mxu0  ;;  %v4448_v0 = vrot.slane %v4446_v53, 4  ;;  %v3989_v10 = vsel %vm3796_vm4, %v3918_v8, 0.0  ;;  %v6085_v21 = vadd.f32 %v3433_v56, %v2060_v24  ;;  %v4460_v5 = vshrl.u32 %v5068_v2, 16  ;;  %v8658_v14 = vpop.permute.xlu0 %3700 }
 0x3c4   : > { %v4456_v44 = vor.u32 %v4455_v58, %v4452_v63  ;;  %v3990_v29 = vadd.f32 %v3989_v10, %v3988_v4  ;;  %v4463_v11 = vshll.u32 %v5068_v2, 16  ;;  %v3787_v36 = vsel %vm3746_vm2, %v6084_v31, 0.0  ;;  %v3704_v41 = vpop.permute.xlu1 %3703 }
 0x3c5   : > { %v3788_v60 = vsel %vm3747_vm1, %v6085_v21, 0.0  ;;  %v4462_v24 = vrot.slane %v4460_v5, 6  ;;  %v3860_v47 = vsel %vm3796_vm4, %v3787_v36, 0.0  ;;  %v3919_v34 = vmul.f32 %v3787_v36, %v3787_v36 }
 0x3c6   : > { %v4457_v61 = vsel %vm8362_vm12, %v4448_v0, %v4456_v44  ;;  %v4458_v39 = vrot.slane %v4456_v44, 4  ;;  %v4465_v59 = vrot.slane %v4463_v11, 7  ;;  %v5069_v51 = vpack.c.bf16 %v3787_v36, %v3787_v36 }
 0x3c7   : > { %v2073_v25 = vpop.f32.mrb[72].mxu1  ;;  %4634 = vst.msk [vmem:[%s8190_s17 + $0x80] sm:$0xf] %vm3876_vm5, %v4457_v61  ;;  %v3862_v30 = vsel %vm3796_vm4, %v3788_v60, 0.0  ;;  %v3861_v9 = vadd.f32 %v3860_v47, %v3859_v48  ;;  %v3920_v13 = vmul.f32 %v3788_v60, %v3788_v60  ;;  %v5070_v28 = vpack.c.bf16 %v3788_v60, %v3788_v60 }
 0x3c8   : > { %v3438_v37 = vpop.f32.mrb[68].mxu0  ;;  %v5696_v23 = vpop.f32.mrb[73].mxu1  ;;  %v4466_v20 = vor.u32 %v4465_v59, %v4462_v24  ;;  %v3991_v54 = vsel %vm3796_vm4, %v3919_v34, 0.0  ;;  %v4470_v57 = vshrl.u32 %v5069_v51, 16  ;;  %v4473_v15 = vshll.u32 %v5069_v51, 16 }
 0x3c9   : > { %v6036_v12 = vpop.f32.mrb[69].mxu0  ;;  %v8666_v27 = vpop.f32.mrb[74].mxu1  ;;  %v6086_v45 = vadd.f32 %v3438_v37, %v2065_v46  ;;  %vm3750_vm8 = vcmp.eq.s32.totalorder %v8658_v14, 1  ;;  %v3992_v3 = vadd.f32 %v3991_v54, %v3990_v29  ;;  %v3863_v43 = vadd.f32 %v3862_v30, %v3861_v9 }
 0x3ca   : > { %v3441_v17 = vpop.f32.mrb[70].mxu0  ;;  %v5697_v32 = vpop.f32.mrb[75].mxu1  ;;  %v4467_v26 = vsel %vm8362_vm12, %v4458_v39, %v4466_v20  ;;  %v4468_v52 = vrot.slane %v4466_v20, 4  ;;  %v4472_v33 = vrot.slane %v4470_v57, 6  ;;  %v4475_v53 = vrot.slane %v4473_v15, 7 }
 0x3cb   : > { %v6037_v62 = vpop.f32.mrb[71].mxu0  ;;  %4635 = vst.msk [vmem:[%s8190_s17 + $0x84] sm:$0xf] %vm3876_vm5, %v4467_v26  ;;  %v3993_v49 = vsel %vm3796_vm4, %v3920_v13, 0.0  ;;  %v4480_v16 = vshrl.u32 %v5070_v28, 16  ;;  %v4483_v46 = vshll.u32 %v5070_v28, 16  ;;  %v6087_v4 = vadd.f32 %v3441_v17, %v8646_v1 }
 0x3cc   : > { %v3994_v7 = vadd.f32 %v3993_v49, %v3992_v3  ;;  %v3789_v40 = vsel %vm3748_vm3, %v6086_v45, 0.0  ;;  %v4476_v22 = vor.u32 %v4475_v53, %v4472_v33  ;;  %vm3751_vm9 = vcmp.eq.s32.totalorder %v3704_v41, 1  ;;  %v3707_v45 = vpop.permute.xlu0 %3706 }
 0x3cd   : > { %v4482_v42 = vrot.slane %v4480_v16, 6  ;;  %v3864_v19 = vsel %vm3796_vm4, %v3789_v40, 0.0  ;;  %v3921_v18 = vmul.f32 %v3789_v40, %v3789_v40  ;;  %v4485_v48 = vrot.slane %v4483_v46, 7 }
 0x3ce   : > { %v3865_v8 = vadd.f32 %v3864_v19, %v3863_v43  ;;  %v5071_v56 = vpack.c.bf16 %v3789_v40, %v3789_v40  ;;  %v3790_v38 = vsel %vm3749_vm15, %v6087_v4, 0.0  ;;  %v4477_v6 = vsel %vm8362_vm12, %v4468_v52, %v4476_v22 }
 0x3cf   : > { %v2081_v63 = vpop.f32.mrb[76].mxu1  ;;  %v4478_v58 = vrot.slane %v4476_v22, 4  ;;  %v3995_v1 = vsel %vm3796_vm4, %v3921_v18, 0.0  ;;  %v3866_v2 = vsel %vm3796_vm4, %v3790_v38, 0.0  ;;  %4636 = vst.msk [vmem:[%s8190_s17 + $0x88] sm:$0xf] %vm3876_vm5, %v4477_v6  ;;  %v4486_v0 = vor.u32 %v4485_v48, %v4482_v42 }
 0x3d0   : > { %v3446_v31 = vpop.f32.mrb[72].mxu0  ;;  %v5700_v35 = vpop.f32.mrb[77].mxu1  ;;  %v3996_v10 = vadd.f32 %v3995_v1, %v3994_v7  ;;  %v4490_v21 = vshrl.u32 %v5071_v56, 16  ;;  %v4493_v50 = vshll.u32 %v5071_v56, 16  ;;  %v3867_v5 = vadd.f32 %v3866_v2, %v3865_v8 }
 0x3d1   : > { %v6040_v44 = vpop.f32.mrb[73].mxu0  ;;  %v8686_v29 = vpop.f32.mrb[78].mxu1  ;;  %v3922_v11 = vmul.f32 %v3790_v38, %v3790_v38  ;;  %v5072_v36 = vpack.c.bf16 %v3790_v38, %v3790_v38  ;;  %v6088_v60 = vadd.f32 %v3446_v31, %v2073_v25  ;;  %v4487_v24 = vsel %vm8362_vm12, %v4478_v58, %v4486_v0 }
 0x3d2   : > { %v3449_v61 = vpop.f32.mrb[74].mxu0  ;;  %v5701_v39 = vpop.f32.mrb[79].mxu1  ;;  %v4488_v59 = vrot.slane %v4486_v0, 4  ;;  %v4492_v47 = vrot.slane %v4490_v21, 6  ;;  %v4495_v34 = vrot.slane %v4493_v50, 7  ;;  %vm3752_vm7 = vcmp.eq.s32.totalorder %v3707_v45, 1 }
 0x3d3   : > { %v6041_v51 = vpop.f32.mrb[75].mxu0  ;;  %4637 = vst.msk [vmem:[%s8190_s17 + $0x8c] sm:$0xf] %vm3876_vm5, %v4487_v24  ;;  %v3997_v30 = vsel %vm3796_vm4, %v3922_v11, 0.0  ;;  %v4500_v37 = vshrl.u32 %v5072_v36, 16  ;;  %v4503_v23 = vshll.u32 %v5072_v36, 16  ;;  %v6089_v14 = vadd.f32 %v3449_v61, %v8666_v27  ;;  %v3713_v11 = vpop.permute.xlu0 %3712 }
 0x3d4   : > { %v3791_v20 = vsel %vm3750_vm8, %v6088_v60, 0.0  ;;  %v4496_v25 = vor.u32 %v4495_v34, %v4492_v47  ;;  %v3998_v9 = vadd.f32 %v3997_v30, %v3996_v10  ;;  %v3710_v10 = vpop.permute.xlu1 %3709  ;;  %vm3754_vm13 = vcmp.eq.s32.totalorder %v3713_v11, 1 }
 0x3d5   : > { %v3868_v13 = vsel %vm3796_vm4, %v3791_v20, 0.0  ;;  %v3923_v28 = vmul.f32 %v3791_v20, %v3791_v20  ;;  %v4502_v12 = vrot.slane %v4500_v37, 6  ;;  %v4505_v54 = vrot.slane %v4503_v23, 7 }
 0x3d6   : > { %v3869_v57 = vadd.f32 %v3868_v13, %v3867_v5  ;;  %v5073_v15 = vpack.c.bf16 %v3791_v20, %v3791_v20  ;;  %v4497_v17 = vsel %vm8362_vm12, %v4488_v59, %v4496_v25  ;;  %v4498_v32 = vrot.slane %v4496_v25, 4 }
 0x3d7   : > { %v3999_v26 = vsel %vm3796_vm4, %v3923_v28, 0.0  ;;  %v2089_v52 = vpop.f32.mrb[80].mxu1  ;;  %4638 = vst.msk [vmem:[%s8190_s17 + $0x90] sm:$0xf] %vm3876_vm5, %v4497_v17  ;;  %v4506_v3 = vor.u32 %v4505_v54, %v4502_v12  ;;  %v3792_v16 = vsel %vm3751_vm9, %v6089_v14, 0.0  ;;  %vm3753_vm11 = vcmp.eq.s32.totalorder %v3710_v10, 1 }
 0x3d8   : > { %v4000_v43 = vadd.f32 %v3999_v26, %v3998_v9  ;;  %v4510_v62 = vshrl.u32 %v5073_v15, 16  ;;  %v4513_v33 = vshll.u32 %v5073_v15, 16  ;;  %v3454_v53 = vpop.f32.mrb[76].mxu0  ;;  %v5704_v49 = vpop.f32.mrb[81].mxu1  ;;  %v3870_v48 = vsel %vm3796_vm4, %v3792_v16, 0.0 }
 0x3d9   : > { %v6090_v7 = vadd.f32 %v3454_v53, %v2081_v63  ;;  %v6044_v46 = vpop.f32.mrb[77].mxu0  ;;  %v2092_v40 = vpop.f32.mrb[82].mxu1  ;;  %v4507_v4 = vsel %vm8362_vm12, %v4498_v32, %v4506_v3  ;;  %v4508_v27 = vrot.slane %v4506_v3, 4  ;;  %v3924_v8 = vmul.f32 %v3792_v16, %v3792_v16 }
 0x3da   : > { %v4512_v22 = vrot.slane %v4510_v62, 6  ;;  %v4515_v42 = vrot.slane %v4513_v33, 7  ;;  %v3457_v19 = vpop.f32.mrb[78].mxu0  ;;  %v5705_v18 = vpop.f32.mrb[83].mxu1  ;;  %4639 = vst.msk [vmem:[%s8190_s17 + $0x94] sm:$0xf] %vm3876_vm5, %v4507_v4  ;;  %v5074_v56 = vpack.c.bf16 %v3792_v16, %v3792_v16  ;;  %v3871_v6 = vadd.f32 %v3870_v48, %v3869_v57 }
 0x3db   : > { %v3793_v38 = vsel %vm3752_vm7, %v6090_v7, 0.0  ;;  %v6045_v41 = vpop.f32.mrb[79].mxu0  ;;  %v4001_v2 = vsel %vm3796_vm4, %v3924_v8, 0.0  ;;  %v6091_v47 = vadd.f32 %v3457_v19, %v8686_v29  ;;  %vm4651_vm6 = vsmask.f32 7950 }
 0x3dc   : > { %v4516_v63 = vor.u32 %v4515_v42, %v4512_v22  ;;  %v3872_v58 = vsel %vm3796_vm4, %v3793_v38, 0.0  ;;  %v3925_v1 = vmul.f32 %v3793_v38, %v3793_v38  ;;  %v4520_v31 = vshrl.u32 %v5074_v56, 16 }
 0x3dd   : > { %v4523_v35 = vshll.u32 %v5074_v56, 16  ;;  %v5075_v0 = vpack.c.bf16 %v3793_v38, %v3793_v38  ;;  %v4002_v44 = vadd.f32 %v4001_v2, %v4000_v43  ;;  %v3873_v5 = vadd.f32 %v3872_v58, %v3871_v6  ;;  %v4647_v58 = vld [vmem:[%s8190_s17 + $0xa8] sm:$0xf] }
 0x3de   : > { %v4517_v21 = vsel %vm8362_vm12, %v4508_v27, %v4516_v63  ;;  %v4518_v50 = vrot.slane %v4516_v63, 4  ;;  %v4522_v36 = vrot.slane %v4520_v31, 6  ;;  %v4003_v61 = vsel %vm3796_vm4, %v3925_v1, 0.0 }
 0x3df   : > { %4640 = vst.msk [vmem:[%s8190_s17 + $0x98] sm:$0xf] %vm3876_vm5, %v4517_v21  ;;  %v4525_v60 = vrot.slane %v4523_v35, 7  ;;  %v4530_v39 = vshrl.u32 %v5075_v0, 16  ;;  %v4004_v24 = vadd.f32 %v4003_v61, %v4002_v44  ;;  %v4533_v59 = vshll.u32 %v5075_v0, 16 }
 0x3e0   : > { %v3462_v34 = vpop.f32.mrb[80].mxu0  ;;  %v3794_v25 = vsel %vm3753_vm11, %v6091_v47, 0.0 }
 0x3e1   : > { %v4526_v51 = vor.u32 %v4525_v60, %v4522_v36  ;;  %v4532_v30 = vrot.slane %v4530_v39, 6  ;;  %v6092_v37 = vadd.f32 %v3462_v34, %v2089_v52  ;;  %v6048_v23 = vpop.f32.mrb[81].mxu0  ;;  %v4535_v20 = vrot.slane %v4533_v59, 7 }
 0x3e2   : > { %v3465_v9 = vpop.f32.mrb[82].mxu0  ;;  %v3874_v12 = vsel %vm3796_vm4, %v3794_v25, 0.0  ;;  %v3926_v54 = vmul.f32 %v3794_v25, %v3794_v25  ;;  %v5076_v45 = vpack.c.bf16 %v3794_v25, %v3794_v25 }
 0x3e3   : > { %v4527_v13 = vsel %vm8362_vm12, %v4518_v50, %v4526_v51  ;;  %v4528_v28 = vrot.slane %v4526_v51, 4  ;;  %v6049_v29 = vpop.f32.mrb[83].mxu0  ;;  %v4536_v57 = vor.u32 %v4535_v20, %v4532_v30  ;;  %v3875_v15 = vadd.f32 %v3874_v12, %v3873_v5 }
 0x3e4   : > { %4641 = vst.msk [vmem:[%s8190_s17 + $0x9c] sm:$0xf] %vm3876_vm5, %v4527_v13  ;;  %v3795_v17 = vsel %vm3754_vm13, %v6092_v37, 0.0  ;;  %v4005_v32 = vsel %vm3796_vm4, %v3926_v54, 0.0  ;;  %v4540_v62 = vshrl.u32 %v5076_v45, 16  ;;  %v4543_v33 = vshll.u32 %v5076_v45, 16 }
 0x3e5   : > { %v3877_v26 = vsel %vm3876_vm5, %v3795_v17, 0.0  ;;  %v3927_v14 = vmul.f32 %v3795_v17, %v3795_v17  ;;  %v5077_v52 = vpack.c.bf16 %v3795_v17, %v3795_v17  ;;  %v4537_v3 = vsel %vm8362_vm12, %v4528_v28, %v4536_v57 }
 0x3e6   : > { %v4006_v43 = vadd.f32 %v4005_v32, %v4004_v24  ;;  %4642 = vst.msk [vmem:[%s8190_s17 + $0xa0] sm:$0xf] %vm3876_vm5, %v4537_v3  ;;  %v3878_v53 = vadd.f32 %v3877_v26, %v3875_v15  ;;  %v4542_v7 = vrot.slane %v4540_v62, 6  ;;  %v4538_v4 = vrot.slane %v4536_v57, 4 }
 0x3e7   : > { %v4007_v49 = vsel %vm3876_vm5, %v3927_v14, 0.0  ;;  %v4550_v16 = vshrl.u32 %v5077_v52, 16  ;;  %v4553_v40 = vshll.u32 %v5077_v52, 16  ;;  %v4545_v27 = vrot.slane %v4543_v33, 7 }
 0x3e8   : > { %v4008_v46 = vadd.f32 %v4007_v49, %v4006_v43  ;;  %v3879_v22 = vrot.slane %v3878_v53, 4  ;;  %vm4645_vm4 = vsmask.f32 3328 }
 0x3e9   : > { %v4552_v42 = vrot.slane %v4550_v16, 6  ;;  %v4555_v18 = vrot.slane %v4553_v40, 7  ;;  %v4546_v48 = vor.u32 %v4545_v27, %v4542_v7  ;;  %vm4646_vm14 = vmand %vm3876_vm5, %vm4645_vm4 }
 0x3ea   : > { %v4009_v19 = vrot.slane %v4008_v46, 4  ;;  %v3880_v8 = vadd.f32 %v3879_v22, %v3878_v53 }
 0x3eb   : > { %v4556_v38 = vor.u32 %v4555_v18, %v4552_v42  ;;  %v4547_v41 = vsel %vm8362_vm12, %v4538_v4, %v4546_v48  ;;  %v4548_v63 = vrot.slane %v4546_v48, 4 }
 0x3ec   : > { %v4010_v56 = vadd.f32 %v4009_v19, %v4008_v46  ;;  %v3881_v6 = vrot.slane %v3880_v8, 2  ;;  %4643 = vst.msk [vmem:[%s8190_s17 + $0xa4] sm:$0xf] %vm3876_vm5, %v4547_v41  ;;  %vm4650_vm5 = vcmask 60419  }
 0x3ed   : > { %v4557_v31 = vsel %vm8362_vm12, %v4548_v63, %v4556_v38  ;;  %vm4652_vm12 = vmand %vm4650_vm5, %vm4651_vm6 }
 0x3ee   : > { %v4011_v1 = vrot.slane %v4010_v56, 2  ;;  %v3882_v2 = vadd.f32 %v3881_v6, %v3880_v8  ;;  %v4648_v0 = vsel %vm4646_vm14, %v4557_v31, %v4647_v58 }
 0x3ef   : > { %4649 = vst [vmem:[%s8190_s17 + $0xa8] sm:$0xf] %v4648_v0 }
 0x3f0   : > { %v4012_v35 = vadd.f32 %v4011_v1, %v4010_v56  ;;  %v3883_v10 = vrot.slane %v3882_v2, 1 }
 0x3f2   : > { %v4013_v21 = vrot.slane %v4012_v35, 1  ;;  %v3884_v50 = vadd.f32 %v3883_v10, %v3882_v2 }
 0x3f4   : > { %v4014_v55 = vadd.f32 %v4013_v21, %v4012_v35  ;;  %3886 = vst.msk [vmem:[%s238_s20] sm:$0x1] %vm3885_vm10, %v3884_v50 }
 0x3f6   : > { %4015 = vst.msk [vmem:[%s241_s23] sm:$0x1] %vm3885_vm10, %v4014_v55  ;;  %v4653_v44 = vld [vmem:[%s8190_s17 + $0xa8] sm:$0x8] }
 0x3f7   : > { %v4654_v5 = vsel %vm4652_vm12, 0, %v4653_v44 }
 0x3f8   : > { %4655 = vst [vmem:[%s8190_s17 + $0xa8] sm:$0x8] %v4654_v5 }
 0x3f9 PF: > { %s16_s18 = sadd.s32 1, %s6745_s18  }
 0x3fa   : > { %p13_p4 = scmp.ge.s32.totalorder %s16_s18, 4  }
 0x3fc   :  { %15 = sbr.rel (!%p13_p4) target bundleno = 1 (0x1), region = 94 }

// kernel: double_cv.4
= control target key start
LH: loop header
LB: loop body
LE: loop exit
PB: predicated region body
PF: predicated region fallthrough
CT: control target
= control target key end

     0   :  { %s7452_s24 = smov 0   ;;  %s10325_s0 = inlined_call_operand.vmem [shape: bf16[2,362,8], index: 0, kind: input, shape index: {}]   ;;  %s10326_s1 = inlined_call_operand.vmem [shape: bf16[9,8,8], index: 1, kind: input, shape index: {}]   ;;  %s10327_s2 = inlined_call_operand.vmem [shape: f32[1,8], index: 2, kind: input, shape index: {}]   ;;  %s10328_s3 = inlined_call_operand.vmem [shape: f32[1,8], index: 3, kind: input, shape index: {}]   ;;  %s10329_s4 = inlined_call_operand.vmem [shape: f32[362,1], index: 4, kind: input, shape index: {}]   ;;  %s10330_s5 = inlined_call_operand.vmem [shape: bf16[2,362,8], index: 5, kind: output, shape index: {0}]   ;;  %s10331_s6 = inlined_call_operand.vmem [shape: f32[2,1,8], index: 6, kind: output, shape index: {1}]   ;;  %s10332_s7 = inlined_call_operand.vmem [shape: f32[2,1,8], index: 7, kind: output, shape index: {2}]  }
   0x1 LB: > { %s5383_s25 = sadd.s32 4294967295, %s7407_s24   ;;  %p5387_p0 = scmp.ge.s32.totalorder %s7407_s24, 1  ;;  %s7407_s24 = sphi %s7452_s24, %s18_s24  }
   0x2   : > { %p242_p1 = scmp.lt.s32.totalorder %s7407_s24, 3 }
   0x4   : > { %p243_p2 = pnand %p5387_p0, %p242_p1 }
   0x6   : > { %246 = sbr.rel (%p243_p2) target bundleno = 1148 (0x47c), region = 40 }
   0xd   : > { %v637_v0 = vld [vmem:[%s10329_s4 + $0x20] sm:$0xff]  ;;  %v635_v1 = vld [vmem:[%s10329_s4 + $0x10] sm:$0xff]  ;;  %v638_v2 = vld [vmem:[%s10329_s4 + $0x28] sm:$0xff]  ;;  %v10335_v3 = vmov 0   ;;  %v10333_v43 = vmov 0.0   ;;  %p280_p3 = scmp.lt.s32.totalorder %s5383_s25, 1 }
   0xe   : > { %7398 = vset.pattern.permute.xlu1 %v10335_v3  ;;  %7397 = vset.pattern.permute.xlu0 %v10335_v3  ;;  %vm683_vm0 = vcmp.gt.f32.partialorder %v637_v0, 0.0  ;;  %vm681_vm1 = vcmp.gt.f32.partialorder %v635_v1, 0.0  ;;  %vm684_vm2 = vcmp.gt.f32.partialorder %v638_v2, 0.0  ;;  %v636_v4 = vld [vmem:[%s10329_s4 + $0x18] sm:$0xff]  ;;  %v634_v7 = vld [vmem:[%s10329_s4 + $0x8] sm:$0xff]  ;;  %v633_v8 = vld [vmem:[%s10329_s4] sm:$0xff] }
   0xf   : > { %v729_v5 = vsel %vm683_vm0, 1, %v10335_v3  ;;  %v727_v6 = vsel %vm681_vm1, 1, %v10335_v3  ;;  %vm682_vm3 = vcmp.gt.f32.partialorder %v636_v4, 0.0  ;;  %v730_v9 = vsel %vm684_vm2, 1, %v10335_v3  ;;  %v640_v11 = vld [vmem:[%s10329_s4 + $0x38] sm:$0xff]  ;;  %v639_v12 = vld [vmem:[%s10329_s4 + $0x30] sm:$0xff]  ;;  %6324 = vmatprep.subr.bf16.mxu0 %v10333_v43  ;;  %5980 = vmatprep.subr.bf16.mxu1 %v10333_v43 }
  0x10   : > { %784 = vperm.xlu1 %7398, %v729_v5   ;;  %778 = vperm.xlu0 %7397, %v727_v6   ;;  %v728_v10 = vsel %vm682_vm3, 1, %v10335_v3  ;;  %vm680_vm4 = vcmp.gt.f32.partialorder %v634_v7, 0.0  ;;  %vm679_vm5 = vcmp.gt.f32.partialorder %v633_v8, 0.0  ;;  %vm686_vm6 = vcmp.gt.f32.partialorder %v640_v11, 0.0  ;;  %v642_v15 = vld [vmem:[%s10329_s4 + $0x48] sm:$0xff]  ;;  %v641_v16 = vld [vmem:[%s10329_s4 + $0x40] sm:$0xff] }
  0x11   : > { %v726_v13 = vsel %vm680_vm4, 1, %v10335_v3  ;;  %v725_v14 = vsel %vm679_vm5, 1, %v10335_v3  ;;  %vm685_vm7 = vcmp.gt.f32.partialorder %v639_v12, 0.0  ;;  %v732_v17 = vsel %vm686_vm6, 1, %v10335_v3  ;;  %v644_v19 = vld [vmem:[%s10329_s4 + $0x58] sm:$0xff]  ;;  %v643_v20 = vld [vmem:[%s10329_s4 + $0x50] sm:$0xff] }
  0x12   : > { %v731_v18 = vsel %vm685_vm7, 1, %v10335_v3  ;;  %vm688_vm8 = vcmp.gt.f32.partialorder %v642_v15, 0.0  ;;  %vm687_vm9 = vcmp.gt.f32.partialorder %v641_v16, 0.0  ;;  %vm690_vm10 = vcmp.gt.f32.partialorder %v644_v19, 0.0  ;;  %v646_v23 = vld [vmem:[%s10329_s4 + $0x68] sm:$0xff]  ;;  %v645_v24 = vld [vmem:[%s10329_s4 + $0x60] sm:$0xff] }
  0x13   : > { %v734_v21 = vsel %vm688_vm8, 1, %v10335_v3  ;;  %v733_v22 = vsel %vm687_vm9, 1, %v10335_v3  ;;  %vm689_vm11 = vcmp.gt.f32.partialorder %v643_v20, 0.0  ;;  %v736_v25 = vsel %vm690_vm10, 1, %v10335_v3  ;;  %v648_v27 = vld [vmem:[%s10329_s4 + $0x78] sm:$0xff]  ;;  %v647_v28 = vld [vmem:[%s10329_s4 + $0x70] sm:$0xff] }
  0x14   : > { %787 = vperm.xlu1 %7398, %v730_v9   ;;  %781 = vperm.xlu0 %7397, %v728_v10   ;;  %v735_v26 = vsel %vm689_vm11, 1, %v10335_v3  ;;  %vm692_vm12 = vcmp.gt.f32.partialorder %v646_v23, 0.0  ;;  %vm691_vm13 = vcmp.gt.f32.partialorder %v645_v24, 0.0  ;;  %vm694_vm14 = vcmp.gt.f32.partialorder %v648_v27, 0.0  ;;  %v650_v31 = vld [vmem:[%s10329_s4 + $0x88] sm:$0xff]  ;;  %v649_v32 = vld [vmem:[%s10329_s4 + $0x80] sm:$0xff] }
  0x15   : > { %v738_v29 = vsel %vm692_vm12, 1, %v10335_v3  ;;  %v737_v30 = vsel %vm691_vm13, 1, %v10335_v3  ;;  %vm693_vm15 = vcmp.gt.f32.partialorder %v647_v28, 0.0  ;;  %v740_v33 = vsel %vm694_vm14, 1, %v10335_v3  ;;  %v652_v35 = vld [vmem:[%s10329_s4 + $0x98] sm:$0xff]  ;;  %v651_v36 = vld [vmem:[%s10329_s4 + $0x90] sm:$0xff] }
  0x16   : > { %v739_v34 = vsel %vm693_vm15, 1, %v10335_v3  ;;  %vm696_vm0 = vcmp.gt.f32.partialorder %v650_v31, 0.0  ;;  %vm695_vm1 = vcmp.gt.f32.partialorder %v649_v32, 0.0  ;;  %vm698_vm2 = vcmp.gt.f32.partialorder %v652_v35, 0.0  ;;  %v654_v39 = vld [vmem:[%s10329_s4 + $0xa8] sm:$0xff]  ;;  %v653_v40 = vld [vmem:[%s10329_s4 + $0xa0] sm:$0xff] }
  0x17   : > { %v742_v37 = vsel %vm696_vm0, 1, %v10335_v3  ;;  %v741_v38 = vsel %vm695_vm1, 1, %v10335_v3  ;;  %vm697_vm3 = vcmp.gt.f32.partialorder %v651_v36, 0.0  ;;  %v744_v41 = vsel %vm698_vm2, 1, %v10335_v3  ;;  %v656_v44 = vld [vmem:[%s10329_s4 + $0xb8] sm:$0xff]  ;;  %v655_v45 = vld [vmem:[%s10329_s4 + $0xb0] sm:$0xff] }
  0x18   : > { %775 = vperm.xlu1 %7398, %v726_v13   ;;  %772 = vperm.xlu0 %7397, %v725_v14   ;;  %v743_v42 = vsel %vm697_vm3, 1, %v10335_v3  ;;  %vm700_vm4 = vcmp.gt.f32.partialorder %v654_v39, 0.0  ;;  %vm699_vm5 = vcmp.gt.f32.partialorder %v653_v40, 0.0  ;;  %v5479_v46 = vld [vmem:[%s10326_s1 + $0x10] sm:$0xf]  ;;  %vm1300_vm6 = vcmask 1043456  }
  0x19   : > { %v746_v47 = vsel %vm700_vm4, 1, %v10335_v3  ;;  %v745_v48 = vsel %vm699_vm5, 1, %v10335_v3  ;;  %vm702_vm7 = vcmp.gt.f32.partialorder %v656_v44, 0.0  ;;  %vm701_vm8 = vcmp.gt.f32.partialorder %v655_v45, 0.0  ;;  %v658_v50 = vld [vmem:[%s10329_s4 + $0xc8] sm:$0xff]  ;;  %v657_v51 = vld [vmem:[%s10329_s4 + $0xc0] sm:$0xff] }
  0x1a   : > { %v7562_v49 = vsel %vm1300_vm6, %v5479_v46, 0  ;;  %v748_v52 = vsel %vm702_vm7, 1, %v10335_v3  ;;  %v747_v53 = vsel %vm701_vm8, 1, %v10335_v3  ;;  %vm704_vm9 = vcmp.gt.f32.partialorder %v658_v50, 0.0  ;;  %v660_v54 = vld [vmem:[%s10329_s4 + $0xd8] sm:$0xff]  ;;  %v659_v55 = vld [vmem:[%s10329_s4 + $0xd0] sm:$0xff] }
  0x1b   : > { %10378 = vst [vmem:[#allocation2_spill] sm:$0xff] %v7562_v49  ;;  %6325 = vmatpush3.bf16.msra.mxu0 %v7562_v49  ;;  %vm703_vm10 = vcmp.gt.f32.partialorder %v657_v51, 0.0  ;;  %v750_v56 = vsel %vm704_vm9, 1, %v10335_v3  ;;  %vm706_vm11 = vcmp.gt.f32.partialorder %v660_v54, 0.0  ;;  %vm705_vm12 = vcmp.gt.f32.partialorder %v659_v55, 0.0  ;;  %v662_v59 = vld [vmem:[%s10329_s4 + $0xe8] sm:$0xff] }
  0x1c   : > { %793 = vperm.xlu1 %7398, %v732_v17   ;;  %790 = vperm.xlu0 %7397, %v731_v18   ;;  %v749_v57 = vsel %vm703_vm10, 1, %v10335_v3  ;;  %vm7411_vm13 = vmmov 0   ;;  %v5392_v58 = vld [vmem:[%s10326_s1 + $0x4] sm:$0xf]  ;;  %v752_v61 = vsel %vm706_vm11, 1, %v10335_v3  ;;  %v751_v62 = vsel %vm705_vm12, 1, %v10335_v3 }
  0x1d   : > { %6410 = vmatprep.subr.bf16.mxu0 %v10333_v43  ;;  %6326 = vmatprep.mubr.msk.bf16.mxu0 %vm7411_vm13, %v10333_v43  ;;  %v661_v60 = vld [vmem:[%s10329_s4 + $0xe0] sm:$0xff]  ;;  %v1302_v63 = vsel %vm1300_vm6, %v5392_v58, 0  ;;  %vm708_vm14 = vcmp.gt.f32.partialorder %v662_v59, 0.0  ;;  %v664_v0 = vld [vmem:[%s10329_s4 + $0xf8] sm:$0xff]  ;;  %v663_v1 = vld [vmem:[%s10329_s4 + $0xf0] sm:$0xff]  ;;  %s10476_s25 = smov (!%p280_p3, %s5383_s25), 1 }
  0x1e   : > { %5982 = vmatprep.mubr.msk.bf16.mxu1 %vm7411_vm13, %v10333_v43  ;;  %vm707_vm15 = vcmp.gt.f32.partialorder %v661_v60, 0.0  ;;  %5981 = vmatpush3.bf16.msra.mxu1 %v1302_v63  ;;  %v754_v2 = vsel %vm708_vm14, 1, %v10335_v3  ;;  %vm710_vm0 = vcmp.gt.f32.partialorder %v664_v0, 0.0  ;;  %vm709_vm1 = vcmp.gt.f32.partialorder %v663_v1, 0.0  ;;  %v666_v5 = vld [vmem:[%s10329_s4 + $0x108] sm:$0xff]  ;;  %v665_v6 = vld [vmem:[%s10329_s4 + $0x100] sm:$0xff]  ;;  %s292_s9 = scalar_lea.vmem %s10331_s6, %s10476_s25  ;;  %s295_s12 = scalar_lea.vmem %s10332_s7, %s10476_s25 }
  0x1f   : > { %6066 = vmatprep.subr.bf16.mxu1 %v10333_v43  ;;  %v753_v4 = vsel %vm707_vm15, 1, %v10335_v3  ;;  %v756_v7 = vsel %vm710_vm0, 1, %v10335_v3  ;;  %v755_v8 = vsel %vm709_vm1, 1, %v10335_v3  ;;  %vm712_vm2 = vcmp.gt.f32.partialorder %v666_v5, 0.0  ;;  %v668_v9 = vld [vmem:[%s10329_s4 + $0x118] sm:$0xff]  ;;  %v667_v10 = vld [vmem:[%s10329_s4 + $0x110] sm:$0xff] }
  0x20   : > { %799 = vperm.xlu1 %7398, %v734_v21   ;;  %796 = vperm.xlu0 %7397, %v733_v22   ;;  %vm711_vm3 = vcmp.gt.f32.partialorder %v665_v6, 0.0  ;;  %v758_v11 = vsel %vm712_vm2, 1, %v10335_v3  ;;  %vm714_vm4 = vcmp.gt.f32.partialorder %v668_v9, 0.0  ;;  %vm713_vm5 = vcmp.gt.f32.partialorder %v667_v10, 0.0  ;;  %v670_v13 = vld [vmem:[%s10329_s4 + $0x128] sm:$0xff]  ;;  %v669_v14 = vld [vmem:[%s10329_s4 + $0x120] sm:$0xff] }
  0x21   : > { %v757_v12 = vsel %vm711_vm3, 1, %v10335_v3  ;;  %v760_v15 = vsel %vm714_vm4, 1, %v10335_v3  ;;  %v759_v16 = vsel %vm713_vm5, 1, %v10335_v3  ;;  %vm716_vm7 = vcmp.gt.f32.partialorder %v670_v13, 0.0  ;;  %v672_v17 = vld [vmem:[%s10329_s4 + $0x138] sm:$0xff]  ;;  %v671_v18 = vld [vmem:[%s10329_s4 + $0x130] sm:$0xff] }
  0x22   : > { %vm715_vm8 = vcmp.gt.f32.partialorder %v669_v14, 0.0  ;;  %v674_v19 = vld [vmem:[%s10329_s4 + $0x148] sm:$0xff]  ;;  %v673_v20 = vld [vmem:[%s10329_s4 + $0x140] sm:$0xff]  ;;  %v676_v21 = vld [vmem:[%s10329_s4 + $0x158] sm:$0xff]  ;;  %v762_v23 = vsel %vm716_vm7, 1, %v10335_v3  ;;  %vm718_vm9 = vcmp.gt.f32.partialorder %v672_v17, 0.0 }
  0x23   : > { %v675_v22 = vld [vmem:[%s10329_s4 + $0x150] sm:$0xff]  ;;  %vm717_vm10 = vcmp.gt.f32.partialorder %v671_v18, 0.0  ;;  %v678_v24 = vld [vmem:[%s10329_s4 + $0x168] sm:$0x3]  ;;  %vm720_vm11 = vcmp.gt.f32.partialorder %v674_v19, 0.0  ;;  %vm719_vm12 = vcmp.gt.f32.partialorder %v673_v20, 0.0 }
  0x24   : > { %805 = vperm.xlu1 %7398, %v736_v25   ;;  %802 = vperm.xlu0 %7397, %v735_v26   ;;  %v761_v25 = vsel %vm715_vm8, 1, %v10335_v3  ;;  %v677_v26 = vld [vmem:[%s10329_s4 + $0x160] sm:$0xff]  ;;  %s7385_s17 = smul.u32 184, %s10476_s25  ;;  %vm722_vm14 = vcmp.gt.f32.partialorder %v676_v21, 0.0  ;;  %vm721_vm15 = vcmp.gt.f32.partialorder %v675_v22, 0.0  ;;  %v1024_v28 = vld [vmem:[%s10329_s4 + $0x13] sm:$0xff] }
  0x25   : > { %v1025_v27 = vld [vmem:[%s10329_s4 + $0x1b] sm:$0xff]  ;;  %v763_v31 = vsel %vm717_vm10, 1, %v10335_v3  ;;  %vm724_vm0 = vcmp.gt.f32.partialorder %v678_v24, 0.0  ;;  %v1026_v32 = vld [vmem:[%s10329_s4 + $0x23] sm:$0xff]  ;;  %v766_v35 = vsel %vm720_vm11, 1, %v10335_v3  ;;  %v765_v36 = vsel %vm719_vm12, 1, %v10335_v3 }
  0x26   : > { %vm723_vm1 = vcmp.gt.f32.partialorder %v677_v26, 0.0  ;;  %vm4130_vm2 = vcmp.gt.f32.partialorder %v1025_v27, 0.0  ;;  %v7696_v39 = vsel %vm722_vm14, 1, %v10335_v3  ;;  %v7700_v40 = vsel %vm721_vm15, 1, %v10335_v3  ;;  %s7713_s18 = scalar_lea.vmem %s10325_s0, %s7385_s17  ;;  %v1039_v58 = vld [vmem:[%s10329_s4 + $0x8b] sm:$0xff]  ;;  %v1041_v1 = vld [vmem:[%s10329_s4 + $0x9b] sm:$0xff]  ;;  %s9810_s30 = scalar_lea.vmem %s10330_s5, %s7385_s17 }
  0x27   : > { %vm4129_vm3 = vcmp.gt.f32.partialorder %v1024_v28, 0.0  ;;  %v7717_v44 = vsel %vm724_vm0, 1, %v10335_v3  ;;  %vm4131_vm5 = vcmp.gt.f32.partialorder %v1026_v32, 0.0  ;;  %v7720_v45 = vsel %vm723_vm1, 1, %v10335_v3  ;;  %v5761_v59 = vld [vmem:[%s7713_s18 + $0x8] sm:$0xff]   ;;  %v1040_v5 = vld [vmem:[%s10329_s4 + $0x93] sm:$0xff] }
  0x28   : > { %811 = vperm.xlu1 %7398, %v738_v29   ;;  %808 = vperm.xlu0 %7397, %v737_v30   ;;  %v1027_v29 = vld [vmem:[%s10329_s4 + $0x2b] sm:$0xff]  ;;  %v764_v30 = vsel %vm718_vm9, 1, %v10335_v3  ;;  %v7723_v46 = vsel %vm4130_vm2, 1, %v10335_v3  ;;  %v7733_v50 = vsel %vm4129_vm3, 1, %v10335_v3  ;;  %v7745_v54 = vsel %vm4131_vm5, 1, %v10335_v3  ;;  %v1042_v14 = vld [vmem:[%s10329_s4 + $0xa3] sm:$0xff] }
  0x29   : > { %vm4132_vm4 = vcmp.gt.f32.partialorder %v1027_v29, 0.0  ;;  %vm4144_vm2 = vcmp.gt.f32.partialorder %v1039_v58, 0.0  ;;  %v7789_v6 = vld [vmem:[%s10327_s2] ss:$0 sm:$0xff]  ;;  %vm4145_vm5 = vcmp.gt.f32.partialorder %v1040_v5, 0.0  ;;  %v1044_v21 = vld [vmem:[%s10329_s4 + $0xb3] sm:$0xff] }
  0x2a   : > { %v7737_v51 = vsel %vm4132_vm4, 1, %v10335_v3  ;;  %vm4146_vm4 = vcmp.gt.f32.partialorder %v1041_v1, 0.0  ;;  %v7818_v19 = vsel %vm4144_vm2, 1, %v10335_v3  ;;  %v1047_v26 = vld [vmem:[%s10329_s4 + $0xcb] sm:$0xff]  ;;  %v5763_v27 = vld [vmem:[%s7713_s18 + $0x18] sm:$0xff]  }
  0x2b   : > { %v7843_v28 = vsel %vm4146_vm4, 1, %v10335_v3 }
  0x2c   : > { %817 = vperm.xlu1 %7398, %v740_v33   ;;  %814 = vperm.xlu0 %7397, %v739_v34   ;;  %v1029_v33 = vld [vmem:[%s10329_s4 + $0x3b] sm:$0xff]  ;;  %v1028_v34 = vld [vmem:[%s10329_s4 + $0x33] sm:$0xff] }
  0x2d   : > { %vm4134_vm7 = vcmp.gt.f32.partialorder %v1029_v33, 0.0  ;;  %vm4133_vm8 = vcmp.gt.f32.partialorder %v1028_v34, 0.0  ;;  %v5764_v33 = vld [vmem:[%s7713_s18 + $0x20] sm:$0xff]  }
  0x2e   : > { %v7749_v55 = vsel %vm4134_vm7, 1, %v10335_v3 }
  0x30   : > { %823 = vperm.xlu1 %7398, %v742_v37   ;;  %820 = vperm.xlu0 %7397, %v741_v38   ;;  %v1031_v37 = vld [vmem:[%s10329_s4 + $0x4b] sm:$0xff]  ;;  %v1030_v38 = vld [vmem:[%s10329_s4 + $0x43] sm:$0xff] }
  0x31   : > { %vm4136_vm9 = vcmp.gt.f32.partialorder %v1031_v37, 0.0  ;;  %vm4135_vm10 = vcmp.gt.f32.partialorder %v1030_v38, 0.0  ;;  %v5688_v37 = vunpack.c.h.bf16 %v5763_v27 }
  0x32   : > { %v7764_v60 = vsel %vm4136_vm9, 1, %v10335_v3 }
  0x34   : > { %829 = vperm.xlu1 %7398, %v744_v41   ;;  %826 = vperm.xlu0 %7397, %v743_v42   ;;  %v1033_v41 = vld [vmem:[%s10329_s4 + $0x5b] sm:$0xff]  ;;  %v1032_v42 = vld [vmem:[%s10329_s4 + $0x53] sm:$0xff] }
  0x35   : > { %vm4138_vm11 = vcmp.gt.f32.partialorder %v1033_v41, 0.0  ;;  %vm4137_vm12 = vcmp.gt.f32.partialorder %v1032_v42, 0.0 }
  0x36   : > { %v7774_v63 = vsel %vm4138_vm11, 1, %v10335_v3  ;;  %v7777_v0 = vsel %vm4137_vm12, 1, %v10335_v3  ;;  %vm4152_vm11 = vcmp.gt.f32.partialorder %v1047_v26, 0.0  ;;  %v5766_v26 = vld [vmem:[%s7713_s18 + $0x30] sm:$0xff]  }
  0x38   : > { %835 = vperm.xlu1 %7398, %v746_v47   ;;  %832 = vperm.xlu0 %7397, %v745_v48   ;;  %v1035_v47 = vld [vmem:[%s10329_s4 + $0x6b] sm:$0xff]  ;;  %v1034_v48 = vld [vmem:[%s10329_s4 + $0x63] sm:$0xff] }
  0x39   : > { %vm4140_vm14 = vcmp.gt.f32.partialorder %v1035_v47, 0.0  ;;  %vm4139_vm15 = vcmp.gt.f32.partialorder %v1034_v48, 0.0 }
  0x3a   : > { %v7793_v9 = vsel %vm4140_vm14, 1, %v10335_v3  ;;  %v7797_v10 = vsel %vm4139_vm15, 1, %v10335_v3 }
  0x3c   : > { %841 = vperm.xlu1 %7398, %v748_v52   ;;  %838 = vperm.xlu0 %7397, %v747_v53   ;;  %v1037_v52 = vld [vmem:[%s10329_s4 + $0x7b] sm:$0xff]  ;;  %v5762_v53 = vld [vmem:[%s7713_s18 + $0x10] sm:$0xff]  }
  0x3d   : > { %vm4142_vm0 = vcmp.gt.f32.partialorder %v1037_v52, 0.0 }
  0x3e   : > { %v7804_v13 = vsel %vm4142_vm0, 1, %v10335_v3 }
  0x40   : > { %847 = vperm.xlu1 %7398, %v750_v56   ;;  %844 = vperm.xlu0 %7397, %v749_v57   ;;  %v7753_v56 = vsel %vm4133_vm8, 1, %v10335_v3  ;;  %v1036_v57 = vld [vmem:[%s10329_s4 + $0x73] sm:$0xff]  ;;  %vm4147_vm8 = vcmp.gt.f32.partialorder %v1042_v14, 0.0 }
  0x41   : > { %vm4141_vm1 = vcmp.gt.f32.partialorder %v1036_v57, 0.0  ;;  %v5765_v57 = vld [vmem:[%s7713_s18 + $0x28] sm:$0xff]  }
  0x42   : > { %v7814_v18 = vsel %vm4141_vm1, 1, %v10335_v3 }
  0x44   : > { %853 = vperm.xlu1 %7398, %v752_v61   ;;  %850 = vperm.xlu0 %7397, %v751_v62   ;;  %v7768_v61 = vsel %vm4135_vm10, 1, %v10335_v3  ;;  %v1038_v62 = vld [vmem:[%s10329_s4 + $0x83] sm:$0xff]  ;;  %vm4149_vm10 = vcmp.gt.f32.partialorder %v1044_v21, 0.0 }
  0x45   : > { %vm4143_vm3 = vcmp.gt.f32.partialorder %v1038_v62, 0.0  ;;  %v7875_v47 = vsel %vm4149_vm10, 1, %v10335_v3  ;;  %v5691_v62 = vunpack.c.l.bf16 %v5764_v33 }
  0x46   : > { %v7828_v22 = vsel %vm4143_vm3, 1, %v10335_v3 }
  0x48   : > { %859 = vperm.xlu1 %7398, %v754_v2   ;;  %856 = vperm.xlu0 %7397, %v753_v4   ;;  %v5683_v2 = vunpack.c.l.bf16 %v5762_v53  ;;  %v5674_v4 = vld [vmem:[%s7713_s18] sm:$0xff]  }
  0x49   : > { %v5675_v17 = vunpack.c.l.bf16 %v5674_v4 }
  0x4a   : > { %v400_v20 = vmul.f32 %v5683_v2, %v7789_v6 }
  0x4b   : > { %v396_v32 = vmul.f32 %v5675_v17, %v7789_v6 }
  0x4c   : > { %865 = vperm.xlu1 %7398, %v756_v7   ;;  %862 = vperm.xlu0 %7397, %v755_v8   ;;  %v5679_v7 = vunpack.c.l.bf16 %v5761_v59  ;;  %v5684_v8 = vunpack.c.h.bf16 %v5762_v53  ;;  %v7880_v53 = vsel %vm4152_vm11, 1, %v10335_v3 }
  0x4e   : > { %v398_v24 = vmul.f32 %v5679_v7, %v7789_v6  ;;  %v1049_v7 = vld [vmem:[%s10329_s4 + $0xdb] sm:$0xff] }
  0x4f   : > { %vm4154_vm4 = vcmp.gt.f32.partialorder %v1049_v7, 0.0 }
  0x50   : > { %871 = vperm.xlu1 %7398, %v758_v11   ;;  %868 = vperm.xlu0 %7397, %v757_v12   ;;  %v1043_v11 = vld [vmem:[%s10329_s4 + $0xab] sm:$0xff]  ;;  %v5680_v12 = vunpack.c.h.bf16 %v5761_v59  ;;  %v403_v59 = vmul.f32 %v5688_v37, %v7789_v6 }
  0x51   : > { %vm4148_vm7 = vcmp.gt.f32.partialorder %v1043_v11, 0.0 }
  0x52   : > { %v399_v29 = vmul.f32 %v5680_v12, %v7789_v6 }
  0x54   : > { %877 = vperm.xlu1 %7398, %v760_v15   ;;  %874 = vperm.xlu0 %7397, %v759_v16   ;;  %v1045_v15 = vld [vmem:[%s10329_s4 + $0xbb] sm:$0xff]  ;;  %v5676_v16 = vunpack.c.h.bf16 %v5674_v4 }
  0x55   : > { %vm4150_vm9 = vcmp.gt.f32.partialorder %v1045_v15, 0.0  ;;  %v404_v15 = vmul.f32 %v5691_v62, %v7789_v6 }
  0x56   : > { %v7870_v41 = vsel %vm4150_vm9, 1, %v10335_v3 }
  0x58   : > { %883 = vperm.xlu1 %7398, %v762_v23   ;;  %880 = vperm.xlu0 %7397, %v761_v25   ;;  %v7833_v23 = vld [vmem:[%s10328_s3] ss:$0 sm:$0xff]  ;;  %v401_v25 = vmul.f32 %v5684_v8, %v7789_v6  ;;  %v1048_v8 = vld [vmem:[%s10329_s4 + $0xd3] sm:$0xff] }
  0x59   : > { %v453_v34 = vadd.f32 %v7833_v23, %v400_v20  ;;  %v451_v38 = vadd.f32 %v7833_v23, %v398_v24  ;;  %v452_v42 = vadd.f32 %v7833_v23, %v399_v29  ;;  %v449_v52 = vadd.f32 %v7833_v23, %v396_v32 }
  0x5a   : > { %v456_v14 = vadd.f32 %v7833_v23, %v403_v59  ;;  %v457_v37 = vadd.f32 %v7833_v23, %v404_v15 }
  0x5b   : > { %vm499_vm14 = vcmp.ge.f32.partialorder %v453_v34, 0.0  ;;  %v545_v58 = vmul.f32 0.2, %v453_v34  ;;  %vm497_vm15 = vcmp.ge.f32.partialorder %v451_v38, 0.0  ;;  %v543_v1 = vmul.f32 0.2, %v451_v38 }
  0x5c   : > { %889 = vperm.xlu1 %7398, %v764_v30   ;;  %886 = vperm.xlu0 %7397, %v763_v31   ;;  %v7848_v30 = vsel %vm4145_vm5, 1, %v10335_v3  ;;  %v397_v31 = vmul.f32 %v5676_v16, %v7789_v6  ;;  %v544_v4 = vmul.f32 0.2, %v452_v42  ;;  %vm498_vm1 = vcmp.ge.f32.partialorder %v452_v42, 0.0 }
  0x5d   : > { %v541_v12 = vmul.f32 0.2, %v449_v52  ;;  %vm495_vm3 = vcmp.ge.f32.partialorder %v449_v52, 0.0  ;;  %v5695_v16 = vunpack.c.l.bf16 %v5765_v57  ;;  %v7899_v17 = vsel %vm499_vm14, %v453_v34, %v545_v58 }
  0x5e   : > { %v450_v48 = vadd.f32 %v7833_v23, %v397_v31  ;;  %v7902_v20 = vsel %vm497_vm15, %v451_v38, %v543_v1  ;;  %vm4153_vm5 = vcmp.gt.f32.partialorder %v1048_v8, 0.0  ;;  %v7919_v29 = vsel %vm498_vm1, %v452_v42, %v544_v4  ;;  %v5501_v38 = vld [vmem:[%s10326_s1 + $0x14] sm:$0xf] }
  0x5f   : > { %v7925_v32 = vsel %vm495_vm3, %v449_v52, %v541_v12  ;;  %v548_v34 = vmul.f32 0.2, %v456_v14  ;;  %v7942_v42 = vsel %vm4153_vm5, 1, %v10335_v3  ;;  %v7947_v58 = vsel %vm1300_vm6, %v5501_v38, 0 }
  0x60   : > { %895 = vperm.xlu1 %7398, %v766_v35   ;;  %892 = vperm.xlu0 %7397, %v765_v36   ;;  %v7855_v35 = vsel %vm4148_vm7, 1, %v10335_v3  ;;  %v1046_v36 = vld [vmem:[%s10329_s4 + $0xc3] sm:$0xff]  ;;  %vm496_vm2 = vcmp.ge.f32.partialorder %v450_v48, 0.0  ;;  %vm502_vm7 = vcmp.ge.f32.partialorder %v456_v14, 0.0  ;;  %v549_v62 = vmul.f32 0.2, %v457_v37 }
  0x61   : > { %vm4151_vm12 = vcmp.gt.f32.partialorder %v1046_v36, 0.0  ;;  %v7931_v36 = vsel %vm4154_vm4, 1, %v10335_v3  ;;  %v7952_v59 = vsel %vm502_vm7, %v456_v14, %v548_v34  ;;  %v1065_v14 = vld [vmem:[%s10326_s1] sm:$0xf] }
  0x62   : > { %v7906_v21 = vsel %vm4151_vm12, 1, %v10335_v3  ;;  %vm503_vm12 = vcmp.ge.f32.partialorder %v457_v37, 0.0 }
  0x64   : > { %901 = vperm.xlu1 %7398, %v7696_v39   ;;  %898 = vperm.xlu0 %7397, %v7700_v40   ;;  %v7865_v39 = vsel %vm4147_vm8, 1, %v10335_v3  ;;  %v454_v40 = vadd.f32 %v7833_v23, %v401_v25 }
  0x66   : > { %vm500_vm0 = vcmp.ge.f32.partialorder %v454_v40, 0.0  ;;  %v546_v2 = vmul.f32 0.2, %v454_v40 }
  0x68   : > { %907 = vperm.xlu1 %7398, %v7717_v44   ;;  %904 = vperm.xlu0 %7397, %v7720_v45   ;;  %v5687_v44 = vunpack.c.l.bf16 %v5763_v27  ;;  %v5692_v45 = vunpack.c.h.bf16 %v5764_v33  ;;  %v7916_v27 = vsel %vm500_vm0, %v454_v40, %v546_v2  ;;  %v1050_v33 = vld [vmem:[%s10329_s4 + $0xe3] sm:$0xff]  ;;  %v406_v40 = vmul.f32 %v5695_v16, %v7789_v6  ;;  %v1052_v2 = vld [vmem:[%s10329_s4 + $0xf3] sm:$0xff] }
  0x69   : > { %vm4155_vm9 = vcmp.gt.f32.partialorder %v1050_v33, 0.0  ;;  %vm4157_vm0 = vcmp.gt.f32.partialorder %v1052_v2, 0.0  ;;  %v5768_v16 = vld [vmem:[%s7713_s18 + $0x40] sm:$0xff]  }
  0x6a   : > { %v402_v5 = vmul.f32 %v5687_v44, %v7789_v6  ;;  %v405_v11 = vmul.f32 %v5692_v45, %v7789_v6  ;;  %v5700_v44 = vunpack.c.h.bf16 %v5766_v26  ;;  %v5767_v45 = vld [vmem:[%s7713_s18 + $0x38] sm:$0xff]   ;;  %v459_v1 = vadd.f32 %v7833_v23, %v406_v40  ;;  %v5769_v40 = vld [vmem:[%s7713_s18 + $0x48] sm:$0xff]  }
  0x6b   : > { %v5704_v4 = vunpack.c.h.bf16 %v5767_v45  ;;  %v7966_v7 = vsel %vm4155_vm9, 1, %v10335_v3  ;;  %v5703_v15 = vunpack.c.l.bf16 %v5767_v45  ;;  %v1057_v33 = vld [vmem:[%s10329_s4 + $0x11b] sm:$0xff]  ;;  %v5708_v38 = vunpack.c.h.bf16 %v5768_v16 }
  0x6c   : > { %4215 = vperm.xlu1 %7398, %v7723_v46   ;;  %4212 = vperm.xlu0 %7397, %v7733_v50   ;;  %v5696_v46 = vunpack.c.h.bf16 %v5765_v57  ;;  %v542_v50 = vmul.f32 0.2, %v450_v48  ;;  %v455_v24 = vadd.f32 %v7833_v23, %v402_v5  ;;  %v458_v25 = vadd.f32 %v7833_v23, %v405_v11  ;;  %v1055_v11 = vld [vmem:[%s10329_s4 + $0x10b] sm:$0xff] }
  0x6d   : > { %v409_v8 = vmul.f32 %v5700_v44, %v7789_v6  ;;  %vm4160_vm1 = vcmp.gt.f32.partialorder %v1055_v11, 0.0  ;;  %vm4162_vm4 = vcmp.gt.f32.partialorder %v1057_v33, 0.0  ;;  %v1058_v11 = vld [vmem:[%s10329_s4 + $0x123] sm:$0xff] }
  0x6e   : > { %v7922_v31 = vsel %vm496_vm2, %v450_v48, %v542_v50  ;;  %v547_v48 = vmul.f32 0.2, %v455_v24  ;;  %v550_v52 = vmul.f32 0.2, %v458_v25  ;;  %vm501_vm10 = vcmp.ge.f32.partialorder %v455_v24, 0.0  ;;  %v1054_v50 = vld [vmem:[%s10329_s4 + $0x103] sm:$0xff] }
  0x6f   : > { %vm504_vm11 = vcmp.ge.f32.partialorder %v458_v25, 0.0  ;;  %vm505_vm2 = vcmp.ge.f32.partialorder %v459_v1, 0.0  ;;  %vm4159_vm3 = vcmp.gt.f32.partialorder %v1054_v50, 0.0  ;;  %v8016_v45 = vsel %vm4160_vm1, 1, %v10335_v3 }
  0x70   : > { %4221 = vperm.xlu1 %7398, %v7737_v51   ;;  %4218 = vperm.xlu0 %7397, %v7745_v54   ;;  %v1051_v51 = vld [vmem:[%s10329_s4 + $0xeb] sm:$0xff]  ;;  %v407_v54 = vmul.f32 %v5696_v46, %v7789_v6 }
  0x71   : > { %vm4156_vm8 = vcmp.gt.f32.partialorder %v1051_v51, 0.0  ;;  %v411_v51 = vmul.f32 %v5704_v4, %v7789_v6  ;;  %v1059_v4 = vld [vmem:[%s10329_s4 + $0x12b] sm:$0xff] }
  0x72   : > { %v460_v57 = vadd.f32 %v7833_v23, %v407_v54  ;;  %v7962_v5 = vsel %vm4156_vm8, 1, %v10335_v3  ;;  %vm4164_vm9 = vcmp.gt.f32.partialorder %v1059_v4, 0.0  ;;  %v1063_v4 = vld [vmem:[%s10329_s4 + $0x14b] sm:$0xff] }
  0x74   : > { %4227 = vperm.xlu1 %7398, %v7749_v55   ;;  %4224 = vperm.xlu0 %7397, %v7753_v56   ;;  %v1053_v55 = vld [vmem:[%s10329_s4 + $0xfb] sm:$0xff]  ;;  %v5699_v56 = vunpack.c.l.bf16 %v5766_v26  ;;  %v552_v46 = vmul.f32 0.2, %v460_v57  ;;  %vm506_vm15 = vcmp.ge.f32.partialorder %v460_v57, 0.0  ;;  %v462_v26 = vadd.f32 %v7833_v23, %v409_v8 }
  0x75   : > { %vm4158_vm14 = vcmp.gt.f32.partialorder %v1053_v55, 0.0  ;;  %v5712_v8 = vunpack.c.h.bf16 %v5769_v40 }
  0x76   : > { %v408_v12 = vmul.f32 %v5699_v56, %v7789_v6  ;;  %v7993_v54 = vsel %vm4158_vm14, 1, %v10335_v3  ;;  %v8000_v34 = vsel %vm506_vm15, %v460_v57, %v552_v46  ;;  %v5770_v57 = vld [vmem:[%s7713_s18 + $0x50] sm:$0xff]   ;;  %v8024_v56 = vsel %vm4159_vm3, 1, %v10335_v3 }
  0x77   : > { %vm508_vm5 = vcmp.ge.f32.partialorder %v462_v26, 0.0  ;;  %v554_v2 = vmul.f32 0.2, %v462_v26  ;;  %v5711_v46 = vunpack.c.l.bf16 %v5769_v40  ;;  %v5716_v50 = vunpack.c.h.bf16 %v5770_v57 }
  0x78   : > { %4233 = vperm.xlu1 %7398, %v7764_v60   ;;  %4230 = vperm.xlu0 %7397, %v7768_v61   ;;  %v7973_v60 = vsel %vm501_vm10, %v455_v24, %v547_v48  ;;  %v7976_v61 = vsel %vm504_vm11, %v458_v25, %v550_v52  ;;  %v7987_v24 = vsel %vm503_vm12, %v457_v37, %v549_v62  ;;  %v551_v25 = vmul.f32 0.2, %v459_v1  ;;  %v1056_v37 = vld [vmem:[%s10329_s4 + $0x113] sm:$0xff] }
  0x79   : > { %v461_v44 = vadd.f32 %v7833_v23, %v408_v12  ;;  %v410_v48 = vmul.f32 %v5703_v15, %v7789_v6  ;;  %v5707_v52 = vunpack.c.l.bf16 %v5768_v16  ;;  %v464_v62 = vadd.f32 %v7833_v23, %v411_v51 }
  0x7a   : > { %v8021_v55 = vsel %vm505_vm2, %v459_v1, %v551_v25  ;;  %vm4161_vm7 = vcmp.gt.f32.partialorder %v1056_v37, 0.0  ;;  %v413_v1 = vmul.f32 %v5708_v38, %v7789_v6  ;;  %v8040_v16 = vsel %vm4162_vm4, 1, %v10335_v3  ;;  %v5771_v38 = vld [vmem:[%s7713_s18 + $0x58] sm:$0xff]  }
  0x7b   : > { %vm507_vm8 = vcmp.ge.f32.partialorder %v461_v44, 0.0  ;;  %v463_v12 = vadd.f32 %v7833_v23, %v410_v48  ;;  %v556_v15 = vmul.f32 0.2, %v464_v62  ;;  %v8043_v25 = vsel %vm4161_vm7, 1, %v10335_v3  ;;  %v1061_v48 = vld [vmem:[%s10329_s4 + $0x13b] sm:$0xff] }
  0x7c   : > { %4239 = vperm.xlu1 %7398, %v7774_v63   ;;  %4236 = vperm.xlu0 %7397, %v7777_v0   ;;  %v8004_v63 = vsel %vm4157_vm0, 1, %v10335_v3  ;;  %v8007_v0 = vsel %vm1300_vm6, %v1065_v14, 0  ;;  %v412_v14 = vmul.f32 %v5707_v52, %v7789_v6  ;;  %v8048_v51 = vsel %vm508_vm5, %v462_v26, %v554_v2 }
  0x7d   : > { %vm510_vm10 = vcmp.ge.f32.partialorder %v464_v62, 0.0  ;;  %vm4163_vm11 = vcmp.gt.f32.partialorder %v1058_v11, 0.0  ;;  %v415_v37 = vmul.f32 %v5712_v8, %v7789_v6  ;;  %v466_v33 = vadd.f32 %v7833_v23, %v413_v1 }
  0x7e   : > { %v414_v40 = vmul.f32 %v5711_v46, %v7789_v6  ;;  %v465_v2 = vadd.f32 %v7833_v23, %v412_v14  ;;  %v8068_v8 = vsel %vm4164_vm9, 1, %v10335_v3  ;;  %v8070_v1 = vsel %vm510_vm10, %v464_v62, %v556_v15 }
  0x7f   : > { %vm509_vm12 = vcmp.ge.f32.partialorder %v463_v12, 0.0  ;;  %v8073_v11 = vsel %vm4163_vm11, 1, %v10335_v3  ;;  %v5720_v46 = vunpack.c.h.bf16 %v5771_v38  ;;  %vm4166_vm14 = vcmp.gt.f32.partialorder %v1061_v48, 0.0  ;;  %v1064_v48 = vld [vmem:[%s10329_s4 + $0x153] sm:$0xf] }
  0x80   : > { %4245 = vperm.xlu1 %7398, %v7793_v9   ;;  %4242 = vperm.xlu0 %7397, %v7797_v10   ;;  %v5715_v9 = vunpack.c.l.bf16 %v5770_v57  ;;  %v553_v10 = vmul.f32 0.2, %v461_v44  ;;  %v555_v57 = vmul.f32 0.2, %v463_v12  ;;  %v558_v62 = vmul.f32 0.2, %v466_v33 }
  0x81   : > { %vm512_vm0 = vcmp.ge.f32.partialorder %v466_v33, 0.0  ;;  %vm511_vm1 = vcmp.ge.f32.partialorder %v465_v2, 0.0  ;;  %v557_v15 = vmul.f32 0.2, %v465_v2  ;;  %vm4168_vm2 = vcmp.gt.f32.partialorder %v1063_v4, 0.0 }
  0x82   : > { %v416_v26 = vmul.f32 %v5715_v9, %v7789_v6  ;;  %v8063_v52 = vsel %vm507_vm8, %v461_v44, %v553_v10  ;;  %v468_v44 = vadd.f32 %v7833_v23, %v415_v37  ;;  %v467_v9 = vadd.f32 %v7833_v23, %v414_v40 }
  0x83   : > { %v8090_v37 = vsel %vm4166_vm14, 1, %v10335_v3  ;;  %v419_v40 = vmul.f32 %v5720_v46, %v7789_v6  ;;  %vm4169_vm9 = vcmp.gt.f32.partialorder %v1064_v48, 0.0 }
  0x84   : > { %4251 = vperm.xlu1 %7398, %v7804_v13   ;;  %4248 = vperm.xlu0 %7397, %v7814_v18   ;;  %v1060_v13 = vld [vmem:[%s10329_s4 + $0x133] sm:$0xff]  ;;  %v417_v18 = vmul.f32 %v5716_v50, %v7789_v6  ;;  %v5719_v50 = vunpack.c.l.bf16 %v5771_v38  ;;  %v469_v14 = vadd.f32 %v7833_v23, %v416_v26  ;;  %10379 = vst [vmem:[#allocation3_spill] sm:$0xff] %v8090_v37  ;;  %vm514_vm3 = vcmp.ge.f32.partialorder %v468_v44, 0.0  ;;  %v5773_v37 = vld [vmem:[%s7713_s18 + $0x68] sm:$0xff]  }
  0x85   : > { %vm4165_vm15 = vcmp.gt.f32.partialorder %v1060_v13, 0.0  ;;  %v8103_v26 = vsel %vm512_vm0, %v466_v33, %v558_v62  ;;  %vm513_vm5 = vcmp.ge.f32.partialorder %v467_v9, 0.0  ;;  %v472_v49 = vadd.f32 %v7833_v23, %v419_v40 }
  0x86   : > { %v470_v10 = vadd.f32 %v7833_v23, %v417_v18  ;;  %v8093_v38 = vsel %vm4165_vm15, 1, %v10335_v3  ;;  %v418_v13 = vmul.f32 %v5719_v50, %v7789_v6  ;;  %v5772_v18 = vld [vmem:[%s7713_s18 + $0x60] sm:$0xff]   ;;  %10381 = vst [vmem:[#allocation5_spill] sm:$0xff] %v8103_v26  ;;  %v561_v46 = vmul.f32 0.2, %v469_v14 }
  0x87   : > { %10380 = vst [vmem:[#allocation4_spill] sm:$0xff] %v8093_v38  ;;  %vm515_vm8 = vcmp.ge.f32.partialorder %v469_v14, 0.0  ;;  %v5724_v38 = vunpack.c.h.bf16 %v5772_v18  ;;  %v5723_v50 = vunpack.c.l.bf16 %v5772_v18  ;;  %v10382_v62 = vmov 0  }
  0x88   : > { %4257 = vperm.xlu1 %7398, %v7818_v19   ;;  %4254 = vperm.xlu0 %7397, %v7828_v22   ;;  %v1062_v19 = vld [vmem:[%s10329_s4 + $0x143] sm:$0xff]  ;;  %v8087_v22 = vsel %vm509_vm12, %v463_v12, %v555_v57  ;;  %v560_v12 = vmul.f32 0.2, %v468_v44  ;;  %v559_v57 = vmul.f32 0.2, %v467_v9  ;;  %vm516_vm7 = vcmp.ge.f32.partialorder %v470_v10, 0.0 }
  0x89   : > { %vm4167_vm4 = vcmp.gt.f32.partialorder %v1062_v19, 0.0  ;;  %v562_v43 = vmul.f32 0.2, %v470_v10  ;;  %v8117_v26 = vsel %vm4168_vm2, 1, %v10382_v62  ;;  %v5728_v4 = vunpack.c.h.bf16 %v5773_v37 }
  0x8a   : > { %v8113_v33 = vsel %vm514_vm3, %v468_v44, %v560_v12  ;;  %v8125_v40 = vsel %vm513_vm5, %v467_v9, %v559_v57  ;;  %v8135_v44 = vsel %vm4169_vm9, 1, %v10382_v62  ;;  %v5727_v19 = vunpack.c.l.bf16 %v5773_v37 }
  0x8b   : > { %vm518_vm12 = vcmp.ge.f32.partialorder %v472_v49, 0.0  ;;  %v564_v9 = vmul.f32 0.2, %v472_v49  ;;  %v421_v18 = vmul.f32 %v5724_v38, %v7789_v6  ;;  %vm2378_vm0 = vsmask.f32 6400 }
  0x8c   : > { %4263 = vperm.xlu1 %7398, %v7843_v28   ;;  %4260 = vperm.xlu0 %7397, %v7848_v30   ;;  %v8106_v30 = vsel %vm511_vm1, %v465_v2, %v557_v15  ;;  %v8121_v2 = vsel %vm4167_vm4, 1, %v10382_v62  ;;  %v471_v15 = vadd.f32 %v7833_v23, %v418_v13  ;;  %vm1236_vm2 = vcmask 64512  }
  0x8d   : > { %vm1068_vm5 = vsmask.f32 7424 }
  0x8e   : > { %vm517_vm1 = vcmp.ge.f32.partialorder %v471_v15, 0.0 }
  0x8f   : > { %v785_v3 = vpop.permute.xlu1 %784  ;;  %v779_v28 = vpop.permute.xlu0 %778 }
  0x90   : > { %4269 = vperm.xlu1 %7398, %v7855_v35   ;;  %4266 = vperm.xlu0 %7397, %v7865_v39   ;;  %v8128_v35 = vsel %vm516_vm7, %v470_v10, %v562_v43  ;;  %v8131_v39 = vsel %vm515_vm8, %v469_v14, %v561_v46  ;;  %vm913_vm10 = vcmp.eq.s32.totalorder %v785_v3, 1  ;;  %vm911_vm11 = vcmp.eq.s32.totalorder %v779_v28, 1  ;;  %v8142_v14 = vld [vmem:[%s7713_s18 + $0x70] sm:$0xff]  }
  0x91   : > { %v420_v43 = vmul.f32 %v5723_v50, %v7789_v6  ;;  %v563_v10 = vmul.f32 0.2, %v471_v15  ;;  %v959_v37 = vsel %vm913_vm10, %v7899_v17, 0.0  ;;  %v957_v48 = vsel %vm911_vm11, %v7902_v20, 0.0 }
  0x92   : > { %v422_v50 = vmul.f32 %v5727_v19, %v7789_v6  ;;  %v8157_v3 = vsel %vm518_vm12, %v472_v49, %v564_v9  ;;  %v8160_v17 = vadd.f32 %v7833_v23, %v421_v18 }
  0x93   : > { %v788_v12 = vpop.permute.xlu1 %787  ;;  %v782_v13 = vpop.permute.xlu0 %781  ;;  %v8163_v20 = vadd.f32 %v7833_v23, %v420_v43  ;;  %v8183_v43 = vsel %vm517_vm1, %v471_v15, %v563_v10  ;;  %v5731_v10 = vunpack.c.l.bf16 %v8142_v14 }
  0x94   : > { %vm914_vm14 = vcmp.eq.s32.totalorder %v788_v12, 1  ;;  %vm912_vm15 = vcmp.eq.s32.totalorder %v782_v13, 1  ;;  %4275 = vperm.xlu1 %7398, %v7870_v41   ;;  %4272 = vperm.xlu0 %7397, %v7875_v47   ;;  %v423_v47 = vmul.f32 %v5728_v4, %v7789_v6  ;;  %vm520_vm9 = vcmp.ge.f32.partialorder %v8160_v17, 0.0 }
  0x95   : > { %v960_v38 = vsel %vm914_vm14, %v7916_v27, 0.0  ;;  %v958_v57 = vsel %vm912_vm15, %v7919_v29, 0.0  ;;  %v5732_v27 = vunpack.c.h.bf16 %v8142_v14  ;;  %vm519_vm10 = vcmp.ge.f32.partialorder %v8163_v20, 0.0 }
  0x96   : > { %v8150_v46 = vpack.c.bf16 %v960_v38, %v959_v37  ;;  %v8152_v41 = vpack.c.bf16 %v958_v57, %v957_v48  ;;  %v8188_v38 = vadd.f32 %v7833_v23, %v423_v47  ;;  %v8191_v57 = vadd.f32 %v7833_v23, %v422_v50 }
  0x97   : > { %v776_v12 = vpop.permute.xlu1 %775  ;;  %v773_v13 = vpop.permute.xlu0 %772 }
  0x98   : > { %10383 = vst [vmem:[#allocation6_spill] sm:$0xff] %v8150_v46  ;;  %10384 = vst [vmem:[#allocation7_spill] sm:$0xff] %v8152_v41  ;;  %vm910_vm3 = vcmp.eq.s32.totalorder %v776_v12, 1  ;;  %vm909_vm4 = vcmp.eq.s32.totalorder %v773_v13, 1  ;;  %4281 = vperm.xlu1 %7398, %v7880_v53   ;;  %4278 = vperm.xlu0 %7397, %v7906_v21   ;;  %v1077_v29 = vshll.u32 %v8152_v41, 16  ;;  %v1081_v28 = vshrl.u32 %v8152_v41, 16 }
  0x99   : > { %v956_v49 = vsel %vm910_vm3, %v7922_v31, 0.0  ;;  %v955_v4 = vsel %vm909_vm4, %v7925_v32, 0.0  ;;  %v8173_v19 = vshll.u32 %v8150_v46, 16  ;;  %v8176_v9 = vshrl.u32 %v8150_v46, 16 }
  0x9a   : > { %v8178_v18 = vpack.c.bf16 %v956_v49, %v955_v4  ;;  %v2379_v53 = vrot.slane %v1081_v28, 1  ;;  %v2380_v21 = vrot.slane %v1077_v29, 2  ;;  %v566_v4 = vmul.f32 0.2, %v8160_v17 }
  0x9b   : > { %10385 = vst [vmem:[#allocation8_spill] sm:$0xff] %v8173_v19  ;;  %10386 = vst [vmem:[#allocation9_spill] sm:$0xff] %v8176_v9  ;;  %v794_v37 = vpop.permute.xlu1 %793  ;;  %v791_v48 = vpop.permute.xlu0 %790  ;;  %v2382_v31 = vrot.slane %v8176_v9, 1  ;;  %v2383_v32 = vrot.slane %v8173_v19, 2  ;;  %vm522_vm11 = vcmp.ge.f32.partialorder %v8188_v38, 0.0  ;;  %vm521_vm3 = vcmp.ge.f32.partialorder %v8191_v57, 0.0 }
  0x9c   : > { %10387 = vst [vmem:[#allocation10_spill] sm:$0xff] %v8178_v18  ;;  %vm916_vm7 = vcmp.eq.s32.totalorder %v794_v37, 1  ;;  %vm915_vm8 = vcmp.eq.s32.totalorder %v791_v48, 1  ;;  %4287 = vperm.xlu1 %7398, %v7931_v36   ;;  %4284 = vperm.xlu0 %7397, %v7942_v42   ;;  %v2381_v15 = vor.u32 %v2380_v21, %v2379_v53  ;;  %v1072_v50 = vshll.u32 %v8178_v18, 16 }
  0x9d   : > { %v962_v12 = vsel %vm916_vm7, %v7952_v59, 0.0  ;;  %v961_v13 = vsel %vm915_vm8, %v7973_v60, 0.0  ;;  %v2384_v49 = vor.u32 %v2383_v32, %v2382_v31  ;;  %v1070_v21 = vshrl.u32 %v8178_v18, 16 }
  0x9e   : > { %v8199_v47 = vpack.c.bf16 %v962_v12, %v961_v13  ;;  %v565_v59 = vmul.f32 0.2, %v8163_v20  ;;  %v1074_v60 = vrot.slane %v1072_v50, 1  ;;  %v1079_v13 = vrot.slane %v1077_v29, 1  ;;  %v5775_v29 = vld [vmem:[%s7713_s18 + $0x78] sm:$0xff]  }
  0x9f   : > { %v800_v36 = vpop.permute.xlu1 %799  ;;  %v797_v42 = vpop.permute.xlu0 %796  ;;  %v2385_v53 = vsel %vm2378_vm0, %v2381_v15, %v2384_v49  ;;  %v568_v15 = vmul.f32 0.2, %v8188_v38  ;;  %v10391_v50 = vmov 0.0  }
  0xa0   : > { %vm918_vm12 = vcmp.eq.s32.totalorder %v800_v36, 1  ;;  %vm917_vm14 = vcmp.eq.s32.totalorder %v797_v42, 1  ;;  %6327 = vmatmul.mubr.msk.bf16.vlgmr.msra.gmra.mrb[0].mxu0 %vm1236_vm2, %v2385_v53  ;;  %4293 = vperm.xlu1 %7398, %v7962_v5   ;;  %v8211_v37 = vshll.u32 %v8199_v47, 16  ;;  %v8218_v32 = vshrl.u32 %v8199_v47, 16 }
  0xa1   : > { %v964_v48 = vsel %vm918_vm12, %v7976_v61, 0.0  ;;  %v963_v31 = vsel %vm917_vm14, %v7987_v24, 0.0  ;;  %6411 = vmatpush3.bf16.msra.mxu0 %v7947_v58  ;;  %4290 = vperm.xlu0 %7397, %v7966_v7   ;;  %v1075_v5 = vor.u32 %v1074_v60, %v1070_v21  ;;  %v567_v36 = vmul.f32 0.2, %v8191_v57 }
  0xa2   : > { %10388 = vst [vmem:[#allocation11_spill] sm:$0xff] %v8211_v37  ;;  %10389 = vst [vmem:[#allocation12_spill] sm:$0xff] %v8218_v32  ;;  %v8221_v12 = vpack.c.bf16 %v964_v48, %v963_v31  ;;  %6330 = vmatprep.mubr.msk.bf16.mxu0 %vm7411_vm13, %v10391_v50  ;;  %v2387_v61 = vrot.slane %v8211_v37, 2  ;;  %6496 = vmatprep.subr.bf16.mxu0 %v10391_v50  ;;  %v2386_v7 = vrot.slane %v8218_v32, 1 }
  0xa3   : > { %v806_v58 = vpop.permute.xlu1 %805  ;;  %v803_v24 = vpop.permute.xlu0 %802  ;;  %v425_v42 = vmul.f32 %v5732_v27, %v7789_v6  ;;  %v424_v53 = vmul.f32 %v5731_v10, %v7789_v6  ;;  %v1080_v21 = vsel %vm1068_vm5, %v1075_v5, %v1079_v13 }
  0xa4   : > { %10390 = vst [vmem:[#allocation13_spill] sm:$0xff] %v8221_v12  ;;  %vm920_vm15 = vcmp.eq.s32.totalorder %v806_v58, 1  ;;  %vm919_vm1 = vcmp.eq.s32.totalorder %v803_v24, 1  ;;  %4299 = vperm.xlu1 %7398, %v7993_v54   ;;  %v8237_v60 = vshll.u32 %v8221_v12, 16  ;;  %5983 = vmatmul.mubr.msk.bf16.vlgmr.msra.gmra.mrb[0].mxu1 %vm1236_vm2, %v1080_v21  ;;  %v2388_v14 = vor.u32 %v2387_v61, %v2386_v7 }
  0xa5   : > { %v966_v48 = vsel %vm920_vm15, %v8000_v34, 0.0  ;;  %v965_v31 = vsel %vm919_vm1, %v8021_v55, 0.0  ;;  %4296 = vperm.xlu0 %7397, %v8004_v63   ;;  %v8244_v27 = vshrl.u32 %v8221_v12, 16  ;;  %6067 = vmatpush3.bf16.msra.mxu1 %v8007_v0  ;;  %v8254_v54 = vsel %vm520_vm9, %v8160_v17, %v566_v4  ;;  %v5776_v55 = vld [vmem:[%s7713_s18 + $0x80] sm:$0xff]  }
  0xa6   : > { %10392 = vst [vmem:[#allocation14_spill] sm:$0xff] %v8237_v60  ;;  %v8246_v10 = vpack.c.bf16 %v966_v48, %v965_v31  ;;  %5986 = vmatprep.mubr.msk.bf16.mxu1 %vm7411_vm13, %v10391_v50  ;;  %v8259_v34 = vsel %vm519_vm10, %v8163_v20, %v565_v59  ;;  %v5736_v63 = vunpack.c.h.bf16 %v5775_v29  ;;  %v2389_v58 = vsel %vm2378_vm0, %v2384_v49, %v2388_v14 }
  0xa7   : > { %10393 = vst [vmem:[#allocation15_spill] sm:$0xff] %v8244_v27  ;;  %v812_v5 = vpop.permute.xlu1 %811  ;;  %v809_v61 = vpop.permute.xlu0 %808  ;;  %v2390_v0 = vrot.slane %v8244_v27, 1  ;;  %v2391_v24 = vrot.slane %v8237_v60, 2  ;;  %v5735_v7 = vunpack.c.l.bf16 %v5775_v29  ;;  %6152 = vmatprep.subr.bf16.mxu1 %v10391_v50  ;;  %v1083_v17 = vor.u32 %v1081_v28, %v1079_v13  ;;  %v8282_v28 = vld [vmem:[%s7713_s18 + $0x88] sm:$0xff]  }
  0xa8   : > { %10394 = vst [vmem:[#allocation16_spill] sm:$0xff] %v8246_v10  ;;  %6331 = vmatmul.mubr.msk.bf16.gmra.mrb[4].mxu0 %vm1236_vm2, %v2389_v58  ;;  %4305 = vperm.xlu1 %7398, %v8016_v45   ;;  %v8273_v20 = vsel %vm522_vm11, %v8188_v38, %v568_v15  ;;  %v478_v49 = vadd.f32 %v7833_v23, %v425_v42  ;;  %vm922_vm4 = vcmp.eq.s32.totalorder %v812_v5, 1  ;;  %vm921_vm7 = vcmp.eq.s32.totalorder %v809_v61, 1  ;;  %v8316_v5 = vld [vmem:[%s7713_s18 + $0x90] sm:$0xff]  }
  0xa9   : > { %4302 = vperm.xlu0 %7397, %v8024_v56   ;;  %6334 = vmatprep.mubr.msk.bf16.mxu0 %vm7411_vm13, %v10391_v50  ;;  %v477_v45 = vadd.f32 %v7833_v23, %v424_v53  ;;  %v5740_v4 = vunpack.c.h.bf16 %v5776_v55  ;;  %v1087_v59 = vrot.slane %v8173_v19, 1  ;;  %v8286_v38 = vshll.u32 %v8246_v10, 16 }
  0xaa   : > { %v8289_v15 = vshrl.u32 %v8246_v10, 16  ;;  %v5739_v13 = vunpack.c.l.bf16 %v5776_v55  ;;  %v8291_v56 = vor.u32 %v2391_v24, %v2390_v0  ;;  %v8296_v53 = vsel %vm521_vm3, %v8191_v57, %v567_v36 }
  0xab   : > { %10395 = vst [vmem:[#allocation17_spill] sm:$0xff] %v8286_v38  ;;  %v818_v42 = vpop.permute.xlu1 %817  ;;  %v815_v29 = vpop.permute.xlu0 %814  ;;  %v427_v21 = vmul.f32 %v5736_v63, %v7789_v6  ;;  %v426_v48 = vmul.f32 %v5735_v7, %v7789_v6  ;;  %v968_v31 = vsel %vm922_vm4, %v8048_v51, 0.0  ;;  %v967_v55 = vsel %vm921_vm7, %v8063_v52, 0.0 }
  0xac   : > { %10396 = vst [vmem:[#allocation18_spill] sm:$0xff] %v8289_v15  ;;  %v1088_v58 = vsel %vm1068_vm5, %v1083_v17, %v1087_v59  ;;  %4311 = vperm.xlu1 %7398, %v8040_v16   ;;  %v5744_v0 = vunpack.c.h.bf16 %v8282_v28  ;;  %vm524_vm8 = vcmp.ge.f32.partialorder %v478_v49, 0.0  ;;  %v570_v57 = vmul.f32 0.2, %v478_v49 }
  0xad   : > { %5987 = vmatmul.mubr.msk.bf16.gmra.mrb[4].mxu1 %vm1236_vm2, %v1088_v58  ;;  %4308 = vperm.xlu0 %7397, %v8043_v25   ;;  %vm523_vm9 = vcmp.ge.f32.partialorder %v477_v45, 0.0  ;;  %v569_v36 = vmul.f32 0.2, %v477_v45  ;;  %v2394_v51 = vrot.slane %v8289_v15, 1  ;;  %v2395_v52 = vrot.slane %v8286_v38, 2 }
  0xae   : > { %5990 = vmatprep.mubr.msk.bf16.mxu1 %vm7411_vm13, %v10391_v50  ;;  %v429_v63 = vmul.f32 %v5740_v4, %v7789_v6  ;;  %v428_v16 = vmul.f32 %v5739_v13, %v7789_v6  ;;  %v8318_v61 = vpack.c.bf16 %v968_v31, %v967_v55  ;;  %v2393_v7 = vsel %vm2378_vm0, %v2388_v14, %v8291_v56 }
  0xaf   : > { %v8320_v25 = vpop.permute.xlu1 %823  ;;  %v8322_v24 = vpop.permute.xlu0 %820  ;;  %v8327_v17 = vadd.f32 %v7833_v23, %v427_v21  ;;  %v5743_v58 = vunpack.c.l.bf16 %v8282_v28  ;;  %vm924_vm10 = vcmp.eq.s32.totalorder %v818_v42, 1  ;;  %vm923_vm11 = vcmp.eq.s32.totalorder %v815_v29, 1  ;;  %v10400_v42 = vld [vmem:[#allocation4_spill] sm:$0xff] }
  0xb0   : > { %10397 = vst [vmem:[#allocation19_spill] sm:$0xff] %v8318_v61  ;;  %6335 = vmatmul.mubr.msk.bf16.gmra.mrb[8].mxu0 %vm1236_vm2, %v2393_v7  ;;  %4317 = vperm.xlu1 %7398, %v8068_v8   ;;  %v1095_v4 = vrot.slane %v8211_v37, 1  ;;  %v431_v13 = vmul.f32 %v5744_v0, %v7789_v6  ;;  %v8338_v14 = vsel %vm524_vm8, %v478_v49, %v570_v57  ;;  %v5748_v31 = vunpack.c.h.bf16 %v8316_v5 }
  0xb1   : > { %4314 = vperm.xlu0 %7397, %v8073_v11   ;;  %6338 = vmatprep.mubr.msk.bf16.mxu0 %vm7411_vm13, %v10391_v50  ;;  %v8341_v28 = vsel %vm523_vm9, %v477_v45, %v569_v36  ;;  %v479_v21 = vadd.f32 %v7833_v23, %v426_v48  ;;  %v1091_v8 = vor.u32 %v8176_v9, %v1087_v59  ;;  %v970_v7 = vsel %vm924_vm10, %v8070_v1, 0.0 }
  0xb2   : > { %v8346_v55 = vor.u32 %v2395_v52, %v2394_v51  ;;  %v482_v0 = vadd.f32 %v7833_v23, %v429_v63  ;;  %v481_v11 = vadd.f32 %v7833_v23, %v428_v16  ;;  %v969_v49 = vsel %vm923_vm11, %v8087_v22, 0.0  ;;  %v10399_v51 = vld [vmem:[#allocation3_spill] sm:$0xff] }
  0xb3   : > { %v8354_v45 = vpop.permute.xlu1 %829  ;;  %v8356_v57 = vpop.permute.xlu0 %826  ;;  %v8359_v48 = vshll.u32 %v8318_v61, 16  ;;  %v8362_v59 = vshrl.u32 %v8318_v61, 16  ;;  %v1096_v36 = vsel %vm1068_vm5, %v1091_v8, %v1095_v4  ;;  %vm526_vm12 = vcmp.ge.f32.partialorder %v8327_v17, 0.0 }
  0xb4   : > { %4323 = vperm.xlu1 %7398, %v10399_v51   ;;  %v572_v1 = vmul.f32 0.2, %v8327_v17  ;;  %v484_v22 = vadd.f32 %v7833_v23, %v431_v13  ;;  %vm525_vm14 = vcmp.ge.f32.partialorder %v479_v21, 0.0  ;;  %v571_v29 = vmul.f32 0.2, %v479_v21 }
  0xb5   : > { %10398 = vst [vmem:[#allocation20_spill] sm:$0xff] %v8359_v48  ;;  %5991 = vmatmul.mubr.msk.bf16.gmra.mrb[8].mxu1 %vm1236_vm2, %v1096_v36  ;;  %4320 = vperm.xlu0 %7397, %v10400_v42   ;;  %v430_v52 = vmul.f32 %v5743_v58, %v7789_v6  ;;  %v5747_v63 = vunpack.c.l.bf16 %v8316_v5  ;;  %v8373_v16 = vpack.c.bf16 %v970_v7, %v969_v49  ;;  %vm528_vm15 = vcmp.ge.f32.partialorder %v482_v0, 0.0  ;;  %v8388_v7 = vld [vmem:[%s7713_s18 + $0x98] sm:$0xff]  }
  0xb6   : > { %5994 = vmatprep.mubr.msk.bf16.mxu1 %vm7411_vm13, %v10391_v50  ;;  %v574_v8 = vmul.f32 0.2, %v482_v0  ;;  %v433_v13 = vmul.f32 %v5748_v31, %v7789_v6  ;;  %v2397_v42 = vsel %vm2378_vm0, %v8291_v56, %v8346_v55  ;;  %v2398_v58 = vrot.slane %v8362_v59, 1 }
  0xb7   : > { %10401 = vst [vmem:[#allocation3_spill] sm:$0xff] %v8373_v16  ;;  %v8378_v51 = vpop.permute.xlu1 %835  ;;  %v8380_v36 = vpop.permute.xlu0 %832  ;;  %v2399_v5 = vrot.slane %v8359_v48, 2  ;;  %vm527_vm1 = vcmp.ge.f32.partialorder %v481_v11, 0.0  ;;  %v1103_v31 = vrot.slane %v8237_v60, 1  ;;  %v573_v49 = vmul.f32 0.2, %v481_v11 }
  0xb8   : > { %6339 = vmatmul.mubr.msk.bf16.gmra.mrb[12].mxu0 %vm1236_vm2, %v2397_v42  ;;  %4329 = vperm.xlu1 %7398, %v8117_v26   ;;  %vm530_vm3 = vcmp.ge.f32.partialorder %v484_v22, 0.0  ;;  %v576_v62 = vmul.f32 0.2, %v484_v22  ;;  %vm926_vm4 = vcmp.eq.s32.totalorder %v8320_v25, 1  ;;  %vm925_vm7 = vcmp.eq.s32.totalorder %v8322_v24, 1 }
  0xb9   : > { %4326 = vperm.xlu0 %7397, %v8121_v2   ;;  %6342 = vmatprep.mubr.msk.bf16.mxu0 %vm7411_vm13, %v10391_v50  ;;  %v483_v56 = vadd.f32 %v7833_v23, %v430_v52  ;;  %v432_v42 = vmul.f32 %v5747_v63, %v7789_v6  ;;  %v1099_v26 = vor.u32 %v8218_v32, %v1095_v4  ;;  %v8402_v19 = vshll.u32 %v8373_v16, 16  ;;  %v10403_v63 = vld [vmem:[#allocation5_spill] sm:$0xff] }
  0xba   : > { %v8405_v9 = vshrl.u32 %v8373_v16, 16  ;;  %v5752_v18 = vunpack.c.h.bf16 %v8388_v7  ;;  %v2400_v10 = vor.u32 %v2399_v5, %v2398_v58  ;;  %v8415_v6 = vsel %vm526_vm12, %v8327_v17, %v572_v1 }
  0xbb   : > { %10402 = vst [vmem:[#allocation4_spill] sm:$0xff] %v8402_v19  ;;  %v8408_v61 = vpop.permute.xlu1 %841  ;;  %v8410_v2 = vpop.permute.xlu0 %838  ;;  %v8418_v4 = vsel %vm525_vm14, %v479_v21, %v571_v29  ;;  %v486_v52 = vadd.f32 %v7833_v23, %v433_v13  ;;  %v972_v16 = vsel %vm926_vm4, %v10403_v63, 0.0  ;;  %v971_v12 = vsel %vm925_vm7, %v8106_v30, 0.0  ;;  %v5780_v30 = vld [vmem:[%s7713_s18 + $0xa0] sm:$0xff]  }
  0xbc   : > { %v1104_v58 = vsel %vm1068_vm5, %v1099_v26, %v1103_v31  ;;  %v8429_v5 = vsel %vm528_vm15, %v482_v0, %v574_v8  ;;  %v8434_v17 = vsel %vm527_vm1, %v481_v11, %v573_v49  ;;  %v8437_v25 = vsel %vm530_vm3, %v484_v22, %v576_v62  ;;  %v5781_v11 = vld [vmem:[%s7713_s18 + $0xa8] sm:$0xff]  }
  0xbd   : > { %5995 = vmatmul.mubr.msk.bf16.gmra.mrb[12].mxu1 %vm1236_vm2, %v1104_v58  ;;  %4332 = vperm.xlu0 %7397, %v8135_v44   ;;  %vm529_vm8 = vcmp.ge.f32.partialorder %v483_v56, 0.0  ;;  %v485_v24 = vadd.f32 %v7833_v23, %v432_v42  ;;  %v2402_v21 = vrot.slane %v8405_v9, 1  ;;  %v2403_v0 = vrot.slane %v8402_v19, 2  ;;  %v8448_v44 = vld [vmem:[%s10327_s2] ss:$0 sm:$0xff] }
  0xbe   : > { %5998 = vmatprep.mubr.msk.bf16.mxu1 %vm7411_vm13, %v10391_v50  ;;  %v575_v1 = vmul.f32 0.2, %v483_v56  ;;  %v435_v62 = vmul.f32 %v8448_v44, %v5752_v18  ;;  %v8452_v22 = vpack.c.bf16 %v972_v16, %v971_v12  ;;  %v2401_v8 = vsel %vm2378_vm0, %v8346_v55, %v2400_v10 }
  0xbf   : > { %v8454_v23 = vpop.permute.xlu1 %847  ;;  %v8456_v29 = vpop.permute.xlu0 %844  ;;  %vm532_vm9 = vcmp.ge.f32.partialorder %v486_v52, 0.0  ;;  %v5751_v13 = vunpack.c.l.bf16 %v8388_v7  ;;  %vm928_vm10 = vcmp.eq.s32.totalorder %v8354_v45, 1  ;;  %vm927_vm11 = vcmp.eq.s32.totalorder %v8356_v57, 1  ;;  %v8473_v45 = vld [vmem:[%s10328_s3] ss:$0 sm:$0xff] }
  0xc0   : > { %10404 = vst [vmem:[#allocation5_spill] sm:$0xff] %v8452_v22  ;;  %6343 = vmatmul.mubr.msk.bf16.gmra.mrb[16].mxu0 %vm1236_vm2, %v2401_v8  ;;  %v1111_v18 = vrot.slane %v8286_v38, 1  ;;  %v5756_v12 = vunpack.c.h.bf16 %v5780_v30  ;;  %v578_v16 = vmul.f32 0.2, %v486_v52  ;;  %v577_v49 = vmul.f32 0.2, %v485_v24 }
  0xc1   : > { %6346 = vmatprep.mubr.msk.bf16.mxu0 %vm7411_vm13, %v10391_v50  ;;  %v5755_v42 = vunpack.c.l.bf16 %v5780_v30  ;;  %v5760_v26 = vunpack.c.h.bf16 %v5781_v11  ;;  %v1107_v55 = vor.u32 %v8244_v27, %v1103_v31  ;;  %v8468_v63 = vor.u32 %v2403_v0, %v2402_v21 }
  0xc2   : > { %vm531_vm12 = vcmp.ge.f32.partialorder %v485_v24, 0.0  ;;  %v488_v57 = vadd.f32 %v8473_v45, %v435_v62  ;;  %v974_v7 = vsel %vm928_vm10, %v8113_v33, 0.0  ;;  %v973_v58 = vsel %vm927_vm11, %v8125_v40, 0.0 }
  0xc3   : > { %v8478_v8 = vpop.permute.xlu1 %853  ;;  %v8480_v30 = vpop.permute.xlu0 %850  ;;  %v8483_v31 = vshll.u32 %v8452_v22, 16  ;;  %v8486_v21 = vshrl.u32 %v8452_v22, 16  ;;  %v1112_v0 = vsel %vm1068_vm5, %v1107_v55, %v1111_v18  ;;  %v8490_v62 = vsel %vm529_vm8, %v483_v56, %v575_v1  ;;  %v341_v55 = vld [vmem:[%s7713_s18 + $0xb0] sm:$0xf] }
  0xc4   : > { %v434_v33 = vmul.f32 %v8448_v44, %v5751_v13  ;;  %v437_v40 = vmul.f32 %v8448_v44, %v5756_v12  ;;  %v8496_v38 = vsel %vm532_vm9, %v486_v52, %v578_v16  ;;  %v8498_v60 = vsel %vm531_vm12, %v485_v24, %v577_v49  ;;  %v342_v12 = vld [vmem:[%s7713_s18 + $0xb4] sm:$0x1] }
  0xc5   : > { %5999 = vmatmul.mubr.msk.bf16.gmra.mrb[16].mxu1 %vm1236_vm2, %v1112_v0  ;;  %v436_v22 = vmul.f32 %v8448_v44, %v5755_v42  ;;  %v5759_v27 = vunpack.c.l.bf16 %v5781_v11  ;;  %v8501_v37 = vpack.c.bf16 %v974_v7, %v973_v58  ;;  %v2405_v56 = vsel %vm2378_vm0, %v2400_v10, %v8468_v63 }
  0xc6   : > { %6002 = vmatprep.mubr.msk.bf16.mxu1 %vm7411_vm13, %v10391_v50  ;;  %v580_v1 = vmul.f32 0.2, %v488_v57  ;;  %v439_v13 = vmul.f32 %v8448_v44, %v5760_v26  ;;  %vm930_vm14 = vcmp.eq.s32.totalorder %v8378_v51, 1  ;;  %vm929_vm15 = vcmp.eq.s32.totalorder %v8380_v36, 1 }
  0xc7   : > { %10405 = vst [vmem:[#allocation21_spill] sm:$0xff] %v8501_v37  ;;  %v8512_v52 = vpop.permute.xlu1 %859  ;;  %v8514_v24 = vpop.permute.xlu0 %856  ;;  %v2406_v11 = vrot.slane %v8486_v21, 1  ;;  %v2407_v10 = vrot.slane %v8483_v31, 2  ;;  %v1119_v16 = vrot.slane %v8359_v48, 1  ;;  %vm534_vm1 = vcmp.ge.f32.partialorder %v488_v57, 0.0 }
  0xc8   : > { %6347 = vmatmul.mubr.msk.bf16.gmra.mrb[20].mxu0 %vm1236_vm2, %v2405_v56  ;;  %v487_v49 = vadd.f32 %v8473_v45, %v434_v33  ;;  %v490_v42 = vadd.f32 %v8473_v45, %v437_v40  ;;  %v489_v26 = vadd.f32 %v8473_v45, %v436_v22  ;;  %v438_v7 = vmul.f32 %v8448_v44, %v5759_v27 }
  0xc9   : > { %6350 = vmatprep.mubr.msk.bf16.mxu0 %vm7411_vm13, %v10391_v50  ;;  %v388_v58 = vunpack.c.l.bf16 %v342_v12  ;;  %v387_v0 = vunpack.c.l.bf16 %v341_v55  ;;  %v976_v56 = vsel %vm930_vm14, %v8128_v35, 0.0  ;;  %v975_v48 = vsel %vm929_vm15, %v8131_v39, 0.0 }
  0xca   : > { %v1115_v33 = vor.u32 %v8289_v15, %v1111_v18  ;;  %v8534_v40 = vshrl.u32 %v8501_v37, 16  ;;  %v2408_v27 = vor.u32 %v2407_v10, %v2406_v11  ;;  %v8541_v12 = vshll.u32 %v8501_v37, 16 }
  0xcb   : > { %v8536_v32 = vpop.permute.xlu1 %865  ;;  %v8538_v22 = vpop.permute.xlu0 %862  ;;  %v8544_v51 = vsel %vm534_vm1, %v488_v57, %v580_v1  ;;  %v492_v35 = vadd.f32 %v8473_v45, %v439_v13  ;;  %vm932_vm3 = vcmp.eq.s32.totalorder %v8408_v61, 1  ;;  %vm931_vm4 = vcmp.eq.s32.totalorder %v8410_v2, 1 }
  0xcc   : > { %v1120_v39 = vsel %vm1068_vm5, %v1115_v33, %v1119_v16  ;;  %vm533_vm7 = vcmp.ge.f32.partialorder %v487_v49, 0.0  ;;  %v8550_v36 = vpack.c.bf16 %v976_v56, %v975_v48  ;;  %v579_v18 = vmul.f32 0.2, %v487_v49 }
  0xcd   : > { %6003 = vmatmul.mubr.msk.bf16.gmra.mrb[20].mxu1 %vm1236_vm2, %v1120_v39  ;;  %vm536_vm8 = vcmp.ge.f32.partialorder %v490_v42, 0.0  ;;  %v441_v55 = vmul.f32 %v8448_v44, %v388_v58  ;;  %v2410_v57 = vrot.slane %v8534_v40, 1  ;;  %v582_v1 = vmul.f32 0.2, %v490_v42 }
  0xce   : > { %10406 = vst [vmem:[#allocation22_spill] sm:$0xff] %v8550_v36  ;;  %6006 = vmatprep.mubr.msk.bf16.mxu1 %vm7411_vm13, %v10391_v50  ;;  %vm535_vm9 = vcmp.ge.f32.partialorder %v489_v26, 0.0  ;;  %v440_v61 = vmul.f32 %v8448_v44, %v387_v0  ;;  %v978_v2 = vsel %vm932_vm3, %v8157_v3, 0.0  ;;  %v977_v48 = vsel %vm931_vm4, %v8183_v43, 0.0 }
  0xcf   : > { %v8560_v13 = vpop.permute.xlu1 %871  ;;  %v8562_v11 = vpop.permute.xlu0 %868  ;;  %v2409_v10 = vsel %vm2378_vm0, %v8468_v63, %v2408_v27  ;;  %v2411_v58 = vrot.slane %v8541_v12, 2  ;;  %v1127_v56 = vrot.slane %v8402_v19, 1  ;;  %v581_v33 = vmul.f32 0.2, %v489_v26 }
  0xd0   : > { %6351 = vmatmul.mubr.msk.bf16.gmra.mrb[24].mxu0 %vm1236_vm2, %v2409_v10  ;;  %vm538_vm10 = vcmp.ge.f32.partialorder %v492_v35, 0.0  ;;  %v584_v44 = vmul.f32 0.2, %v492_v35  ;;  %v8572_v3 = vshll.u32 %v8550_v36, 16  ;;  %v8575_v43 = vshrl.u32 %v8550_v36, 16 }
  0xd1   : > { %6354 = vmatprep.mubr.msk.bf16.mxu0 %vm7411_vm13, %v10391_v50  ;;  %v491_v63 = vadd.f32 %v8473_v45, %v438_v7  ;;  %v494_v0 = vadd.f32 %v8473_v45, %v441_v55  ;;  %v8579_v39 = vpack.c.bf16 %v978_v2, %v977_v48  ;;  %v1123_v10 = vor.u32 %v8362_v59, %v1119_v16 }
  0xd2   : > { %v8583_v15 = vsel %vm533_vm7, %v487_v49, %v579_v18  ;;  %v8586_v37 = vsel %vm536_vm8, %v490_v42, %v582_v1  ;;  %vm934_vm11 = vcmp.eq.s32.totalorder %v8454_v23, 1  ;;  %vm933_vm12 = vcmp.eq.s32.totalorder %v8456_v29, 1  ;;  %v5523_v1 = vld [vmem:[%s10326_s1 + $0x18] sm:$0xf] }
  0xd3   : > { %10407 = vst [vmem:[#allocation23_spill] sm:$0xff] %v8579_v39  ;;  %v2412_v36 = vor.u32 %v2411_v58, %v2410_v57  ;;  %v493_v19 = vadd.f32 %v8473_v45, %v440_v61  ;;  %v8591_v7 = vpop.permute.xlu1 %877  ;;  %v8593_v55 = vpop.permute.xlu0 %874  ;;  %v1128_v2 = vsel %vm1068_vm5, %v1123_v10, %v1127_v56  ;;  %v8597_v16 = vsel %vm535_vm9, %v489_v26, %v581_v33 }
  0xd4   : > { %v8600_v49 = vsel %vm538_vm10, %v492_v35, %v584_v44  ;;  %vm2776_vm14 = vcmask 1045504   ;;  %v2414_v23 = vrot.slane %v8575_v43, 1  ;;  %v2415_v29 = vrot.slane %v8572_v3, 2 }
  0xd5   : > { %10408 = vst [vmem:[#allocation24_spill] sm:$0xff] %v8600_v49  ;;  %6007 = vmatmul.mubr.msk.bf16.gmra.mrb[24].mxu1 %vm1236_vm2, %v1128_v2  ;;  %v583_v45 = vmul.f32 0.2, %v491_v63  ;;  %v586_v42 = vmul.f32 0.2, %v494_v0  ;;  %v980_v18 = vsel %vm934_vm11, %v8254_v54, 0.0  ;;  %v2413_v61 = vsel %vm2378_vm0, %v2408_v27, %v2412_v36 }
  0xd6   : > { %v979_v57 = vsel %vm933_vm12, %v8259_v34, 0.0  ;;  %6010 = vmatprep.mubr.msk.bf16.mxu1 %vm7411_vm13, %v10391_v50  ;;  %v8610_v26 = vshll.u32 %v8579_v39, 16  ;;  %v8613_v35 = vshrl.u32 %v8579_v39, 16  ;;  %v585_v48 = vmul.f32 0.2, %v493_v19 }
  0xd7   : > { %v2777_v54 = vrot.slane %v8152_v41, 2  ;;  %v2778_v34 = vrot.slane %v8150_v46, 2  ;;  %v1135_v58 = vrot.slane %v8483_v31, 1  ;;  %vm537_vm15 = vcmp.ge.f32.partialorder %v491_v63, 0.0  ;;  %v8632_v2 = vpop.permute.xlu1 %883 }
  0xd8   : > { %6355 = vmatmul.mubr.msk.bf16.gmra.mrb[28].mxu0 %vm1236_vm2, %v2413_v61  ;;  %vm540_vm1 = vcmp.ge.f32.partialorder %v494_v0, 0.0  ;;  %vm539_vm3 = vcmp.ge.f32.partialorder %v493_v19, 0.0  ;;  %v8623_v33 = vpack.c.bf16 %v980_v18, %v979_v57  ;;  %v1131_v44 = vor.u32 %v8405_v9, %v1127_v56  ;;  %v8634_v61 = vpop.permute.xlu0 %880 }
  0xd9   : > { %6358 = vmatprep.mubr.msk.bf16.mxu0 %vm7411_vm13, %v10391_v50  ;;  %v1143_v27 = vrot.slane %v8541_v12, 1  ;;  %v8630_v10 = vsel %vm1300_vm6, %v5523_v1, 0  ;;  %v2416_v46 = vor.u32 %v2415_v29, %v2414_v23  ;;  %v2418_v41 = vrot.slane %v8613_v35, 1 }
  0xda   : > { %v2419_v18 = vrot.slane %v8610_v26, 2  ;;  %v1151_v57 = vrot.slane %v8572_v3, 1  ;;  %v8639_v56 = vsel %vm537_vm15, %v491_v63, %v583_v45  ;;  %v8641_v39 = vsel %vm540_vm1, %v494_v0, %v586_v42 }
  0xdb   : > { %v8643_v49 = vsel %vm539_vm3, %v493_v19, %v585_v48  ;;  %v8646_v1 = vsel %vm2776_vm14, %v2777_v54, %v2778_v34  ;;  %vm936_vm4 = vcmp.eq.s32.totalorder %v8478_v8, 1  ;;  %vm935_vm7 = vcmp.eq.s32.totalorder %v8480_v30, 1 }
  0xdc   : > { %v1136_v23 = vsel %vm1068_vm5, %v1131_v44, %v1135_v58  ;;  %v10371_v29 = vrot.slane %v8199_v47, 2  ;;  %v1139_v63 = vor.u32 %v8486_v21, %v1135_v58  ;;  %v8655_v0 = vshll.u32 %v8623_v33, 16  ;;  %v8671_v44 = vpop.permute.xlu1 %889 }
  0xdd   : > { %6011 = vmatmul.mubr.msk.bf16.gmra.mrb[28].mxu1 %vm1236_vm2, %v1136_v23  ;;  %v8658_v19 = vshrl.u32 %v8623_v33, 16  ;;  %v1159_v45 = vrot.slane %v8610_v26, 1  ;;  %v2417_v8 = vsel %vm2378_vm0, %v2412_v36, %v2416_v46  ;;  %v2420_v30 = vor.u32 %v2419_v18, %v2418_v41  ;;  %v8673_v36 = vpop.permute.xlu0 %886 }
  0xde   : > { %6014 = vmatprep.mubr.msk.bf16.mxu1 %vm7411_vm13, %v10391_v50  ;;  %v1147_v42 = vor.u32 %v8534_v40, %v1143_v27  ;;  %v1155_v48 = vor.u32 %v8575_v43, %v1151_v57  ;;  %v982_v54 = vsel %vm936_vm4, %v8273_v20, 0.0  ;;  %v981_v58 = vsel %vm935_vm7, %v8296_v53, 0.0 }
  0xdf   : > { %vm938_vm8 = vcmp.eq.s32.totalorder %v8512_v52, 1  ;;  %vm937_vm9 = vcmp.eq.s32.totalorder %v8514_v24, 1  ;;  %vm940_vm10 = vcmp.eq.s32.totalorder %v8536_v32, 1  ;;  %v1144_v41 = vsel %vm1068_vm5, %v1139_v63, %v1143_v27 }
  0xe0   : > { %6359 = vmatmul.mubr.msk.bf16.gmra.mrb[32].mxu0 %vm1236_vm2, %v2417_v8  ;;  %v1152_v18 = vsel %vm1068_vm5, %v1147_v42, %v1151_v57  ;;  %v8681_v20 = vsel %vm2776_vm14, %v2778_v34, %v10371_v29  ;;  %vm939_vm11 = vcmp.eq.s32.totalorder %v8538_v22, 1  ;;  %v2422_v53 = vrot.slane %v8658_v19, 1 }
  0xe1   : > { %6362 = vmatprep.mubr.msk.bf16.mxu0 %vm7411_vm13, %v10391_v50  ;;  %v2423_v52 = vrot.slane %v8655_v0, 2  ;;  %v8689_v24 = vsel %vm1068_vm5, %v1155_v48, %v1159_v45  ;;  %v8691_v27 = vpack.c.bf16 %v982_v54, %v981_v58  ;;  %v984_v57 = vsel %vm938_vm8, %v8338_v14, 0.0  ;;  %v10410_v58 = vld [vmem:[#allocation12_spill] sm:$0xff] }
  0xe2   : > { %v983_v23 = vsel %vm937_vm9, %v8341_v28, 0.0  ;;  %v2421_v34 = vsel %vm2378_vm0, %v2416_v46, %v2420_v30  ;;  %v986_v22 = vsel %vm940_vm10, %v8415_v6, 0.0  ;;  %vm942_vm12 = vcmp.eq.s32.totalorder %v8560_v13, 1  ;;  %v893_v13 = vpop.permute.xlu0 %892 }
  0xe3   : > { %vm941_vm15 = vcmp.eq.s32.totalorder %v8562_v11, 1  ;;  %v1163_v63 = vor.u32 %v8613_v35, %v1159_v45  ;;  %v985_v8 = vsel %vm939_vm11, %v8418_v4, 0.0  ;;  %vm944_vm1 = vcmp.eq.s32.totalorder %v8591_v7, 1  ;;  %v896_v4 = vpop.permute.xlu1 %895  ;;  %v10412_v7 = vld [vmem:[#allocation15_spill] sm:$0xff] }
  0xe4   : > { %vm943_vm3 = vcmp.eq.s32.totalorder %v8593_v55, 1  ;;  %vm946_vm4 = vcmp.eq.s32.totalorder %v8632_v2, 1  ;;  %v8706_v14 = vpack.c.bf16 %v984_v57, %v983_v23  ;;  %vm945_vm7 = vcmp.eq.s32.totalorder %v8634_v61, 1  ;;  %v10413_v2 = vld [vmem:[#allocation14_spill] sm:$0xff] }
  0xe5   : > { %6015 = vmatmul.mubr.msk.bf16.gmra.mrb[32].mxu1 %vm1236_vm2, %v1144_v41  ;;  %v8710_v46 = vor.u32 %v2423_v52, %v2422_v53  ;;  %v1167_v32 = vrot.slane %v8655_v0, 1  ;;  %vm3382_vm8 = vsmask.f32 5376  ;;  %v988_v28 = vsel %vm942_vm12, %v8429_v5, 0.0  ;;  %v10411_v53 = vld [vmem:[#allocation11_spill] sm:$0xff] }
  0xe6   : > { %v987_v6 = vsel %vm941_vm15, %v8434_v17, 0.0  ;;  %6018 = vmatprep.mubr.msk.bf16.mxu1 %vm7411_vm13, %v10391_v50  ;;  %v8718_v11 = vshll.u32 %v8691_v27, 16  ;;  %v8721_v45 = vshrl.u32 %v8691_v27, 16  ;;  %v8723_v42 = vpack.c.bf16 %v986_v22, %v985_v8  ;;  %v899_v8 = vpop.permute.xlu0 %898 }
  0xe7   : > { %10409 = vst [vmem:[#allocation25_spill] sm:$0xff] %v8710_v46  ;;  %v990_v48 = vsel %vm944_vm1, %v8437_v25, 0.0  ;;  %v989_v5 = vsel %vm943_vm3, %v8490_v62, 0.0  ;;  %v992_v17 = vsel %vm946_vm4, %v8496_v38, 0.0  ;;  %v991_v54 = vsel %vm945_vm7, %v8498_v60, 0.0 }
  0xe8   : > { %6363 = vmatmul.mubr.msk.bf16.gmra.mrb[36].mxu0 %vm1236_vm2, %v2421_v34  ;;  %v3386_v41 = vrot.slane %v10410_v58, 2  ;;  %v3387_v52 = vrot.slane %v10411_v53, 3  ;;  %v3390_v25 = vrot.slane %v10412_v7, 2  ;;  %v8741_v57 = vpack.c.bf16 %v988_v28, %v987_v6  ;;  %v10415_v53 = vld [vmem:[#allocation4_spill] sm:$0xff] }
  0xe9   : > { %6366 = vmatprep.mubr.msk.bf16.mxu0 %vm7411_vm13, %v10391_v50  ;;  %v2425_v38 = vsel %vm2378_vm0, %v2420_v30, %v8710_v46  ;;  %v8750_v60 = vsel %vm1068_vm5, %v1163_v63, %v1167_v32  ;;  %v8753_v62 = vshll.u32 %v8706_v14, 16  ;;  %v8755_v55 = vpack.c.bf16 %v990_v48, %v989_v5  ;;  %v902_v63 = vpop.permute.xlu1 %901 }
  0xea   : > { %vm948_vm9 = vcmp.eq.s32.totalorder %v8671_v44, 1  ;;  %vm947_vm10 = vcmp.eq.s32.totalorder %v8673_v36, 1  ;;  %v3391_v61 = vrot.slane %v10413_v2, 3  ;;  %v8760_v23 = vpack.c.bf16 %v992_v17, %v991_v54 }
  0xeb   : > { %v8763_v30 = vshrl.u32 %v8706_v14, 16  ;;  %v8766_v34 = vshll.u32 %v8723_v42, 16  ;;  %v8769_v22 = vshrl.u32 %v8723_v42, 16  ;;  %vm950_vm11 = vcmp.eq.s32.totalorder %v896_v4, 1 }
  0xec   : > { %vm949_vm12 = vcmp.eq.s32.totalorder %v893_v13, 1  ;;  %v8771_v44 = vor.u32 %v3387_v52, %v3386_v41  ;;  %v8773_v36 = vor.u32 %v3391_v61, %v3390_v25  ;;  %v994_v28 = vsel %vm948_vm9, %v8544_v51, 0.0  ;;  %v10414_v51 = vld [vmem:[#allocation20_spill] sm:$0xff] }
  0xed   : > { %v993_v6 = vsel %vm947_vm10, %v8583_v15, 0.0  ;;  %6019 = vmatmul.mubr.msk.bf16.gmra.mrb[36].mxu1 %vm1236_vm2, %v1152_v18  ;;  %v8779_v48 = vshll.u32 %v8741_v57, 16  ;;  %v3398_v5 = vrot.slane %v8362_v59, 2  ;;  %v8785_v17 = vshrl.u32 %v8741_v57, 16  ;;  %v908_v13 = vpop.permute.xlu1 %907 }
  0xee   : > { %6022 = vmatprep.mubr.msk.bf16.mxu1 %vm7411_vm13, %v10391_v50  ;;  %v8788_v54 = vshll.u32 %v8755_v55, 16  ;;  %v8793_v15 = vsel %vm3382_vm8, %v8771_v44, %v8773_v36  ;;  %v3399_v18 = vrot.slane %v10414_v51, 3  ;;  %v996_v58 = vsel %vm950_vm11, %v8586_v37, 0.0 }
  0xef   : > { %v995_v59 = vsel %vm949_vm12, %v8597_v16, 0.0  ;;  %v3402_v41 = vrot.slane %v8405_v9, 2  ;;  %v3403_v52 = vrot.slane %v10415_v53, 3  ;;  %v8802_v7 = vpack.c.bf16 %v994_v28, %v993_v6 }
  0xf0   : > { %6367 = vmatmul.mubr.msk.bf16.gmra.mrb[40].mxu0 %vm1236_vm2, %v2425_v38  ;;  %v8806_v25 = vshrl.u32 %v8755_v55, 16  ;;  %v8809_v2 = vshll.u32 %v8760_v23, 16  ;;  %v8811_v61 = vor.u32 %v3399_v18, %v3398_v5  ;;  %vm952_vm15 = vcmp.eq.s32.totalorder %v902_v63, 1  ;;  %v905_v38 = vpop.permute.xlu0 %904 }
  0xf1   : > { %6412 = vmatprep.mubr.msk.bf16.mxu0 %vm7411_vm13, %v10391_v50  ;;  %v3404_v37 = vor.u32 %v3403_v52, %v3402_v41  ;;  %v3406_v9 = vrot.slane %v8486_v21, 2  ;;  %v3407_v16 = vrot.slane %v8483_v31, 3  ;;  %v8817_v4 = vpack.c.bf16 %v996_v58, %v995_v59  ;;  %v10416_v31 = vld [vmem:[#allocation24_spill] sm:$0xff] }
  0xf2   : > { %v8820_v28 = vshrl.u32 %v8760_v23, 16  ;;  %v3410_v6 = vrot.slane %v8534_v40, 2  ;;  %v3411_v5 = vrot.slane %v8541_v12, 3  ;;  %vm951_vm1 = vcmp.eq.s32.totalorder %v899_v8, 1 }
  0xf3   : > { %v8826_v63 = vsel %vm3382_vm8, %v8811_v61, %v3404_v37  ;;  %v3408_v51 = vor.u32 %v3407_v16, %v3406_v9  ;;  %v3414_v21 = vrot.slane %v8575_v43, 2  ;;  %v998_v18 = vsel %vm952_vm15, %v10416_v31, 0.0 }
  0xf4   : > { %v8831_v58 = vshll.u32 %v8802_v7, 16  ;;  %v8834_v59 = vshrl.u32 %v8802_v7, 16  ;;  %v3412_v41 = vor.u32 %v3411_v5, %v3410_v6  ;;  %vm954_vm3 = vcmp.eq.s32.totalorder %v908_v13, 1 }
  0xf5   : > { %vm953_vm4 = vcmp.eq.s32.totalorder %v905_v38, 1  ;;  %6023 = vmatmul.mubr.msk.bf16.gmra.mrb[40].mxu1 %vm1236_vm2, %v8689_v24  ;;  %v8839_v40 = vsel %vm3382_vm8, %v3404_v37, %v3408_v51  ;;  %v3415_v12 = vrot.slane %v8572_v3, 3  ;;  %v997_v43 = vsel %vm951_vm1, %v8639_v56, 0.0 }
  0xf6   : > { %6026 = vmatprep.mubr.msk.bf16.mxu1 %vm7411_vm13, %v10391_v50  ;;  %v8846_v8 = vsel %vm3382_vm8, %v3408_v51, %v3412_v41  ;;  %v3418_v53 = vrot.slane %v8613_v35, 2  ;;  %v3419_v52 = vrot.slane %v8610_v26, 3  ;;  %v8851_v9 = vshll.u32 %v8817_v4, 16 }
  0xf7   : > { %v3416_v24 = vor.u32 %v3415_v12, %v3414_v21  ;;  %v3422_v37 = vrot.slane %v8658_v19, 2  ;;  %v3423_v3 = vrot.slane %v8655_v0, 3  ;;  %v1000_v56 = vsel %vm954_vm3, %v8641_v39, 0.0 }
  0xf8   : > { %v999_v16 = vsel %vm953_vm4, %v8643_v49, 0.0  ;;  %6413 = vmatmul.mubr.msk.bf16.vlgmr.msra.gmra.mrb[0].mxu0 %vm1236_vm2, %v8646_v1  ;;  %v8860_v13 = vshrl.u32 %v8817_v4, 16  ;;  %v3420_v35 = vor.u32 %v3419_v52, %v3418_v53  ;;  %v3426_v39 = vrot.slane %v8721_v45, 2 }
  0xf9   : > { %6497 = vmatpush3.bf16.msra.mxu0 %v8630_v10  ;;  %6416 = vmatprep.mubr.msk.bf16.mxu0 %vm7411_vm13, %v10391_v50  ;;  %v8866_v26 = vsel %vm3382_vm8, %v3412_v41, %v3416_v24  ;;  %v3424_v38 = vor.u32 %v3423_v3, %v3422_v37  ;;  %v3427_v49 = vrot.slane %v8718_v11, 3  ;;  %v3430_v6 = vrot.slane %v8763_v30, 2 }
  0xfa   : > { %6582 = vmatprep.subr.bf16.mxu0 %v10391_v50  ;;  %v8872_v1 = vsel %vm3382_vm8, %v3416_v24, %v3420_v35  ;;  %v3431_v10 = vrot.slane %v8753_v62, 3  ;;  %v3434_v5 = vrot.slane %v8769_v22, 2  ;;  %v3435_v31 = vrot.slane %v8766_v34, 3 }
  0xfb   : > { %v8878_v51 = vsel %vm3382_vm8, %v3420_v35, %v3424_v38  ;;  %v3428_v21 = vor.u32 %v3427_v49, %v3426_v39  ;;  %v3438_v41 = vrot.slane %v8785_v17, 2  ;;  %v8882_v12 = vpack.c.bf16 %v998_v18, %v997_v43 }
  0xfc   : > { %v8884_v53 = vpack.c.bf16 %v1000_v56, %v999_v16  ;;  %v3432_v52 = vor.u32 %v3431_v10, %v3430_v6  ;;  %v3439_v24 = vrot.slane %v8779_v48, 3  ;;  %v3436_v3 = vor.u32 %v3435_v31, %v3434_v5 }
  0xfd   : > { %6027 = vmatmul.mubr.msk.bf16.gmra.mrb[44].mxu1 %vm1236_vm2, %v8750_v60  ;;  %v8890_v37 = vsel %vm3382_vm8, %v3424_v38, %v3428_v21  ;;  %v3442_v35 = vrot.slane %v8806_v25, 2  ;;  %v3443_v39 = vrot.slane %v8788_v54, 3  ;;  %v3446_v56 = vrot.slane %v8820_v28, 2 }
  0xfe   : > { %6030 = vmatprep.mubr.msk.bf16.mxu1 %vm7411_vm13, %v10391_v50  ;;  %v8897_v18 = vsel %vm3382_vm8, %v3428_v21, %v3432_v52  ;;  %v3440_v43 = vor.u32 %v3439_v24, %v3438_v41  ;;  %v3447_v16 = vrot.slane %v8809_v2, 3  ;;  %v8902_v60 = vsel %vm3382_vm8, %v3432_v52, %v3436_v3 }
  0xff   : > { %v3444_v38 = vor.u32 %v3443_v39, %v3442_v35  ;;  %v3450_v49 = vrot.slane %v8834_v59, 2  ;;  %v3451_v6 = vrot.slane %v8831_v58, 3  ;;  %v1171_v10 = vor.u32 %v8658_v19, %v1167_v32  ;;  %v10419_v39 = vld [vmem:[#allocation13_spill] sm:$0xff] }
 0x100   : > { %6417 = vmatmul.mubr.msk.bf16.gmra.mrb[4].mxu0 %vm1236_vm2, %v8681_v20  ;;  %v1175_v5 = vrot.slane %v8718_v11, 1  ;;  %v8913_v21 = vsel %vm3382_vm8, %v3436_v3, %v3440_v43  ;;  %v3448_v31 = vor.u32 %v3447_v16, %v3446_v56  ;;  %v3454_v24 = vrot.slane %v8860_v13, 2 }
 0x101   : > { %6420 = vmatprep.mubr.msk.bf16.mxu0 %vm7411_vm13, %v10391_v50  ;;  %v8918_v41 = vsel %vm3382_vm8, %v3440_v43, %v3444_v38  ;;  %v3452_v52 = vor.u32 %v3451_v6, %v3450_v49  ;;  %v3455_v35 = vrot.slane %v8851_v9, 3  ;;  %v10374_v19 = vshrl.u32 %v8882_v12, 16 }
 0x102   : > { %10417 = vst [vmem:[#allocation12_spill] sm:$0xff] %v8918_v41  ;;  %v8923_v0 = vsel %vm3382_vm8, %v3444_v38, %v3448_v31  ;;  %v10373_v32 = vshll.u32 %v8882_v12, 16  ;;  %v3463_v3 = vshrl.u32 %v8884_v53, 16  ;;  %v2782_v56 = vrot.slane %v10419_v39, 2 }
 0x103   : > { %10418 = vst [vmem:[#allocation11_spill] sm:$0xff] %v8923_v0  ;;  %v8930_v16 = vsel %vm3382_vm8, %v3448_v31, %v3452_v52  ;;  %v3456_v43 = vor.u32 %v3455_v35, %v3454_v24  ;;  %v3466_v49 = vshll.u32 %v8884_v53, 16  ;;  %v1176_v6 = vsel %vm1068_vm5, %v1171_v10, %v1175_v5 }
 0x104   : > { %v3458_v38 = vrot.slane %v10374_v19, 2  ;;  %v3459_v29 = vrot.slane %v10373_v32, 3  ;;  %v3465_v0 = vrot.slane %v3463_v3, 2  ;;  %v10421_v24 = vrot.slane %v8199_v47, 2 }
 0x105   : > { %6031 = vmatmul.mubr.msk.bf16.gmra.mrb[48].mxu1 %vm1236_vm2, %v1176_v6  ;;  %v8940_v46 = vsel %vm3382_vm8, %v3452_v52, %v3456_v43  ;;  %v3468_v41 = vrot.slane %v3466_v49, 3  ;;  %v1183_v6 = vrot.slane %v8753_v62, 1  ;;  %v1179_v3 = vor.u32 %v8721_v45, %v1175_v5  ;;  %v10425_v49 = vld [vmem:[#allocation16_spill] sm:$0xff] }
 0x106   : > { %10420 = vst [vmem:[#allocation15_spill] sm:$0xff] %v8940_v46  ;;  %6034 = vmatprep.mubr.msk.bf16.mxu1 %vm7411_vm13, %v10391_v50  ;;  %v3460_v31 = vor.u32 %v3459_v29, %v3458_v38  ;;  %v8947_v10 = vsel %vm2776_vm14, %v10421_v24, %v2782_v56  ;;  %v2426_v38 = vrot.slane %v8721_v45, 1  ;;  %v2430_v24 = vrot.slane %v8763_v30, 1 }
 0x107   : > { %v8949_v35 = vor.u32 %v3468_v41, %v3465_v0  ;;  %v2784_v41 = vrot.slane %v10425_v49, 2  ;;  %v1184_v0 = vsel %vm1068_vm5, %v1179_v3, %v1183_v6  ;;  %v2434_v5 = vrot.slane %v8769_v22, 1 }
 0x108   : > { %6421 = vmatmul.mubr.msk.bf16.gmra.mrb[8].mxu0 %vm1236_vm2, %v8947_v10  ;;  %v8955_v52 = vsel %vm3382_vm8, %v3456_v43, %v3460_v31  ;;  %v2427_v43 = vrot.slane %v8718_v11, 2  ;;  %v2435_v3 = vrot.slane %v8766_v34, 2  ;;  %v1191_v45 = vrot.slane %v8766_v34, 1 }
 0x109   : > { %10422 = vst [vmem:[#allocation14_spill] sm:$0xff] %v8949_v35  ;;  %10423 = vst [vmem:[#allocation20_spill] sm:$0xff] %v8955_v52  ;;  %6424 = vmatprep.mubr.msk.bf16.mxu0 %vm7411_vm13, %v10391_v50  ;;  %v8961_v29 = vsel %vm3382_vm8, %v3460_v31, %v8949_v35  ;;  %v2431_v31 = vrot.slane %v8753_v62, 2  ;;  %v8974_v32 = vsel %vm2776_vm14, %v2782_v56, %v2784_v41  ;;  %v10426_v56 = vld [vmem:[#allocation19_spill] sm:$0xff]  ;;  %v2439_v52 = vrot.slane %v8779_v48, 2 }
 0x10a   : > { %10424 = vst [vmem:[#allocation4_spill] sm:$0xff] %v8961_v29  ;;  %v8983_v11 = vor.u32 %v2427_v43, %v2426_v38  ;;  %v2436_v19 = vor.u32 %v2435_v3, %v2434_v5  ;;  %v1187_v62 = vor.u32 %v8763_v30, %v1183_v6  ;;  %v2786_v35 = vrot.slane %v10426_v56, 2 }
 0x10b   : > { %v2438_v29 = vrot.slane %v8785_v17, 1  ;;  %v2442_v38 = vrot.slane %v8806_v25, 1  ;;  %v2443_v43 = vrot.slane %v8788_v54, 2  ;;  %v2447_v5 = vrot.slane %v8809_v2, 2 }
 0x10c   : > { %vm3780_vm7 = vcmask 1044480   ;;  %vm5218_vm10 = vcmask 60417   ;;  %vm5219_vm11 = vsmask.f32 7942  ;;  %vm4767_vm12 = vsmask.f32 5392 }
 0x10d   : > { %6035 = vmatmul.mubr.msk.bf16.gmra.mrb[52].mxu1 %vm1236_vm2, %v1184_v0  ;;  %v2432_v0 = vor.u32 %v2431_v31, %v2430_v24  ;;  %v1192_v24 = vsel %vm1068_vm5, %v1187_v62, %v1191_v45  ;;  %v2440_v30 = vor.u32 %v2439_v52, %v2438_v29  ;;  %v2444_v6 = vor.u32 %v2443_v43, %v2442_v38  ;;  %vm9960_vm15 = vmand %vm5218_vm10, %vm5219_vm11 }
 0x10e   : > { %6038 = vmatprep.mubr.msk.bf16.mxu1 %vm7411_vm13, %v10391_v50  ;;  %v2446_v31 = vrot.slane %v8820_v28, 1  ;;  %v9010_v62 = vsel %vm2776_vm14, %v2784_v41, %v2786_v35  ;;  %v1195_v38 = vor.u32 %v8769_v22, %v1191_v45  ;;  %v1199_v43 = vrot.slane %v8779_v48, 1 }
 0x10f   : > { %v8991_v46 = vsel %vm2378_vm0, %v8983_v11, %v2432_v0  ;;  %v8994_v34 = vsel %vm2378_vm0, %v2432_v0, %v2436_v19  ;;  %v9005_v3 = vsel %vm2378_vm0, %v2436_v19, %v2440_v30  ;;  %v2450_v0 = vrot.slane %v8834_v59, 1 }
 0x110   : > { %6425 = vmatmul.mubr.msk.bf16.gmra.mrb[12].mxu0 %vm1236_vm2, %v8974_v32  ;;  %10427 = vst [vmem:[#allocation24_spill] sm:$0xff] %v8991_v46  ;;  %10428 = vst [vmem:[#allocation13_spill] sm:$0xff] %v8994_v34  ;;  %v2451_v34 = vrot.slane %v8831_v58, 2  ;;  %v9013_v52 = vsel %vm2378_vm0, %v2440_v30, %v2444_v6  ;;  %v2448_v29 = vor.u32 %v2447_v5, %v2446_v31  ;;  %v2454_v30 = vrot.slane %v8860_v13, 1 }
 0x111   : > { %6428 = vmatprep.mubr.msk.bf16.mxu0 %vm7411_vm13, %v10391_v50  ;;  %10429 = vst [vmem:[#allocation16_spill] sm:$0xff] %v9005_v3  ;;  %10430 = vst [vmem:[#allocation19_spill] sm:$0xff] %v9013_v52  ;;  %v2455_v31 = vrot.slane %v8851_v9, 2  ;;  %v3818_v22 = vrot.slane %v8882_v12, 3  ;;  %v10433_v48 = vshrl.u32 %v8882_v12, 16  ;;  %v10435_v52 = vld [vmem:[#allocation3_spill] sm:$0xff]  ;;  %v1200_v3 = vsel %vm1068_vm5, %v1195_v38, %v1199_v43 }
 0x112   : > { %v2452_v19 = vor.u32 %v2451_v34, %v2450_v0  ;;  %v10434_v34 = vshll.u32 %v8882_v12, 16  ;;  %v10376_v41 = vrot.slane %v8884_v53, 3  ;;  %v10436_v46 = vrot.slane %v8817_v4, 3 }
 0x113   : > { %v2461_v45 = vrot.slane %v10433_v48, 1 }
 0x114   : > { %v9028_v5 = vsel %vm2378_vm0, %v2448_v29, %v2452_v19  ;;  %v2464_v0 = vrot.slane %v10434_v34, 2 }
 0x115   : > { %6039 = vmatmul.mubr.msk.bf16.gmra.mrb[56].mxu1 %vm1236_vm2, %v1192_v24  ;;  %v9022_v24 = vsel %vm2378_vm0, %v2444_v6, %v2448_v29  ;;  %10432 = vst [vmem:[#allocation27_spill] sm:$0xff] %v9028_v5  ;;  %v2788_v6 = vrot.slane %v10435_v52, 2  ;;  %v9041_v29 = vsel %vm3780_vm7, %v10436_v46, %v3818_v22 }
 0x116   : > { %6042 = vmatprep.mubr.msk.bf16.mxu1 %vm7411_vm13, %v10391_v50  ;;  %10431 = vst [vmem:[#allocation26_spill] sm:$0xff] %v9022_v24  ;;  %v2456_v24 = vor.u32 %v2455_v31, %v2454_v30  ;;  %v9043_v5 = vor.u32 %v2464_v0, %v2461_v45  ;;  %v9052_v30 = vsel %vm3780_vm7, %v3818_v22, %v10376_v41  ;;  %v10440_v31 = vld [vmem:[#allocation5_spill] sm:$0xff] }
 0x117   : > { %10438 = vst [vmem:[#allocation28_spill] sm:$0xff] %v9052_v30  ;;  %v9061_v46 = vsel %vm2776_vm14, %v2786_v35, %v2788_v6  ;;  %v2790_v22 = vrot.slane %v10440_v31, 2 }
 0x118   : > { %6429 = vmatmul.mubr.msk.bf16.gmra.mrb[16].mxu0 %vm1236_vm2, %v9010_v62  ;;  %10437 = vst [vmem:[#allocation3_spill] sm:$0xff] %v9043_v5  ;;  %v9047_v48 = vsel %vm2378_vm0, %v2452_v19, %v2456_v24  ;;  %v9058_v38 = vsel %vm2378_vm0, %v2456_v24, %v9043_v5  ;;  %v1203_v19 = vor.u32 %v8785_v17, %v1199_v43  ;;  %v10441_v43 = vld [vmem:[#allocation21_spill] sm:$0xff] }
 0x119   : > { %6432 = vmatprep.mubr.msk.bf16.mxu0 %vm7411_vm13, %v10391_v50  ;;  %10439 = vst [vmem:[#allocation29_spill] sm:$0xff] %v9058_v38  ;;  %v9075_v35 = vsel %vm2776_vm14, %v2788_v6, %v2790_v22  ;;  %v2792_v24 = vrot.slane %v10441_v43, 2  ;;  %v10442_v6 = vld [vmem:[#allocation22_spill] sm:$0xff] }
 0x11b   : > { %v9089_v0 = vsel %vm2776_vm14, %v2790_v22, %v2792_v24 }
 0x11d   : > { %6043 = vmatmul.mubr.msk.bf16.gmra.mrb[60].mxu1 %vm1236_vm2, %v1200_v3  ;;  %v1207_v3 = vrot.slane %v8788_v54, 1  ;;  %v1215_v54 = vrot.slane %v8809_v2, 1  ;;  %v1223_v2 = vrot.slane %v8831_v58, 1  ;;  %v1231_v58 = vrot.slane %v8851_v9, 1 }
 0x11e   : > { %6046 = vmatprep.mubr.msk.bf16.mxu1 %vm7411_vm13, %v10391_v50  ;;  %v2798_v9 = vrot.slane %v8623_v33, 2 }
 0x11f   : > { %v1208_v45 = vsel %vm1068_vm5, %v1203_v19, %v1207_v3  ;;  %v1211_v17 = vor.u32 %v8806_v25, %v1207_v3  ;;  %v1219_v25 = vor.u32 %v8820_v28, %v1215_v54  ;;  %v2794_v3 = vrot.slane %v10442_v6, 2 }
 0x120   : > { %6433 = vmatmul.mubr.msk.bf16.gmra.mrb[20].mxu0 %vm1236_vm2, %v9061_v46  ;;  %v1227_v28 = vor.u32 %v8834_v59, %v1223_v2  ;;  %v1235_v59 = vor.u32 %v8860_v13, %v1231_v58 }
 0x121   : > { %6436 = vmatprep.mubr.msk.bf16.mxu0 %vm7411_vm13, %v10391_v50  ;;  %v1216_v34 = vsel %vm1068_vm5, %v1211_v17, %v1215_v54  ;;  %v1224_v19 = vsel %vm1068_vm5, %v1219_v25, %v1223_v2  ;;  %v9103_v22 = vsel %vm2776_vm14, %v2792_v24, %v2794_v3  ;;  %v5435_v2 = vld [vmem:[%s10326_s1 + $0x8] sm:$0xf]  ;;  %v2800_v25 = vrot.slane %v8691_v27, 2 }
 0x122   : > { %v1232_v17 = vsel %vm1068_vm5, %v1227_v28, %v1231_v58  ;;  %v1878_v13 = vsel %vm1300_vm6, %v5435_v2, 0  ;;  %v2802_v58 = vrot.slane %v8706_v14, 2  ;;  %v10445_v28 = vld [vmem:[#allocation7_spill] sm:$0xff]  ;;  %v2806_v2 = vrot.slane %v8741_v57, 2 }
 0x123   : > { %vm1772_vm5 = vcmask 1046528  }
 0x125   : > { %6047 = vmatmul.mubr.msk.bf16.gmra.mrb[64].mxu1 %vm1236_vm2, %v1208_v45  ;;  %v10443_v45 = vld [vmem:[#allocation23_spill] sm:$0xff] }
 0x126   : > { %6050 = vmatprep.mubr.msk.bf16.mxu1 %vm7411_vm13, %v10391_v50  ;;  %v2796_v54 = vrot.slane %v10443_v45, 2 }
 0x128   : > { %6437 = vmatmul.mubr.msk.bf16.gmra.mrb[24].mxu0 %vm1236_vm2, %v9075_v35  ;;  %v9117_v24 = vsel %vm2776_vm14, %v2794_v3, %v2796_v54  ;;  %v10444_v3 = vld [vmem:[#allocation10_spill] sm:$0xff] }
 0x129   : > { %6440 = vmatprep.mubr.msk.bf16.mxu0 %vm7411_vm13, %v10391_v50 }
 0x12d   : > { %6051 = vmatmul.mubr.msk.bf16.gmra.mrb[68].mxu1 %vm1236_vm2, %v1216_v34  ;;  %v9129_v34 = vsel %vm2776_vm14, %v2796_v54, %v2798_v9  ;;  %v9158_v54 = vsel %vm2776_vm14, %v2800_v25, %v2802_v58 }
 0x12e   : > { %6054 = vmatprep.mubr.msk.bf16.mxu1 %vm7411_vm13, %v10391_v50 }
 0x130   : > { %6441 = vmatmul.mubr.msk.bf16.gmra.mrb[28].mxu0 %vm1236_vm2, %v9089_v0 }
 0x131   : > { %6444 = vmatprep.mubr.msk.bf16.mxu0 %vm7411_vm13, %v10391_v50 }
 0x135   : > { %6055 = vmatmul.mubr.msk.bf16.gmra.mrb[72].mxu1 %vm1236_vm2, %v1224_v19  ;;  %v9145_v19 = vsel %vm2776_vm14, %v2798_v9, %v2800_v25  ;;  %v2808_v25 = vrot.slane %v8755_v55, 2 }
 0x136   : > { %6058 = vmatprep.mubr.msk.bf16.mxu1 %vm7411_vm13, %v10391_v50 }
 0x138   : > { %6445 = vmatmul.mubr.msk.bf16.gmra.mrb[32].mxu0 %vm1236_vm2, %v9103_v22 }
 0x139   : > { %6448 = vmatprep.mubr.msk.bf16.mxu0 %vm7411_vm13, %v10391_v50 }
 0x13d   : > { %6059 = vmatmul.mubr.msk.bf16.gmra.mrb[76].mxu1 %vm1236_vm2, %v1232_v17  ;;  %v2804_v17 = vrot.slane %v8723_v42, 2 }
 0x13e   : > { %6062 = vmatprep.mubr.msk.bf16.mxu1 %vm7411_vm13, %v10391_v50 }
 0x13f   : > { %v9170_v9 = vsel %vm2776_vm14, %v2802_v58, %v2804_v17  ;;  %v9194_v58 = vsel %vm2776_vm14, %v2806_v2, %v2808_v25 }
 0x140   : > { %6449 = vmatmul.mubr.msk.bf16.gmra.mrb[36].mxu0 %vm1236_vm2, %v9117_v24 }
 0x141   : > { %6452 = vmatprep.mubr.msk.bf16.mxu0 %vm7411_vm13, %v10391_v50 }
 0x145   : > { %6063 = vmatmul.mubr.msk.bf16.gmra.mrb[80].mxu1 %vm1236_vm2, %v1235_v59  ;;  %v10446_v59 = vld [vmem:[#allocation6_spill] sm:$0xff] }
 0x146   : > { %6068 = vmatprep.mubr.msk.bf16.mxu1 %vm7411_vm13, %v10391_v50 }
 0x148   : > { %6453 = vmatmul.mubr.msk.bf16.gmra.mrb[40].mxu0 %vm1236_vm2, %v9129_v34 }
 0x149   : > { %6456 = vmatprep.mubr.msk.bf16.mxu0 %vm7411_vm13, %v10391_v50 }
 0x14d   : > { %6069 = vmatmul.mubr.msk.bf16.vlgmr.msra.gmra.mrb[0].mxu1 %vm1236_vm2, %v10444_v3 }
 0x14e   : > { %6153 = vmatpush3.bf16.msra.mxu1 %v1878_v13  ;;  %6072 = vmatprep.mubr.msk.bf16.mxu1 %vm7411_vm13, %v10391_v50  ;;  %v9182_v13 = vsel %vm2776_vm14, %v2804_v17, %v2806_v2  ;;  %v2810_v17 = vrot.slane %v8760_v23, 2  ;;  %v2812_v2 = vrot.slane %v8802_v7, 2 }
 0x14f   : > { %6238 = vmatprep.subr.bf16.mxu1 %v10391_v50 }
 0x150   : > { %6457 = vmatmul.mubr.msk.bf16.gmra.mrb[44].mxu0 %vm1236_vm2, %v9145_v19  ;;  %v9206_v41 = vsel %vm2776_vm14, %v2808_v25, %v2810_v17  ;;  %v9218_v5 = vsel %vm2776_vm14, %v2810_v17, %v2812_v2  ;;  %v2814_v25 = vrot.slane %v8817_v4, 2  ;;  %v9237_v17 = vrot.slane %v8882_v12, 2 }
 0x151   : > { %6460 = vmatprep.mubr.msk.bf16.mxu0 %vm7411_vm13, %v10391_v50 }
 0x152   : > { %v9230_v30 = vsel %vm2776_vm14, %v2812_v2, %v2814_v25  ;;  %v9245_v38 = vsel %vm2776_vm14, %v2814_v25, %v9237_v17  ;;  %v5545_v2 = vld [vmem:[%s10326_s1 + $0x1c] sm:$0xf] }
 0x153   : > { %v3535_v25 = vsel %vm1300_vm6, %v5545_v2, 0  ;;  %v1790_v2 = vrot.slane %v10441_v43, 1 }
 0x155   : > { %6073 = vmatmul.mubr.msk.bf16.gmra.mrb[4].mxu1 %vm1236_vm2, %v10445_v28 }
 0x156   : > { %6076 = vmatprep.mubr.msk.bf16.mxu1 %vm7411_vm13, %v10391_v50 }
 0x158   : > { %6461 = vmatmul.mubr.msk.bf16.gmra.mrb[48].mxu0 %vm1236_vm2, %v9158_v54 }
 0x159   : > { %6464 = vmatprep.mubr.msk.bf16.mxu0 %vm7411_vm13, %v10391_v50 }
 0x15d   : > { %6077 = vmatmul.mubr.msk.bf16.gmra.mrb[8].mxu1 %vm1236_vm2, %v10446_v59 }
 0x15e   : > { %6080 = vmatprep.mubr.msk.bf16.mxu1 %vm7411_vm13, %v10391_v50 }
 0x160   : > { %6465 = vmatmul.mubr.msk.bf16.gmra.mrb[52].mxu0 %vm1236_vm2, %v9170_v9 }
 0x161   : > { %6468 = vmatprep.mubr.msk.bf16.mxu0 %vm7411_vm13, %v10391_v50 }
 0x165   : > { %6081 = vmatmul.mubr.msk.bf16.gmra.mrb[12].mxu1 %vm1236_vm2, %v8199_v47 }
 0x166   : > { %6084 = vmatprep.mubr.msk.bf16.mxu1 %vm7411_vm13, %v10391_v50 }
 0x168   : > { %6469 = vmatmul.mubr.msk.bf16.gmra.mrb[56].mxu0 %vm1236_vm2, %v9182_v13 }
 0x169   : > { %6472 = vmatprep.mubr.msk.bf16.mxu0 %vm7411_vm13, %v10391_v50 }
 0x16d   : > { %6085 = vmatmul.mubr.msk.bf16.gmra.mrb[16].mxu1 %vm1236_vm2, %v10419_v39 }
 0x16e   : > { %6088 = vmatprep.mubr.msk.bf16.mxu1 %vm7411_vm13, %v10391_v50 }
 0x170   : > { %6473 = vmatmul.mubr.msk.bf16.gmra.mrb[60].mxu0 %vm1236_vm2, %v9194_v58 }
 0x171   : > { %6476 = vmatprep.mubr.msk.bf16.mxu0 %vm7411_vm13, %v10391_v50 }
 0x175   : > { %6089 = vmatmul.mubr.msk.bf16.gmra.mrb[20].mxu1 %vm1236_vm2, %v10425_v49 }
 0x176   : > { %6092 = vmatprep.mubr.msk.bf16.mxu1 %vm7411_vm13, %v10391_v50 }
 0x178   : > { %6477 = vmatmul.mubr.msk.bf16.gmra.mrb[64].mxu0 %vm1236_vm2, %v9206_v41 }
 0x179   : > { %6480 = vmatprep.mubr.msk.bf16.mxu0 %vm7411_vm13, %v10391_v50 }
 0x17d   : > { %6093 = vmatmul.mubr.msk.bf16.gmra.mrb[24].mxu1 %vm1236_vm2, %v10426_v56 }
 0x17e   : > { %6096 = vmatprep.mubr.msk.bf16.mxu1 %vm7411_vm13, %v10391_v50 }
 0x180   : > { %6481 = vmatmul.mubr.msk.bf16.gmra.mrb[68].mxu0 %vm1236_vm2, %v9218_v5 }
 0x181   : > { %6484 = vmatprep.mubr.msk.bf16.mxu0 %vm7411_vm13, %v10391_v50 }
 0x185   : > { %6097 = vmatmul.mubr.msk.bf16.gmra.mrb[28].mxu1 %vm1236_vm2, %v10435_v52 }
 0x186   : > { %6100 = vmatprep.mubr.msk.bf16.mxu1 %vm7411_vm13, %v10391_v50 }
 0x188   : > { %6485 = vmatmul.mubr.msk.bf16.gmra.mrb[72].mxu0 %vm1236_vm2, %v9230_v30 }
 0x189   : > { %6488 = vmatprep.mubr.msk.bf16.mxu0 %vm7411_vm13, %v10391_v50 }
 0x18d   : > { %6101 = vmatmul.mubr.msk.bf16.gmra.mrb[32].mxu1 %vm1236_vm2, %v10440_v31 }
 0x18e   : > { %6104 = vmatprep.mubr.msk.bf16.mxu1 %vm7411_vm13, %v10391_v50 }
 0x190   : > { %6489 = vmatmul.mubr.msk.bf16.gmra.mrb[76].mxu0 %vm1236_vm2, %v9245_v38 }
 0x191   : > { %6492 = vmatprep.mubr.msk.bf16.mxu0 %vm7411_vm13, %v10391_v50 }
 0x195   : > { %6105 = vmatmul.mubr.msk.bf16.gmra.mrb[36].mxu1 %vm1236_vm2, %v10441_v43 }
 0x196   : > { %6108 = vmatprep.mubr.msk.bf16.mxu1 %vm7411_vm13, %v10391_v50 }
 0x198   : > { %6493 = vmatmul.mubr.msk.bf16.gmra.mrb[80].mxu0 %vm1236_vm2, %v9237_v17 }
 0x199   : > { %6498 = vmatprep.mubr.msk.bf16.mxu0 %vm7411_vm13, %v10391_v50 }
 0x19d   : > { %6109 = vmatmul.mubr.msk.bf16.gmra.mrb[40].mxu1 %vm1236_vm2, %v10442_v6 }
 0x19e   : > { %6112 = vmatprep.mubr.msk.bf16.mxu1 %vm7411_vm13, %v10391_v50 }
 0x1a0   : > { %6499 = vmatmul.mubr.msk.bf16.vlgmr.msra.gmra.mrb[0].mxu0 %vm1236_vm2, %v8681_v20  ;;  %v1773_v20 = vrot.slane %v10444_v3, 1 }
 0x1a1   : > { %6583 = vmatpush3.bf16.msra.mxu0 %v3535_v25  ;;  %6502 = vmatprep.mubr.msk.bf16.mxu0 %vm7411_vm13, %v10391_v50 }
 0x1a2   : > { %6668 = vmatprep.subr.bf16.mxu0 %v10391_v50 }
 0x1a5   : > { %6113 = vmatmul.mubr.msk.bf16.gmra.mrb[44].mxu1 %vm1236_vm2, %v10443_v45 }
 0x1a6   : > { %6116 = vmatprep.mubr.msk.bf16.mxu1 %vm7411_vm13, %v10391_v50 }
 0x1a8   : > { %6503 = vmatmul.mubr.msk.bf16.gmra.mrb[4].mxu0 %vm1236_vm2, %v8947_v10  ;;  %v1774_v10 = vrot.slane %v10445_v28, 1 }
 0x1a9   : > { %6506 = vmatprep.mubr.msk.bf16.mxu0 %vm7411_vm13, %v10391_v50 }
 0x1ad   : > { %6117 = vmatmul.mubr.msk.bf16.gmra.mrb[48].mxu1 %vm1236_vm2, %v8623_v33 }
 0x1ae   : > { %6120 = vmatprep.mubr.msk.bf16.mxu1 %vm7411_vm13, %v10391_v50 }
 0x1b0   : > { %6507 = vmatmul.mubr.msk.bf16.gmra.mrb[8].mxu0 %vm1236_vm2, %v8974_v32  ;;  %v5457_v32 = vld [vmem:[%s10326_s1 + $0xc] sm:$0xf] }
 0x1b1   : > { %6510 = vmatprep.mubr.msk.bf16.mxu0 %vm7411_vm13, %v10391_v50 }
 0x1b5   : > { %6121 = vmatmul.mubr.msk.bf16.gmra.mrb[52].mxu1 %vm1236_vm2, %v8691_v27 }
 0x1b6   : > { %6124 = vmatprep.mubr.msk.bf16.mxu1 %vm7411_vm13, %v10391_v50 }
 0x1b8   : > { %6511 = vmatmul.mubr.msk.bf16.gmra.mrb[12].mxu0 %vm1236_vm2, %v9010_v62  ;;  %v2133_v62 = vsel %vm1300_vm6, %v5457_v32, 0 }
 0x1b9   : > { %6514 = vmatprep.mubr.msk.bf16.mxu0 %vm7411_vm13, %v10391_v50 }
 0x1bd   : > { %6125 = vmatmul.mubr.msk.bf16.gmra.mrb[56].mxu1 %vm1236_vm2, %v8706_v14 }
 0x1be   : > { %6128 = vmatprep.mubr.msk.bf16.mxu1 %vm7411_vm13, %v10391_v50 }
 0x1c0   : > { %6515 = vmatmul.mubr.msk.bf16.gmra.mrb[16].mxu0 %vm1236_vm2, %v9061_v46  ;;  %v1775_v46 = vsel %vm1772_vm5, %v1773_v20, %v1774_v10 }
 0x1c1   : > { %6518 = vmatprep.mubr.msk.bf16.mxu0 %vm7411_vm13, %v10391_v50 }
 0x1c5   : > { %6129 = vmatmul.mubr.msk.bf16.gmra.mrb[60].mxu1 %vm1236_vm2, %v8723_v42 }
 0x1c6   : > { %6132 = vmatprep.mubr.msk.bf16.mxu1 %vm7411_vm13, %v10391_v50 }
 0x1c8   : > { %6519 = vmatmul.mubr.msk.bf16.gmra.mrb[20].mxu0 %vm1236_vm2, %v9075_v35  ;;  %v1776_v35 = vrot.slane %v10446_v59, 1 }
 0x1c9   : > { %6522 = vmatprep.mubr.msk.bf16.mxu0 %vm7411_vm13, %v10391_v50 }
 0x1cd   : > { %6133 = vmatmul.mubr.msk.bf16.gmra.mrb[64].mxu1 %vm1236_vm2, %v8741_v57 }
 0x1ce   : > { %6136 = vmatprep.mubr.msk.bf16.mxu1 %vm7411_vm13, %v10391_v50 }
 0x1d0   : > { %6523 = vmatmul.mubr.msk.bf16.gmra.mrb[24].mxu0 %vm1236_vm2, %v9089_v0  ;;  %v9369_v0 = vsel %vm1772_vm5, %v1774_v10, %v1776_v35  ;;  %v10447_v10 = vld [vmem:[#allocation9_spill] sm:$0xff] }
 0x1d1   : > { %6526 = vmatprep.mubr.msk.bf16.mxu0 %vm7411_vm13, %v10391_v50 }
 0x1d5   : > { %6137 = vmatmul.mubr.msk.bf16.gmra.mrb[68].mxu1 %vm1236_vm2, %v8755_v55 }
 0x1d6   : > { %6140 = vmatprep.mubr.msk.bf16.mxu1 %vm7411_vm13, %v10391_v50 }
 0x1d8   : > { %6527 = vmatmul.mubr.msk.bf16.gmra.mrb[28].mxu0 %vm1236_vm2, %v9103_v22  ;;  %v1778_v22 = vrot.slane %v8199_v47, 1 }
 0x1d9   : > { %6530 = vmatprep.mubr.msk.bf16.mxu0 %vm7411_vm13, %v10391_v50 }
 0x1dd   : > { %6141 = vmatmul.mubr.msk.bf16.gmra.mrb[72].mxu1 %vm1236_vm2, %v8760_v23 }
 0x1de   : > { %6144 = vmatprep.mubr.msk.bf16.mxu1 %vm7411_vm13, %v10391_v50 }
 0x1e0   : > { %6531 = vmatmul.mubr.msk.bf16.gmra.mrb[32].mxu0 %vm1236_vm2, %v9117_v24  ;;  %v9381_v24 = vsel %vm1772_vm5, %v1776_v35, %v1778_v22 }
 0x1e1   : > { %6534 = vmatprep.mubr.msk.bf16.mxu0 %vm7411_vm13, %v10391_v50 }
 0x1e5   : > { %6145 = vmatmul.mubr.msk.bf16.gmra.mrb[76].mxu1 %vm1236_vm2, %v8802_v7 }
 0x1e6   : > { %6148 = vmatprep.mubr.msk.bf16.mxu1 %vm7411_vm13, %v10391_v50 }
 0x1e8   : > { %6535 = vmatmul.mubr.msk.bf16.gmra.mrb[36].mxu0 %vm1236_vm2, %v9129_v34  ;;  %v1780_v34 = vrot.slane %v10419_v39, 1 }
 0x1e9   : > { %6538 = vmatprep.mubr.msk.bf16.mxu0 %vm7411_vm13, %v10391_v50 }
 0x1ea   : > { %v9393_v3 = vsel %vm1772_vm5, %v1778_v22, %v1780_v34  ;;  %v5567_v22 = vld [vmem:[%s10326_s1 + $0x20] sm:$0xf] }
 0x1ed   : > { %6149 = vmatmul.mubr.msk.bf16.gmra.mrb[80].mxu1 %vm1236_vm2, %v8817_v4 }
 0x1ee   : > { %6154 = vmatprep.mubr.msk.bf16.mxu1 %vm7411_vm13, %v10391_v50 }
 0x1f0   : > { %6539 = vmatmul.mubr.msk.bf16.gmra.mrb[40].mxu0 %vm1236_vm2, %v9145_v19  ;;  %v1782_v19 = vrot.slane %v10425_v49, 1 }
 0x1f1   : > { %6542 = vmatprep.mubr.msk.bf16.mxu0 %vm7411_vm13, %v10391_v50 }
 0x1f2   : > { %v9405_v28 = vsel %vm1772_vm5, %v1780_v34, %v1782_v19 }
 0x1f5   : > { %6155 = vmatmul.mubr.msk.bf16.vlgmr.msra.gmra.mrb[0].mxu1 %vm1236_vm2, %v1775_v46  ;;  %v10448_v46 = vld [vmem:[#allocation8_spill] sm:$0xff] }
 0x1f6   : > { %6239 = vmatpush3.bf16.msra.mxu1 %v2133_v62  ;;  %6158 = vmatprep.mubr.msk.bf16.mxu1 %vm7411_vm13, %v10391_v50  ;;  %v3383_v62 = vrot.slane %v10447_v10, 2  ;;  %v3384_v35 = vrot.slane %v10448_v46, 3  ;;  %v1798_v10 = vrot.slane %v8691_v27, 1 }
 0x1f7   : > { %6754 = vmatprep.subr.bf16.mxu1 %v10391_v50 }
 0x1f8   : > { %6543 = vmatmul.mubr.msk.bf16.gmra.mrb[44].mxu0 %vm1236_vm2, %v9158_v54  ;;  %v1784_v54 = vrot.slane %v10426_v56, 1 }
 0x1f9   : > { %6546 = vmatprep.mubr.msk.bf16.mxu0 %vm7411_vm13, %v10391_v50 }
 0x1fd   : > { %6159 = vmatmul.mubr.msk.bf16.gmra.mrb[4].mxu1 %vm1236_vm2, %v9369_v0 }
 0x1fe   : > { %6162 = vmatprep.mubr.msk.bf16.mxu1 %vm7411_vm13, %v10391_v50 }
 0x200   : > { %6547 = vmatmul.mubr.msk.bf16.gmra.mrb[48].mxu0 %vm1236_vm2, %v9170_v9  ;;  %v9417_v9 = vsel %vm1772_vm5, %v1782_v19, %v1784_v54  ;;  %v3385_v19 = vor.u32 %v3384_v35, %v3383_v62 }
 0x201   : > { %6550 = vmatprep.mubr.msk.bf16.mxu0 %vm7411_vm13, %v10391_v50 }
 0x205   : > { %6163 = vmatmul.mubr.msk.bf16.gmra.mrb[8].mxu1 %vm1236_vm2, %v9381_v24 }
 0x206   : > { %6166 = vmatprep.mubr.msk.bf16.mxu1 %vm7411_vm13, %v10391_v50 }
 0x208   : > { %6551 = vmatmul.mubr.msk.bf16.gmra.mrb[52].mxu0 %vm1236_vm2, %v9182_v13  ;;  %v1786_v13 = vrot.slane %v10435_v52, 1 }
 0x209   : > { %6554 = vmatprep.mubr.msk.bf16.mxu0 %vm7411_vm13, %v10391_v50 }
 0x20d   : > { %6167 = vmatmul.mubr.msk.bf16.gmra.mrb[12].mxu1 %vm1236_vm2, %v9393_v3 }
 0x20e   : > { %6170 = vmatprep.mubr.msk.bf16.mxu1 %vm7411_vm13, %v10391_v50 }
 0x210   : > { %6555 = vmatmul.mubr.msk.bf16.gmra.mrb[56].mxu0 %vm1236_vm2, %v9194_v58  ;;  %v1788_v58 = vrot.slane %v10440_v31, 1 }
 0x211   : > { %6558 = vmatprep.mubr.msk.bf16.mxu0 %vm7411_vm13, %v10391_v50 }
 0x212   : > { %v9454_v25 = vsel %vm1772_vm5, %v1788_v58, %v1790_v2 }
 0x215   : > { %6171 = vmatmul.mubr.msk.bf16.gmra.mrb[16].mxu1 %vm1236_vm2, %v9405_v28 }
 0x216   : > { %6174 = vmatprep.mubr.msk.bf16.mxu1 %vm7411_vm13, %v10391_v50 }
 0x218   : > { %6559 = vmatmul.mubr.msk.bf16.gmra.mrb[60].mxu0 %vm1236_vm2, %v9206_v41  ;;  %v9429_v41 = vsel %vm1772_vm5, %v1784_v54, %v1786_v13  ;;  %v3886_v54 = vsel %vm1300_vm6, %v5567_v22, 0  ;;  %vm4637_vm6 = vcmask 58368  }
 0x219   : > { %6562 = vmatprep.mubr.msk.bf16.mxu0 %vm7411_vm13, %v10391_v50 }
 0x21d   : > { %6175 = vmatmul.mubr.msk.bf16.gmra.mrb[20].mxu1 %vm1236_vm2, %v9417_v9 }
 0x21e   : > { %6178 = vmatprep.mubr.msk.bf16.mxu1 %vm7411_vm13, %v10391_v50 }
 0x220   : > { %6563 = vmatmul.mubr.msk.bf16.gmra.mrb[64].mxu0 %vm1236_vm2, %v9218_v5  ;;  %v9441_v5 = vsel %vm1772_vm5, %v1786_v13, %v1788_v58  ;;  %v3389_v13 = vsel %vm3382_vm8, %v3385_v19, %v8771_v44  ;;  %v1796_v58 = vrot.slane %v8623_v33, 1  ;;  %v10450_v44 = vld [vmem:[#allocation17_spill] sm:$0xff] }
 0x221   : > { %6566 = vmatprep.mubr.msk.bf16.mxu0 %vm7411_vm13, %v10391_v50 }
 0x222   : > { %v9511_v62 = vsel %vm1772_vm5, %v1796_v58, %v1798_v10 }
 0x225   : > { %6179 = vmatmul.mubr.msk.bf16.gmra.mrb[24].mxu1 %vm1236_vm2, %v9429_v41 }
 0x226   : > { %6182 = vmatprep.mubr.msk.bf16.mxu1 %vm7411_vm13, %v10391_v50 }
 0x228   : > { %6567 = vmatmul.mubr.msk.bf16.gmra.mrb[68].mxu0 %vm1236_vm2, %v9230_v30  ;;  %v3128_v30 = vrot.slane %v8884_v53, 2 }
 0x229   : > { %6570 = vmatprep.mubr.msk.bf16.mxu0 %vm7411_vm13, %v10391_v50 }
 0x22a   : > { %v3129_v20 = vsel %vm2776_vm14, %v9237_v17, %v3128_v30  ;;  %v1794_v17 = vrot.slane %v10443_v45, 1 }
 0x22d   : > { %6183 = vmatmul.mubr.msk.bf16.gmra.mrb[28].mxu1 %vm1236_vm2, %v9441_v5 }
 0x22e   : > { %6186 = vmatprep.mubr.msk.bf16.mxu1 %vm7411_vm13, %v10391_v50 }
 0x230   : > { %6571 = vmatmul.mubr.msk.bf16.gmra.mrb[72].mxu0 %vm1236_vm2, %v9245_v38  ;;  %v1792_v38 = vrot.slane %v10442_v6, 1 }
 0x231   : > { %6574 = vmatprep.mubr.msk.bf16.mxu0 %vm7411_vm13, %v10391_v50 }
 0x232   : > { %v9467_v32 = vsel %vm1772_vm5, %v1790_v2, %v1792_v38  ;;  %v9483_v34 = vsel %vm1772_vm5, %v1792_v38, %v1794_v17  ;;  %v9497_v2 = vsel %vm1772_vm5, %v1794_v17, %v1796_v58  ;;  %v3395_v38 = vrot.slane %v10450_v44, 3 }
 0x233   : > { %v1808_v58 = vrot.slane %v8760_v23, 1  ;;  %v3800_v44 = vrot.slane %v8623_v33, 3 }
 0x235   : > { %6187 = vmatmul.mubr.msk.bf16.gmra.mrb[32].mxu1 %vm1236_vm2, %v9454_v25 }
 0x236   : > { %6190 = vmatprep.mubr.msk.bf16.mxu1 %vm7411_vm13, %v10391_v50 }
 0x238   : > { %6575 = vmatmul.mubr.msk.bf16.gmra.mrb[76].mxu0 %vm1236_vm2, %v3129_v20 }
 0x239   : > { %6578 = vmatprep.mubr.msk.bf16.mxu0 %vm7411_vm13, %v10391_v50 }
 0x23d   : > { %6191 = vmatmul.mubr.msk.bf16.gmra.mrb[36].mxu1 %vm1236_vm2, %v9467_v32 }
 0x23e   : > { %6194 = vmatprep.mubr.msk.bf16.mxu1 %vm7411_vm13, %v10391_v50 }
 0x240   : > { %6579 = vmatmul.mubr.msk.bf16.gmra.mrb[80].mxu0 %vm1236_vm2, %v3128_v30  ;;  %v10449_v30 = vld [vmem:[#allocation18_spill] sm:$0xff] }
 0x241   : > { %6584 = vmatprep.mubr.msk.bf16.mxu0 %vm7411_vm13, %v10391_v50  ;;  %v3394_v20 = vrot.slane %v10449_v30, 2  ;;  %v1810_v30 = vrot.slane %v8802_v7, 1 }
 0x243   : > { %v3396_v17 = vor.u32 %v3395_v38, %v3394_v20  ;;  %v9594_v20 = vrot.slane %v8817_v4, 1 }
 0x245   : > { %6195 = vmatmul.mubr.msk.bf16.gmra.mrb[40].mxu1 %vm1236_vm2, %v9483_v34  ;;  %v3397_v46 = vsel %vm3382_vm8, %v8773_v36, %v3396_v17  ;;  %v3401_v22 = vsel %vm3382_vm8, %v3396_v17, %v8811_v61  ;;  %v1802_v36 = vrot.slane %v8723_v42, 1  ;;  %v1804_v61 = vrot.slane %v8741_v57, 1  ;;  %v10458_v17 = vld [vmem:[#allocation25_spill] sm:$0xff] }
 0x246   : > { %6198 = vmatprep.mubr.msk.bf16.mxu1 %vm7411_vm13, %v10391_v50  ;;  %vm4495_vm8 = vcmask 60416  }
 0x248   : > { %6585 = vmatmul.mubr.msk.bf16.vlgmr.msra.gmra.mrb[0].mxu0 %vm1236_vm2, %v3389_v13  ;;  %v1806_v13 = vrot.slane %v8755_v55, 1 }
 0x249   : > { %6669 = vmatpush3.bf16.msra.mxu0 %v3886_v54  ;;  %6588 = vmatprep.mubr.msk.bf16.mxu0 %vm7411_vm13, %v10391_v50  ;;  %v9549_v54 = vsel %vm1772_vm5, %v1802_v36, %v1804_v61 }
 0x24d   : > { %6199 = vmatmul.mubr.msk.bf16.gmra.mrb[44].mxu1 %vm1236_vm2, %v9497_v2 }
 0x24e   : > { %6202 = vmatprep.mubr.msk.bf16.mxu1 %vm7411_vm13, %v10391_v50 }
 0x250   : > { %6589 = vmatmul.mubr.msk.bf16.gmra.mrb[4].mxu0 %vm1236_vm2, %v8793_v15  ;;  %v1800_v15 = vrot.slane %v8706_v14, 1 }
 0x251   : > { %6592 = vmatprep.mubr.msk.bf16.mxu0 %vm7411_vm13, %v10391_v50 }
 0x252   : > { %v9524_v35 = vsel %vm1772_vm5, %v1798_v10, %v1800_v15  ;;  %v9537_v19 = vsel %vm1772_vm5, %v1800_v15, %v1802_v36  ;;  %v3804_v10 = vrot.slane %v8706_v14, 3  ;;  %v4640_v14 = vld [vmem:[%s9810_s30 + $0x8] sm:$0x3]  ;;  %v10459_v15 = vld [vmem:[#allocation24_spill] sm:$0xff]  ;;  %v10461_v36 = vld [vmem:[#allocation13_spill] sm:$0xff] }
 0x255   : > { %6203 = vmatmul.mubr.msk.bf16.gmra.mrb[48].mxu1 %vm1236_vm2, %v9511_v62 }
 0x256   : > { %6206 = vmatprep.mubr.msk.bf16.mxu1 %vm7411_vm13, %v10391_v50 }
 0x258   : > { %6593 = vmatmul.mubr.msk.bf16.gmra.mrb[8].mxu0 %vm1236_vm2, %v3397_v46 }
 0x259   : > { %6596 = vmatprep.mubr.msk.bf16.mxu0 %vm7411_vm13, %v10391_v50 }
 0x25d   : > { %6207 = vmatmul.mubr.msk.bf16.gmra.mrb[52].mxu1 %vm1236_vm2, %v9524_v35 }
 0x25e   : > { %6210 = vmatprep.mubr.msk.bf16.mxu1 %vm7411_vm13, %v10391_v50 }
 0x260   : > { %6597 = vmatmul.mubr.msk.bf16.gmra.mrb[12].mxu0 %vm1236_vm2, %v3401_v22  ;;  %v10460_v22 = vmov 0  }
 0x261   : > { %6600 = vmatprep.mubr.msk.bf16.mxu0 %vm7411_vm13, %v10391_v50  ;;  %4635 = vst.msk [vmem:[%s9810_s30] sm:$0xf] %vm4495_vm8, %v10460_v22  ;;  %4636 = vst.msk [vmem:[%s9810_s30 + $0x4] sm:$0xf] %vm4495_vm8, %v10460_v22 }
 0x262   : > { %5275 = vst.msk [vmem:[%s9810_s30 + $0xac] sm:$0xf] %vm4495_vm8, %v10460_v22  ;;  %5276 = vst.msk [vmem:[%s9810_s30 + $0xb0] sm:$0xf] %vm4495_vm8, %v10460_v22 }
 0x265   : > { %6211 = vmatmul.mubr.msk.bf16.gmra.mrb[56].mxu1 %vm1236_vm2, %v9537_v19 }
 0x266   : > { %6214 = vmatprep.mubr.msk.bf16.mxu1 %vm7411_vm13, %v10391_v50 }
 0x268   : > { %6601 = vmatmul.mubr.msk.bf16.gmra.mrb[16].mxu0 %vm1236_vm2, %v8826_v63  ;;  %v9561_v63 = vsel %vm1772_vm5, %v1804_v61, %v1806_v13  ;;  %v3810_v61 = vrot.slane %v8755_v55, 3 }
 0x269   : > { %6604 = vmatprep.mubr.msk.bf16.mxu0 %vm7411_vm13, %v10391_v50 }
 0x26d   : > { %6215 = vmatmul.mubr.msk.bf16.gmra.mrb[60].mxu1 %vm1236_vm2, %v9549_v54 }
 0x26e   : > { %6218 = vmatprep.mubr.msk.bf16.mxu1 %vm7411_vm13, %v10391_v50 }
 0x270   : > { %6605 = vmatmul.mubr.msk.bf16.gmra.mrb[20].mxu0 %vm1236_vm2, %v8839_v40  ;;  %v9573_v40 = vsel %vm1772_vm5, %v1806_v13, %v1808_v58  ;;  %v3812_v13 = vrot.slane %v8760_v23, 3 }
 0x271   : > { %6608 = vmatprep.mubr.msk.bf16.mxu0 %vm7411_vm13, %v10391_v50 }
 0x272   : > { %v3813_v55 = vsel %vm3780_vm7, %v3810_v61, %v3812_v13 }
 0x275   : > { %6219 = vmatmul.mubr.msk.bf16.gmra.mrb[64].mxu1 %vm1236_vm2, %v9561_v63 }
 0x276   : > { %6222 = vmatprep.mubr.msk.bf16.mxu1 %vm7411_vm13, %v10391_v50 }
 0x278   : > { %6609 = vmatmul.mubr.msk.bf16.gmra.mrb[24].mxu0 %vm1236_vm2, %v8846_v8  ;;  %v9585_v8 = vsel %vm1772_vm5, %v1808_v58, %v1810_v30  ;;  %v3814_v58 = vrot.slane %v8802_v7, 3  ;;  %v10465_v7 = vld [vmem:[#allocation27_spill] sm:$0xff] }
 0x279   : > { %6612 = vmatprep.mubr.msk.bf16.mxu0 %vm7411_vm13, %v10391_v50 }
 0x27a   : > { %v3815_v23 = vsel %vm3780_vm7, %v3812_v13, %v3814_v58 }
 0x27d   : > { %6223 = vmatmul.mubr.msk.bf16.gmra.mrb[68].mxu1 %vm1236_vm2, %v9573_v40 }
 0x27e   : > { %6226 = vmatprep.mubr.msk.bf16.mxu1 %vm7411_vm13, %v10391_v50 }
 0x280   : > { %6613 = vmatmul.mubr.msk.bf16.gmra.mrb[28].mxu0 %vm1236_vm2, %v8866_v26  ;;  %v9600_v26 = vsel %vm1772_vm5, %v1810_v30, %v9594_v20 }
 0x281   : > { %6616 = vmatprep.mubr.msk.bf16.mxu0 %vm7411_vm13, %v10391_v50 }
 0x285   : > { %6227 = vmatmul.mubr.msk.bf16.gmra.mrb[72].mxu1 %vm1236_vm2, %v9585_v8 }
 0x286   : > { %6230 = vmatprep.mubr.msk.bf16.mxu1 %vm7411_vm13, %v10391_v50 }
 0x288   : > { %6617 = vmatmul.mubr.msk.bf16.gmra.mrb[32].mxu0 %vm1236_vm2, %v8872_v1  ;;  %v10451_v1 = vld [vmem:[#allocation2_spill] sm:$0xff] }
 0x289   : > { %6620 = vmatprep.mubr.msk.bf16.mxu0 %vm7411_vm13, %v10391_v50 }
 0x28d   : > { %6231 = vmatmul.mubr.msk.bf16.gmra.mrb[76].mxu1 %vm1236_vm2, %v9600_v26 }
 0x28e   : > { %6234 = vmatprep.mubr.msk.bf16.mxu1 %vm7411_vm13, %v10391_v50 }
 0x290   : > { %6621 = vmatmul.mubr.msk.bf16.gmra.mrb[36].mxu0 %vm1236_vm2, %v8878_v51  ;;  %v10452_v51 = vld [vmem:[#allocation12_spill] sm:$0xff] }
 0x291   : > { %6624 = vmatprep.mubr.msk.bf16.mxu0 %vm7411_vm13, %v10391_v50 }
 0x295   : > { %6235 = vmatmul.mubr.msk.bf16.gmra.mrb[80].mxu1 %vm1236_vm2, %v9594_v20 }
 0x296   : > { %6240 = vmatprep.mubr.msk.bf16.mxu1 %vm7411_vm13, %v10391_v50 }
 0x298   : > { %6625 = vmatmul.mubr.msk.bf16.gmra.mrb[40].mxu0 %vm1236_vm2, %v8890_v37  ;;  %v10453_v37 = vld [vmem:[#allocation11_spill] sm:$0xff] }
 0x299   : > { %6628 = vmatprep.mubr.msk.bf16.mxu0 %vm7411_vm13, %v10391_v50 }
 0x29d   : > { %6241 = vmatmul.mubr.msk.bf16.vlgmr.msra.gmra.mrb[0].mxu1 %vm1236_vm2, %v9369_v0  ;;  %v3782_v0 = vrot.slane %v8199_v47, 3 }
 0x29e   : > { %6755 = vmatpush3.bf16.msra.mxu1 %v10451_v1  ;;  %6244 = vmatprep.mubr.msk.bf16.mxu1 %vm7411_vm13, %v10391_v50  ;;  %v10466_v1 = vrot.slane %v8817_v4, 3 }
 0x2a0   : > { %6629 = vmatmul.mubr.msk.bf16.gmra.mrb[44].mxu0 %vm1236_vm2, %v8897_v18  ;;  %v10454_v18 = vld [vmem:[#allocation15_spill] sm:$0xff] }
 0x2a1   : > { %6632 = vmatprep.mubr.msk.bf16.mxu0 %vm7411_vm13, %v10391_v50 }
 0x2a5   : > { %6245 = vmatmul.mubr.msk.bf16.gmra.mrb[4].mxu1 %vm1236_vm2, %v9381_v24  ;;  %v3781_v24 = vrot.slane %v10446_v59, 3  ;;  %v3786_v59 = vrot.slane %v10425_v49, 3 }
 0x2a6   : > { %6248 = vmatprep.mubr.msk.bf16.mxu1 %vm7411_vm13, %v10391_v50 }
 0x2a8   : > { %6633 = vmatmul.mubr.msk.bf16.gmra.mrb[48].mxu0 %vm1236_vm2, %v8902_v60  ;;  %v10455_v60 = vld [vmem:[#allocation20_spill] sm:$0xff] }
 0x2a9   : > { %6636 = vmatprep.mubr.msk.bf16.mxu0 %vm7411_vm13, %v10391_v50 }
 0x2ad   : > { %6249 = vmatmul.mubr.msk.bf16.gmra.mrb[8].mxu1 %vm1236_vm2, %v9393_v3  ;;  %v3783_v3 = vsel %vm3780_vm7, %v3781_v24, %v3782_v0 }
 0x2ae   : > { %6252 = vmatprep.mubr.msk.bf16.mxu1 %vm7411_vm13, %v10391_v50 }
 0x2b0   : > { %6637 = vmatmul.mubr.msk.bf16.gmra.mrb[52].mxu0 %vm1236_vm2, %v8913_v21  ;;  %v10456_v21 = vld [vmem:[#allocation4_spill] sm:$0xff] }
 0x2b1   : > { %6640 = vmatprep.mubr.msk.bf16.mxu0 %vm7411_vm13, %v10391_v50 }
 0x2b5   : > { %6253 = vmatmul.mubr.msk.bf16.gmra.mrb[12].mxu1 %vm1236_vm2, %v9405_v28  ;;  %v3784_v28 = vrot.slane %v10419_v39, 3 }
 0x2b6   : > { %6256 = vmatprep.mubr.msk.bf16.mxu1 %vm7411_vm13, %v10391_v50 }
 0x2b7   : > { %v3785_v47 = vsel %vm3780_vm7, %v3782_v0, %v3784_v28  ;;  %v3787_v39 = vsel %vm3780_vm7, %v3784_v28, %v3786_v59  ;;  %v10468_v28 = vld [vmem:[#allocation28_spill] sm:$0xff] }
 0x2b8   : > { %6641 = vmatmul.mubr.msk.bf16.gmra.mrb[56].mxu0 %vm1236_vm2, %v10452_v51  ;;  %v3817_v51 = vsel %vm3780_vm7, %v3814_v58, %v10466_v1 }
 0x2b9   : > { %6644 = vmatprep.mubr.msk.bf16.mxu0 %vm7411_vm13, %v10391_v50 }
 0x2bd   : > { %6257 = vmatmul.mubr.msk.bf16.gmra.mrb[16].mxu1 %vm1236_vm2, %v9417_v9  ;;  %v3788_v9 = vrot.slane %v10426_v56, 3 }
 0x2be   : > { %6260 = vmatprep.mubr.msk.bf16.mxu1 %vm7411_vm13, %v10391_v50 }
 0x2bf   : > { %v3789_v49 = vsel %vm3780_vm7, %v3786_v59, %v3788_v9 }
 0x2c0   : > { %6645 = vmatmul.mubr.msk.bf16.gmra.mrb[60].mxu0 %vm1236_vm2, %v10453_v37 }
 0x2c1   : > { %6648 = vmatprep.mubr.msk.bf16.mxu0 %vm7411_vm13, %v10391_v50 }
 0x2c5   : > { %6261 = vmatmul.mubr.msk.bf16.gmra.mrb[20].mxu1 %vm1236_vm2, %v9429_v41  ;;  %v3790_v41 = vrot.slane %v10435_v52, 3 }
 0x2c6   : > { %6264 = vmatprep.mubr.msk.bf16.mxu1 %vm7411_vm13, %v10391_v50 }
 0x2c7   : > { %v3791_v56 = vsel %vm3780_vm7, %v3788_v9, %v3790_v41 }
 0x2c8   : > { %6649 = vmatmul.mubr.msk.bf16.gmra.mrb[64].mxu0 %vm1236_vm2, %v8930_v16  ;;  %v10457_v16 = vld [vmem:[#allocation14_spill] sm:$0xff] }
 0x2c9   : > { %6652 = vmatprep.mubr.msk.bf16.mxu0 %vm7411_vm13, %v10391_v50 }
 0x2cd   : > { %6265 = vmatmul.mubr.msk.bf16.gmra.mrb[24].mxu1 %vm1236_vm2, %v9441_v5  ;;  %v3792_v5 = vrot.slane %v10440_v31, 3 }
 0x2ce   : > { %6268 = vmatprep.mubr.msk.bf16.mxu1 %vm7411_vm13, %v10391_v50 }
 0x2cf   : > { %v3793_v52 = vsel %vm3780_vm7, %v3790_v41, %v3792_v5 }
 0x2d0   : > { %6653 = vmatmul.mubr.msk.bf16.gmra.mrb[68].mxu0 %vm1236_vm2, %v10454_v18 }
 0x2d1   : > { %6656 = vmatprep.mubr.msk.bf16.mxu0 %vm7411_vm13, %v10391_v50 }
 0x2d5   : > { %6269 = vmatmul.mubr.msk.bf16.gmra.mrb[28].mxu1 %vm1236_vm2, %v9454_v25  ;;  %v3794_v25 = vrot.slane %v10441_v43, 3 }
 0x2d6   : > { %6272 = vmatprep.mubr.msk.bf16.mxu1 %vm7411_vm13, %v10391_v50 }
 0x2d7   : > { %v3795_v31 = vsel %vm3780_vm7, %v3792_v5, %v3794_v25 }
 0x2d8   : > { %6657 = vmatmul.mubr.msk.bf16.gmra.mrb[72].mxu0 %vm1236_vm2, %v10455_v60 }
 0x2d9   : > { %6660 = vmatprep.mubr.msk.bf16.mxu0 %vm7411_vm13, %v10391_v50 }
 0x2dd   : > { %6273 = vmatmul.mubr.msk.bf16.gmra.mrb[32].mxu1 %vm1236_vm2, %v9467_v32  ;;  %v3796_v32 = vrot.slane %v10442_v6, 3 }
 0x2de   : > { %6276 = vmatprep.mubr.msk.bf16.mxu1 %vm7411_vm13, %v10391_v50 }
 0x2df   : > { %v3797_v43 = vsel %vm3780_vm7, %v3794_v25, %v3796_v32 }
 0x2e0   : > { %6661 = vmatmul.mubr.msk.bf16.gmra.mrb[76].mxu0 %vm1236_vm2, %v10456_v21 }
 0x2e1   : > { %6664 = vmatprep.mubr.msk.bf16.mxu0 %vm7411_vm13, %v10391_v50 }
 0x2e5   : > { %6277 = vmatmul.mubr.msk.bf16.gmra.mrb[36].mxu1 %vm1236_vm2, %v9483_v34  ;;  %v3798_v34 = vrot.slane %v10443_v45, 3 }
 0x2e6   : > { %6280 = vmatprep.mubr.msk.bf16.mxu1 %vm7411_vm13, %v10391_v50 }
 0x2e7   : > { %v3799_v6 = vsel %vm3780_vm7, %v3796_v32, %v3798_v34  ;;  %v3801_v38 = vsel %vm3780_vm7, %v3798_v34, %v3800_v44 }
 0x2e8   : > { %6665 = vmatmul.mubr.msk.bf16.gmra.mrb[80].mxu0 %vm1236_vm2, %v10457_v16 }
 0x2e9   : > { %6670 = vmatprep.mubr.msk.bf16.mxu0 %vm7411_vm13, %v10391_v50 }
 0x2ed   : > { %6281 = vmatmul.mubr.msk.bf16.gmra.mrb[40].mxu1 %vm1236_vm2, %v9497_v2  ;;  %v2124_v2 = vrot.slane %v8882_v12, 1  ;;  %v3802_v12 = vrot.slane %v8691_v27, 3 }
 0x2ee   : > { %6284 = vmatprep.mubr.msk.bf16.mxu1 %vm7411_vm13, %v10391_v50 }
 0x2ef   : > { %v2125_v45 = vsel %vm1772_vm5, %v9594_v20, %v2124_v2  ;;  %v3803_v33 = vsel %vm3780_vm7, %v3800_v44, %v3802_v12  ;;  %v3805_v27 = vsel %vm3780_vm7, %v3802_v12, %v3804_v10 }
 0x2f0   : > { %6671 = vmatmul.mubr.msk.bf16.vlgmr.msra.gmra.mrb[0].mxu0 %vm1236_vm2, %v3783_v3  ;;  %v10467_v3 = vld [vmem:[#allocation29_spill] sm:$0xff] }
 0x2f1   : > { %6674 = vmatprep.mubr.msk.bf16.mxu0 %vm7411_vm13, %v10391_v50 }
 0x2f5   : > { %6285 = vmatmul.mubr.msk.bf16.gmra.mrb[44].mxu1 %vm1236_vm2, %v9511_v62  ;;  %v2429_v62 = vsel %vm2378_vm0, %v10458_v17, %v8983_v11  ;;  %vm4638_vm0 = vsmask.f32 1280  ;;  %v3806_v11 = vrot.slane %v8723_v42, 3  ;;  %v3808_v42 = vrot.slane %v8741_v57, 3 }
 0x2f6   : > { %6288 = vmatprep.mubr.msk.bf16.mxu1 %vm7411_vm13, %v10391_v50  ;;  %vm4639_vm14 = vmand %vm4637_vm6, %vm4638_vm0 }
 0x2f7   : > { %v4641_v46 = vsel %vm4639_vm14, 0, %v4640_v14  ;;  %v3811_v57 = vsel %vm3780_vm7, %v3808_v42, %v3810_v61  ;;  %vm9972_vm4 = vmor %vm4638_vm0, %vm4767_vm12 }
 0x2f8   : > { %6675 = vmatmul.mubr.msk.bf16.gmra.mrb[4].mxu0 %vm1236_vm2, %v3785_v47  ;;  %4642 = vst [vmem:[%s9810_s30 + $0x8] sm:$0x3] %v4641_v46 }
 0x2f9   : > { %6678 = vmatprep.mubr.msk.bf16.mxu0 %vm7411_vm13, %v10391_v50 }
 0x2fd   : > { %6289 = vmatmul.mubr.msk.bf16.gmra.mrb[48].mxu1 %vm1236_vm2, %v9524_v35  ;;  %v3807_v35 = vsel %vm3780_vm7, %v3804_v10, %v3806_v11 }
 0x2fe   : > { %6292 = vmatprep.mubr.msk.bf16.mxu1 %vm7411_vm13, %v10391_v50 }
 0x300   : > { %6679 = vmatmul.mubr.msk.bf16.gmra.mrb[8].mxu0 %vm1236_vm2, %v3787_v39  ;;  %v10469_v39 = vld [vmem:[#allocation3_spill] sm:$0xff] }
 0x301   : > { %6682 = vmatprep.mubr.msk.bf16.mxu0 %vm7411_vm13, %v10391_v50 }
 0x305   : > { %6293 = vmatmul.mubr.msk.bf16.gmra.mrb[52].mxu1 %vm1236_vm2, %v9537_v19  ;;  %v3809_v19 = vsel %vm3780_vm7, %v3806_v11, %v3808_v42 }
 0x306   : > { %6296 = vmatprep.mubr.msk.bf16.mxu1 %vm7411_vm13, %v10391_v50 }
 0x308   : > { %6683 = vmatmul.mubr.msk.bf16.gmra.mrb[12].mxu0 %vm1236_vm2, %v3789_v49  ;;  %v10470_v49 = vrot.slane %v8884_v53, 3 }
 0x309   : > { %6686 = vmatprep.mubr.msk.bf16.mxu0 %vm7411_vm13, %v10391_v50 }
 0x30d   : > { %6297 = vmatmul.mubr.msk.bf16.gmra.mrb[56].mxu1 %vm1236_vm2, %v9549_v54  ;;  %v10462_v54 = vld [vmem:[#allocation16_spill] sm:$0xff] }
 0x30e   : > { %6300 = vmatprep.mubr.msk.bf16.mxu1 %vm7411_vm13, %v10391_v50 }
 0x310   : > { %6687 = vmatmul.mubr.msk.bf16.gmra.mrb[16].mxu0 %vm1236_vm2, %v3791_v56 }
 0x311   : > { %6690 = vmatprep.mubr.msk.bf16.mxu0 %vm7411_vm13, %v10391_v50 }
 0x315   : > { %6301 = vmatmul.mubr.msk.bf16.gmra.mrb[60].mxu1 %vm1236_vm2, %v9561_v63  ;;  %v10463_v63 = vld [vmem:[#allocation19_spill] sm:$0xff] }
 0x316   : > { %6304 = vmatprep.mubr.msk.bf16.mxu1 %vm7411_vm13, %v10391_v50 }
 0x318   : > { %6691 = vmatmul.mubr.msk.bf16.gmra.mrb[20].mxu0 %vm1236_vm2, %v3793_v52 }
 0x319   : > { %6694 = vmatprep.mubr.msk.bf16.mxu0 %vm7411_vm13, %v10391_v50 }
 0x31d   : > { %6305 = vmatmul.mubr.msk.bf16.gmra.mrb[64].mxu1 %vm1236_vm2, %v9573_v40  ;;  %v10464_v40 = vld [vmem:[#allocation26_spill] sm:$0xff] }
 0x31e   : > { %6308 = vmatprep.mubr.msk.bf16.mxu1 %vm7411_vm13, %v10391_v50 }
 0x320   : > { %6695 = vmatmul.mubr.msk.bf16.gmra.mrb[24].mxu0 %vm1236_vm2, %v3795_v31 }
 0x321   : > { %6698 = vmatprep.mubr.msk.bf16.mxu0 %vm7411_vm13, %v10391_v50 }
 0x325   : > { %6309 = vmatmul.mubr.msk.bf16.gmra.mrb[68].mxu1 %vm1236_vm2, %v9585_v8 }
 0x326   : > { %6312 = vmatprep.mubr.msk.bf16.mxu1 %vm7411_vm13, %v10391_v50 }
 0x328   : > { %6699 = vmatmul.mubr.msk.bf16.gmra.mrb[28].mxu0 %vm1236_vm2, %v3797_v43 }
 0x329   : > { %6702 = vmatprep.mubr.msk.bf16.mxu0 %vm7411_vm13, %v10391_v50 }
 0x32d   : > { %6313 = vmatmul.mubr.msk.bf16.gmra.mrb[72].mxu1 %vm1236_vm2, %v9600_v26 }
 0x32e   : > { %6316 = vmatprep.mubr.msk.bf16.mxu1 %vm7411_vm13, %v10391_v50 }
 0x330   : > { %6703 = vmatmul.mubr.msk.bf16.gmra.mrb[32].mxu0 %vm1236_vm2, %v3799_v6 }
 0x331   : > { %6706 = vmatprep.mubr.msk.bf16.mxu0 %vm7411_vm13, %v10391_v50 }
 0x335   : > { %6317 = vmatmul.mubr.msk.bf16.gmra.mrb[76].mxu1 %vm1236_vm2, %v2125_v45 }
 0x336   : > { %6320 = vmatprep.mubr.msk.bf16.mxu1 %vm7411_vm13, %v10391_v50 }
 0x338   : > { %6707 = vmatmul.mubr.msk.bf16.gmra.mrb[36].mxu0 %vm1236_vm2, %v3801_v38 }
 0x339   : > { %6710 = vmatprep.mubr.msk.bf16.mxu0 %vm7411_vm13, %v10391_v50 }
 0x33d   : > { %6321 = vmatmul.mubr.msk.bf16.gmra.mrb[80].mxu1 %vm1236_vm2, %v2124_v2 }
 0x33e   : > { %6370 = vmatprep.mubr.msk.bf16.mxu1 %vm7411_vm13, %v10391_v50 }
 0x340   : > { %6711 = vmatmul.mubr.msk.bf16.gmra.mrb[40].mxu0 %vm1236_vm2, %v3803_v33 }
 0x341   : > { %6714 = vmatprep.mubr.msk.bf16.mxu0 %vm7411_vm13, %v10391_v50 }
 0x345   : > { %6371 = vmatmul.mubr.msk.bf16.vlgmr.msra.gmra.mrb[44].mxu1 %vm1236_vm2, %v2429_v62 }
 0x346   : > { %6374 = vmatprep.mubr.msk.bf16.mxu1 %vm7411_vm13, %v10391_v50 }
 0x348   : > { %6715 = vmatmul.mubr.msk.bf16.gmra.mrb[44].mxu0 %vm1236_vm2, %v3805_v27 }
 0x349   : > { %6718 = vmatprep.mubr.msk.bf16.mxu0 %vm7411_vm13, %v10391_v50 }
 0x34d   : > { %6375 = vmatmul.mubr.msk.bf16.gmra.mrb[48].mxu1 %vm1236_vm2, %v10459_v15  ;;  %v4213_v15 = vpop.permute.xlu0 %4212 }
 0x34e   : > { %6378 = vmatprep.mubr.msk.bf16.mxu1 %vm7411_vm13, %v10391_v50 }
 0x350   : > { %6719 = vmatmul.mubr.msk.bf16.gmra.mrb[48].mxu0 %vm1236_vm2, %v3807_v35 }
 0x351   : > { %6722 = vmatprep.mubr.msk.bf16.mxu0 %vm7411_vm13, %v10391_v50 }
 0x355   : > { %6379 = vmatmul.mubr.msk.bf16.gmra.mrb[52].mxu1 %vm1236_vm2, %v10461_v36 }
 0x356   : > { %6382 = vmatprep.mubr.msk.bf16.mxu1 %vm7411_vm13, %v10391_v50 }
 0x358   : > { %6723 = vmatmul.mubr.msk.bf16.gmra.mrb[52].mxu0 %vm1236_vm2, %v3809_v19  ;;  %v4216_v19 = vpop.permute.xlu1 %4215 }
 0x359   : > { %6726 = vmatprep.mubr.msk.bf16.mxu0 %vm7411_vm13, %v10391_v50  ;;  %vm4335_vm9 = vcmp.eq.s32.totalorder %v4216_v19, 1 }
 0x35c   : > { %v4222_v1 = vpop.permute.xlu1 %4221 }
 0x35d   : > { %6383 = vmatmul.mubr.msk.bf16.gmra.mrb[56].mxu1 %vm1236_vm2, %v10462_v54  ;;  %vm4337_vm1 = vcmp.eq.s32.totalorder %v4222_v1, 1 }
 0x35e   : > { %6386 = vmatprep.mubr.msk.bf16.mxu1 %vm7411_vm13, %v10391_v50 }
 0x360   : > { %6727 = vmatmul.mubr.msk.bf16.gmra.mrb[56].mxu0 %vm1236_vm2, %v3811_v57 }
 0x361   : > { %6730 = vmatprep.mubr.msk.bf16.mxu0 %vm7411_vm13, %v10391_v50 }
 0x365   : > { %6387 = vmatmul.mubr.msk.bf16.gmra.mrb[60].mxu1 %vm1236_vm2, %v10463_v63 }
 0x366   : > { %6390 = vmatprep.mubr.msk.bf16.mxu1 %vm7411_vm13, %v10391_v50 }
 0x368   : > { %6731 = vmatmul.mubr.msk.bf16.gmra.mrb[60].mxu0 %vm1236_vm2, %v3813_v55 }
 0x369   : > { %6734 = vmatprep.mubr.msk.bf16.mxu0 %vm7411_vm13, %v10391_v50 }
 0x36d   : > { %6391 = vmatmul.mubr.msk.bf16.gmra.mrb[64].mxu1 %vm1236_vm2, %v10464_v40 }
 0x36e   : > { %6394 = vmatprep.mubr.msk.bf16.mxu1 %vm7411_vm13, %v10391_v50 }
 0x370   : > { %v9875_v30 = vpop.f32.mrb[0].mxu1  ;;  %6735 = vmatmul.mubr.msk.bf16.gmra.mrb[64].mxu0 %vm1236_vm2, %v3815_v23 }
 0x371   : > { %v6242_v8 = vpop.f32.mrb[1].mxu1  ;;  %6738 = vmatprep.mubr.msk.bf16.mxu0 %vm7411_vm13, %v10391_v50 }
 0x372   : > { %v9880_v20 = vpop.f32.mrb[2].mxu1 }
 0x373   : > { %v6243_v26 = vpop.f32.mrb[3].mxu1 }
 0x375   : > { %6395 = vmatmul.mubr.msk.bf16.gmra.mrb[68].mxu1 %vm1236_vm2, %v10465_v7 }
 0x376   : > { %6398 = vmatprep.mubr.msk.bf16.mxu1 %vm7411_vm13, %v10391_v50 }
 0x378   : > { %v9889_v37 = vpop.f32.mrb[4].mxu1  ;;  %6739 = vmatmul.mubr.msk.bf16.gmra.mrb[68].mxu0 %vm1236_vm2, %v3817_v51  ;;  %v4219_v51 = vpop.permute.xlu0 %4218 }
 0x379   : > { %v6246_v18 = vpop.f32.mrb[5].mxu1  ;;  %6742 = vmatprep.mubr.msk.bf16.mxu0 %vm7411_vm13, %v10391_v50  ;;  %vm4336_vm3 = vcmp.eq.s32.totalorder %v4219_v51, 1 }
 0x37a   : > { %v9894_v60 = vpop.f32.mrb[6].mxu1 }
 0x37b   : > { %v6247_v21 = vpop.f32.mrb[7].mxu1 }
 0x37d   : > { %6399 = vmatmul.mubr.msk.bf16.gmra.mrb[72].mxu1 %vm1236_vm2, %v9047_v48 }
 0x37e   : > { %6402 = vmatprep.mubr.msk.bf16.mxu1 %vm7411_vm13, %v10391_v50 }
 0x380   : > { %v9900_v4 = vpop.f32.mrb[8].mxu1  ;;  %6743 = vmatmul.mubr.msk.bf16.gmra.mrb[72].mxu0 %vm1236_vm2, %v9041_v29 }
 0x381   : > { %v6250_v16 = vpop.f32.mrb[9].mxu1  ;;  %6746 = vmatprep.mubr.msk.bf16.mxu0 %vm7411_vm13, %v10391_v50 }
 0x382   : > { %v9906_v0 = vpop.f32.mrb[10].mxu1 }
 0x383   : > { %v6251_v24 = vpop.f32.mrb[11].mxu1 }
 0x385   : > { %6403 = vmatmul.mubr.msk.bf16.gmra.mrb[76].mxu1 %vm1236_vm2, %v10467_v3 }
 0x386   : > { %6406 = vmatprep.mubr.msk.bf16.mxu1 %vm7411_vm13, %v10391_v50 }
 0x388   : > { %v9912_v48 = vpop.f32.mrb[12].mxu1  ;;  %6747 = vmatmul.mubr.msk.bf16.gmra.mrb[76].mxu0 %vm1236_vm2, %v10468_v28 }
 0x389   : > { %v6254_v47 = vpop.f32.mrb[13].mxu1  ;;  %6750 = vmatprep.mubr.msk.bf16.mxu0 %vm7411_vm13, %v10391_v50  ;;  %vm4334_vm13 = vcmp.eq.s32.totalorder %v4213_v15, 1 }
 0x38a   : > { %v9918_v29 = vpop.f32.mrb[14].mxu1 }
 0x38b   : > { %v6255_v59 = vpop.f32.mrb[15].mxu1 }
 0x38c   : > { %v5221_v59 = vld [vmem:[%s9810_s30 + $0x8] sm:$0xe] }
 0x38d   : > { %6407 = vmatmul.mubr.msk.bf16.gmra.mrb[80].mxu1 %vm1236_vm2, %v10469_v39 }
 0x390   : > { %v9922_v9 = vpop.f32.mrb[16].mxu1  ;;  %6751 = vmatmul.mubr.msk.bf16.gmra.mrb[80].mxu0 %vm1236_vm2, %v10470_v49 }
 0x391   : > { %v6258_v41 = vpop.f32.mrb[17].mxu1 }
 0x392   : > { %v9927_v56 = vpop.f32.mrb[18].mxu1 }
 0x393   : > { %v6259_v5 = vpop.f32.mrb[19].mxu1 }
 0x398   : > { %v9929_v52 = vpop.f32.mrb[20].mxu1 }
 0x399   : > { %v6262_v25 = vpop.f32.mrb[21].mxu1 }
 0x39a   : > { %v9931_v50 = vpop.f32.mrb[22].mxu1 }
 0x39b   : > { %v6263_v31 = vpop.f32.mrb[23].mxu1 }
 0x3a0   : > { %v9933_v32 = vpop.f32.mrb[24].mxu1 }
 0x3a1   : > { %v6266_v43 = vpop.f32.mrb[25].mxu1 }
 0x3a2   : > { %v9935_v34 = vpop.f32.mrb[26].mxu1 }
 0x3a3   : > { %v6267_v6 = vpop.f32.mrb[27].mxu1 }
 0x3a8   : > { %v9937_v2 = vpop.f32.mrb[28].mxu1 }
 0x3a9   : > { %v6270_v53 = vpop.f32.mrb[29].mxu1 }
 0x3aa   : > { %v9939_v44 = vpop.f32.mrb[30].mxu1 }
 0x3ab   : > { %v6271_v45 = vpop.f32.mrb[31].mxu1 }
 0x3b0   : > { %v9941_v38 = vpop.f32.mrb[32].mxu1 }
 0x3b1   : > { %v6274_v12 = vpop.f32.mrb[33].mxu1 }
 0x3b2   : > { %v9943_v33 = vpop.f32.mrb[34].mxu1 }
 0x3b3   : > { %v6275_v10 = vpop.f32.mrb[35].mxu1 }
 0x3b8   : > { %v9945_v17 = vpop.f32.mrb[36].mxu1 }
 0x3b9   : > { %v6278_v62 = vpop.f32.mrb[37].mxu1 }
 0x3ba   : > { %v9947_v27 = vpop.f32.mrb[38].mxu1 }
 0x3bb   : > { %v6279_v14 = vpop.f32.mrb[39].mxu1 }
 0x3c0   : > { %v9949_v11 = vpop.f32.mrb[40].mxu1 }
 0x3c1   : > { %v6282_v46 = vpop.f32.mrb[41].mxu1 }
 0x3c2   : > { %v9951_v35 = vpop.f32.mrb[42].mxu1 }
 0x3c3   : > { %v6283_v42 = vpop.f32.mrb[43].mxu1  ;;  %v3922_v36 = vpop.f32.mrb[0].mxu0 }
 0x3c4   : > { %v6756_v61 = vadd.f32 %v3922_v36, %v9875_v30  ;;  %v6672_v54 = vpop.f32.mrb[1].mxu0 }
 0x3c5   : > { %v3925_v57 = vpop.f32.mrb[2].mxu0 }
 0x3c6   : > { %v4375_v13 = vsel %vm4334_vm13, %v6756_v61, 0.0  ;;  %v6757_v63 = vadd.f32 %v3925_v57, %v9880_v20  ;;  %v6673_v55 = vpop.f32.mrb[3].mxu0 }
 0x3c7   : > { %v4506_v58 = vmul.f32 %v4375_v13, %v4375_v13  ;;  %v5632_v40 = vpack.c.bf16 %v4375_v13, %v4375_v13  ;;  %v4416_v8 = vsel %vm1236_vm2, %v4375_v13, 0.0  ;;  %v4228_v55 = vpop.permute.xlu1 %4227 }
 0x3c8   : > { %v4376_v23 = vsel %vm4335_vm9, %v6757_v63, 0.0  ;;  %vm4339_vm7 = vcmp.eq.s32.totalorder %v4228_v55, 1 }
 0x3c9   : > { %v4770_v26 = vshrl.u32 %v5632_v40, 16  ;;  %v4773_v7 = vshll.u32 %v5632_v40, 16  ;;  %v4417_v30 = vsel %vm1236_vm2, %v4376_v23, 0.0  ;;  %v4507_v21 = vmul.f32 %v4376_v23, %v4376_v23 }
 0x3ca   : > { %v4418_v18 = vadd.f32 %v4417_v30, %v4416_v8  ;;  %v5633_v16 = vpack.c.bf16 %v4376_v23, %v4376_v23  ;;  %v4547_v20 = vsel %vm1236_vm2, %v4506_v58, 0.0  ;;  %v4225_v58 = vpop.permute.xlu0 %4224 }
 0x3cb   : > { %v4772_v24 = vrot.slane %v4770_v26, 6  ;;  %v4775_v3 = vrot.slane %v4773_v7, 7  ;;  %v3930_v28 = vpop.f32.mrb[4].mxu0  ;;  %v4548_v39 = vsel %vm1236_vm2, %v4507_v21, 0.0  ;;  %vm4338_vm5 = vcmp.eq.s32.totalorder %v4225_v58, 1 }
 0x3cc   : > { %v4779_v49 = vshrl.u32 %v5633_v16, 16  ;;  %v4782_v41 = vshll.u32 %v5633_v16, 16  ;;  %v6758_v5 = vadd.f32 %v3930_v28, %v9889_v37  ;;  %v6676_v25 = vpop.f32.mrb[5].mxu0  ;;  %v4549_v43 = vadd.f32 %v4548_v39, %v4547_v20 }
 0x3cd   : > { %v4776_v31 = vor.u32 %v4775_v3, %v4772_v24  ;;  %v3933_v6 = vpop.f32.mrb[6].mxu0 }
 0x3ce   : > { %v4781_v53 = vrot.slane %v4779_v49, 6  ;;  %v4784_v45 = vrot.slane %v4782_v41, 7  ;;  %v4377_v12 = vsel %vm4336_vm3, %v6758_v5, 0.0  ;;  %v6759_v10 = vadd.f32 %v3933_v6, %v9894_v60  ;;  %v6677_v62 = vpop.f32.mrb[7].mxu0 }
 0x3cf   : > { %v4777_v14 = vrot.slane %v4776_v31, 4  ;;  %v5222_v46 = vsel %vm9960_vm15, %v4776_v31, %v5221_v59  ;;  %v4419_v15 = vsel %vm1236_vm2, %v4377_v12, 0.0  ;;  %v4508_v42 = vmul.f32 %v4377_v12, %v4377_v12 }
 0x3d0   : > { %5223 = vst [vmem:[%s9810_s30 + $0x8] sm:$0xe] %v5222_v46  ;;  %v4785_v36 = vor.u32 %v4784_v45, %v4781_v53  ;;  %v4420_v19 = vadd.f32 %v4419_v15, %v4418_v18  ;;  %v5634_v61 = vpack.c.bf16 %v4377_v12, %v4377_v12  ;;  %v4378_v60 = vsel %vm4337_vm1, %v6759_v10, 0.0  ;;  %v4231_v46 = vpop.permute.xlu0 %4230 }
 0x3d1   : > { %v4550_v54 = vsel %vm1236_vm2, %v4508_v42, 0.0  ;;  %v4421_v57 = vsel %vm1236_vm2, %v4378_v60, 0.0  ;;  %v4509_v13 = vmul.f32 %v4378_v60, %v4378_v60  ;;  %v5635_v63 = vpack.c.bf16 %v4378_v60, %v4378_v60 }
 0x3d2   : > { %v4786_v40 = vsel %vm9972_vm4, %v4777_v14, %v4785_v36  ;;  %v4551_v23 = vadd.f32 %v4550_v54, %v4549_v43  ;;  %v4789_v8 = vshrl.u32 %v5634_v61, 16  ;;  %v4792_v26 = vshll.u32 %v5634_v61, 16 }
 0x3d3   : > { %5224 = vst.msk [vmem:[%s9810_s30 + $0xc] sm:$0xf] %vm4495_vm8, %v4786_v40  ;;  %v4422_v7 = vadd.f32 %v4421_v57, %v4420_v19  ;;  %v4552_v30 = vsel %vm1236_vm2, %v4509_v13, 0.0  ;;  %v4799_v1 = vshrl.u32 %v5635_v63, 16  ;;  %v3938_v51 = vpop.f32.mrb[8].mxu0  ;;  %v4802_v16 = vshll.u32 %v5635_v63, 16 }
 0x3d4   : > { %v4791_v18 = vrot.slane %v4789_v8, 6  ;;  %v4553_v21 = vadd.f32 %v4552_v30, %v4551_v23  ;;  %v6760_v20 = vadd.f32 %v3938_v51, %v9900_v4  ;;  %v6680_v24 = vpop.f32.mrb[9].mxu0  ;;  %v4794_v3 = vrot.slane %v4792_v26, 7 }
 0x3d5   : > { %v4801_v28 = vrot.slane %v4799_v1, 6  ;;  %v3941_v47 = vpop.f32.mrb[10].mxu0  ;;  %v4787_v59 = vrot.slane %v4785_v36, 4  ;;  %v4804_v39 = vrot.slane %v4802_v16, 7  ;;  %v4234_v36 = vpop.permute.xlu1 %4233  ;;  %vm4340_vm6 = vcmp.eq.s32.totalorder %v4231_v46, 1 }
 0x3d6   : > { %v4379_v49 = vsel %vm4338_vm5, %v6760_v20, 0.0  ;;  %v6761_v41 = vadd.f32 %v3941_v47, %v9906_v0  ;;  %v6681_v5 = vpop.f32.mrb[11].mxu0  ;;  %v4795_v25 = vor.u32 %v4794_v3, %v4791_v18  ;;  %vm4341_vm0 = vcmp.eq.s32.totalorder %v4234_v36, 1 }
 0x3d7   : > { %v4423_v31 = vsel %vm1236_vm2, %v4379_v49, 0.0  ;;  %v4510_v43 = vmul.f32 %v4379_v49, %v4379_v49  ;;  %v5636_v6 = vpack.c.bf16 %v4379_v49, %v4379_v49  ;;  %v4805_v53 = vor.u32 %v4804_v39, %v4801_v28 }
 0x3d8   : > { %v4424_v4 = vadd.f32 %v4423_v31, %v4422_v7  ;;  %v4380_v45 = vsel %vm4339_vm7, %v6761_v41, 0.0  ;;  %v4796_v12 = vsel %vm9972_vm4, %v4787_v59, %v4795_v25  ;;  %v4797_v10 = vrot.slane %v4795_v25, 4  ;;  %v4237_v25 = vpop.permute.xlu0 %4236 }
 0x3d9   : > { %v4554_v62 = vsel %vm1236_vm2, %v4510_v43, 0.0  ;;  %v4809_v14 = vshrl.u32 %v5636_v6, 16  ;;  %5225 = vst.msk [vmem:[%s9810_s30 + $0x10] sm:$0xf] %vm4495_vm8, %v4796_v12  ;;  %v4812_v15 = vshll.u32 %v5636_v6, 16  ;;  %v4425_v42 = vsel %vm1236_vm2, %v4380_v45, 0.0  ;;  %v4240_v3 = vpop.permute.xlu1 %4239 }
 0x3da   : > { %v4555_v0 = vadd.f32 %v4554_v62, %v4553_v21  ;;  %v4806_v19 = vsel %vm9972_vm4, %v4797_v10, %v4805_v53  ;;  %v4426_v60 = vadd.f32 %v4425_v42, %v4424_v4  ;;  %v4511_v54 = vmul.f32 %v4380_v45, %v4380_v45 }
 0x3db   : > { %v4811_v61 = vrot.slane %v4809_v14, 6  ;;  %v3946_v57 = vpop.f32.mrb[12].mxu0  ;;  %5226 = vst.msk [vmem:[%s9810_s30 + $0x14] sm:$0xf] %vm4495_vm8, %v4806_v19  ;;  %v4814_v13 = vrot.slane %v4812_v15, 7  ;;  %v5637_v63 = vpack.c.bf16 %v4380_v45, %v4380_v45  ;;  %v4807_v40 = vrot.slane %v4805_v53, 4 }
 0x3dc   : > { %v6762_v55 = vadd.f32 %v3946_v57, %v9912_v48  ;;  %v6684_v58 = vpop.f32.mrb[13].mxu0  ;;  %v4556_v23 = vsel %vm1236_vm2, %v4511_v54, 0.0  ;;  %vm4343_vm14 = vcmp.eq.s32.totalorder %v4240_v3, 1  ;;  %vm4342_vm13 = vcmp.eq.s32.totalorder %v4237_v25, 1 }
 0x3dd   : > { %v3949_v8 = vpop.f32.mrb[14].mxu0  ;;  %v4815_v26 = vor.u32 %v4814_v13, %v4811_v61  ;;  %v4557_v7 = vadd.f32 %v4556_v23, %v4555_v0  ;;  %v4819_v30 = vshrl.u32 %v5637_v63, 16  ;;  %v4822_v1 = vshll.u32 %v5637_v63, 16  ;;  %v4243_v23 = vpop.permute.xlu0 %4242 }
 0x3de   : > { %v6685_v51 = vpop.f32.mrb[15].mxu0  ;;  %v4381_v18 = vsel %vm4340_vm6, %v6762_v55, 0.0  ;;  %v6763_v21 = vadd.f32 %v3949_v8, %v9918_v29  ;;  %vm4344_vm9 = vcmp.eq.s32.totalorder %v4243_v23, 1  ;;  %vm4504_vm15 = vcmask 57344  }
 0x3df   : > { %v4816_v16 = vsel %vm9972_vm4, %v4807_v40, %v4815_v26  ;;  %v4817_v48 = vrot.slane %v4815_v26, 4  ;;  %v4821_v20 = vrot.slane %v4819_v30, 6  ;;  %v4824_v24 = vrot.slane %v4822_v1, 7  ;;  %v4246_v30 = vpop.permute.xlu1 %4245  ;;  %5277 = vst.msk [vmem:[%s9810_s30 + $0xb4] sm:$0x1] %vm4504_vm15, %v10460_v22 }
 0x3e0   : > { %5227 = vst.msk [vmem:[%s9810_s30 + $0x18] sm:$0xf] %vm4495_vm8, %v4816_v16  ;;  %v4427_v28 = vsel %vm1236_vm2, %v4381_v18, 0.0  ;;  %v4512_v47 = vmul.f32 %v4381_v18, %v4381_v18  ;;  %v5638_v59 = vpack.c.bf16 %v4381_v18, %v4381_v18  ;;  %v4382_v39 = vsel %vm4341_vm0, %v6763_v21, 0.0 }
 0x3e1   : > { %v4825_v49 = vor.u32 %v4824_v24, %v4821_v20  ;;  %v4428_v41 = vadd.f32 %v4427_v28, %v4426_v60  ;;  %v4429_v5 = vsel %vm1236_vm2, %v4382_v39, 0.0  ;;  %v4513_v29 = vmul.f32 %v4382_v39, %v4382_v39 }
 0x3e2   : > { %v4558_v31 = vsel %vm1236_vm2, %v4512_v47, 0.0  ;;  %v4829_v43 = vshrl.u32 %v5638_v59, 16  ;;  %v4832_v6 = vshll.u32 %v5638_v59, 16  ;;  %v5639_v53 = vpack.c.bf16 %v4382_v39, %v4382_v39 }
 0x3e3   : > { %v3954_v4 = vpop.f32.mrb[16].mxu0  ;;  %v4826_v45 = vsel %vm9972_vm4, %v4817_v48, %v4825_v49  ;;  %v4559_v12 = vadd.f32 %v4558_v31, %v4557_v7  ;;  %v4430_v10 = vadd.f32 %v4429_v5, %v4428_v41  ;;  %v4560_v0 = vsel %vm1236_vm2, %v4513_v29, 0.0 }
 0x3e4   : > { %v6688_v62 = vpop.f32.mrb[17].mxu0  ;;  %5228 = vst.msk [vmem:[%s9810_s30 + $0x1c] sm:$0xf] %vm4495_vm8, %v4826_v45  ;;  %v4831_v14 = vrot.slane %v4829_v43, 6  ;;  %v4834_v46 = vrot.slane %v4832_v6, 7  ;;  %v4839_v15 = vshrl.u32 %v5639_v53, 16  ;;  %v6764_v61 = vadd.f32 %v3954_v4, %v9922_v9 }
 0x3e5   : > { %v3957_v42 = vpop.f32.mrb[18].mxu0  ;;  %v4561_v36 = vadd.f32 %v4560_v0, %v4559_v12  ;;  %v4842_v19 = vshll.u32 %v5639_v53, 16  ;;  %v4827_v57 = vrot.slane %v4825_v49, 4  ;;  %v4249_v53 = vpop.permute.xlu0 %4248  ;;  %vm4345_vm10 = vcmp.eq.s32.totalorder %v4246_v30, 1 }
 0x3e6   : > { %v6765_v60 = vadd.f32 %v3957_v42, %v9927_v56  ;;  %v6689_v54 = vpop.f32.mrb[19].mxu0  ;;  %v4835_v13 = vor.u32 %v4834_v46, %v4831_v14  ;;  %v4841_v63 = vrot.slane %v4839_v15, 6  ;;  %v4383_v58 = vsel %vm4342_vm13, %v6764_v61, 0.0 }
 0x3e7   : > { %v4844_v55 = vrot.slane %v4842_v19, 7  ;;  %v4431_v7 = vsel %vm1236_vm2, %v4383_v58, 0.0  ;;  %v4514_v9 = vmul.f32 %v4383_v58, %v4383_v58  ;;  %v5640_v51 = vpack.c.bf16 %v4383_v58, %v4383_v58 }
 0x3e8   : > { %v4384_v40 = vsel %vm4343_vm14, %v6765_v60, 0.0  ;;  %v4836_v8 = vsel %vm9972_vm4, %v4827_v57, %v4835_v13  ;;  %v4837_v26 = vrot.slane %v4835_v13, 4  ;;  %v4432_v1 = vadd.f32 %v4431_v7, %v4430_v10  ;;  %v4252_v10 = vpop.permute.xlu1 %4251 }
 0x3e9   : > { %5229 = vst.msk [vmem:[%s9810_s30 + $0x20] sm:$0xf] %vm4495_vm8, %v4836_v8  ;;  %v4845_v56 = vor.u32 %v4844_v55, %v4841_v63  ;;  %v4433_v18 = vsel %vm1236_vm2, %v4384_v40, 0.0  ;;  %v4562_v21 = vsel %vm1236_vm2, %v4514_v9, 0.0  ;;  %v4515_v16 = vmul.f32 %v4384_v40, %v4384_v40  ;;  %v4255_v23 = vpop.permute.xlu0 %4254 }
 0x3ea   : > { %v5641_v48 = vpack.c.bf16 %v4384_v40, %v4384_v40  ;;  %v4563_v3 = vadd.f32 %v4562_v21, %v4561_v36  ;;  %v4849_v28 = vshrl.u32 %v5640_v51, 16  ;;  %v4852_v59 = vshll.u32 %v5640_v51, 16 }
 0x3eb   : > { %v3962_v20 = vpop.f32.mrb[20].mxu0  ;;  %v4846_v24 = vsel %vm9972_vm4, %v4837_v26, %v4845_v56  ;;  %v4434_v39 = vadd.f32 %v4433_v18, %v4432_v1  ;;  %v4564_v49 = vsel %vm1236_vm2, %v4515_v16, 0.0  ;;  %v4847_v62 = vrot.slane %v4845_v56, 4 }
 0x3ec   : > { %v6692_v47 = vpop.f32.mrb[21].mxu0  ;;  %5230 = vst.msk [vmem:[%s9810_s30 + $0x24] sm:$0xf] %vm4495_vm8, %v4846_v24  ;;  %v4859_v41 = vshrl.u32 %v5641_v48, 16  ;;  %v4851_v29 = vrot.slane %v4849_v28, 6  ;;  %v4565_v25 = vadd.f32 %v4564_v49, %v4563_v3  ;;  %v4862_v31 = vshll.u32 %v5641_v48, 16  ;;  %v10041_v56 = vpop.permute.xlu1 %4257 }
 0x3ed   : > { %v3965_v5 = vpop.f32.mrb[22].mxu0  ;;  %v6766_v43 = vadd.f32 %v3962_v20, %v9929_v52  ;;  %v4854_v4 = vrot.slane %v4852_v59, 7  ;;  %vm4347_vm11 = vcmp.eq.s32.totalorder %v4252_v10, 1  ;;  %vm4346_vm12 = vcmp.eq.s32.totalorder %v4249_v53, 1 }
 0x3ee   : > { %v6693_v6 = vpop.f32.mrb[23].mxu0  ;;  %v4861_v45 = vrot.slane %v4859_v41, 6  ;;  %v6767_v12 = vadd.f32 %v3965_v5, %v9931_v50  ;;  %v4864_v14 = vrot.slane %v4862_v31, 7  ;;  %vm4349_vm1 = vcmp.eq.s32.totalorder %v10041_v56, 1  ;;  %v10055_v5 = vpop.permute.xlu0 %4260 }
 0x3ef   : > { %v4385_v46 = vsel %vm4344_vm9, %v6766_v43, 0.0  ;;  %v4855_v0 = vor.u32 %v4854_v4, %v4851_v29  ;;  %vm4348_vm3 = vcmp.eq.s32.totalorder %v4255_v23, 1  ;;  %vm4350_vm7 = vcmp.eq.s32.totalorder %v10055_v5, 1 }
 0x3f0   : > { %v4435_v15 = vsel %vm1236_vm2, %v4385_v46, 0.0  ;;  %v4516_v42 = vmul.f32 %v4385_v46, %v4385_v46  ;;  %v5642_v36 = vpack.c.bf16 %v4385_v46, %v4385_v46  ;;  %v4865_v19 = vor.u32 %v4864_v14, %v4861_v45 }
 0x3f1   : > { %v4436_v52 = vadd.f32 %v4435_v15, %v4434_v39  ;;  %v4386_v61 = vsel %vm4345_vm10, %v6767_v12, 0.0  ;;  %v4856_v60 = vsel %vm9972_vm4, %v4847_v62, %v4855_v0  ;;  %v4857_v54 = vrot.slane %v4855_v0, 4 }
 0x3f2   : > { %v4566_v50 = vsel %vm1236_vm2, %v4516_v42, 0.0  ;;  %v4869_v57 = vshrl.u32 %v5642_v36, 16  ;;  %5231 = vst.msk [vmem:[%s9810_s30 + $0x28] sm:$0xf] %vm4495_vm8, %v4856_v60  ;;  %v4872_v55 = vshll.u32 %v5642_v36, 16  ;;  %v4437_v58 = vsel %vm1236_vm2, %v4386_v61, 0.0 }
 0x3f3   : > { %v3970_v13 = vpop.f32.mrb[24].mxu0  ;;  %v4567_v63 = vadd.f32 %v4566_v50, %v4565_v25  ;;  %v4866_v8 = vsel %vm9972_vm4, %v4857_v54, %v4865_v19  ;;  %v4438_v7 = vadd.f32 %v4437_v58, %v4436_v52  ;;  %v4517_v9 = vmul.f32 %v4386_v61, %v4386_v61 }
 0x3f4   : > { %v6696_v40 = vpop.f32.mrb[25].mxu0  ;;  %v4871_v26 = vrot.slane %v4869_v57, 6  ;;  %5232 = vst.msk [vmem:[%s9810_s30 + $0x2c] sm:$0xf] %vm4495_vm8, %v4866_v8  ;;  %v4874_v1 = vrot.slane %v4872_v55, 7  ;;  %v5643_v51 = vpack.c.bf16 %v4386_v61, %v4386_v61  ;;  %v6768_v18 = vadd.f32 %v3970_v13, %v9933_v32  ;;  %v4264_v57 = vpop.permute.xlu1 %4263 }
 0x3f5   : > { %v3973_v30 = vpop.f32.mrb[26].mxu0  ;;  %v4867_v48 = vrot.slane %v4865_v19, 4  ;;  %v4568_v20 = vsel %vm1236_vm2, %v4517_v9, 0.0  ;;  %vm4351_vm5 = vcmp.eq.s32.totalorder %v4264_v57, 1 }
 0x3f6   : > { %v6769_v21 = vadd.f32 %v3973_v30, %v9935_v34  ;;  %v6697_v16 = vpop.f32.mrb[27].mxu0  ;;  %v4875_v24 = vor.u32 %v4874_v1, %v4871_v26  ;;  %v4569_v3 = vadd.f32 %v4568_v20, %v4567_v63  ;;  %v4879_v28 = vshrl.u32 %v5643_v51, 16 }
 0x3f7   : > { %v4882_v47 = vshll.u32 %v5643_v51, 16  ;;  %v4387_v32 = vsel %vm4346_vm12, %v6768_v18, 0.0 }
 0x3f8   : > { %v4388_v34 = vsel %vm4347_vm11, %v6769_v21, 0.0  ;;  %v4876_v59 = vsel %vm9972_vm4, %v4867_v48, %v4875_v24  ;;  %v4877_v39 = vrot.slane %v4875_v24, 4  ;;  %v4881_v49 = vrot.slane %v4879_v28, 6 }
 0x3f9   : > { %v4884_v41 = vrot.slane %v4882_v47, 7  ;;  %5233 = vst.msk [vmem:[%s9810_s30 + $0x30] sm:$0xf] %vm4495_vm8, %v4876_v59  ;;  %v4439_v29 = vsel %vm1236_vm2, %v4387_v32, 0.0  ;;  %v4518_v25 = vmul.f32 %v4387_v32, %v4387_v32  ;;  %v5644_v22 = vpack.c.bf16 %v4387_v32, %v4387_v32 }
 0x3fa   : > { %v4441_v31 = vsel %vm1236_vm2, %v4388_v34, 0.0  ;;  %v4440_v53 = vadd.f32 %v4439_v29, %v4438_v7  ;;  %v4519_v4 = vmul.f32 %v4388_v34, %v4388_v34  ;;  %v5645_v45 = vpack.c.bf16 %v4388_v34, %v4388_v34 }
 0x3fb   : > { %v3978_v43 = vpop.f32.mrb[28].mxu0  ;;  %v4885_v6 = vor.u32 %v4884_v41, %v4881_v49  ;;  %v4570_v10 = vsel %vm1236_vm2, %v4518_v25, 0.0  ;;  %v4889_v62 = vshrl.u32 %v5644_v22, 16  ;;  %v4892_v14 = vshll.u32 %v5644_v22, 16 }
 0x3fc   : > { %v6700_v12 = vpop.f32.mrb[29].mxu0  ;;  %v6770_v46 = vadd.f32 %v3978_v43, %v9937_v2  ;;  %v4571_v36 = vadd.f32 %v4570_v10, %v4569_v3  ;;  %v4442_v19 = vadd.f32 %v4441_v31, %v4440_v53  ;;  %v4572_v54 = vsel %vm1236_vm2, %v4519_v4, 0.0 }
 0x3fd   : > { %v3981_v0 = vpop.f32.mrb[30].mxu0  ;;  %v4886_v15 = vsel %vm9972_vm4, %v4877_v39, %v4885_v6  ;;  %v4887_v42 = vrot.slane %v4885_v6, 4  ;;  %v4891_v61 = vrot.slane %v4889_v62, 6  ;;  %v4894_v60 = vrot.slane %v4892_v14, 7 }
 0x3fe   : > { %v6701_v52 = vpop.f32.mrb[31].mxu0  ;;  %5234 = vst.msk [vmem:[%s9810_s30 + $0x34] sm:$0xf] %vm4495_vm8, %v4886_v15  ;;  %v4899_v50 = vshrl.u32 %v5645_v45, 16  ;;  %v4573_v13 = vadd.f32 %v4572_v54, %v4571_v36  ;;  %v4902_v2 = vshll.u32 %v5645_v45, 16  ;;  %v4389_v63 = vsel %vm4348_vm3, %v6770_v46, 0.0  ;;  %v4267_v45 = vpop.permute.xlu0 %4266 }
 0x3ff   : > { %v6771_v55 = vadd.f32 %v3981_v0, %v9939_v44  ;;  %v4895_v58 = vor.u32 %v4894_v60, %v4891_v61  ;;  %v4443_v8 = vsel %vm1236_vm2, %v4389_v63, 0.0  ;;  %v4520_v26 = vmul.f32 %v4389_v63, %v4389_v63 }
 0x400   : > { %v4901_v40 = vrot.slane %v4899_v50, 6  ;;  %v4904_v7 = vrot.slane %v4902_v2, 7  ;;  %v4444_v9 = vadd.f32 %v4443_v8, %v4442_v19  ;;  %v5646_v30 = vpack.c.bf16 %v4389_v63, %v4389_v63 }
 0x401   : > { %v4390_v1 = vsel %vm4349_vm1, %v6771_v55, 0.0  ;;  %v4896_v51 = vsel %vm9972_vm4, %v4887_v42, %v4895_v58  ;;  %v4897_v23 = vrot.slane %v4895_v58, 4  ;;  %v4574_v18 = vsel %vm1236_vm2, %v4520_v26, 0.0 }
 0x402   : > { %v4445_v44 = vsel %vm1236_vm2, %v4390_v1, 0.0  ;;  %5235 = vst.msk [vmem:[%s9810_s30 + $0x38] sm:$0xf] %vm4495_vm8, %v4896_v51  ;;  %v4905_v16 = vor.u32 %v4904_v7, %v4901_v40  ;;  %v4575_v48 = vadd.f32 %v4574_v18, %v4573_v13  ;;  %v4909_v20 = vshrl.u32 %v5646_v30, 16  ;;  %v4270_v13 = vpop.permute.xlu1 %4269 }
 0x403   : > { %v3986_v21 = vpop.f32.mrb[32].mxu0  ;;  %v4912_v24 = vshll.u32 %v5646_v30, 16  ;;  %v4446_v56 = vadd.f32 %v4445_v44, %v4444_v9  ;;  %v4521_v28 = vmul.f32 %v4390_v1, %v4390_v1  ;;  %v5647_v47 = vpack.c.bf16 %v4390_v1, %v4390_v1 }
 0x404   : > { %v6704_v3 = vpop.f32.mrb[33].mxu0  ;;  %v6772_v32 = vadd.f32 %v3986_v21, %v9941_v38  ;;  %v4906_v59 = vsel %vm9972_vm4, %v4897_v23, %v4905_v16  ;;  %v4907_v39 = vrot.slane %v4905_v16, 4  ;;  %v4911_v49 = vrot.slane %v4909_v20, 6 }
 0x405   : > { %v3989_v34 = vpop.f32.mrb[34].mxu0  ;;  %v4914_v41 = vrot.slane %v4912_v24, 7  ;;  %5236 = vst.msk [vmem:[%s9810_s30 + $0x3c] sm:$0xf] %vm4495_vm8, %v4906_v59  ;;  %v4576_v25 = vsel %vm1236_vm2, %v4521_v28, 0.0  ;;  %v4919_v22 = vshrl.u32 %v5647_v47, 16  ;;  %v4273_v24 = vpop.permute.xlu0 %4272 }
 0x406   : > { %v6705_v29 = vpop.f32.mrb[35].mxu0  ;;  %v4922_v31 = vshll.u32 %v5647_v47, 16  ;;  %v4391_v43 = vsel %vm4350_vm7, %v6772_v32, 0.0  ;;  %v4577_v38 = vadd.f32 %v4576_v25, %v4575_v48  ;;  %v6773_v42 = vadd.f32 %v3989_v34, %v9943_v33  ;;  %v4276_v32 = vpop.permute.xlu1 %4275 }
 0x407   : > { %v4915_v6 = vor.u32 %v4914_v41, %v4911_v49  ;;  %v4447_v53 = vsel %vm1236_vm2, %v4391_v43, 0.0  ;;  %v4522_v4 = vmul.f32 %v4391_v43, %v4391_v43  ;;  %v4921_v12 = vrot.slane %v4919_v22, 6 }
 0x408   : > { %v4924_v10 = vrot.slane %v4922_v31, 7  ;;  %v4448_v62 = vadd.f32 %v4447_v53, %v4446_v56  ;;  %v5648_v14 = vpack.c.bf16 %v4391_v43, %v4391_v43  ;;  %vm4352_vm6 = vcmp.eq.s32.totalorder %v4267_v45, 1 }
 0x409   : > { %v4916_v46 = vsel %vm9972_vm4, %v4907_v39, %v4915_v6  ;;  %v4917_v0 = vrot.slane %v4915_v6, 4  ;;  %v4578_v15 = vsel %vm1236_vm2, %v4522_v4, 0.0  ;;  %v4392_v60 = vsel %vm4351_vm5, %v6773_v42, 0.0 }
 0x40a   : > { %5237 = vst.msk [vmem:[%s9810_s30 + $0x40] sm:$0xf] %vm4495_vm8, %v4916_v46  ;;  %v4925_v5 = vor.u32 %v4924_v10, %v4921_v12  ;;  %v4579_v36 = vadd.f32 %v4578_v15, %v4577_v38  ;;  %v4929_v19 = vshrl.u32 %v5648_v14, 16  ;;  %v4932_v52 = vshll.u32 %v5648_v14, 16 }
 0x40b   : > { %v3994_v61 = vpop.f32.mrb[36].mxu0  ;;  %v4449_v40 = vsel %vm1236_vm2, %v4392_v60, 0.0  ;;  %v4523_v8 = vmul.f32 %v4392_v60, %v4392_v60  ;;  %v5649_v26 = vpack.c.bf16 %v4392_v60, %v4392_v60  ;;  %vm4353_vm0 = vcmp.eq.s32.totalorder %v4270_v13, 1  ;;  %v4279_v60 = vpop.permute.xlu0 %4278 }
 0x40c   : > { %v6774_v54 = vadd.f32 %v3994_v61, %v9945_v17  ;;  %v6708_v50 = vpop.f32.mrb[37].mxu0  ;;  %v4926_v2 = vsel %vm9972_vm4, %v4917_v0, %v4925_v5  ;;  %v4927_v63 = vrot.slane %v4925_v5, 4  ;;  %v4931_v33 = vrot.slane %v4929_v19, 6  ;;  %v4282_v5 = vpop.permute.xlu1 %4281 }
 0x40d   : > { %v4934_v55 = vrot.slane %v4932_v52, 7  ;;  %v3997_v58 = vpop.f32.mrb[38].mxu0  ;;  %5238 = vst.msk [vmem:[%s9810_s30 + $0x44] sm:$0xf] %vm4495_vm8, %v4926_v2  ;;  %v4450_v17 = vadd.f32 %v4449_v40, %v4448_v62  ;;  %v4580_v51 = vsel %vm1236_vm2, %v4523_v8, 0.0  ;;  %v4939_v23 = vshrl.u32 %v5649_v26, 16 }
 0x40e   : > { %v4393_v57 = vsel %vm4352_vm6, %v6774_v54, 0.0  ;;  %v6709_v7 = vpop.f32.mrb[39].mxu0  ;;  %v4942_v18 = vshll.u32 %v5649_v26, 16  ;;  %v4581_v48 = vadd.f32 %v4580_v51, %v4579_v36  ;;  %v6775_v39 = vadd.f32 %v3997_v58, %v9947_v27 }
 0x40f   : > { %v4935_v9 = vor.u32 %v4934_v55, %v4931_v33  ;;  %v4451_v30 = vsel %vm1236_vm2, %v4393_v57, 0.0  ;;  %v4524_v1 = vmul.f32 %v4393_v57, %v4393_v57  ;;  %v5650_v44 = vpack.c.bf16 %v4393_v57, %v4393_v57 }
 0x410   : > { %v4452_v20 = vadd.f32 %v4451_v30, %v4450_v17  ;;  %v4941_v3 = vrot.slane %v4939_v23, 6  ;;  %v4944_v56 = vrot.slane %v4942_v18, 7  ;;  %vm4354_vm14 = vcmp.eq.s32.totalorder %v4273_v24, 1 }
 0x411   : > { %v4936_v21 = vsel %vm9972_vm4, %v4927_v63, %v4935_v9  ;;  %v4937_v16 = vrot.slane %v4935_v9, 4  ;;  %v4582_v28 = vsel %vm1236_vm2, %v4524_v1, 0.0  ;;  %v4949_v47 = vshrl.u32 %v5650_v44, 16 }
 0x412   : > { %5239 = vst.msk [vmem:[%s9810_s30 + $0x48] sm:$0xf] %vm4495_vm8, %v4936_v21  ;;  %v4583_v34 = vadd.f32 %v4582_v28, %v4581_v48  ;;  %v4952_v59 = vshll.u32 %v5650_v44, 16  ;;  %v4945_v41 = vor.u32 %v4944_v56, %v4941_v3  ;;  %v4394_v43 = vsel %vm4353_vm0, %v6775_v39, 0.0  ;;  %v4285_v56 = vpop.permute.xlu0 %4284  ;;  %v10129_v39 = vpop.permute.xlu1 %4287 }
 0x413   : > { %v4002_v49 = vpop.f32.mrb[40].mxu0  ;;  %v4951_v29 = vrot.slane %v4949_v47, 6  ;;  %v4453_v4 = vsel %vm1236_vm2, %v4394_v43, 0.0  ;;  %v4525_v45 = vmul.f32 %v4394_v43, %v4394_v43  ;;  %v5651_v62 = vpack.c.bf16 %v4394_v43, %v4394_v43 }
 0x414   : > { %v6776_v25 = vadd.f32 %v4002_v49, %v9949_v11  ;;  %v6712_v22 = vpop.f32.mrb[41].mxu0  ;;  %v4954_v31 = vrot.slane %v4952_v59, 7  ;;  %v4946_v38 = vsel %vm9972_vm4, %v4937_v16, %v4945_v41  ;;  %v4947_v53 = vrot.slane %v4945_v41, 4 }
 0x415   : > { %v4005_v6 = vpop.f32.mrb[42].mxu0  ;;  %5240 = vst.msk [vmem:[%s9810_s30 + $0x4c] sm:$0xf] %vm4495_vm8, %v4946_v38  ;;  %v4454_v10 = vadd.f32 %v4453_v4, %v4452_v20  ;;  %v4584_v14 = vsel %vm1236_vm2, %v4525_v45, 0.0  ;;  %vm4355_vm13 = vcmp.eq.s32.totalorder %v4276_v32, 1  ;;  %v4959_v52 = vshrl.u32 %v5651_v62, 16 }
 0x416   : > { %v6713_v27 = vpop.f32.mrb[43].mxu0  ;;  %v4955_v12 = vor.u32 %v4954_v31, %v4951_v29  ;;  %v4395_v11 = vsel %vm4354_vm14, %v6776_v25, 0.0  ;;  %v4585_v19 = vadd.f32 %v4584_v14, %v4583_v34  ;;  %v4962_v54 = vshll.u32 %v5651_v62, 16 }
 0x417   : > { %v4455_v46 = vsel %vm1236_vm2, %v4395_v11, 0.0  ;;  %v4526_v0 = vmul.f32 %v4395_v11, %v4395_v11  ;;  %v5652_v15 = vpack.c.bf16 %v4395_v11, %v4395_v11  ;;  %v4961_v33 = vrot.slane %v4959_v52, 6 }
 0x418   : > { %v2655_v42 = vpop.f32.mrb[44].mxu1  ;;  %v4956_v36 = vsel %vm9972_vm4, %v4947_v53, %v4955_v12  ;;  %v4456_v50 = vadd.f32 %v4455_v46, %v4454_v10  ;;  %v6777_v40 = vadd.f32 %v4005_v6, %v9951_v35  ;;  %v4957_v57 = vrot.slane %v4955_v12, 4 }
 0x419   : > { %v6372_v61 = vpop.f32.mrb[45].mxu1  ;;  %5241 = vst.msk [vmem:[%s9810_s30 + $0x50] sm:$0xf] %vm4495_vm8, %v4956_v36  ;;  %v4586_v13 = vsel %vm1236_vm2, %v4526_v0, 0.0  ;;  %v4969_v2 = vshrl.u32 %v5652_v15, 16  ;;  %v4972_v58 = vshll.u32 %v5652_v15, 16 }
 0x41a   : > { %v2658_v63 = vpop.f32.mrb[46].mxu1  ;;  %v4587_v55 = vadd.f32 %v4586_v13, %v4585_v19  ;;  %v4964_v7 = vrot.slane %v4962_v54, 7  ;;  %vm4356_vm9 = vcmp.eq.s32.totalorder %v4279_v60, 1  ;;  %v4396_v51 = vsel %vm4355_vm13, %v6777_v40, 0.0  ;;  %v10141_v61 = vpop.permute.xlu0 %4290 }
 0x41b   : > { %v6373_v8 = vpop.f32.mrb[47].mxu1  ;;  %v4010_v26 = vpop.f32.mrb[44].mxu0  ;;  %v4971_v9 = vrot.slane %v4969_v2, 6  ;;  %v4974_v1 = vrot.slane %v4972_v58, 7  ;;  %v4457_v44 = vsel %vm1236_vm2, %v4396_v51, 0.0  ;;  %v4527_v21 = vmul.f32 %v4396_v51, %v4396_v51 }
 0x41c   : > { %v6778_v17 = vadd.f32 %v4010_v26, %v2655_v42  ;;  %v6716_v30 = vpop.f32.mrb[45].mxu0  ;;  %v4965_v18 = vor.u32 %v4964_v7, %v4961_v33  ;;  %v5653_v16 = vpack.c.bf16 %v4396_v51, %v4396_v51  ;;  %v4458_v20 = vadd.f32 %v4457_v44, %v4456_v50  ;;  %v4294_v2 = vpop.permute.xlu1 %4293 }
 0x41d   : > { %v4013_v23 = vpop.f32.mrb[46].mxu0  ;;  %v4975_v35 = vor.u32 %v4974_v1, %v4971_v9  ;;  %v4588_v32 = vsel %vm1236_vm2, %v4527_v21, 0.0  ;;  %vm4357_vm10 = vcmp.eq.s32.totalorder %v4282_v5, 1  ;;  %vm4358_vm11 = vcmp.eq.s32.totalorder %v4285_v56, 1 }
 0x41e   : > { %v6717_v48 = vpop.f32.mrb[47].mxu0  ;;  %v4397_v24 = vsel %vm4356_vm9, %v6778_v17, 0.0  ;;  %v6779_v3 = vadd.f32 %v4013_v23, %v2658_v63  ;;  %v4966_v28 = vsel %vm9972_vm4, %v4957_v57, %v4965_v18  ;;  %v4967_v47 = vrot.slane %v4965_v18, 4 }
 0x41f   : > { %v4979_v34 = vshrl.u32 %v5653_v16, 16  ;;  %5242 = vst.msk [vmem:[%s9810_s30 + $0x54] sm:$0xf] %vm4495_vm8, %v4966_v28  ;;  %v4589_v49 = vadd.f32 %v4588_v32, %v4587_v55  ;;  %v4982_v41 = vshll.u32 %v5653_v16, 16  ;;  %v4459_v29 = vsel %vm1236_vm2, %v4397_v24, 0.0 }
 0x420   : > { %v2663_v59 = vpop.f32.mrb[48].mxu1  ;;  %v4976_v22 = vsel %vm9972_vm4, %v4967_v47, %v4975_v35  ;;  %v4460_v43 = vadd.f32 %v4459_v29, %v4458_v20  ;;  %v4528_v6 = vmul.f32 %v4397_v24, %v4397_v24  ;;  %v4977_v53 = vrot.slane %v4975_v35, 4  ;;  %v10153_v20 = vpop.permute.xlu0 %4296 }
 0x421   : > { %v6376_v25 = vpop.f32.mrb[49].mxu1  ;;  %v4981_v31 = vrot.slane %v4979_v34, 6  ;;  %5243 = vst.msk [vmem:[%s9810_s30 + $0x58] sm:$0xf] %vm4495_vm8, %v4976_v22  ;;  %v4984_v4 = vrot.slane %v4982_v41, 7  ;;  %v5654_v45 = vpack.c.bf16 %v4397_v24, %v4397_v24  ;;  %v4398_v27 = vsel %vm4357_vm10, %v6779_v3, 0.0 }
 0x422   : > { %v2666_v38 = vpop.f32.mrb[50].mxu1  ;;  %v4590_v62 = vsel %vm1236_vm2, %v4528_v6, 0.0  ;;  %v4461_v11 = vsel %vm1236_vm2, %v4398_v27, 0.0  ;;  %v4529_v14 = vmul.f32 %v4398_v27, %v4398_v27  ;;  %v5655_v46 = vpack.c.bf16 %v4398_v27, %v4398_v27 }
 0x423   : > { %v6377_v12 = vpop.f32.mrb[51].mxu1  ;;  %v4018_v10 = vpop.f32.mrb[48].mxu0  ;;  %v4985_v15 = vor.u32 %v4984_v4, %v4981_v31  ;;  %v4591_v42 = vadd.f32 %v4590_v62, %v4589_v49  ;;  %v4989_v36 = vshrl.u32 %v5654_v45, 16  ;;  %v4992_v19 = vshll.u32 %v5654_v45, 16 }
 0x424   : > { %v6720_v0 = vpop.f32.mrb[49].mxu0  ;;  %v4462_v60 = vadd.f32 %v4461_v11, %v4460_v43  ;;  %v4592_v5 = vsel %vm1236_vm2, %v4529_v14, 0.0  ;;  %v4999_v54 = vshrl.u32 %v5655_v46, 16  ;;  %v5002_v50 = vshll.u32 %v5655_v46, 16  ;;  %v10165_v43 = vpop.permute.xlu1 %4299 }
 0x425   : > { %v4021_v52 = vpop.f32.mrb[50].mxu0  ;;  %v4986_v63 = vsel %vm9972_vm4, %v4977_v53, %v4985_v15  ;;  %v4991_v33 = vrot.slane %v4989_v36, 6  ;;  %v4994_v55 = vrot.slane %v4992_v19, 7  ;;  %v4593_v58 = vadd.f32 %v4592_v5, %v4591_v42 }
 0x426   : > { %v6721_v13 = vpop.f32.mrb[51].mxu0  ;;  %5244 = vst.msk [vmem:[%s9810_s30 + $0x5c] sm:$0xf] %vm4495_vm8, %v4986_v63  ;;  %v5001_v40 = vrot.slane %v4999_v54, 6  ;;  %v5004_v8 = vrot.slane %v5002_v50, 7  ;;  %v6780_v26 = vadd.f32 %v4018_v10, %v2663_v59  ;;  %v4987_v7 = vrot.slane %v4985_v15, 4  ;;  %v10175_v63 = vpop.permute.xlu0 %4302 }
 0x427   : > { %v4995_v9 = vor.u32 %v4994_v55, %v4991_v33  ;;  %v6781_v17 = vadd.f32 %v4021_v52, %v2666_v38  ;;  %vm4359_vm12 = vcmp.eq.s32.totalorder %v10129_v39, 1  ;;  %vm4361_vm1 = vcmp.eq.s32.totalorder %v4294_v2, 1 }
 0x428   : > { %v2671_v57 = vpop.f32.mrb[52].mxu1  ;;  %v5005_v1 = vor.u32 %v5004_v8, %v5001_v40  ;;  %v4399_v51 = vsel %vm4358_vm11, %v6780_v26, 0.0  ;;  %vm4360_vm3 = vcmp.eq.s32.totalorder %v10141_v61, 1  ;;  %vm4362_vm7 = vcmp.eq.s32.totalorder %v10153_v20, 1 }
 0x429   : > { %v6380_v30 = vpop.f32.mrb[53].mxu1  ;;  %v4996_v18 = vsel %vm9972_vm4, %v4987_v7, %v4995_v9  ;;  %v4997_v44 = vrot.slane %v4995_v9, 4  ;;  %v4463_v21 = vsel %vm1236_vm2, %v4399_v51, 0.0  ;;  %v4530_v16 = vmul.f32 %v4399_v51, %v4399_v51 }
 0x42a   : > { %v2674_v23 = vpop.f32.mrb[54].mxu1  ;;  %5245 = vst.msk [vmem:[%s9810_s30 + $0x60] sm:$0xf] %vm4495_vm8, %v4996_v18  ;;  %v4464_v24 = vadd.f32 %v4463_v21, %v4462_v60  ;;  %v5656_v3 = vpack.c.bf16 %v4399_v51, %v4399_v51  ;;  %v4400_v56 = vsel %vm4359_vm12, %v6781_v17, 0.0  ;;  %v5007_v4 = vrot.slane %v5005_v1, 4  ;;  %v10182_v18 = vpop.permute.xlu1 %4305 }
 0x42b   : > { %v6381_v48 = vpop.f32.mrb[55].mxu1  ;;  %v4026_v35 = vpop.f32.mrb[52].mxu0  ;;  %v5006_v47 = vsel %vm9972_vm4, %v4997_v44, %v5005_v1  ;;  %v4594_v32 = vsel %vm1236_vm2, %v4530_v16, 0.0  ;;  %v4465_v34 = vsel %vm1236_vm2, %v4400_v56, 0.0  ;;  %v4531_v59 = vmul.f32 %v4400_v56, %v4400_v56 }
 0x42c   : > { %v6724_v28 = vpop.f32.mrb[53].mxu0  ;;  %5246 = vst.msk [vmem:[%s9810_s30 + $0x64] sm:$0xf] %vm4495_vm8, %v5006_v47  ;;  %v4595_v41 = vadd.f32 %v4594_v32, %v4593_v58  ;;  %v5009_v29 = vshrl.u32 %v5656_v3, 16  ;;  %v5012_v25 = vshll.u32 %v5656_v3, 16  ;;  %v4466_v22 = vadd.f32 %v4465_v34, %v4464_v24 }
 0x42d   : > { %v4029_v49 = vpop.f32.mrb[54].mxu0  ;;  %v4596_v39 = vsel %vm1236_vm2, %v4531_v59, 0.0  ;;  %v5657_v6 = vpack.c.bf16 %v4400_v56, %v4400_v56  ;;  %v6782_v38 = vadd.f32 %v4026_v35, %v2671_v57  ;;  %vm4363_vm5 = vcmp.eq.s32.totalorder %v10165_v43, 1 }
 0x42e   : > { %v6725_v31 = vpop.f32.mrb[55].mxu0  ;;  %v6783_v53 = vadd.f32 %v4029_v49, %v2674_v23  ;;  %v5011_v45 = vrot.slane %v5009_v29, 6  ;;  %v5014_v27 = vrot.slane %v5012_v25, 7  ;;  %v4597_v12 = vadd.f32 %v4596_v39, %v4595_v41 }
 0x42f   : > { %v5019_v62 = vshrl.u32 %v5657_v6, 16  ;;  %v5022_v11 = vshll.u32 %v5657_v6, 16  ;;  %v4401_v14 = vsel %vm4360_vm3, %v6782_v38, 0.0  ;;  %vm4364_vm6 = vcmp.eq.s32.totalorder %v10175_v63, 1 }
 0x430   : > { %v2679_v10 = vpop.f32.mrb[56].mxu1  ;;  %v4402_v46 = vsel %vm4361_vm1, %v6783_v53, 0.0  ;;  %v5015_v15 = vor.u32 %v5014_v27, %v5011_v45  ;;  %v4467_v42 = vsel %vm1236_vm2, %v4401_v14, 0.0  ;;  %v4532_v36 = vmul.f32 %v4401_v14, %v4401_v14 }
 0x431   : > { %v6384_v0 = vpop.f32.mrb[57].mxu1  ;;  %v5658_v19 = vpack.c.bf16 %v4401_v14, %v4401_v14  ;;  %v5021_v60 = vrot.slane %v5019_v62, 6  ;;  %v5024_v5 = vrot.slane %v5022_v11, 7  ;;  %v4468_v54 = vadd.f32 %v4467_v42, %v4466_v22  ;;  %v10202_v42 = vpop.permute.xlu0 %4308 }
 0x432   : > { %v2682_v52 = vpop.f32.mrb[58].mxu1  ;;  %v4469_v50 = vsel %vm1236_vm2, %v4402_v46, 0.0  ;;  %v5016_v2 = vsel %vm9972_vm4, %v5007_v4, %v5015_v15  ;;  %v5017_v33 = vrot.slane %v5015_v15, 4  ;;  %v4598_v55 = vsel %vm1236_vm2, %v4532_v36, 0.0 }
 0x433   : > { %v6385_v13 = vpop.f32.mrb[59].mxu1  ;;  %v4034_v61 = vpop.f32.mrb[56].mxu0  ;;  %v5029_v58 = vshrl.u32 %v5658_v19, 16  ;;  %5247 = vst.msk [vmem:[%s9810_s30 + $0x68] sm:$0xf] %vm4495_vm8, %v5016_v2  ;;  %v5025_v8 = vor.u32 %v5024_v5, %v5021_v60  ;;  %v4599_v26 = vadd.f32 %v4598_v55, %v4597_v12  ;;  %v5032_v57 = vshll.u32 %v5658_v19, 16 }
 0x434   : > { %v6728_v40 = vpop.f32.mrb[57].mxu0  ;;  %v4470_v7 = vadd.f32 %v4469_v50, %v4468_v54  ;;  %v4533_v30 = vmul.f32 %v4402_v46, %v4402_v46  ;;  %v5659_v1 = vpack.c.bf16 %v4402_v46, %v4402_v46  ;;  %v6784_v51 = vadd.f32 %v4034_v61, %v2679_v10  ;;  %v4312_v61 = vpop.permute.xlu1 %4311 }
 0x435   : > { %v4037_v9 = vpop.f32.mrb[58].mxu0  ;;  %v5031_v17 = vrot.slane %v5029_v58, 6  ;;  %v5026_v44 = vsel %vm9972_vm4, %v5017_v33, %v5025_v8  ;;  %v5027_v21 = vrot.slane %v5025_v8, 4  ;;  %v5034_v16 = vrot.slane %v5032_v57, 7 }
 0x436   : > { %v6729_v23 = vpop.f32.mrb[59].mxu0  ;;  %v6785_v48 = vadd.f32 %v4037_v9, %v2682_v52  ;;  %5248 = vst.msk [vmem:[%s9810_s30 + $0x6c] sm:$0xf] %vm4495_vm8, %v5026_v44  ;;  %v4600_v35 = vsel %vm1236_vm2, %v4533_v30, 0.0  ;;  %v5039_v24 = vshrl.u32 %v5659_v1, 16  ;;  %v5042_v3 = vshll.u32 %v5659_v1, 16 }
 0x437   : > { %v4403_v56 = vsel %vm4362_vm7, %v6784_v51, 0.0  ;;  %v5035_v47 = vor.u32 %v5034_v16, %v5031_v17  ;;  %v4601_v32 = vadd.f32 %v4600_v35, %v4599_v26  ;;  %vm4365_vm0 = vcmp.eq.s32.totalorder %v10182_v18, 1  ;;  %v10219_v35 = vpop.permute.xlu0 %4314 }
 0x438   : > { %v2687_v28 = vpop.f32.mrb[60].mxu1  ;;  %v4471_v34 = vsel %vm1236_vm2, %v4403_v56, 0.0  ;;  %v4534_v59 = vmul.f32 %v4403_v56, %v4403_v56  ;;  %v5041_v41 = vrot.slane %v5039_v24, 6  ;;  %v5044_v29 = vrot.slane %v5042_v3, 7  ;;  %v10224_v18 = vpop.permute.xlu1 %4317 }
 0x439   : > { %v6388_v49 = vpop.f32.mrb[61].mxu1  ;;  %v4472_v25 = vadd.f32 %v4471_v34, %v4470_v7  ;;  %v5660_v22 = vpack.c.bf16 %v4403_v56, %v4403_v56  ;;  %v5036_v39 = vsel %vm9972_vm4, %v5027_v21, %v5035_v47  ;;  %v5037_v20 = vrot.slane %v5035_v47, 4 }
 0x43a   : > { %v2690_v31 = vpop.f32.mrb[62].mxu1  ;;  %v4602_v6 = vsel %vm1236_vm2, %v4534_v59, 0.0  ;;  %v4404_v38 = vsel %vm4363_vm5, %v6785_v48, 0.0  ;;  %5249 = vst.msk [vmem:[%s9810_s30 + $0x70] sm:$0xf] %vm4495_vm8, %v5036_v39  ;;  %v5045_v45 = vor.u32 %v5044_v29, %v5041_v41  ;;  %vm4367_vm14 = vcmp.eq.s32.totalorder %v4312_v61, 1 }
 0x43b   : > { %v6389_v53 = vpop.f32.mrb[63].mxu1  ;;  %v4042_v4 = vpop.f32.mrb[60].mxu0  ;;  %v4603_v27 = vadd.f32 %v4602_v6, %v4601_v32  ;;  %v5049_v12 = vshrl.u32 %v5660_v22, 16  ;;  %v5052_v10 = vshll.u32 %v5660_v22, 16  ;;  %v4473_v11 = vsel %vm1236_vm2, %v4404_v38, 0.0 }
 0x43c   : > { %v6732_v62 = vpop.f32.mrb[61].mxu0  ;;  %v4535_v14 = vmul.f32 %v4404_v38, %v4404_v38  ;;  %v5661_v46 = vpack.c.bf16 %v4404_v38, %v4404_v38  ;;  %v6786_v0 = vadd.f32 %v4042_v4, %v2687_v28  ;;  %v5046_v43 = vsel %vm9972_vm4, %v5037_v20, %v5045_v45 }
 0x43d   : > { %v4045_v15 = vpop.f32.mrb[62].mxu0  ;;  %v5047_v36 = vrot.slane %v5045_v45, 4  ;;  %v5051_v19 = vrot.slane %v5049_v12, 6  ;;  %v5054_v52 = vrot.slane %v5052_v10, 7  ;;  %5250 = vst.msk [vmem:[%s9810_s30 + $0x74] sm:$0xf] %vm4495_vm8, %v5046_v43  ;;  %v4474_v5 = vadd.f32 %v4473_v11, %v4472_v25  ;;  %v10233_v11 = vpop.permute.xlu0 %4320 }
 0x43e   : > { %v6733_v60 = vpop.f32.mrb[63].mxu0  ;;  %v4604_v54 = vsel %vm1236_vm2, %v4535_v14, 0.0  ;;  %v5059_v50 = vshrl.u32 %v5661_v46, 16  ;;  %v5062_v13 = vshll.u32 %v5661_v46, 16  ;;  %v4405_v55 = vsel %vm4364_vm6, %v6786_v0, 0.0 }
 0x43f   : > { %v5055_v2 = vor.u32 %v5054_v52, %v5051_v19  ;;  %v4605_v33 = vadd.f32 %v4604_v54, %v4603_v27  ;;  %v6787_v58 = vadd.f32 %v4045_v15, %v2690_v31  ;;  %v4475_v57 = vsel %vm1236_vm2, %v4405_v55, 0.0 }
 0x440   : > { %v2695_v40 = vpop.f32.mrb[64].mxu1  ;;  %v5061_v8 = vrot.slane %v5059_v50, 6  ;;  %v5064_v26 = vrot.slane %v5062_v13, 7  ;;  %v4536_v7 = vmul.f32 %v4405_v55, %v4405_v55  ;;  %v4476_v1 = vadd.f32 %v4475_v57, %v4474_v5 }
 0x441   : > { %v6392_v9 = vpop.f32.mrb[65].mxu1  ;;  %v5056_v17 = vsel %vm9972_vm4, %v5047_v36, %v5055_v2  ;;  %v5057_v30 = vrot.slane %v5055_v2, 4  ;;  %v5662_v51 = vpack.c.bf16 %v4405_v55, %v4405_v55  ;;  %v4406_v21 = vsel %vm4365_vm0, %v6787_v58, 0.0 }
 0x442   : > { %v2698_v23 = vpop.f32.mrb[66].mxu1  ;;  %5251 = vst.msk [vmem:[%s9810_s30 + $0x78] sm:$0xf] %vm4495_vm8, %v5056_v17  ;;  %v5065_v44 = vor.u32 %v5064_v26, %v5061_v8  ;;  %v4606_v63 = vsel %vm1236_vm2, %v4536_v7, 0.0  ;;  %v4477_v28 = vsel %vm1236_vm2, %v4406_v21, 0.0  ;;  %v4537_v59 = vmul.f32 %v4406_v21, %v4406_v21 }
 0x443   : > { %v6393_v16 = vpop.f32.mrb[67].mxu1  ;;  %v4050_v48 = vpop.f32.mrb[64].mxu0  ;;  %v4607_v24 = vadd.f32 %v4606_v63, %v4605_v33  ;;  %v5069_v3 = vshrl.u32 %v5662_v51, 16  ;;  %v5072_v56 = vshll.u32 %v5662_v51, 16  ;;  %v4478_v34 = vadd.f32 %v4477_v28, %v4476_v1 }
 0x444   : > { %v6736_v47 = vpop.f32.mrb[65].mxu0  ;;  %v5066_v32 = vsel %vm9972_vm4, %v5057_v30, %v5065_v44  ;;  %v5663_v25 = vpack.c.bf16 %v4406_v21, %v4406_v21  ;;  %v6788_v22 = vadd.f32 %v4050_v48, %v2695_v40  ;;  %vm4366_vm13 = vcmp.eq.s32.totalorder %v10202_v42, 1 }
 0x445   : > { %v4053_v49 = vpop.f32.mrb[66].mxu0  ;;  %5252 = vst.msk [vmem:[%s9810_s30 + $0x7c] sm:$0xf] %vm4495_vm8, %v5066_v32  ;;  %v5071_v41 = vrot.slane %v5069_v3, 6  ;;  %v5074_v29 = vrot.slane %v5072_v56, 7  ;;  %v5067_v39 = vrot.slane %v5065_v44, 4  ;;  %v10248_v44 = vpop.permute.xlu1 %4323 }
 0x446   : > { %v6737_v31 = vpop.f32.mrb[67].mxu0  ;;  %v4608_v20 = vsel %vm1236_vm2, %v4537_v59, 0.0  ;;  %v6789_v6 = vadd.f32 %v4053_v49, %v2698_v23  ;;  %v5079_v4 = vshrl.u32 %v5663_v25, 16  ;;  %v5082_v45 = vshll.u32 %v5663_v25, 16 }
 0x447   : > { %v5075_v38 = vor.u32 %v5074_v29, %v5071_v41  ;;  %v4609_v53 = vadd.f32 %v4608_v20, %v4607_v24  ;;  %vm4369_vm9 = vcmp.eq.s32.totalorder %v10224_v18, 1  ;;  %vm4368_vm10 = vcmp.eq.s32.totalorder %v10219_v35, 1 }
 0x448   : > { %v2703_v27 = vpop.f32.mrb[68].mxu1  ;;  %v4407_v12 = vsel %vm4366_vm13, %v6788_v22, 0.0  ;;  %v4408_v10 = vsel %vm4367_vm14, %v6789_v6, 0.0  ;;  %v5081_v0 = vrot.slane %v5079_v4, 6  ;;  %v5084_v15 = vrot.slane %v5082_v45, 7 }
 0x449   : > { %v6396_v62 = vpop.f32.mrb[69].mxu1  ;;  %v5076_v14 = vsel %vm9972_vm4, %v5067_v39, %v5075_v38  ;;  %v5077_v46 = vrot.slane %v5075_v38, 4  ;;  %v4479_v43 = vsel %vm1236_vm2, %v4407_v12, 0.0  ;;  %v4538_v36 = vmul.f32 %v4407_v12, %v4407_v12 }
 0x44a   : > { %v2706_v42 = vpop.f32.mrb[70].mxu1  ;;  %5253 = vst.msk [vmem:[%s9810_s30 + $0x80] sm:$0xf] %vm4495_vm8, %v5076_v14  ;;  %v5664_v19 = vpack.c.bf16 %v4407_v12, %v4407_v12  ;;  %v4481_v52 = vsel %vm1236_vm2, %v4408_v10, 0.0  ;;  %v5085_v54 = vor.u32 %v5084_v15, %v5081_v0  ;;  %v4480_v50 = vadd.f32 %v4479_v43, %v4478_v34 }
 0x44b   : > { %v6397_v60 = vpop.f32.mrb[71].mxu1  ;;  %v4058_v5 = vpop.f32.mrb[68].mxu0  ;;  %v4539_v13 = vmul.f32 %v4408_v10, %v4408_v10  ;;  %v5665_v61 = vpack.c.bf16 %v4408_v10, %v4408_v10  ;;  %v4610_v33 = vsel %vm1236_vm2, %v4538_v36, 0.0  ;;  %vm4370_vm11 = vcmp.eq.s32.totalorder %v10233_v11, 1 }
 0x44c   : > { %v6740_v2 = vpop.f32.mrb[69].mxu0  ;;  %v5089_v55 = vshrl.u32 %v5664_v19, 16  ;;  %v5092_v58 = vshll.u32 %v5664_v19, 16  ;;  %v6790_v40 = vadd.f32 %v4058_v5, %v2703_v27  ;;  %v5086_v26 = vsel %vm9972_vm4, %v5077_v46, %v5085_v54 }
 0x44d   : > { %v4061_v8 = vpop.f32.mrb[70].mxu0  ;;  %v5087_v57 = vrot.slane %v5085_v54, 4  ;;  %v4611_v7 = vadd.f32 %v4610_v33, %v4609_v53  ;;  %v4482_v9 = vadd.f32 %v4481_v52, %v4480_v50  ;;  %5254 = vst.msk [vmem:[%s9810_s30 + $0x84] sm:$0xf] %vm4495_vm8, %v5086_v26  ;;  %v4612_v51 = vsel %vm1236_vm2, %v4539_v13, 0.0 }
 0x44e   : > { %v6741_v17 = vpop.f32.mrb[71].mxu0  ;;  %v5091_v30 = vrot.slane %v5089_v55, 6  ;;  %v5094_v1 = vrot.slane %v5092_v58, 7  ;;  %v5099_v23 = vshrl.u32 %v5665_v61, 16  ;;  %v5102_v21 = vshll.u32 %v5665_v61, 16  ;;  %v4327_v61 = vpop.permute.xlu0 %4326 }
 0x44f   : > { %v4613_v63 = vadd.f32 %v4612_v51, %v4611_v7  ;;  %v4409_v16 = vsel %vm4368_vm10, %v6790_v40, 0.0  ;;  %v6791_v48 = vadd.f32 %v4061_v8, %v2706_v42  ;;  %vm4371_vm12 = vcmp.eq.s32.totalorder %v10248_v44, 1 }
 0x450   : > { %v2711_v24 = vpop.f32.mrb[72].mxu1  ;;  %v5095_v3 = vor.u32 %v5094_v1, %v5091_v30  ;;  %v5101_v56 = vrot.slane %v5099_v23, 6  ;;  %v4483_v28 = vsel %vm1236_vm2, %v4409_v16, 0.0  ;;  %v4540_v47 = vmul.f32 %v4409_v16, %v4409_v16 }
 0x451   : > { %v6400_v32 = vpop.f32.mrb[73].mxu1  ;;  %v5104_v34 = vrot.slane %v5102_v21, 7  ;;  %v4484_v59 = vadd.f32 %v4483_v28, %v4482_v9  ;;  %v5666_v49 = vpack.c.bf16 %v4409_v16, %v4409_v16  ;;  %v4410_v41 = vsel %vm4369_vm9, %v6791_v48, 0.0 }
 0x452   : > { %v2714_v29 = vpop.f32.mrb[74].mxu1  ;;  %v5096_v35 = vsel %vm9972_vm4, %v5087_v57, %v5095_v3  ;;  %v5097_v25 = vrot.slane %v5095_v3, 4  ;;  %v4614_v22 = vsel %vm1236_vm2, %v4540_v47, 0.0  ;;  %v4485_v31 = vsel %vm1236_vm2, %v4410_v41, 0.0 }
 0x453   : > { %v6401_v39 = vpop.f32.mrb[75].mxu1  ;;  %v4066_v20 = vpop.f32.mrb[72].mxu0  ;;  %5255 = vst.msk [vmem:[%s9810_s30 + $0x88] sm:$0xf] %vm4495_vm8, %v5096_v35  ;;  %v5105_v6 = vor.u32 %v5104_v34, %v5101_v56  ;;  %v4615_v38 = vadd.f32 %v4614_v22, %v4613_v63  ;;  %v5109_v18 = vshrl.u32 %v5666_v49, 16  ;;  %v5112_v53 = vshll.u32 %v5666_v49, 16 }
 0x454   : > { %v6744_v4 = vpop.f32.mrb[73].mxu0  ;;  %v4486_v45 = vadd.f32 %v4485_v31, %v4484_v59  ;;  %v4541_v27 = vmul.f32 %v4410_v41, %v4410_v41  ;;  %v5667_v12 = vpack.c.bf16 %v4410_v41, %v4410_v41  ;;  %v6792_v10 = vadd.f32 %v4066_v20, %v2711_v24 }
 0x455   : > { %v4069_v62 = vpop.f32.mrb[74].mxu0  ;;  %v5106_v14 = vsel %vm9972_vm4, %v5097_v25, %v5105_v6  ;;  %v5107_v46 = vrot.slane %v5105_v6, 4  ;;  %v5111_v0 = vrot.slane %v5109_v18, 6  ;;  %v5114_v15 = vrot.slane %v5112_v53, 7  ;;  %v4330_v6 = vpop.permute.xlu1 %4329 }
 0x456   : > { %v6745_v42 = vpop.f32.mrb[75].mxu0  ;;  %5256 = vst.msk [vmem:[%s9810_s30 + $0x8c] sm:$0xf] %vm4495_vm8, %v5106_v14  ;;  %v4616_v43 = vsel %vm1236_vm2, %v4541_v27, 0.0  ;;  %v5119_v36 = vshrl.u32 %v5667_v12, 16  ;;  %v5122_v19 = vshll.u32 %v5667_v12, 16  ;;  %v6793_v57 = vadd.f32 %v4069_v62, %v2714_v29  ;;  %v4333_v27 = vpop.permute.xlu0 %4332 }
 0x457   : > { %v4411_v52 = vsel %vm4370_vm11, %v6792_v10, 0.0  ;;  %v5115_v60 = vor.u32 %v5114_v15, %v5111_v0  ;;  %v4617_v5 = vadd.f32 %v4616_v43, %v4615_v38  ;;  %vm4372_vm1 = vcmp.eq.s32.totalorder %v4327_v61, 1 }
 0x458   : > { %v4487_v54 = vsel %vm1236_vm2, %v4411_v52, 0.0  ;;  %v4542_v50 = vmul.f32 %v4411_v52, %v4411_v52  ;;  %v2719_v13 = vpop.f32.mrb[76].mxu1  ;;  %v5121_v2 = vrot.slane %v5119_v36, 6  ;;  %v5124_v33 = vrot.slane %v5122_v19, 7 }
 0x459   : > { %v4488_v55 = vadd.f32 %v4487_v54, %v4486_v45  ;;  %v5668_v58 = vpack.c.bf16 %v4411_v52, %v4411_v52  ;;  %v6404_v40 = vpop.f32.mrb[77].mxu1  ;;  %v5116_v8 = vsel %vm9972_vm4, %v5107_v46, %v5115_v60  ;;  %v5117_v26 = vrot.slane %v5115_v60, 4 }
 0x45a   : > { %v4618_v11 = vsel %vm1236_vm2, %v4542_v50, 0.0  ;;  %v2722_v7 = vpop.f32.mrb[78].mxu1  ;;  %5257 = vst.msk [vmem:[%s9810_s30 + $0x90] sm:$0xf] %vm4495_vm8, %v5116_v8  ;;  %v5125_v9 = vor.u32 %v5124_v33, %v5121_v2  ;;  %v4412_v63 = vsel %vm4371_vm12, %v6793_v57, 0.0  ;;  %vm4373_vm3 = vcmp.eq.s32.totalorder %v4330_v6, 1 }
 0x45b   : > { %v4619_v17 = vadd.f32 %v4618_v11, %v4617_v5  ;;  %v5129_v30 = vshrl.u32 %v5668_v58, 16  ;;  %v5132_v1 = vshll.u32 %v5668_v58, 16  ;;  %v6405_v51 = vpop.f32.mrb[79].mxu1  ;;  %v4074_v23 = vpop.f32.mrb[76].mxu0  ;;  %v4489_v47 = vsel %vm1236_vm2, %v4412_v63, 0.0 }
 0x45c   : > { %v6794_v21 = vadd.f32 %v4074_v23, %v2719_v13  ;;  %v6748_v16 = vpop.f32.mrb[77].mxu0  ;;  %v5126_v48 = vsel %vm9972_vm4, %v5117_v26, %v5125_v9  ;;  %v5127_v24 = vrot.slane %v5125_v9, 4  ;;  %v4543_v32 = vmul.f32 %v4412_v63, %v4412_v63 }
 0x45d   : > { %v5131_v3 = vrot.slane %v5129_v30, 6  ;;  %v5134_v56 = vrot.slane %v5132_v1, 7  ;;  %v4077_v28 = vpop.f32.mrb[78].mxu0  ;;  %5258 = vst.msk [vmem:[%s9810_s30 + $0x94] sm:$0xf] %vm4495_vm8, %v5126_v48  ;;  %v5669_v34 = vpack.c.bf16 %v4412_v63, %v4412_v63  ;;  %v4490_v44 = vadd.f32 %v4489_v47, %v4488_v55 }
 0x45e   : > { %v4413_v59 = vsel %vm4372_vm1, %v6794_v21, 0.0  ;;  %v6749_v49 = vpop.f32.mrb[79].mxu0  ;;  %v4620_v25 = vsel %vm1236_vm2, %v4543_v32, 0.0  ;;  %v6795_v42 = vadd.f32 %v4077_v28, %v2722_v7  ;;  %vm4374_vm7 = vcmp.eq.s32.totalorder %v4333_v27, 1 }
 0x45f   : > { %v5135_v41 = vor.u32 %v5134_v56, %v5131_v3  ;;  %v4491_v29 = vsel %vm1236_vm2, %v4413_v59, 0.0  ;;  %v4544_v35 = vmul.f32 %v4413_v59, %v4413_v59  ;;  %v5139_v22 = vshrl.u32 %v5669_v34, 16 }
 0x460   : > { %v5142_v31 = vshll.u32 %v5669_v34, 16  ;;  %v5670_v39 = vpack.c.bf16 %v4413_v59, %v4413_v59  ;;  %v2727_v20 = vpop.f32.mrb[80].mxu1  ;;  %v4621_v53 = vadd.f32 %v4620_v25, %v4619_v17  ;;  %v4492_v4 = vadd.f32 %v4491_v29, %v4490_v44 }
 0x461   : > { %v5136_v38 = vsel %vm9972_vm4, %v5127_v24, %v5135_v41  ;;  %v5137_v18 = vrot.slane %v5135_v41, 4  ;;  %v6408_v45 = vpop.f32.mrb[81].mxu1  ;;  %v5141_v12 = vrot.slane %v5139_v22, 6  ;;  %v4622_v62 = vsel %vm1236_vm2, %v4544_v35, 0.0 }
 0x462   : > { %5259 = vst.msk [vmem:[%s9810_s30 + $0x98] sm:$0xf] %vm4495_vm8, %v5136_v38  ;;  %v5144_v10 = vrot.slane %v5142_v31, 7  ;;  %v5149_v14 = vshrl.u32 %v5670_v39, 16  ;;  %v2730_v46 = vpop.f32.mrb[82].mxu1  ;;  %v4623_v0 = vadd.f32 %v4622_v62, %v4621_v53  ;;  %v5152_v15 = vshll.u32 %v5670_v39, 16 }
 0x463   : > { %v6409_v43 = vpop.f32.mrb[83].mxu1  ;;  %v4082_v36 = vpop.f32.mrb[80].mxu0  ;;  %v4414_v50 = vsel %vm4373_vm3, %v6795_v42, 0.0  ;;  %v5266_v31 = vld [vmem:[%s9810_s30 + $0xa8] sm:$0xf] }
 0x464   : > { %v5145_v19 = vor.u32 %v5144_v10, %v5141_v12  ;;  %v5151_v52 = vrot.slane %v5149_v14, 6  ;;  %v6796_v60 = vadd.f32 %v4082_v36, %v2727_v20  ;;  %v6752_v5 = vpop.f32.mrb[81].mxu0  ;;  %v5154_v54 = vrot.slane %v5152_v15, 7 }
 0x465   : > { %v4085_v13 = vpop.f32.mrb[82].mxu0  ;;  %v4493_v33 = vsel %vm1236_vm2, %v4414_v50, 0.0  ;;  %v4545_v55 = vmul.f32 %v4414_v50, %v4414_v50  ;;  %v5671_v26 = vpack.c.bf16 %v4414_v50, %v4414_v50  ;;  %vm5270_vm6 = vsmask.f32 7950 }
 0x466   : > { %v5146_v61 = vsel %vm9972_vm4, %v5137_v18, %v5145_v19  ;;  %v5147_v2 = vrot.slane %v5145_v19, 4  ;;  %v6753_v58 = vpop.f32.mrb[83].mxu0  ;;  %v5155_v40 = vor.u32 %v5154_v54, %v5151_v52  ;;  %v4494_v8 = vadd.f32 %v4493_v33, %v4492_v4 }
 0x467   : > { %5260 = vst.msk [vmem:[%s9810_s30 + $0x9c] sm:$0xf] %vm4495_vm8, %v5146_v61  ;;  %v4415_v11 = vsel %vm4374_vm7, %v6796_v60, 0.0  ;;  %v4624_v57 = vsel %vm1236_vm2, %v4545_v55, 0.0  ;;  %v5159_v51 = vshrl.u32 %v5671_v26, 16  ;;  %v5162_v23 = vshll.u32 %v5671_v26, 16 }
 0x468   : > { %v4496_v7 = vsel %vm4495_vm8, %v4415_v11, 0.0  ;;  %v4546_v9 = vmul.f32 %v4415_v11, %v4415_v11  ;;  %v5672_v17 = vpack.c.bf16 %v4415_v11, %v4415_v11  ;;  %v5156_v30 = vsel %vm9972_vm4, %v5147_v2, %v5155_v40 }
 0x469   : > { %v4625_v1 = vadd.f32 %v4624_v57, %v4623_v0  ;;  %5261 = vst.msk [vmem:[%s9810_s30 + $0xa0] sm:$0xf] %vm4495_vm8, %v5156_v30  ;;  %v4497_v63 = vadd.f32 %v4496_v7, %v4494_v8  ;;  %v5161_v48 = vrot.slane %v5159_v51, 6  ;;  %v5157_v56 = vrot.slane %v5155_v40, 4 }
 0x46a   : > { %v4626_v21 = vsel %vm4495_vm8, %v4546_v9, 0.0  ;;  %v5169_v16 = vshrl.u32 %v5672_v17, 16  ;;  %v5172_v3 = vshll.u32 %v5672_v17, 16  ;;  %v5164_v28 = vrot.slane %v5162_v23, 7 }
 0x46b   : > { %v4627_v24 = vadd.f32 %v4626_v21, %v4625_v1  ;;  %v4498_v47 = vrot.slane %v4497_v63, 4  ;;  %vm5264_vm2 = vsmask.f32 3328 }
 0x46c   : > { %v5171_v32 = vrot.slane %v5169_v16, 6  ;;  %v5174_v59 = vrot.slane %v5172_v3, 7  ;;  %v5165_v49 = vor.u32 %v5164_v28, %v5161_v48  ;;  %vm5265_vm5 = vmand %vm4495_vm8, %vm5264_vm2 }
 0x46d   : > { %v4628_v34 = vrot.slane %v4627_v24, 4  ;;  %v4499_v41 = vadd.f32 %v4498_v47, %v4497_v63 }
 0x46e   : > { %v5175_v29 = vor.u32 %v5174_v59, %v5171_v32  ;;  %v5166_v35 = vsel %vm9972_vm4, %v5157_v56, %v5165_v49  ;;  %v5167_v25 = vrot.slane %v5165_v49, 4 }
 0x46f   : > { %v4629_v44 = vadd.f32 %v4628_v34, %v4627_v24  ;;  %v4500_v22 = vrot.slane %v4499_v41, 2  ;;  %5262 = vst.msk [vmem:[%s9810_s30 + $0xa4] sm:$0xf] %vm4495_vm8, %v5166_v35  ;;  %vm5269_vm8 = vcmask 60419  }
 0x470   : > { %v5176_v6 = vsel %vm9972_vm4, %v5167_v25, %v5175_v29  ;;  %vm5271_vm4 = vmand %vm5269_vm8, %vm5270_vm6 }
 0x471   : > { %v4630_v39 = vrot.slane %v4629_v44, 2  ;;  %v4501_v20 = vadd.f32 %v4500_v22, %v4499_v41  ;;  %v5267_v18 = vsel %vm5265_vm5, %v5176_v6, %v5266_v31 }
 0x472   : > { %5268 = vst [vmem:[%s9810_s30 + $0xa8] sm:$0xf] %v5267_v18 }
 0x473   : > { %v4631_v38 = vadd.f32 %v4630_v39, %v4629_v44  ;;  %v4502_v53 = vrot.slane %v4501_v20, 1 }
 0x475   : > { %v4632_v4 = vrot.slane %v4631_v38, 1  ;;  %v4503_v45 = vadd.f32 %v4502_v53, %v4501_v20 }
 0x477   : > { %v4633_v37 = vadd.f32 %v4632_v4, %v4631_v38  ;;  %4505 = vst.msk [vmem:[%s292_s9] sm:$0x1] %vm4504_vm15, %v4503_v45 }
 0x479   : > { %4634 = vst.msk [vmem:[%s295_s12] sm:$0x1] %vm4504_vm15, %v4633_v37  ;;  %v5272_v27 = vld [vmem:[%s9810_s30 + $0xa8] sm:$0x8] }
 0x47a   : > { %v5273_v12 = vsel %vm5271_vm4, 0, %v5272_v27 }
 0x47b   : > { %5274 = vst [vmem:[%s9810_s30 + $0xa8] sm:$0x8] %v5273_v12 }
 0x47c PF: > { %s18_s24 = sadd.s32 1, %s7407_s24  }
 0x47d   : > { %p15_p4 = scmp.ge.s32.totalorder %s18_s24, 4  }
 0x47f   :  { %17 = sbr.rel (!%p15_p4) target bundleno = 1 (0x1), region = 102 }

</bundles_post_ra>
